<compile_context>
chip_gen: v5e
topology: v5e:2x2
jax: 0.10.0
libtpu: 0.0.40
codegen_flags: <defaults>
</compile_context>

<pallas_src>
import functools

import jax
import jax.numpy as jnp
from jax.experimental import pallas as pl
from jax.experimental.pallas import tpu as pltpu


# ----------------------------------------------------------------------------
# Pallas kernel 1: out = act(x @ w + b), tiled over rows of x.
#   x, w are bf16 (MXU native rate), accumulation + epilogue in f32.
# ----------------------------------------------------------------------------
def _matmul_bias_act_kernel(x_ref, w_ref, b_ref, o_ref, *, act):
    acc = jnp.dot(x_ref[...], w_ref[...], preferred_element_type=jnp.float32)
    acc = acc + b_ref[...]                      # (1, N) f32 broadcast
    if act == "relu":
        acc = jnp.maximum(acc, 0.0)
    elif act == "sigmoid":
        acc = jax.nn.sigmoid(acc)               # exp/recip on EUP
    o_ref[...] = acc.astype(o_ref.dtype)


def matmul_bias_act(x, w, b, act="none", out_dtype=jnp.bfloat16, tm=512):
    """act(x @ w + b). Requires w.shape[1] % 128 == 0 (prepared weights)."""
    x = x.astype(jnp.bfloat16)
    w = w.astype(jnp.bfloat16)
    b = b.astype(jnp.float32).reshape(1, -1)
    M, K = x.shape
    K2, N = w.shape
    assert K == K2 and N % 128 == 0, (K, K2, N)

    tm = min(tm, M)
    grid = (pl.cdiv(M, tm),)
    kernel = functools.partial(_matmul_bias_act_kernel, act=act)

    return pl.pallas_call(
        kernel,
        out_shape=jax.ShapeDtypeStruct((M, N), out_dtype),
        grid_spec=pltpu.PrefetchScalarGridSpec(
            num_scalar_prefetch=0,
            grid=grid,
            in_specs=[
                pl.BlockSpec((tm, K), lambda i: (i, 0)),
                pl.BlockSpec((K, N), lambda i: (0, 0)),
                pl.BlockSpec((1, N), lambda i: (0, 0)),
            ],
            out_specs=pl.BlockSpec((tm, N), lambda i: (i, 0)),
        ),
        compiler_params=pltpu.CompilerParams(
            dimension_semantics=("parallel",),
        ),
    )(x, w, b)


# ----------------------------------------------------------------------------
# Pallas kernel 2: fused decoder head (3 tiny Linears in one dispatch).
#   h2 = relu(relu(z @ w1 + b1) @ w2 + b2)   (w2 columns pre-permuted to NHWC)
#   ly = e @ wl + bl
# ----------------------------------------------------------------------------
def _head_kernel(z_ref, w1_ref, b1_ref, w2_ref, b2_ref,
                 e_ref, wl_ref, bl_ref, h_ref, l_ref):
    h1 = jnp.dot(z_ref[...], w1_ref[...], preferred_element_type=jnp.float32)
    h1 = jnp.maximum(h1 + b1_ref[...], 0.0)
    h2 = jnp.dot(h1.astype(jnp.bfloat16), w2_ref[...],
                 preferred_element_type=jnp.float32)
    h2 = jnp.maximum(h2 + b2_ref[...], 0.0)
    ly = jnp.dot(e_ref[...], wl_ref[...], preferred_element_type=jnp.float32)
    ly = ly + bl_ref[...]
    h_ref[...] = h2.astype(h_ref.dtype)
    l_ref[...] = ly.astype(l_ref.dtype)


def fused_head(z, e, p):
    B = z.shape[0]
    args = (z, p["w1"], p["b1"], p["w2"], p["b2"], e, p["wl"], p["bl"])
    in_specs = [pl.BlockSpec(a.shape, lambda i: (0, 0)) for a in args]
    return pl.pallas_call(
        _head_kernel,
        out_shape=(jax.ShapeDtypeStruct((B, 64 * 49), jnp.bfloat16),
                   jax.ShapeDtypeStruct((B, 49), jnp.bfloat16)),
        grid_spec=pltpu.PrefetchScalarGridSpec(
            num_scalar_prefetch=0,
            grid=(1,),
            in_specs=in_specs,
            out_specs=[pl.BlockSpec((B, 64 * 49), lambda i: (0, 0)),
                       pl.BlockSpec((B, 49), lambda i: (0, 0))],
        ),
        compiler_params=pltpu.CompilerParams(
            dimension_semantics=("arbitrary",),
        ),
    )(*args)


# ----------------------------------------------------------------------------
# JAX glue: patch extraction and phase interleave (tiny tensors, NHWC).
# ----------------------------------------------------------------------------
def _extract_patches(x, kh, kw):
    # x: (B, H, W, C) already padded -> (B*OH*OW, kh*kw*C), channel order (dy,dx,c).
    B, H, W, C = x.shape
    OH, OW = H - kh + 1, W - kw + 1
    chunks = []
    for i in range(kh):
        for j in range(kw):
            chunks.append(x[:, i:i + OH, j:j + OW, :])
    patches = jnp.concatenate(chunks, axis=-1)
    return patches.reshape(B * OH * OW, kh * kw * C), (B, OH, OW)


def conv_transpose2d_s2(x_nhwc, wmat, bias, cout, act):
    """ConvTranspose2d(k=4, stride=2, padding=1) via sub-pixel decomposition.

    wmat: (4*Cin, 4*Cout) prepared weight, rows (dy,dx,ci), cols (ry,rx,co).
    """
    B, H, W, _ = x_nhwc.shape
    xp = jnp.pad(x_nhwc, ((0, 0), (1, 1), (1, 1), (0, 0)))
    patches, _ = _extract_patches(xp, 2, 2)                    # (B*(H+1)*(W+1), 4*Cin)
    out = matmul_bias_act(patches, wmat, bias, act=act, out_dtype=jnp.bfloat16)
    R = out.reshape(B, H + 1, W + 1, 4, cout)                  # phase = ry*2+rx
    p00 = R[:, :H, :W, 0, :]
    p01 = R[:, :H, 1:, 1, :]
    p10 = R[:, 1:, :W, 2, :]
    p11 = R[:, 1:, 1:, 3, :]
    top = jnp.stack([p00, p01], axis=3)                        # (B,H,W,2,C)
    bot = jnp.stack([p10, p11], axis=3)
    full = jnp.stack([top, bot], axis=2)                       # (B,H,2,W,2,C)
    return full.reshape(B, 2 * H, 2 * W, cout)


# ----------------------------------------------------------------------------
# Parameters: PyTorch-layout synthetic init + one-time kernel-layout prepare.
# ----------------------------------------------------------------------------
def init_params(key, latent_dim=2, n_classes=10, embedding_dim=100):
    ks = jax.random.split(key, 12)
    n = lambda k, shape, s=0.05: s * jax.random.normal(k, shape, jnp.float32)
    return {
        # noises_reshape (Linear weights stored as (in, out))
        "w1": n(ks[0], (latent_dim, 256)), "b1": n(ks[1], (256,)),
        "w2": n(ks[2], (256, 64 * 7 * 7)), "b2": n(ks[3], (64 * 7 * 7,)),
        # labels_reshape
        "emb": n(ks[4], (n_classes, embedding_dim), 1.0),
        "wl": n(ks[5], (embedding_dim, 49)), "bl": n(ks[6], (49,)),
        # ConvTranspose2d weights (Cin, Cout, kh, kw)
        "ct1_w": n(ks[7], (65, 64, 4, 4)), "ct1_b": n(ks[8], (64,)),
        "ct2_w": n(ks[9], (64, 32, 4, 4)), "ct2_b": n(ks[10], (32,)),
        "c3_w": n(ks[11], (32, 1, 3, 3)), "c3_b": jnp.zeros((1,), jnp.float32),
    }


def prepare_params(raw):
    """One-time (outside jit) conversion of PyTorch-layout params to kernel layout."""
    f32, bf16 = jnp.float32, jnp.bfloat16

    def subpixel(wt, b):
        # wt: (Cin, Cout, 4, 4). Phase (ry,rx) tap index: k = 3 - r - 2*d.
        Cin, Cout = wt.shape[0], wt.shape[1]
        idx = jnp.array([[3, 1], [2, 0]], dtype=jnp.int32)     # [r, d]
        wg = wt[:, :, idx[:, :, None, None], idx[None, None, :, :]]  # (Cin,Cout,ry,dy,rx,dx)
        wmat = wg.transpose(3, 5, 0, 2, 4, 1).reshape(4 * Cin, 4 * Cout)
        bmat = jnp.tile(b, 4).reshape(1, 4 * Cout)
        return wmat.astype(bf16), bmat.astype(f32)

    ct1_w, ct1_b = subpixel(raw["ct1_w"], raw["ct1_b"])
    ct2_w, ct2_b = subpixel(raw["ct2_w"], raw["ct2_b"])

    # Final ConvTranspose2d(32,1,3,3,s=1,p=1) == conv with spatially flipped kernel.
    wt3 = raw["c3_w"]                                          # (32, 1, 3, 3)
    Cin3, Cout3, kh3, kw3 = wt3.shape
    w3 = jnp.flip(wt3, (2, 3)).transpose(2, 3, 0, 1).reshape(kh3 * kw3 * Cin3, Cout3)
    w3 = jnp.pad(w3, ((0, 0), (0, 128 - Cout3)))               # lane-pad Cout 1 -> 128
    b3 = jnp.pad(raw["c3_b"], (0, 128 - Cout3)).reshape(1, 128)

    # Reorder w2/b2 output units from (c, i, j) to NHWC (i, j, c): no act transpose.
    w2 = raw["w2"].reshape(-1, 64, 7, 7).transpose(0, 2, 3, 1).reshape(-1, 64 * 49)
    b2 = raw["b2"].reshape(64, 7, 7).transpose(1, 2, 0).reshape(1, 64 * 49)

    return {
        "w1": raw["w1"].astype(f32), "b1": raw["b1"].reshape(1, -1).astype(f32),
        "w2": w2.astype(bf16), "b2": b2.astype(f32),
        "emb": raw["emb"].astype(f32),
        "wl": raw["wl"].astype(bf16), "bl": raw["bl"].reshape(1, -1).astype(f32),
        "ct1_w": ct1_w, "ct1_b": ct1_b,
        "ct2_w": ct2_w, "ct2_b": ct2_b,
        "c3_w": w3.astype(bf16), "c3_b": b3.astype(f32),
    }


# ----------------------------------------------------------------------------
# Forward pass (activations kept NHWC; NCHW only at the module boundary).
# ----------------------------------------------------------------------------
def cnn_decoder_forward(p, z, y):
    B = z.shape[0]

    # Fused head: noises_reshape Linears + labels_reshape Linear in one kernel.
    e = p["emb"][y].astype(jnp.bfloat16)                       # embedding gather (glue)
    h2, ly = fused_head(z.astype(jnp.float32), e, p)
    z_img = h2.reshape(B, 7, 7, 64)                            # already NHWC-ordered
    y_img = ly.reshape(B, 7, 7, 1)
    x = jnp.concatenate([z_img, y_img], axis=-1)               # (B,7,7,65)

    # Deconv stack.
    x = conv_transpose2d_s2(x, p["ct1_w"], p["ct1_b"], 64, "relu")   # (B,14,14,64)
    x = conv_transpose2d_s2(x, p["ct2_w"], p["ct2_b"], 32, "relu")   # (B,28,28,32)

    # Final stride-1 ConvTranspose2d + Sigmoid (as flipped-kernel conv, pad=1).
    xp = jnp.pad(x, ((0, 0), (1, 1), (1, 1), (0, 0)))
    patches, (_, OH, OW) = _extract_patches(xp, 3, 3)
    out = matmul_bias_act(patches, p["c3_w"], p["c3_b"], act="sigmoid",
                          out_dtype=jnp.float32)
    img = out[:, :1].reshape(B, OH, OW, 1)                     # strip lane pad once
    return img.transpose(0, 3, 1, 2)                           # NCHW (B,1,28,28)


if __name__ == "__main__":
    key = jax.random.PRNGKey(0)
    kp, kz = jax.random.split(key)
    params = prepare_params(init_params(kp))

    batch = 2
    z = jax.random.normal(kz, (batch, 2), jnp.float32)          # latent_dim = 2
    y = jnp.array([3, 7], dtype=jnp.int32)                      # class labels

    fwd = jax.jit(lambda z, y: cnn_decoder_forward(params, z, y))
    out = jax.block_until_ready(fwd(z, y))

    assert out.shape == (batch, 1, 28, 28), out.shape
    assert bool(jnp.all(jnp.isfinite(out)))
    assert bool(jnp.all((out >= 0.0) & (out <= 1.0)))           # sigmoid output range
    print("KERNEL_OK")
</pallas_src>

<mosaic_0001>
module attributes {stable_mosaic.version = 11 : i64} {
  func.func @_head_kernel(%arg0: i32, %arg1: memref<2x2xf32, #tpu.memory_space<vmem>>, %arg2: memref<2x256xf32, #tpu.memory_space<vmem>>, %arg3: memref<1x256xf32, #tpu.memory_space<vmem>>, %arg4: memref<256x3136xbf16, #tpu.memory_space<vmem>>, %arg5: memref<1x3136xf32, #tpu.memory_space<vmem>>, %arg6: memref<2x100xbf16, #tpu.memory_space<vmem>>, %arg7: memref<100x49xbf16, #tpu.memory_space<vmem>>, %arg8: memref<1x49xf32, #tpu.memory_space<vmem>>, %arg9: memref<2x3136xbf16, #tpu.memory_space<vmem>>, %arg10: memref<2x49xbf16, #tpu.memory_space<vmem>>) attributes {dimension_semantics = [#tpu.dimension_semantics<arbitrary>], iteration_bounds = array<i64: 1>, scalar_prefetch = 0 : i64, scratch_operands = 0 : i64, tpu.core_type = #tpu.core_type<tc>, window_params = [{pipeline_mode = #tpu.pipeline_mode<synchronous>, transform_indices = @transform_0, window_bounds = array<i64: 2, 2>}, {pipeline_mode = #tpu.pipeline_mode<synchronous>, transform_indices = @transform_1, window_bounds = array<i64: 2, 256>}, {pipeline_mode = #tpu.pipeline_mode<synchronous>, transform_indices = @transform_2, window_bounds = array<i64: 1, 256>}, {pipeline_mode = #tpu.pipeline_mode<synchronous>, transform_indices = @transform_3, window_bounds = array<i64: 256, 3136>}, {pipeline_mode = #tpu.pipeline_mode<synchronous>, transform_indices = @transform_4, window_bounds = array<i64: 1, 3136>}, {pipeline_mode = #tpu.pipeline_mode<synchronous>, transform_indices = @transform_5, window_bounds = array<i64: 2, 100>}, {pipeline_mode = #tpu.pipeline_mode<synchronous>, transform_indices = @transform_6, window_bounds = array<i64: 100, 49>}, {pipeline_mode = #tpu.pipeline_mode<synchronous>, transform_indices = @transform_7, window_bounds = array<i64: 1, 49>}, {pipeline_mode = #tpu.pipeline_mode<synchronous>, transform_indices = @transform_8, window_bounds = array<i64: 2, 3136>}, {pipeline_mode = #tpu.pipeline_mode<synchronous>, transform_indices = @transform_9, window_bounds = array<i64: 2, 49>}]} {
    %c0 = arith.constant 0 : index
    %c0_0 = arith.constant 0 : index
    %0 = vector.load %arg1[%c0, %c0_0] : memref<2x2xf32, #tpu.memory_space<vmem>>, vector<2x2xf32>
    %c0_1 = arith.constant 0 : index
    %c0_2 = arith.constant 0 : index
    %1 = vector.load %arg2[%c0_1, %c0_2] : memref<2x256xf32, #tpu.memory_space<vmem>>, vector<2x256xf32>
    %cst = arith.constant dense<0.000000e+00> : vector<2x256xf32>
    %2 = tpu.matmul %0, %1, %cst {dimension_numbers = #tpu.dot_dimension_numbers<[1], [0], [0], [1], [0, 0, 1, 1], [], []>} : vector<2x2xf32>, vector<2x256xf32>, vector<2x256xf32> -> vector<2x256xf32>
    %c0_3 = arith.constant 0 : index
    %c0_4 = arith.constant 0 : index
    %3 = vector.load %arg3[%c0_3, %c0_4] : memref<1x256xf32, #tpu.memory_space<vmem>>, vector<1x256xf32>
    %4 = vector.broadcast %3 : vector<1x256xf32> to vector<2x256xf32>
    %5 = arith.addf %2, %4 : vector<2x256xf32>
    %cst_5 = arith.constant 0.000000e+00 : f32
    %6 = vector.broadcast %cst_5 : f32 to vector<2x256xf32>
    %7 = arith.maximumf %5, %6 : vector<2x256xf32>
    %8 = arith.truncf %7 : vector<2x256xf32> to vector<2x256xbf16>
    %c0_6 = arith.constant 0 : index
    %c0_7 = arith.constant 0 : index
    %9 = vector.load %arg4[%c0_6, %c0_7] : memref<256x3136xbf16, #tpu.memory_space<vmem>>, vector<256x3136xbf16>
    %cst_8 = arith.constant dense<0.000000e+00> : vector<2x3136xf32>
    %10 = tpu.matmul %8, %9, %cst_8 {dimension_numbers = #tpu.dot_dimension_numbers<[1], [0], [0], [1], [0, 0, 1, 1], [], []>} : vector<2x256xbf16>, vector<256x3136xbf16>, vector<2x3136xf32> -> vector<2x3136xf32>
    %c0_9 = arith.constant 0 : index
    %c0_10 = arith.constant 0 : index
    %11 = vector.load %arg5[%c0_9, %c0_10] : memref<1x3136xf32, #tpu.memory_space<vmem>>, vector<1x3136xf32>
    %12 = vector.broadcast %11 : vector<1x3136xf32> to vector<2x3136xf32>
    %13 = arith.addf %10, %12 : vector<2x3136xf32>
    %cst_11 = arith.constant 0.000000e+00 : f32
    %14 = vector.broadcast %cst_11 : f32 to vector<2x3136xf32>
    %15 = arith.maximumf %13, %14 : vector<2x3136xf32>
    %c0_12 = arith.constant 0 : index
    %c0_13 = arith.constant 0 : index
    %16 = vector.load %arg6[%c0_12, %c0_13] : memref<2x100xbf16, #tpu.memory_space<vmem>>, vector<2x100xbf16>
    %c0_14 = arith.constant 0 : index
    %c0_15 = arith.constant 0 : index
    %17 = vector.load %arg7[%c0_14, %c0_15] : memref<100x49xbf16, #tpu.memory_space<vmem>>, vector<100x49xbf16>
    %cst_16 = arith.constant dense<0.000000e+00> : vector<2x49xf32>
    %18 = tpu.matmul %16, %17, %cst_16 {dimension_numbers = #tpu.dot_dimension_numbers<[1], [0], [0], [1], [0, 0, 1, 1], [], []>} : vector<2x100xbf16>, vector<100x49xbf16>, vector<2x49xf32> -> vector<2x49xf32>
    %c0_17 = arith.constant 0 : index
    %c0_18 = arith.constant 0 : index
    %19 = vector.load %arg8[%c0_17, %c0_18] : memref<1x49xf32, #tpu.memory_space<vmem>>, vector<1x49xf32>
    %20 = vector.broadcast %19 : vector<1x49xf32> to vector<2x49xf32>
    %21 = arith.addf %18, %20 : vector<2x49xf32>
    %22 = arith.truncf %15 : vector<2x3136xf32> to vector<2x3136xbf16>
    %c0_19 = arith.constant 0 : index
    %c0_20 = arith.constant 0 : index
    %23 = vector.load %arg9[%c0_19, %c0_20] : memref<2x3136xbf16, #tpu.memory_space<vmem>>, vector<2x3136xbf16>
    tpu.vector_store %arg9[%c0_19, %c0_20], %22 {strides = array<i32>} : memref<2x3136xbf16, #tpu.memory_space<vmem>>, vector<2x3136xbf16>,
    %24 = arith.truncf %21 : vector<2x49xf32> to vector<2x49xbf16>
    %c0_21 = arith.constant 0 : index
    %c0_22 = arith.constant 0 : index
    %25 = vector.load %arg10[%c0_21, %c0_22] : memref<2x49xbf16, #tpu.memory_space<vmem>>, vector<2x49xbf16>
    tpu.vector_store %arg10[%c0_21, %c0_22], %24 {strides = array<i32>} : memref<2x49xbf16, #tpu.memory_space<vmem>>, vector<2x49xbf16>,
    return
  }
  func.func @transform_0(%arg0: i32) -> (i32, i32) {
    %c0_i32 = arith.constant 0 : i32
    %c0_i32_0 = arith.constant 0 : i32
    %c0_i32_1 = arith.constant 0 : i32
    return %c0_i32, %c0_i32_0 : i32, i32
  }
  func.func @transform_1(%arg0: i32) -> (i32, i32) {
    %c0_i32 = arith.constant 0 : i32
    %c0_i32_0 = arith.constant 0 : i32
    %c0_i32_1 = arith.constant 0 : i32
    return %c0_i32, %c0_i32_0 : i32, i32
  }
  func.func @transform_2(%arg0: i32) -> (i32, i32) {
    %c0_i32 = arith.constant 0 : i32
    %c0_i32_0 = arith.constant 0 : i32
    %c0_i32_1 = arith.constant 0 : i32
    return %c0_i32, %c0_i32_0 : i32, i32
  }
  func.func @transform_3(%arg0: i32) -> (i32, i32) {
    %c0_i32 = arith.constant 0 : i32
    %c0_i32_0 = arith.constant 0 : i32
    %c0_i32_1 = arith.constant 0 : i32
    return %c0_i32, %c0_i32_0 : i32, i32
  }
  func.func @transform_4(%arg0: i32) -> (i32, i32) {
    %c0_i32 = arith.constant 0 : i32
    %c0_i32_0 = arith.constant 0 : i32
    %c0_i32_1 = arith.constant 0 : i32
    return %c0_i32, %c0_i32_0 : i32, i32
  }
  func.func @transform_5(%arg0: i32) -> (i32, i32) {
    %c0_i32 = arith.constant 0 : i32
    %c0_i32_0 = arith.constant 0 : i32
    %c0_i32_1 = arith.constant 0 : i32
    return %c0_i32, %c0_i32_0 : i32, i32
  }
  func.func @transform_6(%arg0: i32) -> (i32, i32) {
    %c0_i32 = arith.constant 0 : i32
    %c0_i32_0 = arith.constant 0 : i32
    %c0_i32_1 = arith.constant 0 : i32
    return %c0_i32, %c0_i32_0 : i32, i32
  }
  func.func @transform_7(%arg0: i32) -> (i32, i32) {
    %c0_i32 = arith.constant 0 : i32
    %c0_i32_0 = arith.constant 0 : i32
    %c0_i32_1 = arith.constant 0 : i32
    return %c0_i32, %c0_i32_0 : i32, i32
  }
  func.func @transform_8(%arg0: i32) -> (i32, i32) {
    %c0_i32 = arith.constant 0 : i32
    %c0_i32_0 = arith.constant 0 : i32
    %c0_i32_1 = arith.constant 0 : i32
    return %c0_i32, %c0_i32_0 : i32, i32
  }
  func.func @transform_9(%arg0: i32) -> (i32, i32) {
    %c0_i32 = arith.constant 0 : i32
    %c0_i32_0 = arith.constant 0 : i32
    %c0_i32_1 = arith.constant 0 : i32
    return %c0_i32, %c0_i32_0 : i32, i32
  }
}

module attributes {stable_mosaic.version = 11 : i64} {
  func.func @_matmul_bias_act_kernel(%arg0: i32, %arg1: memref<128x260xbf16, #tpu.memory_space<vmem>>, %arg2: memref<260x256xbf16, #tpu.memory_space<vmem>>, %arg3: memref<1x256xf32, #tpu.memory_space<vmem>>, %arg4: memref<128x256xbf16, #tpu.memory_space<vmem>>) attributes {dimension_semantics = [#tpu.dimension_semantics<parallel>], iteration_bounds = array<i64: 1>, scalar_prefetch = 0 : i64, scratch_operands = 0 : i64, tpu.core_type = #tpu.core_type<tc>, window_params = [{transform_indices = @transform_0, window_bounds = array<i64: 128, 260>}, {pipeline_mode = #tpu.pipeline_mode<synchronous>, transform_indices = @transform_1, window_bounds = array<i64: 260, 256>}, {pipeline_mode = #tpu.pipeline_mode<synchronous>, transform_indices = @transform_2, window_bounds = array<i64: 1, 256>}, {transform_indices = @transform_3, window_bounds = array<i64: 128, 256>}]} {
    %c0 = arith.constant 0 : index
    %c0_0 = arith.constant 0 : index
    %0 = vector.load %arg1[%c0, %c0_0] : memref<128x260xbf16, #tpu.memory_space<vmem>>, vector<128x260xbf16>
    %c0_1 = arith.constant 0 : index
    %c0_2 = arith.constant 0 : index
    %1 = vector.load %arg2[%c0_1, %c0_2] : memref<260x256xbf16, #tpu.memory_space<vmem>>, vector<260x256xbf16>
    %cst = arith.constant dense<0.000000e+00> : vector<128x256xf32>
    %2 = tpu.matmul %0, %1, %cst {dimension_numbers = #tpu.dot_dimension_numbers<[1], [0], [0], [1], [0, 0, 1, 1], [], []>} : vector<128x260xbf16>, vector<260x256xbf16>, vector<128x256xf32> -> vector<128x256xf32>
    %c0_3 = arith.constant 0 : index
    %c0_4 = arith.constant 0 : index
    %3 = vector.load %arg3[%c0_3, %c0_4] : memref<1x256xf32, #tpu.memory_space<vmem>>, vector<1x256xf32>
    %4 = vector.broadcast %3 : vector<1x256xf32> to vector<128x256xf32>
    %5 = arith.addf %2, %4 : vector<128x256xf32>
    %cst_5 = arith.constant 0.000000e+00 : f32
    %6 = vector.broadcast %cst_5 : f32 to vector<128x256xf32>
    %7 = arith.maximumf %5, %6 : vector<128x256xf32>
    %8 = arith.truncf %7 : vector<128x256xf32> to vector<128x256xbf16>
    %c0_6 = arith.constant 0 : index
    %c0_7 = arith.constant 0 : index
    %9 = vector.load %arg4[%c0_6, %c0_7] : memref<128x256xbf16, #tpu.memory_space<vmem>>, vector<128x256xbf16>
    tpu.vector_store %arg4[%c0_6, %c0_7], %8 {strides = array<i32>} : memref<128x256xbf16, #tpu.memory_space<vmem>>, vector<128x256xbf16>,
    return
  }
  func.func @transform_0(%arg0: i32) -> (i32, i32) {
    %c0_i32 = arith.constant 0 : i32
    %c0_i32_0 = arith.constant 0 : i32
    return %arg0, %c0_i32 : i32, i32
  }
  func.func @transform_1(%arg0: i32) -> (i32, i32) {
    %c0_i32 = arith.constant 0 : i32
    %c0_i32_0 = arith.constant 0 : i32
    %c0_i32_1 = arith.constant 0 : i32
    return %c0_i32, %c0_i32_0 : i32, i32
  }
  func.func @transform_2(%arg0: i32) -> (i32, i32) {
    %c0_i32 = arith.constant 0 : i32
    %c0_i32_0 = arith.constant 0 : i32
    %c0_i32_1 = arith.constant 0 : i32
    return %c0_i32, %c0_i32_0 : i32, i32
  }
  func.func @transform_3(%arg0: i32) -> (i32, i32) {
    %c0_i32 = arith.constant 0 : i32
    %c0_i32_0 = arith.constant 0 : i32
    return %arg0, %c0_i32 : i32, i32
  }
}

module attributes {stable_mosaic.version = 11 : i64} {
  func.func @_matmul_bias_act_kernel(%arg0: i32, %arg1: memref<450x256xbf16, #tpu.memory_space<vmem>>, %arg2: memref<256x128xbf16, #tpu.memory_space<vmem>>, %arg3: memref<1x128xf32, #tpu.memory_space<vmem>>, %arg4: memref<450x128xbf16, #tpu.memory_space<vmem>>) attributes {dimension_semantics = [#tpu.dimension_semantics<parallel>], iteration_bounds = array<i64: 1>, scalar_prefetch = 0 : i64, scratch_operands = 0 : i64, tpu.core_type = #tpu.core_type<tc>, window_params = [{transform_indices = @transform_0, window_bounds = array<i64: 450, 256>}, {pipeline_mode = #tpu.pipeline_mode<synchronous>, transform_indices = @transform_1, window_bounds = array<i64: 256, 128>}, {pipeline_mode = #tpu.pipeline_mode<synchronous>, transform_indices = @transform_2, window_bounds = array<i64: 1, 128>}, {transform_indices = @transform_3, window_bounds = array<i64: 450, 128>}]} {
    %c0 = arith.constant 0 : index
    %c0_0 = arith.constant 0 : index
    %0 = vector.load %arg1[%c0, %c0_0] : memref<450x256xbf16, #tpu.memory_space<vmem>>, vector<450x256xbf16>
    %c0_1 = arith.constant 0 : index
    %c0_2 = arith.constant 0 : index
    %1 = vector.load %arg2[%c0_1, %c0_2] : memref<256x128xbf16, #tpu.memory_space<vmem>>, vector<256x128xbf16>
    %cst = arith.constant dense<0.000000e+00> : vector<450x128xf32>
    %2 = tpu.matmul %0, %1, %cst {dimension_numbers = #tpu.dot_dimension_numbers<[1], [0], [0], [1], [0, 0, 1, 1], [], []>} : vector<450x256xbf16>, vector<256x128xbf16>, vector<450x128xf32> -> vector<450x128xf32>
    %c0_3 = arith.constant 0 : index
    %c0_4 = arith.constant 0 : index
    %3 = vector.load %arg3[%c0_3, %c0_4] : memref<1x128xf32, #tpu.memory_space<vmem>>, vector<1x128xf32>
    %4 = vector.broadcast %3 : vector<1x128xf32> to vector<450x128xf32>
    %5 = arith.addf %2, %4 : vector<450x128xf32>
    %cst_5 = arith.constant 0.000000e+00 : f32
    %6 = vector.broadcast %cst_5 : f32 to vector<450x128xf32>
    %7 = arith.maximumf %5, %6 : vector<450x128xf32>
    %8 = arith.truncf %7 : vector<450x128xf32> to vector<450x128xbf16>
    %c0_6 = arith.constant 0 : index
    %c0_7 = arith.constant 0 : index
    %9 = vector.load %arg4[%c0_6, %c0_7] : memref<450x128xbf16, #tpu.memory_space<vmem>>, vector<450x128xbf16>
    tpu.vector_store %arg4[%c0_6, %c0_7], %8 {strides = array<i32>} : memref<450x128xbf16, #tpu.memory_space<vmem>>, vector<450x128xbf16>,
    return
  }
  func.func @transform_0(%arg0: i32) -> (i32, i32) {
    %c0_i32 = arith.constant 0 : i32
    %c0_i32_0 = arith.constant 0 : i32
    return %arg0, %c0_i32 : i32, i32
  }
  func.func @transform_1(%arg0: i32) -> (i32, i32) {
    %c0_i32 = arith.constant 0 : i32
    %c0_i32_0 = arith.constant 0 : i32
    %c0_i32_1 = arith.constant 0 : i32
    return %c0_i32, %c0_i32_0 : i32, i32
  }
  func.func @transform_2(%arg0: i32) -> (i32, i32) {
    %c0_i32 = arith.constant 0 : i32
    %c0_i32_0 = arith.constant 0 : i32
    %c0_i32_1 = arith.constant 0 : i32
    return %c0_i32, %c0_i32_0 : i32, i32
  }
  func.func @transform_3(%arg0: i32) -> (i32, i32) {
    %c0_i32 = arith.constant 0 : i32
    %c0_i32_0 = arith.constant 0 : i32
    return %arg0, %c0_i32 : i32, i32
  }
}

module attributes {stable_mosaic.version = 11 : i64} {
  func.func @_matmul_bias_act_kernel(%arg0: i32, %arg1: memref<512x288xbf16, #tpu.memory_space<vmem>>, %arg2: memref<288x128xbf16, #tpu.memory_space<vmem>>, %arg3: memref<1x128xf32, #tpu.memory_space<vmem>>, %arg4: memref<512x128xf32, #tpu.memory_space<vmem>>) attributes {dimension_semantics = [#tpu.dimension_semantics<parallel>], iteration_bounds = array<i64: 4>, scalar_prefetch = 0 : i64, scratch_operands = 0 : i64, tpu.core_type = #tpu.core_type<tc>, window_params = [{transform_indices = @transform_0, window_bounds = array<i64: 512, 288>}, {pipeline_mode = #tpu.pipeline_mode<synchronous>, transform_indices = @transform_1, window_bounds = array<i64: 288, 128>}, {pipeline_mode = #tpu.pipeline_mode<synchronous>, transform_indices = @transform_2, window_bounds = array<i64: 1, 128>}, {transform_indices = @transform_3, window_bounds = array<i64: 512, 128>}]} {
    %c0 = arith.constant 0 : index
    %c0_0 = arith.constant 0 : index
    %0 = vector.load %arg1[%c0, %c0_0] : memref<512x288xbf16, #tpu.memory_space<vmem>>, vector<512x288xbf16>
    %c0_1 = arith.constant 0 : index
    %c0_2 = arith.constant 0 : index
    %1 = vector.load %arg2[%c0_1, %c0_2] : memref<288x128xbf16, #tpu.memory_space<vmem>>, vector<288x128xbf16>
    %cst = arith.constant dense<0.000000e+00> : vector<512x128xf32>
    %2 = tpu.matmul %0, %1, %cst {dimension_numbers = #tpu.dot_dimension_numbers<[1], [0], [0], [1], [0, 0, 1, 1], [], []>} : vector<512x288xbf16>, vector<288x128xbf16>, vector<512x128xf32> -> vector<512x128xf32>
    %c0_3 = arith.constant 0 : index
    %c0_4 = arith.constant 0 : index
    %3 = vector.load %arg3[%c0_3, %c0_4] : memref<1x128xf32, #tpu.memory_space<vmem>>, vector<1x128xf32>
    %4 = vector.broadcast %3 : vector<1x128xf32> to vector<512x128xf32>
    %5 = arith.addf %2, %4 : vector<512x128xf32>
    %6 = arith.negf %5 : vector<512x128xf32>
    %7 = math.exp %6 : vector<512x128xf32>
    %cst_5 = arith.constant 1.000000e+00 : f32
    %8 = vector.broadcast %cst_5 : f32 to vector<512x128xf32>
    %9 = arith.addf %8, %7 : vector<512x128xf32>
    %10 = arith.divf %8, %9 : vector<512x128xf32>
    %c0_6 = arith.constant 0 : index
    %c0_7 = arith.constant 0 : index
    %11 = vector.load %arg4[%c0_6, %c0_7] : memref<512x128xf32, #tpu.memory_space<vmem>>, vector<512x128xf32>
    tpu.vector_store %arg4[%c0_6, %c0_7], %10 {strides = array<i32>} : memref<512x128xf32, #tpu.memory_space<vmem>>, vector<512x128xf32>,
    return
  }
  func.func @transform_0(%arg0: i32) -> (i32, i32) {
    %c0_i32 = arith.constant 0 : i32
    %c0_i32_0 = arith.constant 0 : i32
    return %arg0, %c0_i32 : i32, i32
  }
  func.func @transform_1(%arg0: i32) -> (i32, i32) {
    %c0_i32 = arith.constant 0 : i32
    %c0_i32_0 = arith.constant 0 : i32
    %c0_i32_1 = arith.constant 0 : i32
    return %c0_i32, %c0_i32_0 : i32, i32
  }
  func.func @transform_2(%arg0: i32) -> (i32, i32) {
    %c0_i32 = arith.constant 0 : i32
    %c0_i32_0 = arith.constant 0 : i32
    %c0_i32_1 = arith.constant 0 : i32
    return %c0_i32, %c0_i32_0 : i32, i32
  }
  func.func @transform_3(%arg0: i32) -> (i32, i32) {
    %c0_i32 = arith.constant 0 : i32
    %c0_i32_0 = arith.constant 0 : i32
    return %arg0, %c0_i32 : i32, i32
  }
}

</mosaic_0001>

<bundles_post_ra>
// kernel: _lambda_.5
= control target key start
LH: loop header
LB: loop body
LE: loop exit
PB: predicated region body
PF: predicated region fallthrough
CT: control target
= control target key end

     0   :  { %8 = vsyncpa [#allocation3], 0  ;;  %s1570_s0 = inlined_call_operand.vmem [shape: bf16[128,260], index: 0, kind: input, shape index: {}]   ;;  %s1571_s1 = inlined_call_operand.hbm [shape: bf16[260,256], index: 1, kind: input, shape index: {}]   ;;  %s1572_s2 = inlined_call_operand.hbm [shape: f32[1,256], index: 2, kind: input, shape index: {}]   ;;  %s1573_s3 = inlined_call_operand.vmem [shape: bf16[128,256], index: 3, kind: output, shape index: {}]  }
   0x1   :  { %s16_s14 = sshll.u32 %s1571_s1, 4  ;;  %s17_s14 = int_to_ptr.hbm [resolvable:$true] %s16_s14 }
   0x2   :  { %9 = vsyncpa [#allocation5], 0  ;;  %s1158_s15 = smov [#allocation2]   ;;  %s30_s19 = sshll.u32 %s1572_s2, 4  ;;  %s31_s19 = int_to_ptr.hbm [resolvable:$true] %s30_s19 }
   0x3   :  { %s18_s16 = sshll.u32 %s1158_s15, 4  ;;  %s1159_s20 = smov 128   ;;  %s19_s16 = int_to_ptr.vmem [resolvable:$true] %s18_s16 }
   0x4   :  { %s1160_s21 = smov 8   ;;  %s1161_s22 = smov [#allocation4]  }
   0x5   :  { %24 = dma.hbm_to_vmem [thread:$0]  %s17_s14, 4224, %s19_s16, [#allocation3], %s1159_s20, %s1159_s20, %s1160_s21  }
   0x6   :  { %s32_s23 = sshll.u32 %s1161_s22, 4  ;;  %s33_s23 = int_to_ptr.vmem [resolvable:$true] %s32_s23 }
   0x7   :  { %35 = dma.hbm_to_vmem [thread:$0]  %s31_s19, 32, %s33_s23, [#allocation5]  }
   0x8   :  { %1154 = dma.done.wait [#allocation3], 4224  }
   0x9   :  { %1155 = vsyncadd [#allocation3], 4294963072 }
   0xa   :  { %1156 = dma.done.wait [#allocation5], 32  }
   0xb   :  { %1157 = vsyncadd [#allocation5], 4294967264  ;;  %v951_v0 = vld [vmem:[#allocation2 + $0x70] sm:$0xf]  ;;  %v1076_v1 = vld [vmem:[#allocation2 + $0x74] sm:$0xf0] }
   0xc   :  { %v1188_v2 = vld [vmem:[#allocation2 + $0x100] sm:$0x33]  ;;  %v952_v3 = vor.u32 %v1076_v1, %v951_v0  ;;  %v1074_v6 = vld [vmem:[#allocation2 + $0x64] sm:$0xf0]  ;;  %vm426_vm0 = vcmask 1041408   ;;  %vm401_vm1 = vcmask 31744  }
   0xd   :  { %v333_v4 = vunpack.c.l.b16 %v1188_v2  ;;  %v943_v5 = vld [vmem:[#allocation2 + $0x60] sm:$0xf]  ;;  %v807_v7 = vld [vmem:[%s1570_s0 + $0x8] sm:$0xf]  ;;  %v1039_v8 = vld [vmem:[%s1570_s0 + $0x10] sm:$0xf0]  ;;  %v334_v56 = vunpack.c.h.b16 %v1188_v2 }
   0xe   :  { %433 = vmatpush.bf16.msra.mxu0 %v952_v3  ;;  %1093 = vmatpush.bf16.msra.mxu1 %v952_v3  ;;  %v944_v10 = vor.u32 %v1074_v6, %v943_v5  ;;  %v1091_v11 = vld [vmem:[#allocation2 + $0xf4] sm:$0xf]  ;;  %v1017_v12 = vld [vmem:[#allocation2 + $0xf8] sm:$0xf0]  ;;  %v935_v13 = vld [vmem:[#allocation2 + $0x50] sm:$0xf]  ;;  %v1198_v17 = vor.u32 %v1039_v8, %v807_v7 }
   0xf   :  { %v367_v9 = vpack.c.b16 %v333_v4, %v333_v4  ;;  %v1072_v14 = vld [vmem:[#allocation2 + $0x54] sm:$0xf0]  ;;  %v1020_v15 = vor.u32 %v1091_v11, %v1017_v12  ;;  %v1089_v18 = vld [vmem:[#allocation2 + $0xe4] sm:$0xf]  ;;  %v1009_v19 = vld [vmem:[#allocation2 + $0xe8] sm:$0xf0]  ;;  %v368_v2 = vpack.c.b16 %v334_v56, %v334_v56 }
  0x10   :  { %v936_v20 = vor.u32 %v1072_v14, %v935_v13  ;;  %v927_v21 = vld [vmem:[#allocation2 + $0x40] sm:$0xf]  ;;  %v1070_v22 = vld [vmem:[#allocation2 + $0x44] sm:$0xf0]  ;;  %v1012_v23 = vor.u32 %v1089_v18, %v1009_v19  ;;  %v1087_v24 = vld [vmem:[#allocation2 + $0xd4] sm:$0xf] }
  0x11   :  { %v428_v16 = vsel %vm426_vm0, %v367_v9, 0  ;;  %v1001_v25 = vld [vmem:[#allocation2 + $0xd8] sm:$0xf0]  ;;  %v928_v26 = vor.u32 %v1070_v22, %v927_v21  ;;  %v867_v27 = vld [vmem:[%s1570_s0 + $0x80] sm:$0xf] }
  0x12   :  { %538 = vmatpush.bf16.msra.mxu2 %v428_v16  ;;  %1101 = vmatpush.bf16.msra.mxu3 %v428_v16  ;;  %v1054_v28 = vld [vmem:[%s1570_s0 + $0x88] sm:$0xf0]  ;;  %v919_v29 = vld [vmem:[#allocation2 + $0x30] sm:$0xf]  ;;  %v1068_v30 = vld [vmem:[#allocation2 + $0x34] sm:$0xf0]  ;;  %v1004_v31 = vor.u32 %v1087_v24, %v1001_v25 }
  0x13   :  { %434 = vmatpush.bf16.msra.mxu0 %v944_v10  ;;  %1094 = vmatpush.bf16.msra.mxu1 %v944_v10  ;;  %v1208_v32 = vor.u32 %v1054_v28, %v867_v27  ;;  %v1075_v33 = vld [vmem:[#allocation2 + $0x74] sm:$0xf]  ;;  %v953_v34 = vld [vmem:[#allocation2 + $0x78] sm:$0xf0]  ;;  %v1085_v35 = vld [vmem:[#allocation2 + $0xc4] sm:$0xf]  ;;  %v920_v37 = vor.u32 %v1068_v30, %v919_v29 }
  0x14   :  { %v993_v36 = vld [vmem:[#allocation2 + $0xc8] sm:$0xf0]  ;;  %v956_v38 = vor.u32 %v1075_v33, %v953_v34  ;;  %v1073_v39 = vld [vmem:[#allocation2 + $0x64] sm:$0xf]  ;;  %v911_v41 = vld [vmem:[#allocation2 + $0x20] sm:$0xf] }
  0x15   :  { %1021 = vmatmul.msk.bf16.vlgmr.msra.gmra.mxu2 %vm401_vm1, %v1198_v17  ;;  %1026 = vmatmul.msk.bf16.vlgmr.msra.gmra.mxu3 %vm401_vm1, %v1208_v32  ;;  %v945_v40 = vld [vmem:[#allocation2 + $0x68] sm:$0xf0]  ;;  %v1066_v42 = vld [vmem:[#allocation2 + $0x24] sm:$0xf0]  ;;  %v996_v43 = vor.u32 %v1085_v35, %v993_v36  ;;  %v819_v45 = vld [vmem:[%s1570_s0 + $0x20] sm:$0xf] }
  0x16   :  { %629 = vmatpush.bf16.msrb.mxu2 %v1020_v15  ;;  %580 = vmatpush.bf16.msrb.mxu3 %v956_v38  ;;  %v948_v44 = vor.u32 %v1073_v39, %v945_v40  ;;  %v1042_v46 = vld [vmem:[%s1570_s0 + $0x28] sm:$0xf0]  ;;  %v1083_v47 = vld [vmem:[#allocation2 + $0xb4] sm:$0xf]  ;;  %v912_v48 = vor.u32 %v1066_v42, %v911_v41  ;;  %v985_v49 = vld [vmem:[#allocation2 + $0xb8] sm:$0xf0] }
  0x17   :  { %435 = vmatpush.bf16.msra.mxu0 %v936_v20  ;;  %1095 = vmatpush.bf16.msra.mxu1 %v936_v20  ;;  %v1071_v50 = vld [vmem:[#allocation2 + $0x54] sm:$0xf]  ;;  %v937_v51 = vld [vmem:[#allocation2 + $0x58] sm:$0xf0]  ;;  %v903_v52 = vld [vmem:[#allocation2 + $0x10] sm:$0xf]  ;;  %v988_v54 = vor.u32 %v1083_v47, %v985_v49  ;;  %v1218_v55 = vor.u32 %v1042_v46, %v819_v45 }
  0x18   :  { %v1064_v53 = vld [vmem:[#allocation2 + $0x14] sm:$0xf0]  ;;  %v940_v57 = vor.u32 %v1071_v50, %v937_v51  ;;  %v1057_v60 = vld [vmem:[%s1570_s0 + $0xa0] sm:$0xf0]  ;;  %v895_v61 = vld [vmem:[#allocation2] sm:$0xf] }
  0x19   :  { %v904_v58 = vor.u32 %v1064_v53, %v903_v52  ;;  %v879_v59 = vld [vmem:[%s1570_s0 + $0x98] sm:$0xf]  ;;  %v1062_v62 = vld [vmem:[#allocation2 + $0x4] sm:$0xf0]  ;;  %v799_v63 = vld [vmem:[%s1570_s0] sm:$0xf] }
  0x1a   :  { %630 = vmatpush.bf16.msrb.mxu2 %v1012_v23  ;;  %581 = vmatpush.bf16.msrb.mxu3 %v948_v44  ;;  %v1015_v0 = vld [vmem:[#allocation2 + $0xf0] sm:$0xf]  ;;  %v1092_v1 = vld [vmem:[#allocation2 + $0xf4] sm:$0xf0]  ;;  %v1069_v3 = vld [vmem:[#allocation2 + $0x44] sm:$0xf]  ;;  %v1232_v4 = vor.u32 %v1057_v60, %v879_v59  ;;  %v896_v8 = vor.u32 %v1062_v62, %v895_v61 }
  0x1b   :  { %436 = vmatpush.bf16.msra.mxu0 %v928_v26  ;;  %1096 = vmatpush.bf16.msra.mxu1 %v928_v26  ;;  %v929_v5 = vld [vmem:[#allocation2 + $0x48] sm:$0xf0]  ;;  %v1081_v6 = vld [vmem:[#allocation2 + $0xa4] sm:$0xf]  ;;  %v847_v10 = vld [vmem:[%s1570_s0 + $0x60] sm:$0xf]  ;;  %v1016_v14 = vor.u32 %v1092_v1, %v1015_v0 }
  0x1c   :  { %v977_v7 = vld [vmem:[#allocation2 + $0xa8] sm:$0xf0]  ;;  %v932_v12 = vor.u32 %v1069_v3, %v929_v5  ;;  %v431_v15 = vsel %vm426_vm0, %v368_v2, 0  ;;  %v1007_v16 = vld [vmem:[#allocation2 + $0xe0] sm:$0xf] }
  0x1d   :  { %v1038_v9 = vld [vmem:[%s1570_s0 + $0x8] sm:$0xf0]  ;;  %v980_v13 = vor.u32 %v1081_v6, %v977_v7  ;;  %v1090_v18 = vld [vmem:[#allocation2 + $0xe4] sm:$0xf0]  ;;  %v1067_v22 = vld [vmem:[#allocation2 + $0x34] sm:$0xf] }
  0x1e   :  { %631 = vmatpush.bf16.msrb.mxu2 %v1004_v31  ;;  %582 = vmatpush.bf16.msrb.mxu3 %v940_v57  ;;  %v1050_v11 = vld [vmem:[%s1570_s0 + $0x68] sm:$0xf0]  ;;  %v1244_v19 = vor.u32 %v1038_v9, %v799_v63  ;;  %v1008_v21 = vor.u32 %v1090_v18, %v1007_v16  ;;  %v921_v23 = vld [vmem:[#allocation2 + $0x38] sm:$0xf0]  ;;  %v999_v24 = vld [vmem:[#allocation2 + $0xd0] sm:$0xf] }
  0x1f   :  { %437 = vmatpush.bf16.msra.mxu0 %v920_v37  ;;  %1097 = vmatpush.bf16.msra.mxu1 %v920_v37  ;;  %v1246_v20 = vor.u32 %v1050_v11, %v847_v10  ;;  %v1088_v25 = vld [vmem:[#allocation2 + $0xd4] sm:$0xf0]  ;;  %v924_v26 = vor.u32 %v1067_v22, %v921_v23  ;;  %v1045_v28 = vld [vmem:[%s1570_s0 + $0x40] sm:$0xf0]  ;;  %v913_v30 = vld [vmem:[#allocation2 + $0x28] sm:$0xf0] }
  0x20   :  { %v831_v27 = vld [vmem:[%s1570_s0 + $0x38] sm:$0xf]  ;;  %v1065_v29 = vld [vmem:[#allocation2 + $0x24] sm:$0xf]  ;;  %v1079_v31 = vld [vmem:[#allocation2 + $0x94] sm:$0xf]  ;;  %v1000_v34 = vor.u32 %v1088_v25, %v999_v24 }
  0x21   :  { %v969_v33 = vld [vmem:[#allocation2 + $0x98] sm:$0xf0]  ;;  %v916_v35 = vor.u32 %v1065_v29, %v913_v30  ;;  %v1258_v37 = vor.u32 %v1045_v28, %v831_v27  ;;  %v991_v38 = vld [vmem:[#allocation2 + $0xc0] sm:$0xf]  ;;  %v1086_v39 = vld [vmem:[#allocation2 + $0xc4] sm:$0xf0] }
  0x22   :  { %632 = vmatpush.bf16.msrb.mxu2 %v996_v43  ;;  %583 = vmatpush.bf16.msrb.mxu3 %v932_v12  ;;  %v972_v36 = vor.u32 %v1079_v31, %v969_v33  ;;  %v891_v40 = vld [vmem:[%s1570_s0 + $0xb0] sm:$0xf]  ;;  %v1060_v41 = vld [vmem:[%s1570_s0 + $0xb8] sm:$0xf0]  ;;  %v992_v42 = vor.u32 %v1086_v39, %v991_v38  ;;  %v1063_v43 = vld [vmem:[#allocation2 + $0x14] sm:$0xf] }
  0x23   :  { %438 = vmatpush.bf16.msra.mxu0 %v912_v48  ;;  %1098 = vmatpush.bf16.msra.mxu1 %v912_v48  ;;  %v905_v44 = vld [vmem:[#allocation2 + $0x18] sm:$0xf0]  ;;  %v983_v45 = vld [vmem:[#allocation2 + $0xb0] sm:$0xf]  ;;  %v1084_v46 = vld [vmem:[#allocation2 + $0xb4] sm:$0xf0]  ;;  %v1271_v50 = vor.u32 %v1060_v41, %v891_v40 }
  0x24   :  { %v908_v47 = vor.u32 %v1063_v43, %v905_v44  ;;  %v1061_v48 = vld [vmem:[#allocation2 + $0x4] sm:$0xf]  ;;  %v811_v49 = vld [vmem:[%s1570_s0 + $0x18] sm:$0xf]  ;;  %v897_v51 = vld [vmem:[#allocation2 + $0x8] sm:$0xf0]  ;;  %v984_v57 = vor.u32 %v1084_v46, %v983_v45 }
  0x25   :  { %1022 = vmatmul.msk.bf16.gmra.mxu2 %vm401_vm1, %v1218_v55  ;;  %1027 = vmatmul.msk.bf16.gmra.mxu3 %vm401_vm1, %v1232_v4  ;;  %v1041_v52 = vld [vmem:[%s1570_s0 + $0x20] sm:$0xf0]  ;;  %v859_v53 = vld [vmem:[%s1570_s0 + $0x78] sm:$0xf]  ;;  %v900_v56 = vor.u32 %v1061_v48, %v897_v51  ;;  %v1082_v59 = vld [vmem:[#allocation2 + $0xa4] sm:$0xf0] }
  0x26   :  { %633 = vmatpush.bf16.msrb.mxu2 %v988_v54  ;;  %584 = vmatpush.bf16.msrb.mxu3 %v924_v26  ;;  %v1053_v54 = vld [vmem:[%s1570_s0 + $0x80] sm:$0xf0]  ;;  %v812_v60 = vor.u32 %v1041_v52, %v811_v49  ;;  %v843_v63 = vld [vmem:[%s1570_s0 + $0x50] sm:$0xf]  ;;  %v1048_v0 = vld [vmem:[%s1570_s0 + $0x58] sm:$0xf0] }
  0x27   :  { %439 = vmatpush.bf16.msra.mxu0 %v904_v58  ;;  %1099 = vmatpush.bf16.msra.mxu1 %v904_v58  ;;  %v975_v58 = vld [vmem:[#allocation2 + $0xa0] sm:$0xf]  ;;  %v1282_v61 = vor.u32 %v1053_v54, %v859_v53  ;;  %v967_v1 = vld [vmem:[#allocation2 + $0x90] sm:$0xf]  ;;  %v1080_v2 = vld [vmem:[#allocation2 + $0x94] sm:$0xf0] }
  0x28   :  { %v976_v62 = vor.u32 %v1082_v59, %v975_v58  ;;  %v1077_v3 = vld [vmem:[#allocation2 + $0x84] sm:$0xf]  ;;  %v961_v5 = vld [vmem:[#allocation2 + $0x88] sm:$0xf0]  ;;  %v968_v6 = vor.u32 %v1080_v2, %v967_v1  ;;  %v959_v9 = vld [vmem:[#allocation2 + $0x80] sm:$0xf] }
  0x29   :  { %v964_v7 = vor.u32 %v1077_v3, %v961_v5  ;;  %v1078_v10 = vld [vmem:[#allocation2 + $0x84] sm:$0xf0]  ;;  %v823_v11 = vld [vmem:[%s1570_s0 + $0x30] sm:$0xf]  ;;  %v1051_v22 = vld [vmem:[%s1570_s0 + $0x70] sm:$0xf0] }
  0x2a   :  { %634 = vmatpush.bf16.msrb.mxu2 %v980_v13  ;;  %585 = vmatpush.bf16.msrb.mxu3 %v916_v35  ;;  %v960_v12 = vor.u32 %v1078_v10, %v959_v9  ;;  %v1044_v13 = vld [vmem:[%s1570_s0 + $0x38] sm:$0xf0]  ;;  %v835_v24 = vld [vmem:[%s1570_s0 + $0x48] sm:$0xf]  ;;  %v1059_v26 = vld [vmem:[%s1570_s0 + $0xb0] sm:$0xf0] }
  0x2b   :  { %440 = vmatpush.bf16.msra.mxu0 %v896_v8  ;;  %1100 = vmatpush.bf16.msra.mxu1 %v896_v8  ;;  %v844_v8 = vor.u32 %v1048_v0, %v843_v63  ;;  %v824_v16 = vor.u32 %v1044_v13, %v823_v11  ;;  %v883_v25 = vld [vmem:[%s1570_s0 + $0xa8] sm:$0xf]  ;;  %v1037_v29 = vld [vmem:[%s1570_s0 + $0x4] sm:$0xf]  ;;  %v801_v30 = vld [vmem:[%s1570_s0 + $0xc] sm:$0xf0] }
  0x2c   :  { %v884_v28 = vor.u32 %v1059_v26, %v883_v25  ;;  %v804_v31 = vor.u32 %v1037_v29, %v801_v30  ;;  %v1040_v33 = vld [vmem:[%s1570_s0 + $0x1c] sm:$0xf]  ;;  %v837_v39 = vld [vmem:[%s1570_s0 + $0x54] sm:$0xf0]  ;;  %v110_v45 = vld [vmem:[#allocation4] sm:$0x3] }
  0x2d   :  { %v1375_v48 = vperm.slane %v110_v45, 0  ;;  %v1052_v54 = vld [vmem:[%s1570_s0 + $0x7c] sm:$0xf]  ;;  %v1055_v5 = vld [vmem:[%s1570_s0 + $0x94] sm:$0xf] }
  0x2e   :  { %441 = vmatmul.bf16.vlgmr.msra.gmra.mxu0 %v1244_v19  ;;  %461 = vmatmul.bf16.vlgmr.msra.gmra.mxu1 %v1246_v20 }
  0x2f   :  { %482 = vmatpush.bf16.msrb.mxu1 %v1016_v14  ;;  %685 = vmatpush.bf16.msrb.mxu0 %v431_v15  ;;  %v871_v14 = vld [vmem:[%s1570_s0 + $0x90] sm:$0xf]  ;;  %v1056_v15 = vld [vmem:[%s1570_s0 + $0x98] sm:$0xf0] }
  0x30   :  { %635 = vmatpush.bf16.msrb.mxu2 %v972_v36  ;;  %586 = vmatpush.bf16.msrb.mxu3 %v908_v47  ;;  %v872_v18 = vor.u32 %v1056_v15, %v871_v14  ;;  %v1043_v36 = vld [vmem:[%s1570_s0 + $0x34] sm:$0xf] }
  0x33   :  { %483 = vmatpush.bf16.msrb.mxu1 %v1008_v21  ;;  %v855_v21 = vld [vmem:[%s1570_s0 + $0x68] sm:$0xf] }
  0x34   :  { %587 = vmatpush.bf16.msrb.mxu3 %v900_v56  ;;  %636 = vmatpush.bf16.msrb.mxu2 %v964_v7  ;;  %v856_v23 = vor.u32 %v1051_v22, %v855_v21  ;;  %v861_v56 = vld [vmem:[%s1570_s0 + $0x84] sm:$0xf0]  ;;  %v885_v21 = vld [vmem:[%s1570_s0 + $0xb4] sm:$0xf0] }
  0x35   :  { %1023 = vmatmul.msk.bf16.gmra.mxu2 %vm401_vm1, %v1258_v37  ;;  %1028 = vmatmul.msk.bf16.gmra.mxu3 %vm401_vm1, %v1271_v50  ;;  %v864_v58 = vor.u32 %v1052_v54, %v861_v56 }
  0x37   :  { %484 = vmatpush.bf16.msrb.mxu1 %v1000_v34  ;;  %v813_v34 = vld [vmem:[%s1570_s0 + $0x24] sm:$0xf0] }
  0x38   :  { %v816_v35 = vor.u32 %v1040_v33, %v813_v34  ;;  %v1459_v33 = vperm.slane %v110_v45, 1 }
  0x3b   :  { %485 = vmatpush.bf16.msrb.mxu1 %v992_v42 }
  0x3e   :  { %446 = vmatmul.bf16.gmra.mxu0 %v812_v60  ;;  %466 = vmatmul.bf16.gmra.mxu1 %v1282_v61 }
  0x3f   :  { %486 = vmatpush.bf16.msrb.mxu1 %v984_v57 }
  0x43   :  { %487 = vmatpush.bf16.msrb.mxu1 %v976_v62 }
  0x45   :  { %1024 = vmatmul.msk.bf16.gmra.mxu2 %vm401_vm1, %v844_v8  ;;  %588 = vmatmul.bf16.vlgmr.msrb.gmra.mxu3 %v1244_v19  ;;  %v1047_v19 = vld [vmem:[%s1570_s0 + $0x50] sm:$0xf0] }
  0x46   :  { %v836_v27 = vor.u32 %v1047_v19, %v835_v24 }
  0x47   :  { %488 = vmatpush.bf16.msrb.mxu1 %v968_v6  ;;  %v873_v6 = vld [vmem:[%s1570_s0 + $0x9c] sm:$0xf0] }
  0x4b   :  { %489 = vmatpush.bf16.msrb.mxu1 %v960_v12 }
  0x4e   :  { %451 = vmatmul.bf16.gmra.mxu0 %v824_v16  ;;  %471 = vmatmul.bf16.gmra.mxu1 %v872_v18 }
  0x55   :  { %1025 = vmatmul.msk.bf16.gmra.mxu2 %vm401_vm1, %v856_v23  ;;  %593 = vmatmul.bf16.gmra.mxu3 %v812_v60 }
  0x5e   :  { %456 = vmatmul.bf16.gmra.mxu0 %v836_v27  ;;  %476 = vmatmul.bf16.gmra.mxu1 %v884_v28 }
  0x65   :  { %637 = vmatmul.bf16.vlgmr.msrb.gmra.mxu2 %v804_v31  ;;  %598 = vmatmul.bf16.gmra.mxu3 %v824_v16 }
  0x6e   :  { %490 = vmatmul.bf16.vlgmr.msrb.gmra.mxu1 %v804_v31  ;;  %1029 = vmatmul.msk.bf16.vlgmr.msrb.gmra.mxu0 %vm401_vm1, %v1198_v17  ;;  %v825_v17 = vld [vmem:[%s1570_s0 + $0x3c] sm:$0xf0] }
  0x6f   :  { %v828_v38 = vor.u32 %v1043_v36, %v825_v17 }
  0x75   :  { %642 = vmatmul.bf16.gmra.mxu2 %v816_v35  ;;  %603 = vmatmul.bf16.gmra.mxu3 %v836_v27 }
  0x7e   :  { %495 = vmatmul.bf16.gmra.mxu1 %v816_v35  ;;  %1030 = vmatmul.msk.bf16.gmra.mxu0 %vm401_vm1, %v1218_v55  ;;  %v1046_v55 = vld [vmem:[%s1570_s0 + $0x4c] sm:$0xf] }
  0x7f   :  { %v840_v40 = vor.u32 %v1046_v55, %v837_v39 }
  0x85   :  { %647 = vmatmul.bf16.gmra.mxu2 %v828_v38  ;;  %608 = vmatmul.bf16.gmra.mxu3 %v1246_v20  ;;  %v1049_v20 = vld [vmem:[%s1570_s0 + $0x64] sm:$0xf] }
  0x8e   :  { %500 = vmatmul.bf16.gmra.mxu1 %v828_v38  ;;  %1031 = vmatmul.msk.bf16.gmra.mxu0 %vm401_vm1, %v1258_v37  ;;  %v849_v37 = vld [vmem:[%s1570_s0 + $0x6c] sm:$0xf0] }
  0x8f   :  { %v852_v44 = vor.u32 %v1049_v20, %v849_v37 }
  0x95   :  { %652 = vmatmul.bf16.gmra.mxu2 %v840_v40  ;;  %613 = vmatmul.bf16.gmra.mxu3 %v1282_v61 }
  0x98   :  { %v1357_v41 = vpop.f32.mrf.mxu2  ;;  %v1360_v42 = vpop.f32.mrf.mxu3 }
  0x9e   :  { %505 = vmatmul.bf16.gmra.mxu1 %v840_v40  ;;  %1032 = vmatmul.msk.bf16.gmra.mxu0 %vm401_vm1, %v844_v8  ;;  %v876_v8 = vor.u32 %v1055_v5, %v873_v6 }
  0xa0   :  { %v1369_v43 = vpop.f32.mrf.mxu2  ;;  %v1371_v46 = vpop.f32.mrf.mxu3 }
  0xa5   :  { %657 = vmatmul.bf16.gmra.mxu2 %v852_v44  ;;  %618 = vmatmul.bf16.gmra.mxu3 %v872_v18  ;;  %v1058_v18 = vld [vmem:[%s1570_s0 + $0xac] sm:$0xf] }
  0xa8   :  { %v1373_v47 = vpop.f32.mrf.mxu2  ;;  %v1382_v53 = vpop.f32.mrf.mxu3 }
  0xab   :  { %v1377_v49 = vpop.f32.mrf.mxu0  ;;  %v462_v51 = vpop.f32.mrf.mxu1 }
  0xac   :  { %v1380_v52 = vadd.f32 %v462_v51, %v1375_v48  ;;  %v443_v40 = vadd.f32 %v1377_v49, %v1375_v48 }
  0xae   :  { %510 = vmatmul.bf16.gmra.mxu1 %v852_v44  ;;  %1033 = vmatmul.msk.bf16.gmra.mxu0 %vm401_vm1, %v856_v23  ;;  %v888_v23 = vor.u32 %v1058_v18, %v885_v21 }
  0xb0   :  { %v1391_v57 = vpop.f32.mrf.mxu2  ;;  %v1398_v62 = vpop.f32.mrf.mxu3 }
  0xb3   :  { %v1393_v59 = vpop.f32.mrf.mxu0  ;;  %v464_v60 = vpop.f32.mrf.mxu1 }
  0xb4   :  { %v1396_v61 = vadd.f32 %v464_v60, %v1375_v48  ;;  %v445_v5 = vadd.f32 %v1393_v59, %v1375_v48 }
  0xb5   :  { %662 = vmatmul.bf16.gmra.mxu2 %v864_v58  ;;  %623 = vmatmul.bf16.gmra.mxu3 %v884_v28 }
  0xb8   :  { %v1400_v63 = vpop.f32.mrf.mxu2  ;;  %v1407_v3 = vpop.f32.mrf.mxu3 }
  0xbb   :  { %v1402_v0 = vpop.f32.mrf.mxu0  ;;  %v467_v1 = vpop.f32.mrf.mxu1 }
  0xbc   :  { %v1405_v2 = vadd.f32 %v467_v1, %v1375_v48  ;;  %v448_v59 = vadd.f32 %v1402_v0, %v1375_v48 }
  0xbe   :  { %515 = vmatmul.bf16.gmra.mxu1 %v864_v58  ;;  %1034 = vmatmul.msk.bf16.gmra.mxu0 %vm401_vm1, %v1208_v32 }
  0xc0   :  { %v1417_v7 = vpop.f32.mrf.mxu2  ;;  %v1424_v12 = vpop.f32.mrf.mxu3 }
  0xc3   :  { %v1419_v9 = vpop.f32.mrf.mxu0  ;;  %v469_v10 = vpop.f32.mrf.mxu1 }
  0xc4   :  { %v1422_v11 = vadd.f32 %v469_v10, %v1375_v48  ;;  %v450_v0 = vadd.f32 %v1419_v9, %v1375_v48 }
  0xc5   :  { %667 = vmatmul.bf16.gmra.mxu2 %v876_v8 }
  0xc8   :  { %v1426_v32 = vpop.f32.mrf.mxu2  ;;  %v589_v16 = vpop.f32.mrf.mxu3 }
  0xc9   :  { %v590_v17 = vadd.f32 %v589_v16, %v1459_v33 }
  0xcb   :  { %v1428_v13 = vpop.f32.mrf.mxu0  ;;  %v472_v14 = vpop.f32.mrf.mxu1 }
  0xcc   :  { %v1431_v15 = vadd.f32 %v472_v14, %v1375_v48  ;;  %v453_v9 = vadd.f32 %v1428_v13, %v1375_v48 }
  0xce   :  { %520 = vmatmul.bf16.gmra.mxu1 %v876_v8  ;;  %1035 = vmatmul.msk.bf16.gmra.mxu0 %vm401_vm1, %v1232_v4 }
  0xd0   :  { %v1441_v22 = vpop.f32.mrf.mxu2  ;;  %v591_v26 = vpop.f32.mrf.mxu3 }
  0xd1   :  { %v592_v56 = vadd.f32 %v591_v26, %v1459_v33 }
  0xd3   :  { %v1443_v24 = vpop.f32.mrf.mxu0  ;;  %v474_v19 = vpop.f32.mrf.mxu1 }
  0xd4   :  { %v1446_v25 = vadd.f32 %v474_v19, %v1375_v48  ;;  %v455_v13 = vadd.f32 %v1443_v24, %v1375_v48 }
  0xd5   :  { %672 = vmatmul.bf16.gmra.mxu2 %v888_v23 }
  0xd8   :  { %v1448_v4 = vpop.f32.mrf.mxu2  ;;  %v594_v30 = vpop.f32.mrf.mxu3 }
  0xdb   :  { %v1450_v27 = vpop.f32.mrf.mxu0  ;;  %v477_v28 = vpop.f32.mrf.mxu1 }
  0xdc   :  { %v1453_v29 = vadd.f32 %v477_v28, %v1375_v48  ;;  %v458_v24 = vadd.f32 %v1450_v27, %v1375_v48 }
  0xde   :  { %525 = vmatmul.bf16.gmra.mxu1 %v888_v23  ;;  %1036 = vmatmul.msk.bf16.gmra.mxu0 %vm401_vm1, %v1271_v50 }
  0xe0   :  { %v1457_v31 = vpop.f32.mrf.mxu2  ;;  %v596_v38 = vpop.f32.mrf.mxu3 }
  0xe3   :  { %v1461_v34 = vpop.f32.mrf.mxu0  ;;  %v479_v35 = vpop.f32.mrf.mxu1 }
  0xe4   :  { %v1464_v36 = vadd.f32 %v479_v35, %v1375_v48  ;;  %v460_v27 = vadd.f32 %v1461_v34, %v1375_v48 }
  0xe8   :  { %v638_v55 = vpop.f32.mrf.mxu2  ;;  %v599_v54 = vpop.f32.mrf.mxu3 }
  0xe9   :  { %v639_v39 = vadd.f32 %v638_v55, %v590_v17 }
  0xeb   :  { %v491_v20 = vpop.f32.mrf.mxu1  ;;  %v687_v50 = vpop.f32.mrf.mxu0 }
  0xec   :  { %v492_v37 = vadd.f32 %v491_v20, %v443_v40  ;;  %v688_v44 = vadd.f32 %v687_v50, %v639_v39  ;;  %v597_v40 = vadd.f32 %v596_v38, %v1459_v33 }
  0xee   :  { %v541_v45 = vadd.f32 %v1357_v41, %v492_v37  ;;  %v728_v51 = vmax.f32 %v688_v44, 0.0  ;;  %v595_v41 = vadd.f32 %v594_v30, %v1459_v33 }
  0xf0   :  { %v727_v58 = vmax.f32 %v541_v45, 0.0  ;;  %v640_v60 = vpop.f32.mrf.mxu2  ;;  %v601_v19 = vpop.f32.mrf.mxu3 }
  0xf1   :  { %v641_v1 = vadd.f32 %v640_v60, %v592_v56 }
  0xf2   :  { %v759_v6 = vpack.c.bf16 %v728_v51, %v727_v58 }
  0xf3   :  { %v493_v8 = vpop.f32.mrf.mxu1  ;;  %v689_v10 = vpop.f32.mrf.mxu0 }
  0xf4   :  { %775 = vst [vmem:[%s1573_s3] sm:$0xff] %v759_v6  ;;  %v494_v49 = vadd.f32 %v493_v8, %v445_v5  ;;  %v690_v14 = vadd.f32 %v689_v10, %v641_v1 }
  0xf6   :  { %v543_v16 = vadd.f32 %v1369_v43, %v494_v49  ;;  %v730_v21 = vmax.f32 %v690_v14, 0.0 }
  0xf8   :  { %v729_v18 = vmax.f32 %v543_v16, 0.0  ;;  %v643_v23 = vpop.f32.mrf.mxu2  ;;  %v604_v45 = vpop.f32.mrf.mxu3 }
  0xf9   :  { %v644_v26 = vadd.f32 %v643_v23, %v595_v41 }
  0xfa   :  { %v760_v28 = vpack.c.bf16 %v730_v21, %v729_v18  ;;  %v602_v21 = vadd.f32 %v601_v19, %v1459_v33 }
  0xfb   :  { %v496_v35 = vpop.f32.mrf.mxu1  ;;  %v692_v17 = vpop.f32.mrf.mxu0 }
  0xfc   :  { %776 = vst [vmem:[%s1573_s3 + $0x8] sm:$0xff] %v760_v28  ;;  %v497_v55 = vadd.f32 %v496_v35, %v448_v59  ;;  %v693_v39 = vadd.f32 %v692_v17, %v644_v26 }
  0xfe   :  { %v546_v30 = vadd.f32 %v1373_v47, %v497_v55  ;;  %v732_v43 = vmax.f32 %v693_v39, 0.0  ;;  %v600_v47 = vadd.f32 %v599_v54, %v1459_v33 }
 0x100   :  { %v731_v20 = vmax.f32 %v546_v30, 0.0  ;;  %v645_v50 = vpop.f32.mrf.mxu2  ;;  %v606_v18 = vpop.f32.mrf.mxu3 }
 0x101   :  { %v646_v37 = vadd.f32 %v645_v50, %v597_v40 }
 0x102   :  { %v761_v44 = vpack.c.bf16 %v732_v43, %v731_v20 }
 0x103   :  { %v498_v51 = vpop.f32.mrf.mxu1  ;;  %v694_v56 = vpop.f32.mrf.mxu0 }
 0x104   :  { %777 = vst [vmem:[%s1573_s3 + $0x10] sm:$0xff] %v761_v44  ;;  %v499_v58 = vadd.f32 %v498_v51, %v450_v0  ;;  %v695_v60 = vadd.f32 %v694_v56, %v646_v37 }
 0x106   :  { %v548_v38 = vadd.f32 %v1391_v57, %v499_v58  ;;  %v734_v5 = vmax.f32 %v695_v60, 0.0  ;;  %v607_v58 = vadd.f32 %v606_v18, %v1459_v33 }
 0x108   :  { %v733_v1 = vmax.f32 %v548_v38, 0.0  ;;  %v648_v6 = vpop.f32.mrf.mxu2  ;;  %v609_v19 = vpop.f32.mrf.mxu3 }
 0x109   :  { %v649_v8 = vadd.f32 %v648_v6, %v600_v47 }
 0x10a   :  { %v762_v10 = vpack.c.bf16 %v734_v5, %v733_v1 }
 0x10b   :  { %v501_v49 = vpop.f32.mrf.mxu1  ;;  %v697_v14 = vpop.f32.mrf.mxu0 }
 0x10c   :  { %778 = vst [vmem:[%s1573_s3 + $0x18] sm:$0xff] %v762_v10  ;;  %v502_v41 = vadd.f32 %v501_v49, %v453_v9  ;;  %v698_v16 = vadd.f32 %v697_v14, %v649_v8 }
 0x10e   :  { %v551_v54 = vadd.f32 %v1400_v63, %v502_v41  ;;  %v736_v57 = vmax.f32 %v698_v16, 0.0  ;;  %v605_v63 = vadd.f32 %v604_v45, %v1459_v33 }
 0x110   :  { %v735_v23 = vmax.f32 %v551_v54, 0.0  ;;  %v650_v26 = vpop.f32.mrf.mxu2  ;;  %v611_v38 = vpop.f32.mrf.mxu3 }
 0x111   :  { %v651_v59 = vadd.f32 %v650_v26, %v602_v21 }
 0x112   :  { %v763_v28 = vpack.c.bf16 %v736_v57, %v735_v23 }
 0x113   :  { %v503_v35 = vpop.f32.mrf.mxu1  ;;  %v699_v17 = vpop.f32.mrf.mxu0 }
 0x114   :  { %779 = vst [vmem:[%s1573_s3 + $0x20] sm:$0xff] %v763_v28  ;;  %v504_v55 = vadd.f32 %v503_v35, %v455_v13  ;;  %v700_v39 = vadd.f32 %v699_v17, %v651_v59 }
 0x116   :  { %v553_v30 = vadd.f32 %v1417_v7, %v504_v55  ;;  %v738_v40 = vmax.f32 %v700_v39, 0.0 }
 0x118   :  { %v737_v43 = vmax.f32 %v553_v30, 0.0  ;;  %v653_v20 = vpop.f32.mrf.mxu2  ;;  %v614_v57 = vpop.f32.mrf.mxu3 }
 0x119   :  { %v654_v50 = vadd.f32 %v653_v20, %v605_v63 }
 0x11a   :  { %v764_v37 = vpack.c.bf16 %v738_v40, %v737_v43 }
 0x11b   :  { %v506_v0 = vpop.f32.mrf.mxu1  ;;  %v702_v44 = vpop.f32.mrf.mxu0 }
 0x11c   :  { %780 = vst [vmem:[%s1573_s3 + $0x28] sm:$0xff] %v764_v37  ;;  %v507_v51 = vadd.f32 %v506_v0, %v458_v24  ;;  %v703_v56 = vadd.f32 %v702_v44, %v654_v50 }
 0x11e   :  { %v556_v45 = vadd.f32 %v1426_v32, %v507_v51  ;;  %v740_v7 = vmax.f32 %v703_v56, 0.0  ;;  %v610_v32 = vadd.f32 %v609_v19, %v1459_v33  ;;  %v615_v19 = vadd.f32 %v614_v57, %v1459_v33 }
 0x120   :  { %v739_v60 = vmax.f32 %v556_v45, 0.0  ;;  %v655_v47 = vpop.f32.mrf.mxu2 }
 0x121   :  { %v656_v1 = vadd.f32 %v655_v47, %v607_v58 }
 0x122   :  { %v765_v5 = vpack.c.bf16 %v740_v7, %v739_v60 }
 0x123   :  { %v508_v6 = vpop.f32.mrf.mxu1  ;;  %v704_v8 = vpop.f32.mrf.mxu0 }
 0x124   :  { %781 = vst [vmem:[%s1573_s3 + $0x30] sm:$0xff] %v765_v5  ;;  %v509_v9 = vadd.f32 %v508_v6, %v460_v27  ;;  %v705_v10 = vadd.f32 %v704_v8, %v656_v1 }
 0x126   :  { %v558_v49 = vadd.f32 %v1441_v22, %v509_v9  ;;  %v742_v41 = vmax.f32 %v705_v10, 0.0  ;;  %v612_v22 = vadd.f32 %v611_v38, %v1459_v33 }
 0x128   :  { %v741_v14 = vmax.f32 %v558_v49, 0.0  ;;  %v658_v16 = vpop.f32.mrf.mxu2 }
 0x129   :  { %v659_v18 = vadd.f32 %v658_v16, %v610_v32 }
 0x12a   :  { %v766_v54 = vpack.c.bf16 %v742_v41, %v741_v14 }
 0x12b   :  { %v511_v48 = vpop.f32.mrf.mxu1  ;;  %v707_v34 = vpop.f32.mrf.mxu0 }
 0x12c   :  { %782 = vst [vmem:[%s1573_s3 + $0x38] sm:$0xff] %v766_v54  ;;  %v512_v21 = vadd.f32 %v511_v48, %v1380_v52  ;;  %v708_v23 = vadd.f32 %v707_v34, %v659_v18  ;;  %v616_v52 = vpop.f32.mrf.mxu3 }
 0x12e   :  { %v561_v26 = vadd.f32 %v1448_v4, %v512_v21  ;;  %v744_v59 = vmax.f32 %v708_v23, 0.0 }
 0x130   :  { %v743_v13 = vmax.f32 %v561_v26, 0.0  ;;  %v660_v28 = vpop.f32.mrf.mxu2 }
 0x131   :  { %v661_v35 = vadd.f32 %v660_v28, %v612_v22 }
 0x132   :  { %v767_v17 = vpack.c.bf16 %v744_v59, %v743_v13 }
 0x133   :  { %v513_v55 = vpop.f32.mrf.mxu1  ;;  %v709_v39 = vpop.f32.mrf.mxu0 }
 0x134   :  { %783 = vst [vmem:[%s1573_s3 + $0x40] sm:$0xff] %v767_v17  ;;  %v514_v63 = vadd.f32 %v513_v55, %v1396_v61  ;;  %v710_v30 = vadd.f32 %v709_v39, %v661_v35  ;;  %v619_v45 = vpop.f32.mrf.mxu3 }
 0x135   :  { %v620_v5 = vadd.f32 %v619_v45, %v1459_v33 }
 0x136   :  { %v563_v4 = vadd.f32 %v1457_v31, %v514_v63  ;;  %v746_v40 = vmax.f32 %v710_v30, 0.0  ;;  %v617_v31 = vadd.f32 %v616_v52, %v1459_v33 }
 0x138   :  { %v745_v43 = vmax.f32 %v563_v4, 0.0  ;;  %v663_v20 = vpop.f32.mrf.mxu2 }
 0x139   :  { %v664_v50 = vadd.f32 %v663_v20, %v615_v19 }
 0x13a   :  { %v768_v24 = vpack.c.bf16 %v746_v40, %v745_v43 }
 0x13b   :  { %v516_v37 = vpop.f32.mrf.mxu1  ;;  %v712_v0 = vpop.f32.mrf.mxu0 }
 0x13c   :  { %784 = vst [vmem:[%s1573_s3 + $0x48] sm:$0xff] %v768_v24  ;;  %v517_v44 = vadd.f32 %v516_v37, %v1405_v2  ;;  %v713_v61 = vadd.f32 %v712_v0, %v664_v50  ;;  %v621_v10 = vpop.f32.mrf.mxu3 }
 0x13e   :  { %v566_v51 = vadd.f32 %v1360_v42, %v517_v44  ;;  %v748_v56 = vmax.f32 %v713_v61, 0.0 }
 0x140   :  { %v747_v7 = vmax.f32 %v566_v51, 0.0  ;;  %v665_v58 = vpop.f32.mrf.mxu2 }
 0x141   :  { %v666_v60 = vadd.f32 %v665_v58, %v617_v31 }
 0x142   :  { %v769_v47 = vpack.c.bf16 %v748_v56, %v747_v7 }
 0x143   :  { %v518_v38 = vpop.f32.mrf.mxu1  ;;  %v714_v1 = vpop.f32.mrf.mxu0 }
 0x144   :  { %785 = vst [vmem:[%s1573_s3 + $0x50] sm:$0xff] %v769_v47  ;;  %v519_v27 = vadd.f32 %v518_v38, %v1422_v11  ;;  %v715_v2 = vadd.f32 %v714_v1, %v666_v60  ;;  %v624_v23 = vpop.f32.mrf.mxu3 }
 0x145   :  { %v625_v13 = vadd.f32 %v624_v23, %v1459_v33 }
 0x146   :  { %v568_v42 = vadd.f32 %v1371_v46, %v519_v27  ;;  %v750_v8 = vmax.f32 %v715_v2, 0.0  ;;  %v622_v46 = vadd.f32 %v621_v10, %v1459_v33 }
 0x148   :  { %v749_v6 = vmax.f32 %v568_v42, 0.0  ;;  %v668_v9 = vpop.f32.mrf.mxu2 }
 0x149   :  { %v669_v32 = vadd.f32 %v668_v9, %v620_v5 }
 0x14a   :  { %v770_v49 = vpack.c.bf16 %v750_v8, %v749_v6 }
 0x14b   :  { %v521_v14 = vpop.f32.mrf.mxu1  ;;  %v717_v41 = vpop.f32.mrf.mxu0 }
 0x14c   :  { %786 = vst [vmem:[%s1573_s3 + $0x58] sm:$0xff] %v770_v49  ;;  %v522_v16 = vadd.f32 %v521_v14, %v1431_v15  ;;  %v718_v11 = vadd.f32 %v717_v41, %v669_v32  ;;  %v626_v52 = vpop.f32.mrf.mxu3 }
 0x14e   :  { %v571_v18 = vadd.f32 %v1382_v53, %v522_v16  ;;  %v752_v54 = vmax.f32 %v718_v11, 0.0 }
 0x150   :  { %v751_v57 = vmax.f32 %v571_v18, 0.0  ;;  %v670_v48 = vpop.f32.mrf.mxu2 }
 0x151   :  { %v671_v34 = vadd.f32 %v670_v48, %v622_v46 }
 0x152   :  { %v771_v21 = vpack.c.bf16 %v752_v54, %v751_v57 }
 0x153   :  { %v523_v26 = vpop.f32.mrf.mxu1  ;;  %v719_v59 = vpop.f32.mrf.mxu0 }
 0x154   :  { %787 = vst [vmem:[%s1573_s3 + $0x60] sm:$0xff] %v771_v21  ;;  %v524_v22 = vadd.f32 %v523_v26, %v1446_v25  ;;  %v720_v15 = vadd.f32 %v719_v59, %v671_v34 }
 0x156   :  { %v573_v53 = vadd.f32 %v1398_v62, %v524_v22  ;;  %v754_v35 = vmax.f32 %v720_v15, 0.0  ;;  %v627_v62 = vadd.f32 %v626_v52, %v1459_v33 }
 0x158   :  { %v753_v28 = vmax.f32 %v573_v53, 0.0  ;;  %v673_v17 = vpop.f32.mrf.mxu2 }
 0x159   :  { %v674_v55 = vadd.f32 %v673_v17, %v625_v13 }
 0x15a   :  { %v772_v39 = vpack.c.bf16 %v754_v35, %v753_v28 }
 0x15b   :  { %v526_v63 = vpop.f32.mrf.mxu1  ;;  %v722_v30 = vpop.f32.mrf.mxu0 }
 0x15c   :  { %788 = vst [vmem:[%s1573_s3 + $0x68] sm:$0xff] %v772_v39  ;;  %v527_v19 = vadd.f32 %v526_v63, %v1453_v29  ;;  %v723_v25 = vadd.f32 %v722_v30, %v674_v55 }
 0x15e   :  { %v576_v4 = vadd.f32 %v1407_v3, %v527_v19  ;;  %v756_v43 = vmax.f32 %v723_v25, 0.0 }
 0x160   :  { %v755_v40 = vmax.f32 %v576_v4, 0.0  ;;  %v675_v20 = vpop.f32.mrf.mxu2 }
 0x161   :  { %v676_v50 = vadd.f32 %v675_v20, %v627_v62 }
 0x162   :  { %v773_v24 = vpack.c.bf16 %v756_v43, %v755_v40 }
 0x163   :  { %v528_v37 = vpop.f32.mrf.mxu1  ;;  %v724_v0 = vpop.f32.mrf.mxu0 }
 0x164   :  { %789 = vst [vmem:[%s1573_s3 + $0x70] sm:$0xff] %v773_v24  ;;  %v529_v44 = vadd.f32 %v528_v37, %v1464_v36  ;;  %v725_v61 = vadd.f32 %v724_v0, %v676_v50 }
 0x166   :  { %v578_v29 = vadd.f32 %v1424_v12, %v529_v44  ;;  %v758_v3 = vmax.f32 %v725_v61, 0.0 }
 0x168   :  { %v757_v51 = vmax.f32 %v578_v29, 0.0 }
 0x16a   :  { %v774_v56 = vpack.c.bf16 %v758_v3, %v757_v51 }
 0x16c   :  { %790 = vst [vmem:[%s1573_s3 + $0x78] sm:$0xff] %v774_v56 }
 0x16d   :  { %795 = vsyncpa [#allocation3], 1 }
 0x16e   :  { %796 = vsyncpa [#allocation5], 1 }

// kernel: _lambda_.4
= control target key start
LH: loop header
LB: loop body
LE: loop exit
PB: predicated region body
PF: predicated region fallthrough
CT: control target
= control target key end

     0   :  { %15 = vsyncpa [#allocation3], 0  ;;  %s6052_s0 = inlined_call_operand.hbm [shape: f32[2,2], index: 0, kind: input, shape index: {}]   ;;  %s6053_s1 = inlined_call_operand.hbm [shape: f32[2,256], index: 1, kind: input, shape index: {}]   ;;  %s6054_s2 = inlined_call_operand.hbm [shape: f32[1,256], index: 2, kind: input, shape index: {}]   ;;  %s6055_s3 = inlined_call_operand.hbm [shape: bf16[256,3136], index: 3, kind: input, shape index: {}]   ;;  %s6056_s4 = inlined_call_operand.hbm [shape: f32[1,3136], index: 4, kind: input, shape index: {}]   ;;  %s6057_s5 = inlined_call_operand.vmem [shape: bf16[2,100], index: 5, kind: input, shape index: {}]   ;;  %s6058_s6 = inlined_call_operand.hbm [shape: bf16[100,49], index: 6, kind: input, shape index: {}]   ;;  %s6059_s7 = inlined_call_operand.hbm [shape: f32[1,49], index: 7, kind: input, shape index: {}]   ;;  %s6060_s8 = inlined_call_operand.vmem [shape: bf16[2,3136], index: 8, kind: output, shape index: {0}]   ;;  %s6061_s9 = inlined_call_operand.vmem [shape: bf16[2,49], index: 9, kind: output, shape index: {1}]  }
   0x1   :  { %16 = vsyncpa [#allocation5], 0 }
   0x2   :  { %17 = vsyncpa [#allocation8], 0  ;;  %s35_s11 = sshll.u32 %s6053_s1, 4  ;;  %s36_s11 = int_to_ptr.hbm [resolvable:$true] %s35_s11 }
   0x3   :  { %18 = vsyncpa [#allocation11], 0  ;;  %s5788_s12 = smov [#allocation4]   ;;  %s56_s16 = sshll.u32 %s6055_s3, 4  ;;  %s57_s16 = int_to_ptr.hbm [resolvable:$true] %s56_s16 }
   0x4   :  { %s37_s13 = sshll.u32 %s5788_s12, 4  ;;  %s5789_s17 = smov [#allocation7]   ;;  %s38_s13 = int_to_ptr.vmem [resolvable:$true] %s37_s13 }
   0x5   :  { %40 = dma.hbm_to_vmem [thread:$0]  %s36_s11, 64, %s38_s13, [#allocation5]  }
   0x6   :  { %s58_s18 = sshll.u32 %s5789_s17, 4  ;;  %s5790_s19 = smov 1600   ;;  %s59_s18 = int_to_ptr.vmem [resolvable:$true] %s58_s18 }
   0x7   :  { %s5791_s20 = smov 100   ;;  %s82_s1 = sshll.u32 %s6058_s6, 4  ;;  %s83_s1 = int_to_ptr.hbm [resolvable:$true] %s82_s1 }
   0x8   :  { %64 = dma.hbm_to_vmem [thread:$0]  %s57_s16, 51200, %s59_s18, [#allocation8], %s5790_s19, %s5790_s19, %s5791_s20  }
   0x9   :  { %s5792_s23 = smov [#allocation10]   ;;  %s24_s3 = sshll.u32 %s6052_s0, 4  ;;  %s25_s3 = int_to_ptr.hbm [resolvable:$true] %s24_s3 }
   0xa   :  { %s84_s24 = sshll.u32 %s5792_s23, 4  ;;  %s5793_s27 = smov 64   ;;  %s85_s24 = int_to_ptr.vmem [resolvable:$true] %s84_s24 }
   0xb   :  { %s5794_s28 = smov 4   ;;  %s5795_s29 = smov [#allocation2]  }
   0xc   :  { %90 = dma.hbm_to_vmem [thread:$0]  %s83_s1, 832, %s85_s24, [#allocation11], %s5793_s27, %s5793_s27, %s5794_s28  }
   0xd   :  { %s26_s30 = sshll.u32 %s5795_s29, 4  ;;  %s46_s12 = sshll.u32 %s6054_s2, 4  ;;  %s27_s30 = int_to_ptr.vmem [resolvable:$true] %s26_s30  ;;  %s47_s12 = int_to_ptr.hbm [resolvable:$true] %s46_s12 }
   0xe   :  { %29 = dma.hbm_to_vmem [thread:$0]  %s25_s3, 32, %s27_s30, [#allocation3]  }
   0xf   :  { %s70_s14 = sshll.u32 %s6056_s4, 4  ;;  %s5796_s15 = smov [#allocation6]   ;;  %s71_s14 = int_to_ptr.hbm [resolvable:$true] %s70_s14 }
  0x10   :  { %s48_s16 = sshll.u32 %s5796_s15, 4  ;;  %s5797_s0 = smov [#allocation9]   ;;  %s49_s16 = int_to_ptr.vmem [resolvable:$true] %s48_s16 }
  0x11   :  { %51 = dma.hbm_to_vmem [thread:$0]  %s47_s12, 32, %s49_s16, [#allocation5]  }
  0x12   :  { %s72_s17 = sshll.u32 %s5797_s0, 4  ;;  %s96_s20 = sshll.u32 %s6059_s7, 4  ;;  %s73_s17 = int_to_ptr.vmem [resolvable:$true] %s72_s17  ;;  %s97_s20 = int_to_ptr.hbm [resolvable:$true] %s96_s20 }
  0x13   :  { %75 = dma.hbm_to_vmem [thread:$0]  %s71_s14, 400, %s73_s17, [#allocation8]  }
  0x14   :  { %s5798_s2 = smov [#allocation12]  }
  0x15   :  { %s98_s21 = sshll.u32 %s5798_s2, 4  ;;  %s99_s21 = int_to_ptr.vmem [resolvable:$true] %s98_s21 }
  0x16   :  { %101 = dma.hbm_to_vmem [thread:$0]  %s97_s20, 16, %s99_s21, [#allocation11]  }
  0x17   :  { %5780 = dma.done.wait [#allocation3], 32  }
  0x18   :  { %5781 = vsyncadd [#allocation3], 4294967264 }
  0x19   :  { %5782 = dma.done.wait [#allocation5], 96  }
  0x1a   :  { %5783 = vsyncadd [#allocation5], 4294967200 }
  0x1b   :  { %5784 = dma.done.wait [#allocation8], 51600  }
  0x1c   :  { %5785 = vsyncadd [#allocation8], 4294915696 }
  0x1d   :  { %5786 = dma.done.wait [#allocation11], 848  }
  0x1e   :  { %5787 = vsyncadd [#allocation11], 4294966448  ;;  %v132_v0 = vld [vmem:[#allocation4] sm:$0xf]  ;;  %vm147_vm0 = vcmask 1041408   ;;  %vm143_vm1 = vcmask 15360  }
  0x1f   :  { %v4270_v1 = vld [vmem:[#allocation7 + $0x578] sm:$0xf]  ;;  %140 = vst [vmem:[#allocation1] ss:$4 sm:$0xff] %v132_v0  ;;  %v5380_v2 = vld [vmem:[#allocation7 + $0x5d8] sm:$0xf0] }
  0x20   :  { %v5070_v3 = vld [vmem:[#allocation7 + $0xbb8] sm:$0xf]  ;;  %v4271_v4 = vor.u32 %v5380_v2, %v4270_v1  ;;  %v5580_v5 = vld [vmem:[#allocation7 + $0xc18] sm:$0xf0]  ;;  %v4272_v8 = vld [vmem:[#allocation7 + $0x5dc] sm:$0xf0] }
  0x21   :  { %v5071_v6 = vor.u32 %v5580_v5, %v5070_v3  ;;  %v5368_v7 = vld [vmem:[#allocation7 + $0x57c] sm:$0xf]  ;;  %v4170_v9 = vld [vmem:[#allocation7 + $0x4b0] sm:$0xf]  ;;  %v5072_v11 = vld [vmem:[#allocation7 + $0xc1c] sm:$0xf0] }
  0x22   :  { %2686 = vmatpush.bf16.msra.mxu2 %v4271_v4  ;;  %v5568_v10 = vld [vmem:[#allocation7 + $0xbbc] sm:$0xf]  ;;  %v5355_v12 = vld [vmem:[#allocation7 + $0x510] sm:$0xf0]  ;;  %v131_v13 = vld [vmem:[#allocation2] sm:$0x3]  ;;  %v4275_v20 = vor.u32 %v5368_v7, %v4272_v8 }
  0x23   :  { %2699 = vmatpush.bf16.msra.mxu3 %v5071_v6  ;;  %v4171_v14 = vor.u32 %v5355_v12, %v4170_v9  ;;  %v4970_v15 = vld [vmem:[#allocation7 + $0xaf0] sm:$0xf]  ;;  %v5555_v16 = vld [vmem:[#allocation7 + $0xb50] sm:$0xf0]  ;;  %v4070_v18 = vld [vmem:[#allocation7 + $0x3e8] sm:$0xf]  ;;  %v5075_v21 = vor.u32 %v5568_v10, %v5072_v11 }
  0x24   :  { %v5343_v17 = vld [vmem:[#allocation7 + $0x4b4] sm:$0xf]  ;;  %v5330_v19 = vld [vmem:[#allocation7 + $0x448] sm:$0xf0]  ;;  %v4172_v22 = vld [vmem:[#allocation7 + $0x514] sm:$0xf0]  ;;  %v4971_v27 = vor.u32 %v5555_v16, %v4970_v15 }
  0x25   :  { %v5543_v23 = vld [vmem:[#allocation7 + $0xaf4] sm:$0xf]  ;;  %v4972_v24 = vld [vmem:[#allocation7 + $0xb54] sm:$0xf0]  ;;  %v4071_v28 = vor.u32 %v5330_v19, %v4070_v18  ;;  %v4870_v29 = vld [vmem:[#allocation7 + $0xa28] sm:$0xf]  ;;  %v4175_v33 = vor.u32 %v5343_v17, %v4172_v22 }
  0x26   :  { %v141_v25 = vld.sshfl [vmem:[#allocation1] sm:$0xff pattern:$0x73625140]  ;;  %v142_v26 = vld.sshfl [vmem:[#allocation1 + $0x8] sm:$0xff pattern:$0x73625140]  ;;  %2687 = vmatpush.bf16.msra.mxu2 %v4171_v14  ;;  %v4975_v34 = vor.u32 %v5543_v23, %v4972_v24 }
  0x27   :  { %3564 = vmatpush.msk.msra.mxu0 %vm147_vm0, %v141_v25  ;;  %3566 = vmatpush.msk.msra.mxu1 %vm147_vm0, %v142_v26  ;;  %v5530_v30 = vld [vmem:[#allocation7 + $0xa88] sm:$0xf0]  ;;  %v3970_v31 = vld [vmem:[#allocation7 + $0x320] sm:$0xf]  ;;  %v5305_v32 = vld [vmem:[#allocation7 + $0x380] sm:$0xf0] }
  0x28   :  { %3565 = vmatmul.msk.f32.vlgmr.msra.gmra.mxu0 %vm143_vm1, %v131_v13  ;;  %3567 = vmatmul.msk.f32.vlgmr.msra.gmra.mxu1 %vm143_vm1, %v131_v13  ;;  %v5318_v35 = vld [vmem:[#allocation7 + $0x3ec] sm:$0xf]  ;;  %v4072_v36 = vld [vmem:[#allocation7 + $0x44c] sm:$0xf0]  ;;  %v4871_v37 = vor.u32 %v5530_v30, %v4870_v29  ;;  %v3971_v40 = vor.u32 %v5305_v32, %v3970_v31  ;;  %v4770_v41 = vld [vmem:[#allocation7 + $0x960] sm:$0xf] }
  0x29   :  { %2712 = vmatpush.bf16.msrb.mxu0 %v4275_v20  ;;  %2725 = vmatpush.bf16.msrb.mxu1 %v5075_v21  ;;  %v5518_v38 = vld [vmem:[#allocation7 + $0xa2c] sm:$0xf]  ;;  %v4872_v39 = vld [vmem:[#allocation7 + $0xa8c] sm:$0xf0]  ;;  %v5505_v42 = vld [vmem:[#allocation7 + $0x9c0] sm:$0xf0]  ;;  %v4075_v45 = vor.u32 %v5318_v35, %v4072_v36 }
  0x2a   :  { %2700 = vmatpush.bf16.msra.mxu3 %v4971_v27  ;;  %2688 = vmatpush.bf16.msra.mxu2 %v4071_v28  ;;  %v3870_v43 = vld [vmem:[#allocation7 + $0x258] sm:$0xf]  ;;  %v5280_v44 = vld [vmem:[#allocation7 + $0x2b8] sm:$0xf0]  ;;  %v4875_v46 = vor.u32 %v5518_v38, %v4872_v39  ;;  %v5293_v47 = vld [vmem:[#allocation7 + $0x324] sm:$0xf]  ;;  %v4771_v49 = vor.u32 %v5505_v42, %v4770_v41 }
  0x2b   :  { %v3972_v48 = vld [vmem:[#allocation7 + $0x384] sm:$0xf0]  ;;  %v5493_v50 = vld [vmem:[#allocation7 + $0x964] sm:$0xf]  ;;  %v3871_v52 = vor.u32 %v5280_v44, %v3870_v43  ;;  %v4670_v53 = vld [vmem:[#allocation7 + $0x898] sm:$0xf] }
  0x2c   :  { %v4772_v51 = vld [vmem:[#allocation7 + $0x9c4] sm:$0xf0]  ;;  %v5480_v54 = vld [vmem:[#allocation7 + $0x8f8] sm:$0xf0]  ;;  %v3770_v55 = vld [vmem:[#allocation7 + $0x190] sm:$0xf]  ;;  %v3975_v57 = vor.u32 %v5293_v47, %v3972_v48 }
  0x2d   :  { %2713 = vmatpush.bf16.msrb.mxu0 %v4175_v33  ;;  %2726 = vmatpush.bf16.msrb.mxu1 %v4975_v34  ;;  %v5255_v56 = vld [vmem:[#allocation7 + $0x1f0] sm:$0xf0]  ;;  %v4775_v58 = vor.u32 %v5493_v50, %v4772_v51  ;;  %v5268_v59 = vld [vmem:[#allocation7 + $0x25c] sm:$0xf]  ;;  %v3872_v60 = vld [vmem:[#allocation7 + $0x2bc] sm:$0xf0]  ;;  %v4671_v61 = vor.u32 %v5480_v54, %v4670_v53 }
  0x2e   :  { %2701 = vmatpush.bf16.msra.mxu3 %v4871_v37  ;;  %2689 = vmatpush.bf16.msra.mxu2 %v3971_v40  ;;  %v5468_v62 = vld [vmem:[#allocation7 + $0x89c] sm:$0xf]  ;;  %v4672_v63 = vld [vmem:[#allocation7 + $0x8fc] sm:$0xf0]  ;;  %v3771_v0 = vor.u32 %v5255_v56, %v3770_v55  ;;  %v4570_v1 = vld [vmem:[#allocation7 + $0x7d0] sm:$0xf]  ;;  %v3875_v5 = vor.u32 %v5268_v59, %v3872_v60 }
  0x2f   :  { %v5455_v2 = vld [vmem:[#allocation7 + $0x830] sm:$0xf0]  ;;  %v3670_v3 = vld [vmem:[#allocation7 + $0xc8] sm:$0xf]  ;;  %v5230_v4 = vld [vmem:[#allocation7 + $0x128] sm:$0xf0]  ;;  %v4675_v6 = vor.u32 %v5468_v62, %v4672_v63 }
  0x30   :  { %v5243_v7 = vld [vmem:[#allocation7 + $0x194] sm:$0xf]  ;;  %v3772_v8 = vld [vmem:[#allocation7 + $0x1f4] sm:$0xf0]  ;;  %v4571_v9 = vor.u32 %v5455_v2, %v4570_v1  ;;  %v3671_v12 = vor.u32 %v5230_v4, %v3670_v3  ;;  %v4470_v13 = vld [vmem:[#allocation7 + $0x708] sm:$0xf] }
  0x31   :  { %2714 = vmatpush.bf16.msrb.mxu0 %v4075_v45  ;;  %2727 = vmatpush.bf16.msrb.mxu1 %v4875_v46  ;;  %v5443_v10 = vld [vmem:[#allocation7 + $0x7d4] sm:$0xf]  ;;  %v4572_v11 = vld [vmem:[#allocation7 + $0x834] sm:$0xf0]  ;;  %v5430_v14 = vld [vmem:[#allocation7 + $0x768] sm:$0xf0]  ;;  %v3775_v19 = vor.u32 %v5243_v7, %v3772_v8 }
  0x32   :  { %2702 = vmatpush.bf16.msra.mxu3 %v4771_v49  ;;  %2690 = vmatpush.bf16.msra.mxu2 %v3871_v52  ;;  %v3570_v15 = vld [vmem:[#allocation7] sm:$0xf]  ;;  %v5205_v16 = vld [vmem:[#allocation7 + $0x60] sm:$0xf0]  ;;  %v4575_v20 = vor.u32 %v5443_v10, %v4572_v11  ;;  %v5218_v21 = vld [vmem:[#allocation7 + $0xcc] sm:$0xf]  ;;  %v4471_v22 = vor.u32 %v5430_v14, %v4470_v13 }
  0x33   :  { %v4278_v17 = vld [vmem:[#allocation7 + $0x580] sm:$0xf]  ;;  %v5381_v18 = vld [vmem:[#allocation7 + $0x5e0] sm:$0xf0]  ;;  %v3672_v23 = vld [vmem:[#allocation7 + $0x12c] sm:$0xf0]  ;;  %v3571_v26 = vor.u32 %v5205_v16, %v3570_v15 }
  0x34   :  { %v5418_v24 = vld [vmem:[#allocation7 + $0x70c] sm:$0xf]  ;;  %v4472_v25 = vld [vmem:[#allocation7 + $0x76c] sm:$0xf0]  ;;  %v4370_v27 = vld [vmem:[#allocation7 + $0x640] sm:$0xf]  ;;  %v4279_v29 = vor.u32 %v5381_v18, %v4278_v17  ;;  %v3675_v34 = vor.u32 %v5218_v21, %v3672_v23 }
  0x35   :  { %2715 = vmatpush.bf16.msrb.mxu0 %v3975_v57  ;;  %2728 = vmatpush.bf16.msrb.mxu1 %v4775_v58  ;;  %v5405_v28 = vld [vmem:[#allocation7 + $0x6a0] sm:$0xf0]  ;;  %v5078_v30 = vld [vmem:[#allocation7 + $0xbc0] sm:$0xf]  ;;  %v4178_v32 = vld [vmem:[#allocation7 + $0x4b8] sm:$0xf]  ;;  %v4475_v35 = vor.u32 %v5418_v24, %v4472_v25 }
  0x36   :  { %2703 = vmatpush.bf16.msra.mxu3 %v4671_v61  ;;  %2691 = vmatpush.bf16.msra.mxu2 %v3771_v0  ;;  %v5581_v31 = vld [vmem:[#allocation7 + $0xc20] sm:$0xf0]  ;;  %v5356_v33 = vld [vmem:[#allocation7 + $0x518] sm:$0xf0]  ;;  %v3572_v37 = vld [vmem:[#allocation7 + $0x64] sm:$0xf0]  ;;  %v4371_v39 = vor.u32 %v5405_v28, %v4370_v27 }
  0x37   :  { %v5193_v36 = vld [vmem:[#allocation7 + $0x4] sm:$0xf]  ;;  %v4372_v40 = vld [vmem:[#allocation7 + $0x6a4] sm:$0xf0]  ;;  %v5079_v43 = vor.u32 %v5581_v31, %v5078_v30  ;;  %v4179_v46 = vor.u32 %v5356_v33, %v4178_v32  ;;  %v4978_v47 = vld [vmem:[#allocation7 + $0xaf8] sm:$0xf] }
  0x38   :  { %v5393_v38 = vld [vmem:[#allocation7 + $0x644] sm:$0xf]  ;;  %v4280_v42 = vld [vmem:[#allocation7 + $0x5e4] sm:$0xf0]  ;;  %v5556_v48 = vld [vmem:[#allocation7 + $0xb58] sm:$0xf0]  ;;  %v3575_v51 = vor.u32 %v5193_v36, %v3572_v37 }
  0x39   :  { %2716 = vmatpush.bf16.msrb.mxu0 %v3875_v5  ;;  %2729 = vmatpush.bf16.msrb.mxu1 %v4675_v6  ;;  %v5369_v41 = vld [vmem:[#allocation7 + $0x584] sm:$0xf]  ;;  %v5080_v45 = vld [vmem:[#allocation7 + $0xc24] sm:$0xf0]  ;;  %v4078_v49 = vld [vmem:[#allocation7 + $0x3f0] sm:$0xf]  ;;  %v4375_v52 = vor.u32 %v5393_v38, %v4372_v40  ;;  %v4979_v57 = vor.u32 %v5556_v48, %v4978_v47 }
  0x3a   :  { %2704 = vmatpush.bf16.msra.mxu3 %v4571_v9  ;;  %2692 = vmatpush.bf16.msra.mxu2 %v3671_v12  ;;  %v5569_v44 = vld [vmem:[#allocation7 + $0xbc4] sm:$0xf]  ;;  %v5331_v50 = vld [vmem:[#allocation7 + $0x450] sm:$0xf0]  ;;  %v4283_v53 = vor.u32 %v5369_v41, %v4280_v42  ;;  %v5344_v55 = vld [vmem:[#allocation7 + $0x4bc] sm:$0xf] }
  0x3b   :  { %v5083_v54 = vor.u32 %v5569_v44, %v5080_v45  ;;  %v4180_v56 = vld [vmem:[#allocation7 + $0x51c] sm:$0xf0]  ;;  %v5544_v58 = vld [vmem:[#allocation7 + $0xafc] sm:$0xf]  ;;  %v4079_v60 = vor.u32 %v5331_v50, %v4078_v49  ;;  %v4878_v61 = vld [vmem:[#allocation7 + $0xa30] sm:$0xf] }
  0x3c   :  { %v4980_v59 = vld [vmem:[#allocation7 + $0xb5c] sm:$0xf0]  ;;  %v5531_v62 = vld [vmem:[#allocation7 + $0xa90] sm:$0xf0]  ;;  %v3978_v63 = vld [vmem:[#allocation7 + $0x328] sm:$0xf]  ;;  %v4183_v1 = vor.u32 %v5344_v55, %v4180_v56 }
  0x3d   :  { %2717 = vmatpush.bf16.msrb.mxu0 %v3775_v19  ;;  %2730 = vmatpush.bf16.msrb.mxu1 %v4575_v20  ;;  %v5306_v0 = vld [vmem:[#allocation7 + $0x388] sm:$0xf0]  ;;  %v4983_v2 = vor.u32 %v5544_v58, %v4980_v59  ;;  %v5319_v3 = vld [vmem:[#allocation7 + $0x3f4] sm:$0xf]  ;;  %v4080_v4 = vld [vmem:[#allocation7 + $0x454] sm:$0xf0]  ;;  %v4879_v5 = vor.u32 %v5531_v62, %v4878_v61 }
  0x3e   :  { %2705 = vmatpush.bf16.msra.mxu3 %v4471_v22  ;;  %2693 = vmatpush.bf16.msra.mxu2 %v3571_v26  ;;  %v5519_v6 = vld [vmem:[#allocation7 + $0xa34] sm:$0xf]  ;;  %v4880_v7 = vld [vmem:[#allocation7 + $0xa94] sm:$0xf0]  ;;  %v3979_v8 = vor.u32 %v5306_v0, %v3978_v63  ;;  %v4778_v9 = vld [vmem:[#allocation7 + $0x968] sm:$0xf]  ;;  %v4083_v13 = vor.u32 %v5319_v3, %v4080_v4 }
  0x3f   :  { %v5506_v10 = vld [vmem:[#allocation7 + $0x9c8] sm:$0xf0]  ;;  %v3878_v11 = vld [vmem:[#allocation7 + $0x260] sm:$0xf]  ;;  %v5281_v12 = vld [vmem:[#allocation7 + $0x2c0] sm:$0xf0]  ;;  %v4883_v14 = vor.u32 %v5519_v6, %v4880_v7 }
  0x40   :  { %v5294_v15 = vld [vmem:[#allocation7 + $0x32c] sm:$0xf]  ;;  %v3980_v16 = vld [vmem:[#allocation7 + $0x38c] sm:$0xf0]  ;;  %v4779_v17 = vor.u32 %v5506_v10, %v4778_v9  ;;  %v3879_v20 = vor.u32 %v5281_v12, %v3878_v11  ;;  %v4678_v21 = vld [vmem:[#allocation7 + $0x8a0] sm:$0xf] }
  0x41   :  { %2718 = vmatpush.bf16.msrb.mxu0 %v3675_v34  ;;  %2731 = vmatpush.bf16.msrb.mxu1 %v4475_v35  ;;  %v5494_v18 = vld [vmem:[#allocation7 + $0x96c] sm:$0xf]  ;;  %v4780_v19 = vld [vmem:[#allocation7 + $0x9cc] sm:$0xf0]  ;;  %v5481_v22 = vld [vmem:[#allocation7 + $0x900] sm:$0xf0]  ;;  %v3983_v25 = vor.u32 %v5294_v15, %v3980_v16 }
  0x42   :  { %2738 = vmatpush.bf16.msrb.mxu2 %v4279_v29  ;;  %2706 = vmatpush.bf16.msra.mxu3 %v4371_v39  ;;  %v3778_v23 = vld [vmem:[#allocation7 + $0x198] sm:$0xf]  ;;  %v5256_v24 = vld [vmem:[#allocation7 + $0x1f8] sm:$0xf0]  ;;  %v4783_v26 = vor.u32 %v5494_v18, %v4780_v19  ;;  %v5269_v27 = vld [vmem:[#allocation7 + $0x264] sm:$0xf]  ;;  %v4679_v28 = vor.u32 %v5481_v22, %v4678_v21 }
  0x43   :  { %v3880_v29 = vld [vmem:[#allocation7 + $0x2c4] sm:$0xf0]  ;;  %v5469_v30 = vld [vmem:[#allocation7 + $0x8a4] sm:$0xf]  ;;  %v3779_v32 = vor.u32 %v5256_v24, %v3778_v23  ;;  %v4578_v33 = vld [vmem:[#allocation7 + $0x7d8] sm:$0xf] }
  0x44   :  { %v4680_v31 = vld [vmem:[#allocation7 + $0x904] sm:$0xf0]  ;;  %v5456_v34 = vld [vmem:[#allocation7 + $0x838] sm:$0xf0]  ;;  %v3883_v35 = vor.u32 %v5269_v27, %v3880_v29  ;;  %v3780_v39 = vld [vmem:[#allocation7 + $0x1fc] sm:$0xf0] }
  0x45   :  { %2719 = vmatpush.bf16.msrb.mxu0 %v3575_v51  ;;  %2732 = vmatpush.bf16.msrb.mxu1 %v4375_v52  ;;  %v4683_v36 = vor.u32 %v5469_v30, %v4680_v31  ;;  %v5244_v37 = vld [vmem:[#allocation7 + $0x19c] sm:$0xf]  ;;  %v4579_v38 = vor.u32 %v5456_v34, %v4578_v33  ;;  %v4580_v41 = vld [vmem:[#allocation7 + $0x83c] sm:$0xf0]  ;;  %v3678_v44 = vld [vmem:[#allocation7 + $0xd0] sm:$0xf] }
  0x46   :  { %2751 = vmatpush.bf16.msrb.mxu3 %v5079_v43  ;;  %2739 = vmatpush.bf16.msrb.mxu2 %v4179_v46  ;;  %v5444_v40 = vld [vmem:[#allocation7 + $0x7dc] sm:$0xf]  ;;  %v3783_v42 = vor.u32 %v5244_v37, %v3780_v39  ;;  %v5231_v45 = vld [vmem:[#allocation7 + $0x130] sm:$0xf0]  ;;  %v4478_v47 = vld [vmem:[#allocation7 + $0x710] sm:$0xf] }
  0x47   :  { %v4583_v43 = vor.u32 %v5444_v40, %v4580_v41  ;;  %v3679_v46 = vor.u32 %v5231_v45, %v3678_v44  ;;  %v5431_v48 = vld [vmem:[#allocation7 + $0x770] sm:$0xf0]  ;;  %v3680_v51 = vld [vmem:[#allocation7 + $0x134] sm:$0xf0]  ;;  %v3578_v56 = vld [vmem:[#allocation7 + $0x8] sm:$0xf] }
  0x48   :  { %v5219_v49 = vld [vmem:[#allocation7 + $0xd4] sm:$0xf]  ;;  %v4479_v50 = vor.u32 %v5431_v48, %v4478_v47  ;;  %v4378_v58 = vld [vmem:[#allocation7 + $0x648] sm:$0xf]  ;;  %v5194_v61 = vld [vmem:[#allocation7 + $0xc] sm:$0xf] }
  0x49   :  { %2764 = vmatpush.bf16.msra.mxu0 %v4283_v53  ;;  %2777 = vmatpush.bf16.msra.mxu1 %v5083_v54  ;;  %v5419_v52 = vld [vmem:[#allocation7 + $0x714] sm:$0xf]  ;;  %v4480_v53 = vld [vmem:[#allocation7 + $0x774] sm:$0xf0]  ;;  %v3683_v54 = vor.u32 %v5219_v49, %v3680_v51  ;;  %v3580_v62 = vld [vmem:[#allocation7 + $0x6c] sm:$0xf0] }
  0x4a   :  { %2752 = vmatpush.bf16.msrb.mxu3 %v4979_v57  ;;  %2740 = vmatpush.bf16.msrb.mxu2 %v4079_v60  ;;  %v4483_v55 = vor.u32 %v5419_v52, %v4480_v53  ;;  %v5206_v57 = vld [vmem:[#allocation7 + $0x68] sm:$0xf0]  ;;  %v3583_v0 = vor.u32 %v5194_v61, %v3580_v62  ;;  %v133_v4 = vld [vmem:[#allocation6] sm:$0x3]  ;;  %v4286_v11 = vld [vmem:[#allocation7 + $0x588] sm:$0xf] }
  0x4b   :  { %v3579_v59 = vor.u32 %v5206_v57, %v3578_v56  ;;  %v5406_v60 = vld [vmem:[#allocation7 + $0x6a8] sm:$0xf0]  ;;  %v136_v6 = vperm.slane %v133_v4, 1  ;;  %v4288_v16 = vld [vmem:[#allocation7 + $0x5ec] sm:$0xf0]  ;;  %vm3486_vm2 = vcmask 1040384  }
  0x4c   :  { %v4379_v63 = vor.u32 %v5406_v60, %v4378_v58  ;;  %v5382_v12 = vld [vmem:[#allocation7 + $0x5e8] sm:$0xf0]  ;;  %v4986_v29 = vld [vmem:[#allocation7 + $0xb00] sm:$0xf]  ;;  %v5557_v30 = vld [vmem:[#allocation7 + $0xb60] sm:$0xf0] }
  0x4d   :  { %2765 = vmatpush.bf16.msra.mxu0 %v4183_v1  ;;  %2778 = vmatpush.bf16.msra.mxu1 %v4983_v2  ;;  %v5394_v1 = vld [vmem:[#allocation7 + $0x64c] sm:$0xf]  ;;  %v4380_v2 = vld [vmem:[#allocation7 + $0x6ac] sm:$0xf0]  ;;  %v4287_v23 = vor.u32 %v5382_v12, %v4286_v11  ;;  %v5345_v31 = vld [vmem:[#allocation7 + $0x4c4] sm:$0xf] }
  0x4e   :  { %2753 = vmatpush.bf16.msrb.mxu3 %v4879_v5  ;;  %2741 = vmatpush.bf16.msrb.mxu2 %v3979_v8  ;;  %v4383_v3 = vor.u32 %v5394_v1, %v4380_v2  ;;  %v135_v5 = vperm.slane %v133_v4, 0  ;;  %v5370_v15 = vld [vmem:[#allocation7 + $0x58c] sm:$0xf]  ;;  %v5545_v33 = vld [vmem:[#allocation7 + $0xb04] sm:$0xf]  ;;  %vm3490_vm3 = vcmask 1042434  }
  0x4f   :  { %v5570_v19 = vld [vmem:[#allocation7 + $0xbcc] sm:$0xf]  ;;  %v4291_v27 = vor.u32 %v5370_v15, %v4288_v16  ;;  %v4988_v34 = vld [vmem:[#allocation7 + $0xb64] sm:$0xf0]  ;;  %v4086_v37 = vld [vmem:[#allocation7 + $0x3f8] sm:$0xf] }
  0x50   :  { %v4991_v40 = vor.u32 %v5545_v33, %v4988_v34  ;;  %v4886_v41 = vld [vmem:[#allocation7 + $0xa38] sm:$0xf]  ;;  %v4088_v44 = vld [vmem:[#allocation7 + $0x45c] sm:$0xf0]  ;;  %v5520_v45 = vld [vmem:[#allocation7 + $0xa3c] sm:$0xf] }
  0x51   :  { %2766 = vmatpush.bf16.msra.mxu0 %v4083_v13  ;;  %2779 = vmatpush.bf16.msra.mxu1 %v4883_v14  ;;  %v5086_v13 = vld [vmem:[#allocation7 + $0xbc8] sm:$0xf]  ;;  %v5582_v14 = vld [vmem:[#allocation7 + $0xc28] sm:$0xf0]  ;;  %v3986_v49 = vld [vmem:[#allocation7 + $0x330] sm:$0xf] }
  0x52   :  { %2754 = vmatpush.bf16.msrb.mxu3 %v4779_v17  ;;  %2742 = vmatpush.bf16.msrb.mxu2 %v3879_v20  ;;  %v5088_v20 = vld [vmem:[#allocation7 + $0xc2c] sm:$0xf0]  ;;  %v5087_v24 = vor.u32 %v5582_v14, %v5086_v13  ;;  %v3988_v56 = vld [vmem:[#allocation7 + $0x394] sm:$0xf0]  ;;  %v5495_v57 = vld [vmem:[#allocation7 + $0x974] sm:$0xf] }
  0x53   :  { %v4786_v53 = vld [vmem:[#allocation7 + $0x970] sm:$0xf]  ;;  %v4788_v58 = vld [vmem:[#allocation7 + $0x9d4] sm:$0xf0]  ;;  %v3886_v61 = vld [vmem:[#allocation7 + $0x268] sm:$0xf] }
  0x54   :  { %v5282_v62 = vld [vmem:[#allocation7 + $0x2c8] sm:$0xf0]  ;;  %v4686_v1 = vld [vmem:[#allocation7 + $0x8a8] sm:$0xf]  ;;  %v3888_v4 = vld [vmem:[#allocation7 + $0x2cc] sm:$0xf0] }
  0x55   :  { %2767 = vmatpush.bf16.msra.mxu0 %v3983_v25  ;;  %2780 = vmatpush.bf16.msra.mxu1 %v4783_v26  ;;  %v4186_v25 = vld [vmem:[#allocation7 + $0x4c0] sm:$0xf]  ;;  %v5357_v26 = vld [vmem:[#allocation7 + $0x520] sm:$0xf0]  ;;  %v5482_v2 = vld [vmem:[#allocation7 + $0x908] sm:$0xf0] }
  0x56   :  { %2755 = vmatpush.bf16.msrb.mxu3 %v4679_v28  ;;  %2743 = vmatpush.bf16.msrb.mxu2 %v3779_v32  ;;  %v5091_v28 = vor.u32 %v5570_v19, %v5088_v20  ;;  %v4188_v32 = vld [vmem:[#allocation7 + $0x524] sm:$0xf0]  ;;  %v4586_v13 = vld [vmem:[#allocation7 + $0x7e0] sm:$0xf]  ;;  %v5457_v14 = vld [vmem:[#allocation7 + $0x840] sm:$0xf0] }
  0x57   :  { %v4191_v39 = vor.u32 %v5345_v31, %v4188_v32  ;;  %v5245_v15 = vld [vmem:[#allocation7 + $0x1a4] sm:$0xf]  ;;  %v3788_v16 = vld [vmem:[#allocation7 + $0x204] sm:$0xf0]  ;;  %v4587_v20 = vor.u32 %v5457_v14, %v4586_v13  ;;  %v5420_v31 = vld [vmem:[#allocation7 + $0x71c] sm:$0xf] }
  0x58   :  { %v4488_v32 = vld [vmem:[#allocation7 + $0x77c] sm:$0xf0]  ;;  %v3586_v33 = vld [vmem:[#allocation7 + $0x10] sm:$0xf]  ;;  %v5321_v13 = vld [vmem:[#allocation7 + $0x404] sm:$0xf] }
  0x59   :  { %2768 = vmatpush.bf16.msra.mxu0 %v3883_v35  ;;  %2781 = vmatpush.bf16.msra.mxu1 %v4683_v36  ;;  %v4187_v35 = vor.u32 %v5357_v26, %v4186_v25  ;;  %v4987_v36 = vor.u32 %v5557_v30, %v4986_v29  ;;  %v3791_v25 = vor.u32 %v5245_v15, %v3788_v16  ;;  %v5220_v29 = vld [vmem:[#allocation7 + $0xdc] sm:$0xf]  ;;  %v3688_v30 = vld [vmem:[#allocation7 + $0x13c] sm:$0xf0]  ;;  %v4096_v14 = vld [vmem:[#allocation7 + $0x464] sm:$0xf0] }
  0x5a   :  { %2756 = vmatpush.bf16.msrb.mxu3 %v4579_v38  ;;  %2744 = vmatpush.bf16.msrb.mxu2 %v3679_v46  ;;  %v5332_v38 = vld [vmem:[#allocation7 + $0x458] sm:$0xf0]  ;;  %v4888_v46 = vld [vmem:[#allocation7 + $0xa9c] sm:$0xf0]  ;;  %v5521_v15 = vld [vmem:[#allocation7 + $0xa44] sm:$0xf] }
  0x5b   :  { %v4087_v47 = vor.u32 %v5332_v38, %v4086_v37  ;;  %v4891_v52 = vor.u32 %v5520_v45, %v4888_v46  ;;  %v4386_v37 = vld [vmem:[#allocation7 + $0x650] sm:$0xf]  ;;  %v5407_v38 = vld [vmem:[#allocation7 + $0x6b0] sm:$0xf0]  ;;  %v4896_v16 = vld [vmem:[#allocation7 + $0xaa4] sm:$0xf0] }
  0x5c   :  { %v4294_v45 = vld [vmem:[#allocation7 + $0x590] sm:$0xf]  ;;  %v5383_v46 = vld [vmem:[#allocation7 + $0x5f0] sm:$0xf0]  ;;  %vm3495_vm4 = vcmask 1044484   ;;  %vm3499_vm5 = vcmask 1046534  }
  0x5d   :  { %2769 = vmatpush.bf16.msra.mxu0 %v3783_v42  ;;  %2782 = vmatpush.bf16.msra.mxu1 %v4583_v43  ;;  %v5532_v42 = vld [vmem:[#allocation7 + $0xa98] sm:$0xf0]  ;;  %vm3503_vm6 = vcmask 1045508   ;;  %vm3505_vm7 = vcmask 1043456   ;;  %vm3418_vm8 = vcmask 818176   ;;  %vm3550_vm9 = vcmask 393216  }
  0x5e   :  { %2757 = vmatpush.bf16.msrb.mxu3 %v4479_v50  ;;  %2745 = vmatpush.bf16.msrb.mxu2 %v3579_v59  ;;  %v5320_v43 = vld [vmem:[#allocation7 + $0x3fc] sm:$0xf]  ;;  %v4887_v48 = vor.u32 %v5532_v42, %v4886_v41  ;;  %v5307_v50 = vld [vmem:[#allocation7 + $0x390] sm:$0xf0]  ;;  %v3588_v42 = vld [vmem:[#allocation7 + $0x74] sm:$0xf0] }
  0x5f   :  { %v4091_v51 = vor.u32 %v5320_v43, %v4088_v44  ;;  %v3987_v59 = vor.u32 %v5307_v50, %v3986_v49  ;;  %v5195_v41 = vld [vmem:[#allocation7 + $0x14] sm:$0xf]  ;;  %v4388_v44 = vld [vmem:[#allocation7 + $0x6b4] sm:$0xf0]  ;;  %vm3547_vm10 = vcmask 516096  }
  0x60   :  { %v5395_v43 = vld [vmem:[#allocation7 + $0x654] sm:$0xf] }
  0x61   :  { %2770 = vmatpush.bf16.msra.mxu0 %v3683_v54  ;;  %2783 = vmatpush.bf16.msra.mxu1 %v4483_v55  ;;  %v5507_v54 = vld [vmem:[#allocation7 + $0x9d0] sm:$0xf0] }
  0x62   :  { %2758 = vmatpush.bf16.msrb.mxu3 %v4379_v63  ;;  %v5295_v55 = vld [vmem:[#allocation7 + $0x334] sm:$0xf]  ;;  %v4787_v60 = vor.u32 %v5507_v54, %v4786_v53  ;;  %v5096_v54 = vld [vmem:[#allocation7 + $0xc34] sm:$0xf0] }
  0x63   :  { %v3991_v63 = vor.u32 %v5295_v55, %v3988_v56  ;;  %v5371_v49 = vld [vmem:[#allocation7 + $0x594] sm:$0xf]  ;;  %v3591_v55 = vor.u32 %v5195_v41, %v3588_v42  ;;  %v4391_v56 = vor.u32 %v5395_v43, %v4388_v44  ;;  %v4696_v42 = vld [vmem:[#allocation7 + $0x914] sm:$0xf0] }
  0x64   :  { %v5571_v53 = vld [vmem:[#allocation7 + $0xbd4] sm:$0xf] }
  0x65   :  { %2771 = vmatpush.bf16.msra.mxu0 %v3583_v0  ;;  %2784 = vmatpush.bf16.msra.mxu1 %v4383_v3  ;;  %v4791_v0 = vor.u32 %v5495_v57, %v4788_v58  ;;  %v5270_v3 = vld [vmem:[#allocation7 + $0x26c] sm:$0xf]  ;;  %v4295_v57 = vor.u32 %v5383_v46, %v4294_v45  ;;  %v5471_v41 = vld [vmem:[#allocation7 + $0x8b4] sm:$0xf]  ;;  %v3794_v45 = vld [vmem:[#allocation7 + $0x1a8] sm:$0xf] }
  0x66   :  { %v3891_v11 = vor.u32 %v5270_v3, %v3888_v4  ;;  %v5546_v3 = vld [vmem:[#allocation7 + $0xb0c] sm:$0xf]  ;;  %v4996_v4 = vld [vmem:[#allocation7 + $0xb6c] sm:$0xf0] }
  0x67   :  { %v5258_v46 = vld [vmem:[#allocation7 + $0x208] sm:$0xf0] }
  0xa5   :  { %v169_v7 = vpop.f32.mrf.mxu0  ;;  %v189_v8 = vpop.f32.mrf.mxu1 }
  0xa6   :  { %v170_v9 = vadd.f32 %v169_v7, %v135_v5  ;;  %v190_v10 = vadd.f32 %v189_v8, %v136_v6  ;;  %v5470_v5 = vld [vmem:[#allocation7 + $0x8ac] sm:$0xf]  ;;  %v4688_v6 = vld [vmem:[#allocation7 + $0x90c] sm:$0xf0]  ;;  %v3887_v7 = vor.u32 %v5282_v62, %v3886_v61  ;;  %v4687_v8 = vor.u32 %v5482_v2, %v4686_v1 }
  0xa7   :  { %v4691_v12 = vor.u32 %v5470_v5, %v4688_v6  ;;  %v5099_v62 = vor.u32 %v5571_v53, %v5096_v54  ;;  %v5346_v1 = vld [vmem:[#allocation7 + $0x4cc] sm:$0xf]  ;;  %v4196_v2 = vld [vmem:[#allocation7 + $0x52c] sm:$0xf0] }
  0xa8   :  { %v192_v17 = vmax.f32 %v170_v9, 0.0  ;;  %v193_v18 = vmax.f32 %v190_v10, 0.0  ;;  %v3786_v9 = vld [vmem:[#allocation7 + $0x1a0] sm:$0xf]  ;;  %v5257_v10 = vld [vmem:[#allocation7 + $0x200] sm:$0xf0] }
  0xa9   :  { %v3787_v19 = vor.u32 %v5257_v10, %v3786_v9  ;;  %v4199_v9 = vor.u32 %v5346_v1, %v4196_v2  ;;  %v4999_v10 = vor.u32 %v5546_v3, %v4996_v4  ;;  %v5446_v53 = vld [vmem:[#allocation7 + $0x7ec] sm:$0xf]  ;;  %v4596_v54 = vld [vmem:[#allocation7 + $0x84c] sm:$0xf0]  ;;  %v5421_v1 = vld [vmem:[#allocation7 + $0x724] sm:$0xf] }
  0xaa   :  { %v5874_v21 = vpack.c.bf16 %v192_v17, %v192_v17  ;;  %v5876_v22 = vpack.c.bf16 %v193_v18, %v193_v18  ;;  %v5445_v17 = vld [vmem:[#allocation7 + $0x7e4] sm:$0xf]  ;;  %v4588_v18 = vld [vmem:[#allocation7 + $0x844] sm:$0xf0]  ;;  %v3594_v3 = vld [vmem:[#allocation7 + $0x18] sm:$0xf] }
  0xab   :  { %v4591_v26 = vor.u32 %v5445_v17, %v4588_v18  ;;  %v4496_v2 = vld [vmem:[#allocation7 + $0x784] sm:$0xf0] }
  0xac   :  { %2694 = vmatmul.bf16.vlgmr.msra.gmra.mxu2 %v5874_v21  ;;  %2707 = vmatmul.bf16.vlgmr.msra.gmra.mxu3 %v5876_v22 }
  0xad   :  { %2720 = vmatmul.bf16.vlgmr.msrb.gmra.mxu0 %v5874_v21  ;;  %2733 = vmatmul.bf16.vlgmr.msrb.gmra.mxu1 %v5876_v22 }
  0xae   :  { %2790 = vmatpush.bf16.msra.mxu2 %v4287_v23  ;;  %2803 = vmatpush.bf16.msra.mxu3 %v5087_v24  ;;  %v3686_v23 = vld [vmem:[#allocation7 + $0xd8] sm:$0xf]  ;;  %v5232_v24 = vld [vmem:[#allocation7 + $0x138] sm:$0xf0] }
  0xaf   :  { %2816 = vmatpush.bf16.msrb.mxu0 %v4291_v27  ;;  %2829 = vmatpush.bf16.msrb.mxu1 %v5091_v28  ;;  %v4486_v27 = vld [vmem:[#allocation7 + $0x718] sm:$0xf]  ;;  %v5432_v28 = vld [vmem:[#allocation7 + $0x778] sm:$0xf0]  ;;  %v3687_v34 = vor.u32 %v5232_v24, %v3686_v23  ;;  %v4099_v23 = vor.u32 %v5321_v13, %v4096_v14  ;;  %v4899_v24 = vor.u32 %v5521_v15, %v4896_v16  ;;  %v4396_v14 = vld [vmem:[#allocation7 + $0x6bc] sm:$0xf0] }
  0xb0   :  { %v5396_v13 = vld [vmem:[#allocation7 + $0x65c] sm:$0xf]  ;;  %v4302_v15 = vld [vmem:[#allocation7 + $0x598] sm:$0xf] }
  0xb1   :  { %v5384_v16 = vld [vmem:[#allocation7 + $0x5f8] sm:$0xf0] }
  0xb2   :  { %2791 = vmatpush.bf16.msra.mxu2 %v4187_v35  ;;  %2804 = vmatpush.bf16.msra.mxu3 %v4987_v36  ;;  %v4487_v35 = vor.u32 %v5432_v28, %v4486_v27  ;;  %v5207_v36 = vld [vmem:[#allocation7 + $0x70] sm:$0xf0]  ;;  %v5296_v27 = vld [vmem:[#allocation7 + $0x33c] sm:$0xf]  ;;  %v3996_v28 = vld [vmem:[#allocation7 + $0x39c] sm:$0xf0] }
  0xb3   :  { %2817 = vmatpush.bf16.msrb.mxu0 %v4191_v39  ;;  %2830 = vmatpush.bf16.msrb.mxu1 %v4991_v40  ;;  %v3691_v39 = vor.u32 %v5220_v29, %v3688_v30  ;;  %v4491_v40 = vor.u32 %v5420_v31, %v4488_v32  ;;  %v3587_v50 = vor.u32 %v5207_v36, %v3586_v33  ;;  %v5496_v29 = vld [vmem:[#allocation7 + $0x97c] sm:$0xf]  ;;  %v4796_v30 = vld [vmem:[#allocation7 + $0x9dc] sm:$0xf0]  ;;  %v3894_v33 = vld [vmem:[#allocation7 + $0x270] sm:$0xf] }
  0xb4   :  { %v4799_v36 = vor.u32 %v5496_v29, %v4796_v30  ;;  %v4303_v29 = vor.u32 %v5384_v16, %v4302_v15  ;;  %v3802_v15 = vld [vmem:[#allocation7 + $0x1b0] sm:$0xf]  ;;  %v5259_v16 = vld [vmem:[#allocation7 + $0x210] sm:$0xf0] }
  0xb6   :  { %2792 = vmatpush.bf16.msra.mxu2 %v4087_v47  ;;  %2805 = vmatpush.bf16.msra.mxu3 %v4887_v48  ;;  %v5094_v47 = vld [vmem:[#allocation7 + $0xbd0] sm:$0xf]  ;;  %v5583_v48 = vld [vmem:[#allocation7 + $0xc30] sm:$0xf0] }
  0xb7   :  { %2818 = vmatpush.bf16.msrb.mxu0 %v4091_v51  ;;  %2831 = vmatpush.bf16.msrb.mxu1 %v4891_v52  ;;  %v4387_v51 = vor.u32 %v5407_v38, %v4386_v37  ;;  %v4296_v52 = vld [vmem:[#allocation7 + $0x5f4] sm:$0xf0]  ;;  %v5095_v58 = vor.u32 %v5583_v48, %v5094_v47  ;;  %v4694_v37 = vld [vmem:[#allocation7 + $0x8b0] sm:$0xf]  ;;  %v5483_v38 = vld [vmem:[#allocation7 + $0x910] sm:$0xf0]  ;;  %v4699_v48 = vor.u32 %v5471_v41, %v4696_v42 }
  0xb8   :  { %v4299_v61 = vor.u32 %v5371_v49, %v4296_v52  ;;  %v4695_v44 = vor.u32 %v5483_v38, %v4694_v37  ;;  %v4594_v49 = vld [vmem:[#allocation7 + $0x7e8] sm:$0xf]  ;;  %v3796_v52 = vld [vmem:[#allocation7 + $0x20c] sm:$0xf0]  ;;  %v5347_v37 = vld [vmem:[#allocation7 + $0x4d4] sm:$0xf] }
  0xb9   :  { %v4204_v38 = vld [vmem:[#allocation7 + $0x534] sm:$0xf0] }
  0xba   :  { %2793 = vmatpush.bf16.msra.mxu2 %v3987_v59  ;;  %2806 = vmatpush.bf16.msra.mxu3 %v4787_v60  ;;  %v4194_v59 = vld [vmem:[#allocation7 + $0x4c8] sm:$0xf]  ;;  %v5358_v60 = vld [vmem:[#allocation7 + $0x528] sm:$0xf0] }
  0xbb   :  { %2819 = vmatpush.bf16.msrb.mxu0 %v3991_v63  ;;  %2832 = vmatpush.bf16.msrb.mxu1 %v4791_v0  ;;  %v4994_v63 = vld [vmem:[#allocation7 + $0xb08] sm:$0xf]  ;;  %v5558_v0 = vld [vmem:[#allocation7 + $0xb68] sm:$0xf0]  ;;  %v4195_v5 = vor.u32 %v5358_v60, %v4194_v59  ;;  %v4599_v60 = vor.u32 %v5446_v53, %v4596_v54 }
  0xbc   :  { %2746 = vmatmul.bf16.vlgmr.msrb.gmra.mxu2 %v5874_v21  ;;  %2759 = vmatmul.bf16.vlgmr.msrb.gmra.mxu3 %v5876_v22  ;;  %v4995_v6 = vor.u32 %v5558_v0, %v4994_v63  ;;  %v5221_v63 = vld [vmem:[#allocation7 + $0xe4] sm:$0xf]  ;;  %v3696_v0 = vld [vmem:[#allocation7 + $0x144] sm:$0xf0] }
  0xbd   :  { %2772 = vmatmul.bf16.vlgmr.msra.gmra.mxu0 %v5874_v21  ;;  %2785 = vmatmul.bf16.vlgmr.msra.gmra.mxu1 %v5876_v22 }
  0xbe   :  { %2794 = vmatpush.bf16.msra.mxu2 %v3887_v7  ;;  %2807 = vmatpush.bf16.msra.mxu3 %v4687_v8  ;;  %v4094_v7 = vld [vmem:[#allocation7 + $0x400] sm:$0xf]  ;;  %v5333_v8 = vld [vmem:[#allocation7 + $0x460] sm:$0xf0] }
  0xbf   :  { %2820 = vmatpush.bf16.msrb.mxu0 %v3891_v11  ;;  %2833 = vmatpush.bf16.msrb.mxu1 %v4691_v12  ;;  %v4894_v11 = vld [vmem:[#allocation7 + $0xa40] sm:$0xf]  ;;  %v5533_v12 = vld [vmem:[#allocation7 + $0xaa0] sm:$0xf0]  ;;  %v4095_v17 = vor.u32 %v5333_v8, %v4094_v7  ;;  %v4394_v7 = vld [vmem:[#allocation7 + $0x658] sm:$0xf] }
  0xc0   :  { %v4895_v18 = vor.u32 %v5533_v12, %v4894_v11  ;;  %v5408_v8 = vld [vmem:[#allocation7 + $0x6b8] sm:$0xf0]  ;;  %v3596_v12 = vld [vmem:[#allocation7 + $0x7c] sm:$0xf0] }
  0xc1   :  { %v5196_v11 = vld [vmem:[#allocation7 + $0x1c] sm:$0xf] }
  0xc2   :  { %2795 = vmatpush.bf16.msra.mxu2 %v3787_v19  ;;  %2808 = vmatpush.bf16.msra.mxu3 %v4587_v20  ;;  %v3994_v19 = vld [vmem:[#allocation7 + $0x338] sm:$0xf]  ;;  %v5308_v20 = vld [vmem:[#allocation7 + $0x398] sm:$0xf0] }
  0xc3   :  { %2821 = vmatpush.bf16.msrb.mxu0 %v3791_v25  ;;  %2834 = vmatpush.bf16.msrb.mxu1 %v4591_v26  ;;  %v4794_v25 = vld [vmem:[#allocation7 + $0x978] sm:$0xf]  ;;  %v5508_v26 = vld [vmem:[#allocation7 + $0x9d8] sm:$0xf0]  ;;  %v3995_v31 = vor.u32 %v5308_v20, %v3994_v19 }
  0xc4   :  { %v4795_v32 = vor.u32 %v5508_v26, %v4794_v25  ;;  %v5372_v19 = vld [vmem:[#allocation7 + $0x59c] sm:$0xf]  ;;  %v5104_v26 = vld [vmem:[#allocation7 + $0xc3c] sm:$0xf0] }
  0xc5   :  { %v5572_v25 = vld [vmem:[#allocation7 + $0xbdc] sm:$0xf] }
  0xc6   :  { %2796 = vmatpush.bf16.msra.mxu2 %v3687_v34  ;;  %2809 = vmatpush.bf16.msra.mxu3 %v4487_v35  ;;  %v5283_v34 = vld [vmem:[#allocation7 + $0x2d0] sm:$0xf0]  ;;  %v3999_v35 = vor.u32 %v5296_v27, %v3996_v28  ;;  %v3599_v27 = vor.u32 %v5196_v11, %v3596_v12  ;;  %v4399_v28 = vor.u32 %v5396_v13, %v4396_v14  ;;  %v5472_v11 = vld [vmem:[#allocation7 + $0x8bc] sm:$0xf]  ;;  %v4704_v12 = vld [vmem:[#allocation7 + $0x91c] sm:$0xf0] }
  0xc7   :  { %2822 = vmatpush.bf16.msrb.mxu0 %v3691_v39  ;;  %2835 = vmatpush.bf16.msrb.mxu1 %v4491_v40  ;;  %v5271_v39 = vld [vmem:[#allocation7 + $0x274] sm:$0xf]  ;;  %v3896_v40 = vld [vmem:[#allocation7 + $0x2d4] sm:$0xf0]  ;;  %v3895_v43 = vor.u32 %v5283_v34, %v3894_v33  ;;  %v5107_v34 = vor.u32 %v5572_v25, %v5104_v26 }
  0xc8   :  { %v3899_v47 = vor.u32 %v5271_v39, %v3896_v40  ;;  %v5547_v39 = vld [vmem:[#allocation7 + $0xb14] sm:$0xf]  ;;  %v5004_v40 = vld [vmem:[#allocation7 + $0xb74] sm:$0xf0] }
  0xc9   :  { %v5447_v25 = vld [vmem:[#allocation7 + $0x7f4] sm:$0xf]  ;;  %v4604_v26 = vld [vmem:[#allocation7 + $0x854] sm:$0xf0] }
  0xca   :  { %2797 = vmatpush.bf16.msra.mxu2 %v3587_v50  ;;  %2810 = vmatpush.bf16.msra.mxu3 %v4387_v51  ;;  %v5458_v50 = vld [vmem:[#allocation7 + $0x848] sm:$0xf0] }
  0xcb   :  { %2823 = vmatpush.bf16.msrb.mxu0 %v3591_v55  ;;  %2836 = vmatpush.bf16.msrb.mxu1 %v4391_v56  ;;  %v5246_v51 = vld [vmem:[#allocation7 + $0x1ac] sm:$0xf]  ;;  %v3795_v55 = vor.u32 %v5258_v46, %v3794_v45  ;;  %v4595_v56 = vor.u32 %v5458_v50, %v4594_v49  ;;  %v4207_v45 = vor.u32 %v5347_v37, %v4204_v38  ;;  %v4104_v50 = vld [vmem:[#allocation7 + $0x46c] sm:$0xf0] }
  0xcc   :  { %v3799_v59 = vor.u32 %v5246_v51, %v3796_v52  ;;  %v5007_v46 = vor.u32 %v5547_v39, %v5004_v40  ;;  %v5322_v49 = vld [vmem:[#allocation7 + $0x40c] sm:$0xf]  ;;  %v4904_v52 = vld [vmem:[#allocation7 + $0xaac] sm:$0xf0]  ;;  %v3602_v39 = vld [vmem:[#allocation7 + $0x20] sm:$0xf] }
  0xcd   :  { %2798 = vmatmul.bf16.vlgmr.msra.gmra.mxu2 %v5874_v21  ;;  %2811 = vmatmul.bf16.vlgmr.msra.gmra.mxu3 %v5876_v22  ;;  %v5522_v51 = vld [vmem:[#allocation7 + $0xa4c] sm:$0xf]  ;;  %v4504_v38 = vld [vmem:[#allocation7 + $0x78c] sm:$0xf0] }
  0xce   :  { %2842 = vmatpush.bf16.msrb.mxu2 %v4295_v57  ;;  %2855 = vmatpush.bf16.msrb.mxu3 %v5095_v58  ;;  %v3694_v57 = vld [vmem:[#allocation7 + $0xe0] sm:$0xf]  ;;  %v5233_v58 = vld [vmem:[#allocation7 + $0x140] sm:$0xf0]  ;;  %v5422_v37 = vld [vmem:[#allocation7 + $0x72c] sm:$0xf] }
  0xcf   :  { %2868 = vmatpush.bf16.msra.mxu0 %v4299_v61  ;;  %2881 = vmatpush.bf16.msra.mxu1 %v5099_v62  ;;  %v4494_v61 = vld [vmem:[#allocation7 + $0x720] sm:$0xf]  ;;  %v5433_v62 = vld [vmem:[#allocation7 + $0x780] sm:$0xf0]  ;;  %v3695_v4 = vor.u32 %v5233_v58, %v3694_v57  ;;  %v4107_v57 = vor.u32 %v5322_v49, %v4104_v50  ;;  %v4907_v58 = vor.u32 %v5522_v51, %v4904_v52  ;;  %v4404_v50 = vld [vmem:[#allocation7 + $0x6c4] sm:$0xf0] }
  0xd0   :  { %2824 = vmatmul.bf16.vlgmr.msrb.gmra.mxu0 %v5874_v21  ;;  %2837 = vmatmul.bf16.vlgmr.msrb.gmra.mxu1 %v5876_v22  ;;  %v5397_v49 = vld [vmem:[#allocation7 + $0x664] sm:$0xf]  ;;  %v4310_v51 = vld [vmem:[#allocation7 + $0x5a0] sm:$0xf] }
  0xd1   :  { %v5385_v52 = vld [vmem:[#allocation7 + $0x600] sm:$0xf0] }
  0xd2   :  { %2843 = vmatpush.bf16.msrb.mxu2 %v4195_v5  ;;  %2856 = vmatpush.bf16.msrb.mxu3 %v4995_v6  ;;  %v4495_v5 = vor.u32 %v5433_v62, %v4494_v61  ;;  %v5208_v6 = vld [vmem:[#allocation7 + $0x78] sm:$0xf0]  ;;  %v5297_v61 = vld [vmem:[#allocation7 + $0x344] sm:$0xf]  ;;  %v4004_v62 = vld [vmem:[#allocation7 + $0x3a4] sm:$0xf0] }
  0xd3   :  { %2869 = vmatpush.bf16.msra.mxu0 %v4199_v9  ;;  %2882 = vmatpush.bf16.msra.mxu1 %v4999_v10  ;;  %v3699_v9 = vor.u32 %v5221_v63, %v3696_v0  ;;  %v4499_v10 = vor.u32 %v5421_v1, %v4496_v2  ;;  %v3595_v20 = vor.u32 %v5208_v6, %v3594_v3  ;;  %v5497_v63 = vld [vmem:[#allocation7 + $0x984] sm:$0xf]  ;;  %v4804_v0 = vld [vmem:[#allocation7 + $0x9e4] sm:$0xf0]  ;;  %v3902_v3 = vld [vmem:[#allocation7 + $0x278] sm:$0xf] }
  0xd4   :  { %v4807_v6 = vor.u32 %v5497_v63, %v4804_v0  ;;  %v4311_v63 = vor.u32 %v5385_v52, %v4310_v51  ;;  %v3810_v51 = vld [vmem:[#allocation7 + $0x1b8] sm:$0xf]  ;;  %v5260_v52 = vld [vmem:[#allocation7 + $0x218] sm:$0xf0] }
  0xd6   :  { %2844 = vmatpush.bf16.msrb.mxu2 %v4095_v17  ;;  %2857 = vmatpush.bf16.msrb.mxu3 %v4895_v18  ;;  %v5102_v17 = vld [vmem:[#allocation7 + $0xbd8] sm:$0xf]  ;;  %v5584_v18 = vld [vmem:[#allocation7 + $0xc38] sm:$0xf0] }
  0xd7   :  { %2870 = vmatpush.bf16.msra.mxu0 %v4099_v23  ;;  %2883 = vmatpush.bf16.msra.mxu1 %v4899_v24  ;;  %v4395_v23 = vor.u32 %v5408_v8, %v4394_v7  ;;  %v4304_v24 = vld [vmem:[#allocation7 + $0x5fc] sm:$0xf0]  ;;  %v5103_v30 = vor.u32 %v5584_v18, %v5102_v17  ;;  %v4702_v7 = vld [vmem:[#allocation7 + $0x8b8] sm:$0xf]  ;;  %v5484_v8 = vld [vmem:[#allocation7 + $0x918] sm:$0xf0]  ;;  %v4707_v18 = vor.u32 %v5472_v11, %v4704_v12 }
  0xd8   :  { %v4307_v33 = vor.u32 %v5372_v19, %v4304_v24  ;;  %v4703_v14 = vor.u32 %v5484_v8, %v4702_v7  ;;  %v4602_v19 = vld [vmem:[#allocation7 + $0x7f0] sm:$0xf]  ;;  %v3804_v24 = vld [vmem:[#allocation7 + $0x214] sm:$0xf0]  ;;  %v5348_v7 = vld [vmem:[#allocation7 + $0x4dc] sm:$0xf] }
  0xd9   :  { %v4212_v8 = vld [vmem:[#allocation7 + $0x53c] sm:$0xf0] }
  0xda   :  { %2845 = vmatpush.bf16.msrb.mxu2 %v3995_v31  ;;  %2858 = vmatpush.bf16.msrb.mxu3 %v4795_v32  ;;  %v4202_v31 = vld [vmem:[#allocation7 + $0x4d0] sm:$0xf]  ;;  %v5359_v32 = vld [vmem:[#allocation7 + $0x530] sm:$0xf0] }
  0xdb   :  { %2871 = vmatpush.bf16.msra.mxu0 %v3999_v35  ;;  %2884 = vmatpush.bf16.msra.mxu1 %v4799_v36  ;;  %v5002_v35 = vld [vmem:[#allocation7 + $0xb10] sm:$0xf]  ;;  %v5559_v36 = vld [vmem:[#allocation7 + $0xb70] sm:$0xf0]  ;;  %v4203_v41 = vor.u32 %v5359_v32, %v4202_v31  ;;  %v4607_v32 = vor.u32 %v5447_v25, %v4604_v26 }
  0xdc   :  { %v5003_v42 = vor.u32 %v5559_v36, %v5002_v35  ;;  %v5222_v35 = vld [vmem:[#allocation7 + $0xec] sm:$0xf]  ;;  %v3704_v36 = vld [vmem:[#allocation7 + $0x14c] sm:$0xf0] }
  0xde   :  { %2846 = vmatpush.bf16.msrb.mxu2 %v3895_v43  ;;  %2859 = vmatpush.bf16.msrb.mxu3 %v4695_v44  ;;  %v4102_v43 = vld [vmem:[#allocation7 + $0x408] sm:$0xf]  ;;  %v5334_v44 = vld [vmem:[#allocation7 + $0x468] sm:$0xf0] }
  0xdf   :  { %2872 = vmatpush.bf16.msra.mxu0 %v3899_v47  ;;  %2885 = vmatpush.bf16.msra.mxu1 %v4699_v48  ;;  %v4902_v47 = vld [vmem:[#allocation7 + $0xa48] sm:$0xf]  ;;  %v5534_v48 = vld [vmem:[#allocation7 + $0xaa8] sm:$0xf0]  ;;  %v4103_v53 = vor.u32 %v5334_v44, %v4102_v43  ;;  %v4402_v43 = vld [vmem:[#allocation7 + $0x660] sm:$0xf] }
  0xe0   :  { %v4903_v54 = vor.u32 %v5534_v48, %v4902_v47  ;;  %v5409_v44 = vld [vmem:[#allocation7 + $0x6c0] sm:$0xf0]  ;;  %v3604_v48 = vld [vmem:[#allocation7 + $0x84] sm:$0xf0] }
  0xe1   :  { %v5197_v47 = vld [vmem:[#allocation7 + $0x24] sm:$0xf] }
  0xe2   :  { %2847 = vmatpush.bf16.msrb.mxu2 %v3795_v55  ;;  %2860 = vmatpush.bf16.msrb.mxu3 %v4595_v56  ;;  %v4002_v55 = vld [vmem:[#allocation7 + $0x340] sm:$0xf]  ;;  %v5309_v56 = vld [vmem:[#allocation7 + $0x3a0] sm:$0xf0] }
  0xe3   :  { %2873 = vmatpush.bf16.msra.mxu0 %v3799_v59  ;;  %2886 = vmatpush.bf16.msra.mxu1 %v4599_v60  ;;  %v4802_v59 = vld [vmem:[#allocation7 + $0x980] sm:$0xf]  ;;  %v5509_v60 = vld [vmem:[#allocation7 + $0x9e0] sm:$0xf0]  ;;  %v4003_v1 = vor.u32 %v5309_v56, %v4002_v55 }
  0xe4   :  { %v4803_v2 = vor.u32 %v5509_v60, %v4802_v59  ;;  %v5373_v55 = vld [vmem:[#allocation7 + $0x5a4] sm:$0xf]  ;;  %v5112_v60 = vld [vmem:[#allocation7 + $0xc44] sm:$0xf0] }
  0xe5   :  { %v5573_v59 = vld [vmem:[#allocation7 + $0xbe4] sm:$0xf] }
  0xe6   :  { %2848 = vmatpush.bf16.msrb.mxu2 %v3695_v4  ;;  %2861 = vmatpush.bf16.msrb.mxu3 %v4495_v5  ;;  %v5284_v4 = vld [vmem:[#allocation7 + $0x2d8] sm:$0xf0]  ;;  %v4007_v5 = vor.u32 %v5297_v61, %v4004_v62  ;;  %v3607_v61 = vor.u32 %v5197_v47, %v3604_v48  ;;  %v4407_v62 = vor.u32 %v5397_v49, %v4404_v50  ;;  %v5473_v47 = vld [vmem:[#allocation7 + $0x8c4] sm:$0xf]  ;;  %v4712_v48 = vld [vmem:[#allocation7 + $0x924] sm:$0xf0] }
  0xe7   :  { %2874 = vmatpush.bf16.msra.mxu0 %v3699_v9  ;;  %2887 = vmatpush.bf16.msra.mxu1 %v4499_v10  ;;  %v5272_v9 = vld [vmem:[#allocation7 + $0x27c] sm:$0xf]  ;;  %v3904_v10 = vld [vmem:[#allocation7 + $0x2dc] sm:$0xf0]  ;;  %v3903_v13 = vor.u32 %v5284_v4, %v3902_v3  ;;  %v5115_v4 = vor.u32 %v5573_v59, %v5112_v60 }
  0xe8   :  { %v3907_v17 = vor.u32 %v5272_v9, %v3904_v10  ;;  %v5548_v9 = vld [vmem:[#allocation7 + $0xb1c] sm:$0xf]  ;;  %v5012_v10 = vld [vmem:[#allocation7 + $0xb7c] sm:$0xf0] }
  0xe9   :  { %v5448_v59 = vld [vmem:[#allocation7 + $0x7fc] sm:$0xf]  ;;  %v4612_v60 = vld [vmem:[#allocation7 + $0x85c] sm:$0xf0] }
  0xea   :  { %2849 = vmatpush.bf16.msrb.mxu2 %v3595_v20  ;;  %2862 = vmatpush.bf16.msrb.mxu3 %v4395_v23  ;;  %v5459_v20 = vld [vmem:[#allocation7 + $0x850] sm:$0xf0] }
  0xeb   :  { %2875 = vmatpush.bf16.msra.mxu0 %v3599_v27  ;;  %2888 = vmatpush.bf16.msra.mxu1 %v4399_v28  ;;  %v5247_v23 = vld [vmem:[#allocation7 + $0x1b4] sm:$0xf]  ;;  %v3803_v27 = vor.u32 %v5259_v16, %v3802_v15  ;;  %v4603_v28 = vor.u32 %v5459_v20, %v4602_v19  ;;  %v4215_v15 = vor.u32 %v5348_v7, %v4212_v8  ;;  %v4112_v20 = vld [vmem:[#allocation7 + $0x474] sm:$0xf0] }
  0xec   :  { %v3807_v31 = vor.u32 %v5247_v23, %v3804_v24  ;;  %v5015_v16 = vor.u32 %v5548_v9, %v5012_v10  ;;  %v5323_v19 = vld [vmem:[#allocation7 + $0x414] sm:$0xf]  ;;  %v4912_v24 = vld [vmem:[#allocation7 + $0xab4] sm:$0xf0]  ;;  %v3610_v9 = vld [vmem:[#allocation7 + $0x28] sm:$0xf] }
  0xed   :  { %2850 = vmatmul.bf16.vlgmr.msrb.gmra.mxu2 %v5874_v21  ;;  %2863 = vmatmul.bf16.vlgmr.msrb.gmra.mxu3 %v5876_v22  ;;  %v5523_v23 = vld [vmem:[#allocation7 + $0xa54] sm:$0xf]  ;;  %v4512_v8 = vld [vmem:[#allocation7 + $0x794] sm:$0xf0] }
  0xee   :  { %2894 = vmatpush.bf16.msra.mxu2 %v4303_v29  ;;  %2907 = vmatpush.bf16.msra.mxu3 %v5103_v30  ;;  %v3702_v29 = vld [vmem:[#allocation7 + $0xe8] sm:$0xf]  ;;  %v5234_v30 = vld [vmem:[#allocation7 + $0x148] sm:$0xf0]  ;;  %v5423_v7 = vld [vmem:[#allocation7 + $0x734] sm:$0xf] }
  0xef   :  { %2920 = vmatpush.bf16.msrb.mxu0 %v4307_v33  ;;  %2933 = vmatpush.bf16.msrb.mxu1 %v5107_v34  ;;  %v4502_v33 = vld [vmem:[#allocation7 + $0x728] sm:$0xf]  ;;  %v5434_v34 = vld [vmem:[#allocation7 + $0x788] sm:$0xf0]  ;;  %v3703_v40 = vor.u32 %v5234_v30, %v3702_v29  ;;  %v4115_v29 = vor.u32 %v5323_v19, %v4112_v20  ;;  %v4915_v30 = vor.u32 %v5523_v23, %v4912_v24  ;;  %v4412_v20 = vld [vmem:[#allocation7 + $0x6cc] sm:$0xf0] }
  0xf0   :  { %2876 = vmatmul.bf16.vlgmr.msra.gmra.mxu0 %v5874_v21  ;;  %2889 = vmatmul.bf16.vlgmr.msra.gmra.mxu1 %v5876_v22  ;;  %v5398_v19 = vld [vmem:[#allocation7 + $0x66c] sm:$0xf]  ;;  %v4318_v23 = vld [vmem:[#allocation7 + $0x5a8] sm:$0xf] }
  0xf1   :  { %v5386_v24 = vld [vmem:[#allocation7 + $0x608] sm:$0xf0] }
  0xf2   :  { %2895 = vmatpush.bf16.msra.mxu2 %v4203_v41  ;;  %2908 = vmatpush.bf16.msra.mxu3 %v5003_v42  ;;  %v4503_v41 = vor.u32 %v5434_v34, %v4502_v33  ;;  %v5209_v42 = vld [vmem:[#allocation7 + $0x80] sm:$0xf0]  ;;  %v5298_v33 = vld [vmem:[#allocation7 + $0x34c] sm:$0xf]  ;;  %v4012_v34 = vld [vmem:[#allocation7 + $0x3ac] sm:$0xf0] }
  0xf3   :  { %2921 = vmatpush.bf16.msrb.mxu0 %v4207_v45  ;;  %2934 = vmatpush.bf16.msrb.mxu1 %v5007_v46  ;;  %v3707_v45 = vor.u32 %v5222_v35, %v3704_v36  ;;  %v4507_v46 = vor.u32 %v5422_v37, %v4504_v38  ;;  %v3603_v56 = vor.u32 %v5209_v42, %v3602_v39  ;;  %v5498_v35 = vld [vmem:[#allocation7 + $0x98c] sm:$0xf]  ;;  %v4812_v36 = vld [vmem:[#allocation7 + $0x9ec] sm:$0xf0]  ;;  %v3910_v39 = vld [vmem:[#allocation7 + $0x280] sm:$0xf] }
  0xf4   :  { %v4815_v42 = vor.u32 %v5498_v35, %v4812_v36  ;;  %v4319_v35 = vor.u32 %v5386_v24, %v4318_v23  ;;  %v4718_v24 = vld [vmem:[#allocation7 + $0x8c8] sm:$0xf] }
  0xf6   :  { %2896 = vmatpush.bf16.msra.mxu2 %v4103_v53  ;;  %2909 = vmatpush.bf16.msra.mxu3 %v4903_v54  ;;  %v5110_v53 = vld [vmem:[#allocation7 + $0xbe0] sm:$0xf]  ;;  %v5585_v54 = vld [vmem:[#allocation7 + $0xc40] sm:$0xf0] }
  0xf7   :  { %2922 = vmatpush.bf16.msrb.mxu0 %v4107_v57  ;;  %2935 = vmatpush.bf16.msrb.mxu1 %v4907_v58  ;;  %v4403_v57 = vor.u32 %v5409_v44, %v4402_v43  ;;  %v4312_v58 = vld [vmem:[#allocation7 + $0x604] sm:$0xf0]  ;;  %v5111_v0 = vor.u32 %v5585_v54, %v5110_v53  ;;  %v4710_v43 = vld [vmem:[#allocation7 + $0x8c0] sm:$0xf]  ;;  %v5485_v44 = vld [vmem:[#allocation7 + $0x920] sm:$0xf0]  ;;  %v4715_v54 = vor.u32 %v5473_v47, %v4712_v48 }
  0xf8   :  { %v4315_v3 = vor.u32 %v5373_v55, %v4312_v58  ;;  %v4711_v50 = vor.u32 %v5485_v44, %v4710_v43  ;;  %v4610_v55 = vld [vmem:[#allocation7 + $0x7f8] sm:$0xf]  ;;  %v3812_v58 = vld [vmem:[#allocation7 + $0x21c] sm:$0xf0]  ;;  %v5349_v43 = vld [vmem:[#allocation7 + $0x4e4] sm:$0xf] }
  0xf9   :  { %v4220_v44 = vld [vmem:[#allocation7 + $0x544] sm:$0xf0]  ;;  %v5898_v47 = vld [vmem:[#allocation9] sm:$0xff] }
  0xfa   :  { %2897 = vmatpush.bf16.msra.mxu2 %v4003_v1  ;;  %2910 = vmatpush.bf16.msra.mxu3 %v4803_v2  ;;  %v4210_v1 = vld [vmem:[#allocation7 + $0x4d8] sm:$0xf]  ;;  %v5360_v2 = vld [vmem:[#allocation7 + $0x538] sm:$0xf0] }
  0xfb   :  { %2923 = vmatpush.bf16.msrb.mxu0 %v4007_v5  ;;  %2936 = vmatpush.bf16.msrb.mxu1 %v4807_v6  ;;  %v5010_v5 = vld [vmem:[#allocation7 + $0xb18] sm:$0xf]  ;;  %v5560_v6 = vld [vmem:[#allocation7 + $0xb78] sm:$0xf0]  ;;  %v4211_v11 = vor.u32 %v5360_v2, %v4210_v1  ;;  %v4615_v2 = vor.u32 %v5448_v59, %v4612_v60  ;;  %v4920_v60 = vld [vmem:[#allocation7 + $0xabc] sm:$0xf0] }
  0xfc   :  { %v5011_v12 = vor.u32 %v5560_v6, %v5010_v5  ;;  %v5223_v5 = vld [vmem:[#allocation7 + $0xf4] sm:$0xf]  ;;  %v3712_v6 = vld [vmem:[#allocation7 + $0x154] sm:$0xf0]  ;;  %v5524_v59 = vld [vmem:[#allocation7 + $0xa5c] sm:$0xf] }
  0xfe   :  { %2898 = vmatpush.bf16.msra.mxu2 %v3903_v13  ;;  %2911 = vmatpush.bf16.msra.mxu3 %v4703_v14  ;;  %v4110_v13 = vld [vmem:[#allocation7 + $0x410] sm:$0xf]  ;;  %v5335_v14 = vld [vmem:[#allocation7 + $0x470] sm:$0xf0] }
  0xff   :  { %2924 = vmatpush.bf16.msrb.mxu0 %v3907_v17  ;;  %2937 = vmatpush.bf16.msrb.mxu1 %v4707_v18  ;;  %v4910_v17 = vld [vmem:[#allocation7 + $0xa50] sm:$0xf]  ;;  %v5535_v18 = vld [vmem:[#allocation7 + $0xab0] sm:$0xf0]  ;;  %v4111_v25 = vor.u32 %v5335_v14, %v4110_v13  ;;  %v4410_v13 = vld [vmem:[#allocation7 + $0x668] sm:$0xf] }
 0x100   :  { %v4911_v26 = vor.u32 %v5535_v18, %v4910_v17  ;;  %v5410_v14 = vld [vmem:[#allocation7 + $0x6c8] sm:$0xf0]  ;;  %v3612_v18 = vld [vmem:[#allocation7 + $0x8c] sm:$0xf0] }
 0x101   :  { %v5198_v17 = vld [vmem:[#allocation7 + $0x2c] sm:$0xf] }
 0x102   :  { %2899 = vmatpush.bf16.msra.mxu2 %v3803_v27  ;;  %2912 = vmatpush.bf16.msra.mxu3 %v4603_v28  ;;  %v4010_v27 = vld [vmem:[#allocation7 + $0x348] sm:$0xf]  ;;  %v5310_v28 = vld [vmem:[#allocation7 + $0x3a8] sm:$0xf0] }
 0x103   :  { %2925 = vmatpush.bf16.msrb.mxu0 %v3807_v31  ;;  %2938 = vmatpush.bf16.msrb.mxu1 %v4607_v32  ;;  %v4810_v31 = vld [vmem:[#allocation7 + $0x988] sm:$0xf]  ;;  %v5510_v32 = vld [vmem:[#allocation7 + $0x9e8] sm:$0xf0]  ;;  %v4011_v37 = vor.u32 %v5310_v28, %v4010_v27 }
 0x104   :  { %v4811_v38 = vor.u32 %v5510_v32, %v4810_v31  ;;  %v5374_v27 = vld [vmem:[#allocation7 + $0x5ac] sm:$0xf]  ;;  %v5120_v32 = vld [vmem:[#allocation7 + $0xc4c] sm:$0xf0] }
 0x105   :  { %v5574_v31 = vld [vmem:[#allocation7 + $0xbec] sm:$0xf] }
 0x106   :  { %2900 = vmatpush.bf16.msra.mxu2 %v3703_v40  ;;  %2913 = vmatpush.bf16.msra.mxu3 %v4503_v41  ;;  %v5285_v40 = vld [vmem:[#allocation7 + $0x2e0] sm:$0xf0]  ;;  %v4015_v41 = vor.u32 %v5298_v33, %v4012_v34  ;;  %v3615_v33 = vor.u32 %v5198_v17, %v3612_v18  ;;  %v4415_v34 = vor.u32 %v5398_v19, %v4412_v20  ;;  %v5286_v17 = vld [vmem:[#allocation7 + $0x2e8] sm:$0xf0] }
 0x107   :  { %2926 = vmatpush.bf16.msrb.mxu0 %v3707_v45  ;;  %2939 = vmatpush.bf16.msrb.mxu1 %v4507_v46  ;;  %v5273_v45 = vld [vmem:[#allocation7 + $0x284] sm:$0xf]  ;;  %v3912_v46 = vld [vmem:[#allocation7 + $0x2e4] sm:$0xf0]  ;;  %v3911_v49 = vor.u32 %v5285_v40, %v3910_v39  ;;  %v5018_v39 = vld [vmem:[#allocation7 + $0xb20] sm:$0xf] }
 0x108   :  { %v3915_v53 = vor.u32 %v5273_v45, %v3912_v46  ;;  %v5549_v45 = vld [vmem:[#allocation7 + $0xb24] sm:$0xf]  ;;  %v5020_v46 = vld [vmem:[#allocation7 + $0xb84] sm:$0xf0] }
 0x10a   :  { %2901 = vmatpush.bf16.msra.mxu2 %v3603_v56  ;;  %2914 = vmatpush.bf16.msra.mxu3 %v4403_v57  ;;  %v5460_v56 = vld [vmem:[#allocation7 + $0x858] sm:$0xf0] }
 0x10b   :  { %2927 = vmatpush.bf16.msrb.mxu0 %v3607_v61  ;;  %2940 = vmatpush.bf16.msrb.mxu1 %v4407_v62  ;;  %v5248_v57 = vld [vmem:[#allocation7 + $0x1bc] sm:$0xf]  ;;  %v3811_v61 = vor.u32 %v5260_v52, %v3810_v51  ;;  %v4611_v62 = vor.u32 %v5460_v56, %v4610_v55  ;;  %v4918_v52 = vld [vmem:[#allocation7 + $0xa58] sm:$0xf] }
 0x10c   :  { %v3815_v1 = vor.u32 %v5248_v57, %v3812_v58  ;;  %v5336_v51 = vld [vmem:[#allocation7 + $0x478] sm:$0xf0]  ;;  %v621_v57 = vperm.slane %v5898_v47, 1  ;;  %v4120_v58 = vld [vmem:[#allocation7 + $0x47c] sm:$0xf0] }
 0x10d   :  { %2902 = vmatmul.bf16.vlgmr.msra.gmra.mxu2 %v5874_v21  ;;  %2915 = vmatmul.bf16.vlgmr.msra.gmra.mxu3 %v5876_v22  ;;  %v5536_v55 = vld [vmem:[#allocation7 + $0xab8] sm:$0xf0] }
 0x10e   :  { %2946 = vmatpush.bf16.msrb.mxu2 %v4311_v63  ;;  %2959 = vmatpush.bf16.msrb.mxu3 %v5111_v0  ;;  %v3710_v63 = vld [vmem:[#allocation7 + $0xf0] sm:$0xf]  ;;  %v5235_v0 = vld [vmem:[#allocation7 + $0x150] sm:$0xf0]  ;;  %v5324_v56 = vld [vmem:[#allocation7 + $0x41c] sm:$0xf] }
 0x10f   :  { %2972 = vmatpush.bf16.msra.mxu0 %v4315_v3  ;;  %2985 = vmatpush.bf16.msra.mxu1 %v5115_v4  ;;  %v4510_v3 = vld [vmem:[#allocation7 + $0x730] sm:$0xf]  ;;  %v5435_v4 = vld [vmem:[#allocation7 + $0x790] sm:$0xf0]  ;;  %v3711_v10 = vor.u32 %v5235_v0, %v3710_v63 }
 0x110   :  { %2928 = vmatmul.bf16.vlgmr.msrb.gmra.mxu0 %v5874_v21  ;;  %2941 = vmatmul.bf16.vlgmr.msrb.gmra.mxu1 %v5876_v22 }
 0x112   :  { %2947 = vmatpush.bf16.msrb.mxu2 %v4211_v11  ;;  %2960 = vmatpush.bf16.msrb.mxu3 %v5011_v12  ;;  %v4511_v11 = vor.u32 %v5435_v4, %v4510_v3  ;;  %v5210_v12 = vld [vmem:[#allocation7 + $0x88] sm:$0xf0]  ;;  %v4818_v3 = vld [vmem:[#allocation7 + $0x990] sm:$0xf]  ;;  %v4123_v4 = vor.u32 %v5324_v56, %v4120_v58  ;;  %v4518_v58 = vld [vmem:[#allocation7 + $0x738] sm:$0xf] }
 0x113   :  { %2973 = vmatpush.bf16.msra.mxu0 %v4215_v15  ;;  %2986 = vmatpush.bf16.msra.mxu1 %v5015_v16  ;;  %v3715_v15 = vor.u32 %v5223_v5, %v3712_v6  ;;  %v4515_v16 = vor.u32 %v5423_v7, %v4512_v8  ;;  %v3611_v28 = vor.u32 %v5210_v12, %v3610_v9  ;;  %v5511_v7 = vld [vmem:[#allocation7 + $0x9f0] sm:$0xf0]  ;;  %v4020_v9 = vld [vmem:[#allocation7 + $0x3b4] sm:$0xf0]  ;;  %v620_v12 = vperm.slane %v5898_v47, 0 }
 0x114   :  { %v4923_v5 = vor.u32 %v5524_v59, %v4920_v60  ;;  %v5299_v8 = vld [vmem:[#allocation7 + $0x354] sm:$0xf]  ;;  %v5436_v59 = vld [vmem:[#allocation7 + $0x798] sm:$0xf0] }
 0x115   :  { %v4023_v18 = vor.u32 %v5299_v8, %v4020_v9  ;;  %v5224_v60 = vld [vmem:[#allocation7 + $0xfc] sm:$0xf] }
 0x116   :  { %2948 = vmatpush.bf16.msrb.mxu2 %v4111_v25  ;;  %2961 = vmatpush.bf16.msrb.mxu3 %v4911_v26  ;;  %v5118_v25 = vld [vmem:[#allocation7 + $0xbe8] sm:$0xf]  ;;  %v5586_v26 = vld [vmem:[#allocation7 + $0xc48] sm:$0xf0] }
 0x117   :  { %2974 = vmatpush.bf16.msra.mxu0 %v4115_v29  ;;  %2987 = vmatpush.bf16.msra.mxu1 %v4915_v30  ;;  %v4411_v29 = vor.u32 %v5410_v14, %v4410_v13  ;;  %v4320_v30 = vld [vmem:[#allocation7 + $0x60c] sm:$0xf0]  ;;  %v5119_v36 = vor.u32 %v5586_v26, %v5118_v25  ;;  %v5486_v25 = vld [vmem:[#allocation7 + $0x928] sm:$0xf0] }
 0x118   :  { %v4323_v40 = vor.u32 %v5374_v27, %v4320_v30  ;;  %v5274_v26 = vld [vmem:[#allocation7 + $0x28c] sm:$0xf]  ;;  %v4720_v30 = vld [vmem:[#allocation7 + $0x92c] sm:$0xf0] }
 0x11a   :  { %2949 = vmatpush.bf16.msrb.mxu2 %v4011_v37  ;;  %2962 = vmatpush.bf16.msrb.mxu3 %v4811_v38  ;;  %v4218_v37 = vld [vmem:[#allocation7 + $0x4e0] sm:$0xf]  ;;  %v5361_v38 = vld [vmem:[#allocation7 + $0x540] sm:$0xf0] }
 0x11b   :  { %2975 = vmatpush.bf16.msra.mxu0 %v4015_v41  ;;  %2988 = vmatpush.bf16.msra.mxu1 %v4815_v42  ;;  %v5123_v41 = vor.u32 %v5574_v31, %v5120_v32  ;;  %v5561_v42 = vld [vmem:[#allocation7 + $0xb80] sm:$0xf0]  ;;  %v4219_v48 = vor.u32 %v5361_v38, %v4218_v37  ;;  %v4618_v38 = vld [vmem:[#allocation7 + $0x800] sm:$0xf] }
 0x11c   :  { %v5261_v37 = vld [vmem:[#allocation7 + $0x220] sm:$0xf0] }
 0x11e   :  { %2950 = vmatpush.bf16.msrb.mxu2 %v3911_v49  ;;  %2963 = vmatpush.bf16.msrb.mxu3 %v4711_v50  ;;  %v5019_v49 = vor.u32 %v5561_v42, %v5018_v39  ;;  %v4118_v50 = vld [vmem:[#allocation7 + $0x418] sm:$0xf]  ;;  %v5249_v42 = vld [vmem:[#allocation7 + $0x1c4] sm:$0xf] }
 0x11f   :  { %2976 = vmatpush.bf16.msra.mxu0 %v3915_v53  ;;  %2989 = vmatpush.bf16.msra.mxu1 %v4715_v54  ;;  %v4223_v53 = vor.u32 %v5349_v43, %v4220_v44  ;;  %v5023_v54 = vor.u32 %v5549_v45, %v5020_v46  ;;  %v3820_v43 = vld [vmem:[#allocation7 + $0x224] sm:$0xf0]  ;;  %v5449_v46 = vld [vmem:[#allocation7 + $0x804] sm:$0xf] }
 0x122   :  { %2951 = vmatpush.bf16.msrb.mxu2 %v3811_v61  ;;  %2964 = vmatpush.bf16.msrb.mxu3 %v4611_v62  ;;  %v4119_v61 = vor.u32 %v5336_v51, %v4118_v50  ;;  %v4919_v62 = vor.u32 %v5536_v55, %v4918_v52  ;;  %v3718_v52 = vld [vmem:[#allocation7 + $0xf8] sm:$0xf] }
 0x123   :  { %2977 = vmatpush.bf16.msra.mxu0 %v3815_v1  ;;  %2990 = vmatpush.bf16.msra.mxu1 %v4615_v2  ;;  %v4018_v1 = vld [vmem:[#allocation7 + $0x350] sm:$0xf]  ;;  %v5311_v2 = vld [vmem:[#allocation7 + $0x3b0] sm:$0xf0] }
 0x124   :  { %v4019_v14 = vor.u32 %v5311_v2, %v4018_v1  ;;  %v4519_v2 = vor.u32 %v5436_v59, %v4518_v58 }
 0x126   :  { %2952 = vmatpush.bf16.msrb.mxu2 %v3711_v10  ;;  %2965 = vmatpush.bf16.msrb.mxu3 %v4511_v11  ;;  %v5499_v10 = vld [vmem:[#allocation7 + $0x994] sm:$0xf]  ;;  %v4820_v11 = vld [vmem:[#allocation7 + $0x9f4] sm:$0xf0] }
 0x127   :  { %2978 = vmatpush.bf16.msra.mxu0 %v3715_v15  ;;  %2991 = vmatpush.bf16.msra.mxu1 %v4515_v16  ;;  %v4819_v15 = vor.u32 %v5511_v7, %v4818_v3  ;;  %v3918_v16 = vld [vmem:[#allocation7 + $0x288] sm:$0xf]  ;;  %v4823_v19 = vor.u32 %v5499_v10, %v4820_v11  ;;  %v5411_v7 = vld [vmem:[#allocation7 + $0x6d0] sm:$0xf0]  ;;  %v3620_v11 = vld [vmem:[#allocation7 + $0x94] sm:$0xf0] }
 0x128   :  { %v3919_v32 = vor.u32 %v5286_v17, %v3918_v16  ;;  %v5199_v10 = vld [vmem:[#allocation7 + $0x34] sm:$0xf]  ;;  %v5126_v16 = vld [vmem:[#allocation7 + $0xbf0] sm:$0xf] }
 0x129   :  { %v5587_v17 = vld [vmem:[#allocation7 + $0xc50] sm:$0xf0] }
 0x12a   :  { %2953 = vmatpush.bf16.msrb.mxu2 %v3611_v28  ;;  %2966 = vmatpush.bf16.msrb.mxu3 %v4411_v29  ;;  %v2721_v63 = vpop.f32.mrf.mxu0  ;;  %v2734_v0 = vpop.f32.mrf.mxu1  ;;  %v3920_v28 = vld [vmem:[#allocation7 + $0x2ec] sm:$0xf0]  ;;  %v5474_v29 = vld [vmem:[#allocation7 + $0x8cc] sm:$0xf] }
 0x12b   :  { %2979 = vmatpush.bf16.msra.mxu0 %v3615_v33  ;;  %2992 = vmatpush.bf16.msra.mxu1 %v4415_v34  ;;  %v2722_v6 = vadd.f32 %v2721_v63, %v621_v57  ;;  %v4719_v33 = vor.u32 %v5486_v25, %v4718_v24  ;;  %v3923_v39 = vor.u32 %v5274_v26, %v3920_v28  ;;  %v4520_v63 = vld [vmem:[#allocation7 + $0x79c] sm:$0xf0]  ;;  %v5575_v24 = vld [vmem:[#allocation7 + $0xbf4] sm:$0xf]  ;;  %v5128_v25 = vld [vmem:[#allocation7 + $0xc54] sm:$0xf0] }
 0x12c   :  { %v3623_v26 = vor.u32 %v5199_v10, %v3620_v11 }
 0x12d   :  { %2954 = vmatmul.bf16.vlgmr.msrb.gmra.mxu2 %v5874_v21  ;;  %2967 = vmatmul.bf16.vlgmr.msrb.gmra.mxu3 %v5876_v22  ;;  %v2735_v13 = vadd.f32 %v2734_v0, %v2722_v6  ;;  %v3618_v0 = vld [vmem:[#allocation7 + $0x30] sm:$0xf] }
 0x12e   :  { %2998 = vmatpush.bf16.msra.mxu2 %v4319_v35  ;;  %3011 = vmatpush.bf16.msra.mxu3 %v5119_v36  ;;  %v3818_v36 = vld [vmem:[#allocation7 + $0x1c0] sm:$0xf]  ;;  %v4418_v6 = vld [vmem:[#allocation7 + $0x670] sm:$0xf] }
 0x12f   :  { %3024 = vmatpush.bf16.msrb.mxu0 %v4323_v40  ;;  %3037 = vmatpush.bf16.msrb.mxu1 %v5123_v41  ;;  %v2695_v20 = vpop.f32.mrf.mxu2  ;;  %v2708_v23 = vpop.f32.mrf.mxu3  ;;  %v4723_v40 = vor.u32 %v5474_v29, %v4720_v30  ;;  %v5461_v41 = vld [vmem:[#allocation7 + $0x860] sm:$0xf0]  ;;  %v3337_v44 = vmax.f32 %v2735_v13, 0.0  ;;  %v3819_v50 = vor.u32 %v5261_v37, %v3818_v36  ;;  %v4420_v13 = vld [vmem:[#allocation7 + $0x6d4] sm:$0xf0] }
 0x130   :  { %2980 = vmatmul.bf16.vlgmr.msra.gmra.mxu0 %v5874_v21  ;;  %2993 = vmatmul.bf16.vlgmr.msra.gmra.mxu1 %v5876_v22  ;;  %v2696_v27 = vadd.f32 %v2695_v20, %v620_v12  ;;  %v4619_v51 = vor.u32 %v5461_v41, %v4618_v38  ;;  %v5399_v12 = vld [vmem:[#allocation7 + $0x674] sm:$0xf]  ;;  %v4419_v20 = vor.u32 %v5411_v7, %v4418_v6  ;;  %v5026_v36 = vld [vmem:[#allocation7 + $0xb28] sm:$0xf]  ;;  %v5562_v37 = vld [vmem:[#allocation7 + $0xb88] sm:$0xf0] }
 0x131   :  { %v5350_v38 = vld [vmem:[#allocation7 + $0x4ec] sm:$0xf]  ;;  %v4228_v41 = vld [vmem:[#allocation7 + $0x54c] sm:$0xf0]  ;;  %v5300_v6 = vld [vmem:[#allocation7 + $0x35c] sm:$0xf] }
 0x132   :  { %2999 = vmatpush.bf16.msra.mxu2 %v4219_v48  ;;  %3012 = vmatpush.bf16.msra.mxu3 %v5019_v49  ;;  %v2709_v31 = vadd.f32 %v2708_v23, %v2696_v27  ;;  %v2723_v34 = vpop.f32.mrf.mxu0  ;;  %v2736_v35 = vpop.f32.mrf.mxu1  ;;  %v4620_v48 = vld [vmem:[#allocation7 + $0x864] sm:$0xf0]  ;;  %v4328_v23 = vld [vmem:[#allocation7 + $0x614] sm:$0xf0]  ;;  %v4423_v27 = vor.u32 %v5399_v12, %v4420_v13  ;;  %v4028_v7 = vld [vmem:[#allocation7 + $0x3bc] sm:$0xf0] }
 0x133   :  { %3025 = vmatpush.bf16.msrb.mxu0 %v4223_v53  ;;  %3038 = vmatpush.bf16.msrb.mxu1 %v5023_v54  ;;  %v5236_v53 = vld [vmem:[#allocation7 + $0x158] sm:$0xf0]  ;;  %v3823_v54 = vor.u32 %v5249_v42, %v3820_v43  ;;  %v4623_v55 = vor.u32 %v5449_v46, %v4620_v48  ;;  %v5131_v35 = vor.u32 %v5575_v24, %v5128_v25  ;;  %v5550_v42 = vld [vmem:[#allocation7 + $0xb2c] sm:$0xf]  ;;  %v5028_v43 = vld [vmem:[#allocation7 + $0xb8c] sm:$0xf0] }
 0x134   :  { %v3336_v45 = vmax.f32 %v2709_v31, 0.0  ;;  %v3719_v1 = vor.u32 %v5236_v53, %v3718_v52  ;;  %v5127_v31 = vor.u32 %v5587_v17, %v5126_v16  ;;  %v4126_v46 = vld [vmem:[#allocation7 + $0x420] sm:$0xf]  ;;  %v5337_v48 = vld [vmem:[#allocation7 + $0x480] sm:$0xf0]  ;;  %v4031_v16 = vor.u32 %v5300_v6, %v4028_v7 }
 0x135   :  { %v4926_v52 = vld [vmem:[#allocation7 + $0xa60] sm:$0xf]  ;;  %v5537_v53 = vld [vmem:[#allocation7 + $0xac0] sm:$0xf0]  ;;  %v5475_v24 = vld [vmem:[#allocation7 + $0x8d4] sm:$0xf] }
 0x136   :  { %3000 = vmatpush.bf16.msra.mxu2 %v4119_v61  ;;  %3013 = vmatpush.bf16.msra.mxu3 %v4919_v62  ;;  %v5906_v49 = vpack.c.bf16 %v3337_v44, %v3336_v45  ;;  %v3720_v61 = vld [vmem:[#allocation7 + $0x15c] sm:$0xf0]  ;;  %v5424_v62 = vld [vmem:[#allocation7 + $0x73c] sm:$0xf]  ;;  %v5027_v45 = vor.u32 %v5562_v37, %v5026_v36  ;;  %v4728_v25 = vld [vmem:[#allocation7 + $0x934] sm:$0xf0] }
 0x137   :  { %3026 = vmatpush.bf16.msrb.mxu0 %v4123_v4  ;;  %3039 = vmatpush.bf16.msrb.mxu1 %v4923_v5  ;;  %v2697_v56 = vpop.f32.mrf.mxu2  ;;  %v2710_v57 = vpop.f32.mrf.mxu3  ;;  %v5211_v5 = vld [vmem:[#allocation7 + $0x90] sm:$0xf0]  ;;  %v3723_v8 = vor.u32 %v5224_v60, %v3720_v61  ;;  %v4523_v9 = vor.u32 %v5424_v62, %v4520_v63  ;;  %v4127_v60 = vor.u32 %v5337_v48, %v4126_v46  ;;  %v4026_v62 = vld [vmem:[#allocation7 + $0x358] sm:$0xf]  ;;  %v5312_v63 = vld [vmem:[#allocation7 + $0x3b8] sm:$0xf0] }
 0x138   :  { %v5525_v56 = vld [vmem:[#allocation7 + $0xa64] sm:$0xf]  ;;  %v4928_v57 = vld [vmem:[#allocation7 + $0xac4] sm:$0xf0]  ;;  %v4927_v61 = vor.u32 %v5537_v53, %v4926_v52  ;;  %v4027_v12 = vor.u32 %v5312_v63, %v4026_v62  ;;  %v5462_v37 = vld [vmem:[#allocation7 + $0x868] sm:$0xf0] }
 0x139   :  { %v4626_v36 = vld [vmem:[#allocation7 + $0x808] sm:$0xf]  ;;  %v3726_v46 = vld [vmem:[#allocation7 + $0x100] sm:$0xf]  ;;  %v5237_v48 = vld [vmem:[#allocation7 + $0x160] sm:$0xf0] }
 0x13a   :  { %3001 = vmatpush.bf16.msra.mxu2 %v4019_v14  ;;  %3014 = vmatpush.bf16.msra.mxu3 %v4819_v15  ;;  %v5908_v3 = vpop.f32.mrf.mxu0  ;;  %v5910_v4 = vpop.f32.mrf.mxu1  ;;  %v4326_v14 = vld [vmem:[#allocation7 + $0x5b0] sm:$0xf]  ;;  %v5387_v15 = vld [vmem:[#allocation7 + $0x610] sm:$0xf0]  ;;  %v4526_v52 = vld [vmem:[#allocation7 + $0x740] sm:$0xf] }
 0x13b   :  { %3027 = vmatpush.bf16.msrb.mxu0 %v4023_v18  ;;  %3040 = vmatpush.bf16.msrb.mxu1 %v4823_v19  ;;  %v5375_v18 = vld [vmem:[#allocation7 + $0x5b4] sm:$0xf]  ;;  %v3619_v19 = vor.u32 %v5211_v5, %v3618_v0  ;;  %v4327_v30 = vor.u32 %v5387_v15, %v4326_v14  ;;  %v5512_v5 = vld [vmem:[#allocation7 + $0x9f8] sm:$0xf0]  ;;  %v3926_v14 = vld [vmem:[#allocation7 + $0x290] sm:$0xf] }
 0x13c   :  { %v4331_v34 = vor.u32 %v5375_v18, %v4328_v23  ;;  %v5287_v15 = vld [vmem:[#allocation7 + $0x2f0] sm:$0xf0]  ;;  %v4726_v18 = vld [vmem:[#allocation7 + $0x8d0] sm:$0xf]  ;;  %v3928_v23 = vld [vmem:[#allocation7 + $0x2f4] sm:$0xf0] }
 0x13d   :  { %v5437_v53 = vld [vmem:[#allocation7 + $0x7a0] sm:$0xf0]  ;;  %v4426_v62 = vld [vmem:[#allocation7 + $0x678] sm:$0xf]  ;;  %v5412_v63 = vld [vmem:[#allocation7 + $0x6d8] sm:$0xf0] }
 0x13e   :  { %3002 = vmatpush.bf16.msra.mxu2 %v3919_v32  ;;  %3015 = vmatpush.bf16.msra.mxu3 %v4719_v33  ;;  %v4226_v32 = vld [vmem:[#allocation7 + $0x4e8] sm:$0xf]  ;;  %v5362_v33 = vld [vmem:[#allocation7 + $0x548] sm:$0xf0]  ;;  %v5200_v6 = vld [vmem:[#allocation7 + $0x3c] sm:$0xf] }
 0x13f   :  { %3028 = vmatpush.bf16.msrb.mxu0 %v3923_v39  ;;  %3041 = vmatpush.bf16.msrb.mxu1 %v4723_v40  ;;  %v5912_v28 = vpop.f32.mrf.mxu2  ;;  %v5914_v29 = vpop.f32.mrf.mxu3  ;;  %v4227_v44 = vor.u32 %v5362_v33, %v4226_v32  ;;  %v4731_v33 = vor.u32 %v5475_v24, %v4728_v25  ;;  %v3628_v7 = vld [vmem:[#allocation7 + $0x9c] sm:$0xf0]  ;;  %v622_v24 = vperm.slane %v5898_v47, 2 }
 0x140   :  { %v3631_v25 = vor.u32 %v5200_v6, %v3628_v7  ;;  %v4834_v7 = vld [vmem:[#allocation7 + $0x9a0] sm:$0xf] }
 0x142   :  { %3003 = vmatpush.bf16.msra.mxu2 %v3819_v50  ;;  %3016 = vmatpush.bf16.msra.mxu3 %v4619_v51  ;;  %v2775_v39 = vpop.f32.mrf.mxu0  ;;  %v2788_v40 = vpop.f32.mrf.mxu1  ;;  %v4231_v50 = vor.u32 %v5350_v38, %v4228_v41  ;;  %v5031_v51 = vor.u32 %v5550_v42, %v5028_v43  ;;  %v5250_v38 = vld [vmem:[#allocation7 + $0x1cc] sm:$0xf]  ;;  %v4628_v41 = vld [vmem:[#allocation7 + $0x86c] sm:$0xf0] }
 0x143   :  { %3029 = vmatpush.bf16.msrb.mxu0 %v3823_v54  ;;  %3042 = vmatpush.bf16.msrb.mxu1 %v4623_v55  ;;  %v5325_v54 = vld [vmem:[#allocation7 + $0x424] sm:$0xf]  ;;  %v4128_v55 = vld [vmem:[#allocation7 + $0x484] sm:$0xf0]  ;;  %v3828_v39 = vld [vmem:[#allocation7 + $0x22c] sm:$0xf0] }
 0x144   :  { %v4131_v0 = vor.u32 %v5325_v54, %v4128_v55  ;;  %v5450_v40 = vld [vmem:[#allocation7 + $0x80c] sm:$0xf]  ;;  %v5225_v54 = vld [vmem:[#allocation7 + $0x104] sm:$0xf]  ;;  %v3728_v55 = vld [vmem:[#allocation7 + $0x164] sm:$0xf0] }
 0x146   :  { %3004 = vmatpush.bf16.msra.mxu2 %v3719_v1  ;;  %3017 = vmatpush.bf16.msra.mxu3 %v4519_v2  ;;  %v4931_v1 = vor.u32 %v5525_v56, %v4928_v57  ;;  %v4826_v2 = vld [vmem:[#allocation7 + $0x998] sm:$0xf]  ;;  %v5425_v56 = vld [vmem:[#allocation7 + $0x744] sm:$0xf]  ;;  %v4528_v57 = vld [vmem:[#allocation7 + $0x7a4] sm:$0xf0] }
 0x147   :  { %3030 = vmatpush.bf16.msrb.mxu0 %v3723_v8  ;;  %3043 = vmatpush.bf16.msrb.mxu1 %v4523_v9  ;;  %v2749_v58 = vpop.f32.mrf.mxu2  ;;  %v2762_v59 = vpop.f32.mrf.mxu3  ;;  %v5500_v8 = vld [vmem:[#allocation7 + $0x99c] sm:$0xf]  ;;  %v4828_v9 = vld [vmem:[#allocation7 + $0x9fc] sm:$0xf0]  ;;  %v4827_v13 = vor.u32 %v5512_v5, %v4826_v2 }
 0x148   :  { %v4831_v17 = vor.u32 %v5500_v8, %v4828_v9  ;;  %v3626_v58 = vld [vmem:[#allocation7 + $0x38] sm:$0xf]  ;;  %v3727_v59 = vor.u32 %v5237_v48, %v3726_v46  ;;  %v5400_v8 = vld [vmem:[#allocation7 + $0x67c] sm:$0xf]  ;;  %v4428_v9 = vld [vmem:[#allocation7 + $0x6dc] sm:$0xf0] }
 0x149   :  { %v625_v46 = vperm.slane %v5898_v47, 5 }
 0x14a   :  { %3005 = vmatpush.bf16.msra.mxu2 %v3619_v19  ;;  %3018 = vmatpush.bf16.msra.mxu3 %v4419_v20  ;;  %v5487_v19 = vld [vmem:[#allocation7 + $0x930] sm:$0xf0] }
 0x14b   :  { %3031 = vmatpush.bf16.msrb.mxu0 %v3623_v26  ;;  %3044 = vmatpush.bf16.msrb.mxu1 %v4423_v27  ;;  %v5275_v20 = vld [vmem:[#allocation7 + $0x294] sm:$0xf]  ;;  %v3927_v26 = vor.u32 %v5287_v15, %v3926_v14  ;;  %v4727_v27 = vor.u32 %v5487_v19, %v4726_v18  ;;  %v5134_v14 = vld [vmem:[#allocation7 + $0xbf8] sm:$0xf]  ;;  %v5588_v15 = vld [vmem:[#allocation7 + $0xc58] sm:$0xf0]  ;;  %v4427_v18 = vor.u32 %v5412_v63, %v4426_v62 }
 0x14c   :  { %v3931_v32 = vor.u32 %v5275_v20, %v3928_v23  ;;  %v4336_v19 = vld [vmem:[#allocation7 + $0x61c] sm:$0xf0]  ;;  %v5576_v20 = vld [vmem:[#allocation7 + $0xbfc] sm:$0xf] }
 0x14d   :  { %3006 = vmatmul.bf16.vlgmr.msra.gmra.mxu2 %v5874_v21  ;;  %3019 = vmatmul.bf16.vlgmr.msra.gmra.mxu3 %v5876_v22  ;;  %v5920_v10 = vpop.f32.mrf.mxu0  ;;  %v5922_v11 = vpop.f32.mrf.mxu1  ;;  %v5136_v23 = vld [vmem:[#allocation7 + $0xc5c] sm:$0xf0] }
 0x14e   :  { %3050 = vmatpush.bf16.msrb.mxu2 %v4327_v30  ;;  %3063 = vmatpush.bf16.msrb.mxu3 %v5127_v31  ;;  %v3826_v30 = vld [vmem:[#allocation7 + $0x1c8] sm:$0xf]  ;;  %v5262_v31 = vld [vmem:[#allocation7 + $0x228] sm:$0xf0]  ;;  %v2826_v62 = vadd.f32 %v5920_v10, %v625_v46 }
 0x14f   :  { %3076 = vmatpush.bf16.msra.mxu0 %v4331_v34  ;;  %3089 = vmatpush.bf16.msra.mxu1 %v5131_v35 }
 0x150   :  { %3032 = vmatmul.bf16.vlgmr.msrb.gmra.mxu0 %v5874_v21  ;;  %3045 = vmatmul.bf16.vlgmr.msrb.gmra.mxu1 %v5876_v22  ;;  %v5924_v34 = vpop.f32.mrf.mxu2  ;;  %v5926_v35 = vpop.f32.mrf.mxu3 }
 0x152   :  { %3051 = vmatpush.bf16.msrb.mxu2 %v4227_v44  ;;  %3064 = vmatpush.bf16.msrb.mxu3 %v5027_v45  ;;  %v3827_v44 = vor.u32 %v5262_v31, %v3826_v30  ;;  %v4627_v45 = vor.u32 %v5462_v37, %v4626_v36  ;;  %v624_v30 = vperm.slane %v5898_v47, 4  ;;  %v5363_v36 = vld [vmem:[#allocation7 + $0x550] sm:$0xf0] }
 0x153   :  { %3077 = vmatpush.bf16.msra.mxu0 %v4231_v50  ;;  %3090 = vmatpush.bf16.msra.mxu1 %v5031_v51  ;;  %v3831_v50 = vor.u32 %v5250_v38, %v3828_v39  ;;  %v4631_v51 = vor.u32 %v5450_v40, %v4628_v41  ;;  %v5139_v38 = vor.u32 %v5576_v20, %v5136_v23  ;;  %v5034_v39 = vld [vmem:[#allocation7 + $0xb30] sm:$0xf]  ;;  %v5563_v40 = vld [vmem:[#allocation7 + $0xb90] sm:$0xf0]  ;;  %v5288_v20 = vld [vmem:[#allocation7 + $0x2f8] sm:$0xf0] }
 0x154   :  { %v5351_v41 = vld [vmem:[#allocation7 + $0x4f4] sm:$0xf]  ;;  %v4734_v23 = vld [vmem:[#allocation7 + $0x8d8] sm:$0xf] }
 0x155   :  { %v2827_v42 = vpop.f32.mrf.mxu0  ;;  %v2840_v43 = vpop.f32.mrf.mxu1 }
 0x156   :  { %3052 = vmatpush.bf16.msrb.mxu2 %v4127_v60  ;;  %3065 = vmatpush.bf16.msrb.mxu3 %v4927_v61  ;;  %v4527_v60 = vor.u32 %v5437_v53, %v4526_v52  ;;  %v5212_v61 = vld [vmem:[#allocation7 + $0x98] sm:$0xf0]  ;;  %v4236_v42 = vld [vmem:[#allocation7 + $0x554] sm:$0xf0]  ;;  %v5551_v43 = vld [vmem:[#allocation7 + $0xb34] sm:$0xf] }
 0x157   :  { %3078 = vmatpush.bf16.msra.mxu0 %v4131_v0  ;;  %3091 = vmatpush.bf16.msra.mxu1 %v4931_v1  ;;  %v3731_v0 = vor.u32 %v5225_v54, %v3728_v55  ;;  %v4531_v1 = vor.u32 %v5425_v56, %v4528_v57  ;;  %v4134_v52 = vld [vmem:[#allocation7 + $0x428] sm:$0xf]  ;;  %v5338_v53 = vld [vmem:[#allocation7 + $0x488] sm:$0xf0]  ;;  %v2800_v54 = vadd.f32 %v5924_v34, %v624_v30 }
 0x158   :  { %v2801_v2 = vpop.f32.mrf.mxu2  ;;  %v2814_v5 = vpop.f32.mrf.mxu3  ;;  %v4239_v55 = vor.u32 %v5351_v41, %v4236_v42  ;;  %v4934_v57 = vld [vmem:[#allocation7 + $0xa68] sm:$0xf]  ;;  %v4135_v63 = vor.u32 %v5338_v53, %v4134_v52  ;;  %v5463_v52 = vld [vmem:[#allocation7 + $0x870] sm:$0xf0] }
 0x159   :  { %v4034_v2 = vld [vmem:[#allocation7 + $0x360] sm:$0xf]  ;;  %v5313_v5 = vld [vmem:[#allocation7 + $0x3c0] sm:$0xf0]  ;;  %v2813_v6 = vadd.f32 %v5926_v35, %v2800_v54  ;;  %v5251_v53 = vld [vmem:[#allocation7 + $0x1d4] sm:$0xf] }
 0x15a   :  { %3053 = vmatpush.bf16.msrb.mxu2 %v4027_v12  ;;  %3066 = vmatpush.bf16.msrb.mxu3 %v4827_v13  ;;  %v4334_v12 = vld [vmem:[#allocation7 + $0x5b8] sm:$0xf]  ;;  %v5388_v13 = vld [vmem:[#allocation7 + $0x618] sm:$0xf0] }
 0x15b   :  { %3079 = vmatpush.bf16.msra.mxu0 %v4031_v16  ;;  %3092 = vmatpush.bf16.msra.mxu1 %v4831_v17  ;;  %v5376_v16 = vld [vmem:[#allocation7 + $0x5bc] sm:$0xf]  ;;  %v3627_v17 = vor.u32 %v5212_v61, %v3626_v58  ;;  %v4335_v31 = vor.u32 %v5388_v13, %v4334_v12  ;;  %v5326_v58 = vld [vmem:[#allocation7 + $0x42c] sm:$0xf]  ;;  %v4036_v12 = vld [vmem:[#allocation7 + $0x3c4] sm:$0xf0] }
 0x15c   :  { %v4339_v37 = vor.u32 %v5376_v16, %v4336_v19  ;;  %v5501_v13 = vld [vmem:[#allocation7 + $0x9a4] sm:$0xf]  ;;  %v3934_v16 = vld [vmem:[#allocation7 + $0x298] sm:$0xf]  ;;  %v4035_v19 = vor.u32 %v5313_v5, %v4034_v2  ;;  %v5438_v2 = vld [vmem:[#allocation7 + $0x7a8] sm:$0xf0] }
 0x15d   :  { %v3935_v41 = vor.u32 %v5288_v20, %v3934_v16  ;;  %v5213_v16 = vld [vmem:[#allocation7 + $0xa0] sm:$0xf0] }
 0x15e   :  { %3054 = vmatpush.bf16.msrb.mxu2 %v3927_v26  ;;  %3067 = vmatpush.bf16.msrb.mxu3 %v4727_v27  ;;  %v4431_v26 = vor.u32 %v5400_v8, %v4428_v9  ;;  %v623_v27 = vperm.slane %v5898_v47, 3  ;;  %v5513_v8 = vld [vmem:[#allocation7 + $0xa00] sm:$0xf0] }
 0x15f   :  { %3080 = vmatpush.bf16.msra.mxu0 %v3931_v32  ;;  %3093 = vmatpush.bf16.msra.mxu1 %v4731_v33  ;;  %v5135_v32 = vor.u32 %v5588_v15, %v5134_v14  ;;  %v4234_v33 = vld [vmem:[#allocation7 + $0x4f0] sm:$0xf]  ;;  %v5301_v9 = vld [vmem:[#allocation7 + $0x364] sm:$0xf]  ;;  %v2839_v15 = vadd.f32 %v5922_v11, %v2826_v62  ;;  %v4835_v35 = vor.u32 %v5513_v8, %v4834_v7  ;;  %v5476_v11 = vld [vmem:[#allocation7 + $0x8dc] sm:$0xf] }
 0x160   :  { %v2774_v48 = vadd.f32 %v5908_v3, %v623_v27  ;;  %v4136_v3 = vld [vmem:[#allocation7 + $0x48c] sm:$0xf0]  ;;  %v4039_v27 = vor.u32 %v5301_v9, %v4036_v12  ;;  %v5226_v7 = vld [vmem:[#allocation7 + $0x10c] sm:$0xf]  ;;  %v5413_v20 = vld [vmem:[#allocation7 + $0x6e0] sm:$0xf0] }
 0x161   :  { %v3736_v8 = vld [vmem:[#allocation7 + $0x16c] sm:$0xf0] }
 0x162   :  { %3055 = vmatpush.bf16.msrb.mxu2 %v3827_v44  ;;  %3068 = vmatpush.bf16.msrb.mxu3 %v4627_v45  ;;  %v5036_v44 = vld [vmem:[#allocation7 + $0xb94] sm:$0xf0]  ;;  %v2748_v45 = vadd.f32 %v5912_v28, %v622_v24  ;;  %v5538_v28 = vld [vmem:[#allocation7 + $0xac8] sm:$0xf0]  ;;  %v2787_v34 = vadd.f32 %v5910_v4, %v2774_v48  ;;  %v4836_v4 = vld [vmem:[#allocation7 + $0xa04] sm:$0xf0] }
 0x163   :  { %3081 = vmatpush.bf16.msra.mxu0 %v3831_v50  ;;  %3094 = vmatpush.bf16.msra.mxu1 %v4631_v51  ;;  %v4235_v50 = vor.u32 %v5363_v36, %v4234_v33  ;;  %v5035_v51 = vor.u32 %v5563_v40, %v5034_v39  ;;  %v5039_v56 = vor.u32 %v5551_v43, %v5036_v44  ;;  %v5488_v24 = vld [vmem:[#allocation7 + $0x938] sm:$0xf0]  ;;  %v4736_v36 = vld [vmem:[#allocation7 + $0x93c] sm:$0xf0]  ;;  %v3341_v39 = vmax.f32 %v2839_v15, 0.0 }
 0x164   :  { %v2761_v61 = vadd.f32 %v5914_v29, %v2748_v45  ;;  %v4139_v29 = vor.u32 %v5326_v58, %v4136_v3  ;;  %v4839_v30 = vor.u32 %v5501_v13, %v4836_v4  ;;  %v3464_v40 = vrot.slane %v5906_v49, 3  ;;  %v3834_v43 = vld [vmem:[#allocation7 + $0x1d0] sm:$0xf]  ;;  %v5263_v44 = vld [vmem:[#allocation7 + $0x230] sm:$0xf0] }
 0x165   :  { %v4735_v42 = vor.u32 %v5488_v24, %v4734_v23  ;;  %v4739_v48 = vor.u32 %v5476_v11, %v4736_v36  ;;  %v5426_v13 = vld [vmem:[#allocation7 + $0x74c] sm:$0xf]  ;;  %v4536_v4 = vld [vmem:[#allocation7 + $0x7ac] sm:$0xf0]  ;;  %v3634_v15 = vld [vmem:[#allocation7 + $0x40] sm:$0xf]  ;;  %v3739_v24 = vor.u32 %v5226_v7, %v3736_v8 }
 0x166   :  { %3056 = vmatpush.bf16.msrb.mxu2 %v3727_v59  ;;  %3069 = vmatpush.bf16.msrb.mxu3 %v4527_v60  ;;  %v5526_v59 = vld [vmem:[#allocation7 + $0xa6c] sm:$0xf]  ;;  %v4936_v60 = vld [vmem:[#allocation7 + $0xacc] sm:$0xf0]  ;;  %v3338_v14 = vmax.f32 %v2761_v61, 0.0 }
 0x167   :  { %3082 = vmatpush.bf16.msra.mxu0 %v3731_v0  ;;  %3095 = vmatpush.bf16.msra.mxu1 %v4531_v1  ;;  %v4935_v0 = vor.u32 %v5538_v28, %v4934_v57  ;;  %v627_v1 = vperm.slane %v5898_v47, 7  ;;  %v4939_v10 = vor.u32 %v5526_v59, %v4936_v60  ;;  %v5451_v57 = vld [vmem:[#allocation7 + $0x814] sm:$0xf]  ;;  %v4636_v28 = vld [vmem:[#allocation7 + $0x874] sm:$0xf0]  ;;  %v5964_v8 = vld [vmem:[#allocation9 + $0x8] sm:$0xff] }
 0x168   :  { %v3734_v59 = vld [vmem:[#allocation7 + $0x108] sm:$0xf]  ;;  %v5201_v23 = vld [vmem:[#allocation7 + $0x44] sm:$0xf]  ;;  %v5327_v7 = vld [vmem:[#allocation7 + $0x434] sm:$0xf] }
 0x16a   :  { %3057 = vmatpush.bf16.msrb.mxu2 %v3627_v17  ;;  %3070 = vmatpush.bf16.msrb.mxu3 %v4427_v18 }
 0x16b   :  { %3083 = vmatpush.bf16.msra.mxu0 %v3631_v25  ;;  %3096 = vmatpush.bf16.msra.mxu1 %v4431_v26  ;;  %v3339_v25 = vmax.f32 %v2787_v34, 0.0  ;;  %v3340_v26 = vmax.f32 %v2813_v6, 0.0  ;;  %v3835_v34 = vor.u32 %v5263_v44, %v3834_v43  ;;  %v5589_v43 = vld [vmem:[#allocation7 + $0xc60] sm:$0xf0] }
 0x16c   :  { %v5377_v44 = vld [vmem:[#allocation7 + $0x5c4] sm:$0xf] }
 0x16d   :  { %3058 = vmatmul.bf16.vlgmr.msrb.gmra.mxu2 %v5874_v21  ;;  %3071 = vmatmul.bf16.vlgmr.msrb.gmra.mxu3 %v5876_v22  ;;  %v2877_v17 = vpop.f32.mrf.mxu0  ;;  %v2890_v18 = vpop.f32.mrf.mxu1  ;;  %v5947_v45 = vpack.c.bf16 %v3341_v39, %v3340_v26 }
 0x16e   :  { %3102 = vmatpush.bf16.msra.mxu2 %v4335_v31  ;;  %3115 = vmatpush.bf16.msra.mxu3 %v5135_v32  ;;  %v5276_v31 = vld [vmem:[#allocation7 + $0x29c] sm:$0xf]  ;;  %v3936_v32 = vld [vmem:[#allocation7 + $0x2fc] sm:$0xf0]  ;;  %v2878_v33 = vadd.f32 %v2877_v17, %v627_v1  ;;  %v4534_v1 = vld [vmem:[#allocation7 + $0x748] sm:$0xf] }
 0x16f   :  { %3128 = vmatpush.bf16.msrb.mxu0 %v4339_v37  ;;  %3141 = vmatpush.bf16.msrb.mxu1 %v5139_v38  ;;  %v626_v37 = vperm.slane %v5898_v47, 6  ;;  %v3439_v38 = vpack.c.bf16 %v3339_v25, %v3338_v14  ;;  %v3939_v46 = vor.u32 %v5276_v31, %v3936_v32  ;;  %v3467_v5 = vrot.slane %v5947_v45, 4  ;;  %v5401_v31 = vld [vmem:[#allocation7 + $0x684] sm:$0xf]  ;;  %v4436_v32 = vld [vmem:[#allocation7 + $0x6e4] sm:$0xf0] }
 0x170   :  { %3084 = vmatmul.bf16.vlgmr.msra.gmra.mxu0 %v5874_v21  ;;  %3097 = vmatmul.bf16.vlgmr.msra.gmra.mxu1 %v5876_v22  ;;  %v2864_v47 = vpop.f32.mrf.mxu3  ;;  %v2891_v54 = vadd.f32 %v2890_v18, %v2878_v33  ;;  %v3468_v6 = vrot.slane %v5947_v45, 7  ;;  %v4539_v25 = vor.u32 %v5426_v13, %v4536_v4  ;;  %v3489_v33 = vsel %vm3486_vm2, %v5906_v49, %v3464_v40  ;;  %v5144_v49 = vld [vmem:[#allocation7 + $0xc64] sm:$0xf0]  ;;  %v4944_v13 = vld [vmem:[#allocation7 + $0xad4] sm:$0xf0] }
 0x171   :  { %v3465_v58 = vrot.slane %v3439_v38, 6  ;;  %v3466_v3 = vrot.slane %v3439_v38, 1  ;;  %v5389_v38 = vld [vmem:[#allocation7 + $0x620] sm:$0xf0] }
 0x172   :  { %3103 = vmatpush.bf16.msra.mxu2 %v4235_v50  ;;  %3116 = vmatpush.bf16.msra.mxu3 %v5035_v51  ;;  %v2851_v50 = vpop.f32.mrf.mxu2  ;;  %v4634_v51 = vld [vmem:[#allocation7 + $0x810] sm:$0xf]  ;;  %v3343_v9 = vmax.f32 %v2891_v54, 0.0 }
 0x173   :  { %3129 = vmatpush.bf16.msrb.mxu0 %v4239_v55  ;;  %3142 = vmatpush.bf16.msrb.mxu1 %v5039_v56  ;;  %v2852_v55 = vadd.f32 %v2851_v50, %v626_v37  ;;  %v3836_v56 = vld [vmem:[#allocation7 + $0x234] sm:$0xf0]  ;;  %v3493_v14 = vsel %vm3490_vm3, %v3465_v58, %v3466_v3  ;;  %v4342_v37 = vld [vmem:[#allocation7 + $0x5c0] sm:$0xf]  ;;  %v4344_v50 = vld [vmem:[#allocation7 + $0x624] sm:$0xf0] }
 0x174   :  { %v3494_v39 = vsel %vm147_vm0, %v3489_v33, %v3493_v14  ;;  %v4343_v54 = vor.u32 %v5389_v38, %v4342_v37  ;;  %v5042_v3 = vld [vmem:[#allocation7 + $0xb38] sm:$0xf]  ;;  %v3942_v33 = vld [vmem:[#allocation7 + $0x2a0] sm:$0xf] }
 0x175   :  { %v2865_v60 = vadd.f32 %v2864_v47, %v2852_v55  ;;  %v2879_v61 = vpop.f32.mrf.mxu0  ;;  %v2892_v62 = vpop.f32.mrf.mxu1  ;;  %v5577_v47 = vld [vmem:[#allocation7 + $0xc04] sm:$0xf] }
 0x176   :  { %3104 = vmatpush.bf16.msra.mxu2 %v4135_v63  ;;  %3117 = vmatpush.bf16.msra.mxu3 %v4935_v0  ;;  %v4635_v63 = vor.u32 %v5463_v52, %v4634_v51  ;;  %v5238_v0 = vld [vmem:[#allocation7 + $0x168] sm:$0xf0]  ;;  %v4439_v52 = vor.u32 %v5401_v31, %v4436_v32  ;;  %v5147_v58 = vor.u32 %v5577_v47, %v5144_v49  ;;  %v4244_v61 = vld [vmem:[#allocation7 + $0x55c] sm:$0xf0]  ;;  %v5552_v62 = vld [vmem:[#allocation7 + $0xb3c] sm:$0xf] }
 0x177   :  { %3130 = vmatpush.bf16.msrb.mxu0 %v4139_v29  ;;  %3143 = vmatpush.bf16.msrb.mxu1 %v4939_v10  ;;  %v3839_v29 = vor.u32 %v5251_v53, %v3836_v56  ;;  %v4639_v10 = vor.u32 %v5451_v57, %v4636_v28  ;;  %v3342_v12 = vmax.f32 %v2865_v60, 0.0  ;;  %v3735_v18 = vor.u32 %v5238_v0, %v3734_v59  ;;  %v4242_v56 = vld [vmem:[#allocation7 + $0x4f8] sm:$0xf]  ;;  %v5364_v57 = vld [vmem:[#allocation7 + $0x558] sm:$0xf0] }
 0x178   :  { %v4347_v28 = vor.u32 %v5377_v44, %v4344_v50  ;;  %v5564_v59 = vld [vmem:[#allocation7 + $0xb98] sm:$0xf0]  ;;  %v5477_v44 = vld [vmem:[#allocation7 + $0x8e4] sm:$0xf]  ;;  %v3842_v49 = vld [vmem:[#allocation7 + $0x1d8] sm:$0xf] }
 0x179   :  { %v3441_v17 = vpack.c.bf16 %v3343_v9, %v3342_v12  ;;  %v5352_v60 = vld [vmem:[#allocation7 + $0x4fc] sm:$0xf]  ;;  %v5043_v0 = vor.u32 %v5564_v59, %v5042_v3  ;;  %v4144_v9 = vld [vmem:[#allocation7 + $0x494] sm:$0xf0]  ;;  %v5527_v12 = vld [vmem:[#allocation7 + $0xa74] sm:$0xf] }
 0x17a   :  { %3105 = vmatpush.bf16.msra.mxu2 %v4035_v19  ;;  %3118 = vmatpush.bf16.msra.mxu3 %v4835_v35  ;;  %v4535_v19 = vor.u32 %v5438_v2, %v4534_v1  ;;  %v4434_v35 = vld [vmem:[#allocation7 + $0x680] sm:$0xf]  ;;  %v2853_v26 = vpop.f32.mrf.mxu2  ;;  %v4142_v1 = vld [vmem:[#allocation7 + $0x430] sm:$0xf]  ;;  %v5339_v2 = vld [vmem:[#allocation7 + $0x490] sm:$0xf0] }
 0x17b   :  { %3131 = vmatpush.bf16.msrb.mxu0 %v4039_v27  ;;  %3144 = vmatpush.bf16.msrb.mxu1 %v4839_v30  ;;  %v2866_v27 = vpop.f32.mrf.mxu3  ;;  %v3636_v30 = vld [vmem:[#allocation7 + $0xa4] sm:$0xf0]  ;;  %v3469_v11 = vrot.slane %v3441_v17, 2  ;;  %v3470_v36 = vrot.slane %v3441_v17, 5  ;;  %v4143_v4 = vor.u32 %v5339_v2, %v4142_v1  ;;  %v5314_v17 = vld [vmem:[#allocation7 + $0x3c8] sm:$0xf0] }
 0x17c   :  { %v3639_v51 = vor.u32 %v5201_v23, %v3636_v30  ;;  %v5302_v23 = vld [vmem:[#allocation7 + $0x36c] sm:$0xf]  ;;  %v4844_v26 = vld [vmem:[#allocation7 + $0xa0c] sm:$0xf0]  ;;  %v5452_v3 = vld [vmem:[#allocation7 + $0x81c] sm:$0xf] }
 0x17d   :  { %v3502_v45 = vsel %vm3499_vm5, %v3469_v11, %v3470_v36  ;;  %v5289_v11 = vld [vmem:[#allocation7 + $0x300] sm:$0xf0]  ;;  %v4742_v36 = vld [vmem:[#allocation7 + $0x8e0] sm:$0xf]  ;;  %v5239_v1 = vld [vmem:[#allocation7 + $0x170] sm:$0xf0] }
 0x17e   :  { %3106 = vmatpush.bf16.msra.mxu2 %v3935_v41  ;;  %3119 = vmatpush.bf16.msra.mxu3 %v4735_v42  ;;  %v3498_v41 = vsel %vm3495_vm4, %v3467_v5, %v3468_v6  ;;  %v5142_v42 = vld [vmem:[#allocation7 + $0xc00] sm:$0xf]  ;;  %v4942_v5 = vld [vmem:[#allocation7 + $0xa70] sm:$0xf]  ;;  %v4247_v6 = vor.u32 %v5352_v60, %v4244_v61  ;;  %v3943_v50 = vor.u32 %v5289_v11, %v3942_v33  ;;  %v5390_v33 = vld [vmem:[#allocation7 + $0x628] sm:$0xf0] }
 0x17f   :  { %3132 = vmatpush.bf16.msrb.mxu0 %v3939_v46  ;;  %3145 = vmatpush.bf16.msrb.mxu1 %v4739_v48  ;;  %v3635_v46 = vor.u32 %v5213_v16, %v3634_v15  ;;  %v4435_v48 = vor.u32 %v5413_v20, %v4434_v35  ;;  %v3504_v40 = vsel %vm3503_vm6, %v3498_v41, %v3502_v45  ;;  %v629_v15 = vperm.slane %v5964_v8, 1  ;;  %v4042_v16 = vld [vmem:[#allocation7 + $0x368] sm:$0xf]  ;;  %v5514_v20 = vld [vmem:[#allocation7 + $0xa08] sm:$0xf0] }
 0x180   :  { %v3506_v53 = vsel %vm3505_vm7, %v3494_v39, %v3504_v40  ;;  %v5143_v55 = vor.u32 %v5589_v43, %v5142_v42  ;;  %v4842_v35 = vld [vmem:[#allocation7 + $0x9a8] sm:$0xf]  ;;  %v4043_v31 = vor.u32 %v5314_v17, %v4042_v16  ;;  %v5489_v41 = vld [vmem:[#allocation7 + $0x940] sm:$0xf0]  ;;  %v5264_v40 = vld [vmem:[#allocation7 + $0x238] sm:$0xf0] }
 0x181   :  { %3544 = vst [vmem:[%s6060_s8] sm:$0xff] %v3506_v53  ;;  %v4843_v32 = vor.u32 %v5514_v20, %v4842_v35  ;;  %v5277_v42 = vld [vmem:[#allocation7 + $0x2a4] sm:$0xf]  ;;  %v3944_v43 = vld [vmem:[#allocation7 + $0x304] sm:$0xf0]  ;;  %v4743_v47 = vor.u32 %v5489_v41, %v4742_v36  ;;  %v4644_v59 = vld [vmem:[#allocation7 + $0x87c] sm:$0xf0] }
 0x182   :  { %3107 = vmatpush.bf16.msra.mxu2 %v3835_v34  ;;  %3120 = vmatpush.bf16.msra.mxu3 %v4635_v63  ;;  %v5044_v34 = vld [vmem:[#allocation7 + $0xb9c] sm:$0xf0]  ;;  %v4243_v63 = vor.u32 %v5364_v57, %v4242_v56  ;;  %v4744_v45 = vld [vmem:[#allocation7 + $0x944] sm:$0xf0]  ;;  %v5464_v56 = vld [vmem:[#allocation7 + $0x878] sm:$0xf0] }
 0x183   :  { %3133 = vmatpush.bf16.msrb.mxu0 %v3839_v29  ;;  %3146 = vmatpush.bf16.msrb.mxu1 %v4639_v10  ;;  %v5047_v29 = vor.u32 %v5552_v62, %v5044_v34  ;;  %v5539_v10 = vld [vmem:[#allocation7 + $0xad0] sm:$0xf0]  ;;  %v5252_v57 = vld [vmem:[#allocation7 + $0x1dc] sm:$0xf]  ;;  %v3843_v34 = vor.u32 %v5264_v40, %v3842_v49  ;;  %v4542_v2 = vld [vmem:[#allocation7 + $0x750] sm:$0xf] }
 0x184   :  { %v4943_v14 = vor.u32 %v5539_v10, %v4942_v5  ;;  %v5227_v10 = vld [vmem:[#allocation7 + $0x114] sm:$0xf]  ;;  %v5414_v35 = vld [vmem:[#allocation7 + $0x6e8] sm:$0xf0]  ;;  %v5150_v11 = vld [vmem:[#allocation7 + $0xc08] sm:$0xf] }
 0x185   :  { %v5590_v36 = vld [vmem:[#allocation7 + $0xc68] sm:$0xf0]  ;;  %v4352_v41 = vld [vmem:[#allocation7 + $0x62c] sm:$0xf0] }
 0x186   :  { %3108 = vmatpush.bf16.msra.mxu2 %v3735_v18  ;;  %3121 = vmatpush.bf16.msra.mxu3 %v4535_v19  ;;  %v4147_v18 = vor.u32 %v5327_v7, %v4144_v9  ;;  %v4947_v19 = vor.u32 %v5527_v12, %v4944_v13  ;;  %v3744_v7 = vld [vmem:[#allocation7 + $0x174] sm:$0xf0]  ;;  %v5427_v13 = vld [vmem:[#allocation7 + $0x754] sm:$0xf] }
 0x187   :  { %3134 = vmatpush.bf16.msrb.mxu0 %v3739_v24  ;;  %3147 = vmatpush.bf16.msrb.mxu1 %v4539_v25  ;;  %v4044_v24 = vld [vmem:[#allocation7 + $0x3cc] sm:$0xf0]  ;;  %v5502_v25 = vld [vmem:[#allocation7 + $0x9ac] sm:$0xf]  ;;  %v3747_v20 = vor.u32 %v5227_v10, %v3744_v7  ;;  %v5315_v10 = vld [vmem:[#allocation7 + $0x3d0] sm:$0xf0] }
 0x188   :  { %v4047_v38 = vor.u32 %v5302_v23, %v4044_v24  ;;  %v4847_v39 = vor.u32 %v5502_v25, %v4844_v26  ;;  %v5202_v26 = vld [vmem:[#allocation7 + $0x4c] sm:$0xf] }
 0x18a   :  { %3109 = vmatpush.bf16.msra.mxu2 %v3635_v46  ;;  %3122 = vmatpush.bf16.msra.mxu3 %v4435_v48  ;;  %v628_v46 = vperm.slane %v5964_v8, 0 }
 0x18b   :  { %3135 = vmatpush.bf16.msrb.mxu0 %v3639_v51  ;;  %3148 = vmatpush.bf16.msrb.mxu1 %v4439_v52  ;;  %v3947_v51 = vor.u32 %v5277_v42, %v3944_v43  ;;  %v4747_v52 = vor.u32 %v5477_v44, %v4744_v45  ;;  %v5578_v42 = vld [vmem:[#allocation7 + $0xc0c] sm:$0xf]  ;;  %v5152_v43 = vld [vmem:[#allocation7 + $0xc6c] sm:$0xf0] }
 0x18c   :  { %v5155_v40 = vor.u32 %v5578_v42, %v5152_v43  ;;  %v3850_v42 = vld [vmem:[#allocation7 + $0x1e0] sm:$0xf]  ;;  %v5265_v43 = vld [vmem:[#allocation7 + $0x240] sm:$0xf0] }
 0x18d   :  { %3110 = vmatmul.bf16.vlgmr.msra.gmra.mxu2 %v5874_v21  ;;  %3123 = vmatmul.bf16.vlgmr.msra.gmra.mxu3 %v5876_v22  ;;  %v2929_v27 = vpop.f32.mrf.mxu0  ;;  %v2942_v30 = vpop.f32.mrf.mxu1 }
 0x18e   :  { %3154 = vmatpush.bf16.msrb.mxu2 %v4343_v54  ;;  %3167 = vmatpush.bf16.msrb.mxu3 %v5143_v55  ;;  %v2930_v37 = vadd.f32 %v2929_v27, %v629_v15  ;;  %v4642_v55 = vld [vmem:[#allocation7 + $0x818] sm:$0xf]  ;;  %v3644_v27 = vld [vmem:[#allocation7 + $0xac] sm:$0xf0] }
 0x18f   :  { %3180 = vmatpush.bf16.msra.mxu0 %v4347_v28  ;;  %3193 = vmatpush.bf16.msra.mxu1 %v5147_v58  ;;  %v3844_v58 = vld [vmem:[#allocation7 + $0x23c] sm:$0xf0]  ;;  %v3647_v44 = vor.u32 %v5202_v26, %v3644_v27 }
 0x190   :  { %3136 = vmatmul.bf16.vlgmr.msrb.gmra.mxu0 %v5874_v21  ;;  %3149 = vmatmul.bf16.vlgmr.msrb.gmra.mxu1 %v5876_v22  ;;  %v2943_v48 = vadd.f32 %v2942_v30, %v2930_v37  ;;  %v2903_v53 = vpop.f32.mrf.mxu2  ;;  %v2916_v54 = vpop.f32.mrf.mxu3  ;;  %v3847_v5 = vor.u32 %v5252_v57, %v3844_v58  ;;  %v5402_v30 = vld [vmem:[#allocation7 + $0x68c] sm:$0xf]  ;;  %v4150_v58 = vld [vmem:[#allocation7 + $0x438] sm:$0xf] }
 0x191   :  { %v2904_v28 = vadd.f32 %v2903_v53, %v628_v46  ;;  %v5378_v37 = vld [vmem:[#allocation7 + $0x5cc] sm:$0xf]  ;;  %v5353_v53 = vld [vmem:[#allocation7 + $0x504] sm:$0xf] }
 0x192   :  { %3155 = vmatpush.bf16.msrb.mxu2 %v4243_v63  ;;  %3168 = vmatpush.bf16.msrb.mxu3 %v5043_v0  ;;  %v4643_v63 = vor.u32 %v5464_v56, %v4642_v55  ;;  %v3742_v0 = vld [vmem:[#allocation7 + $0x110] sm:$0xf]  ;;  %v3345_v9 = vmax.f32 %v2943_v48, 0.0  ;;  %v5151_v48 = vor.u32 %v5590_v36, %v5150_v11  ;;  %v4355_v49 = vor.u32 %v5378_v37, %v4352_v41  ;;  %v5553_v55 = vld [vmem:[#allocation7 + $0xb44] sm:$0xf] }
 0x193   :  { %3181 = vmatpush.bf16.msra.mxu0 %v4247_v6  ;;  %3194 = vmatpush.bf16.msra.mxu1 %v5047_v29  ;;  %v2917_v60 = vadd.f32 %v2916_v54, %v2904_v28  ;;  %v4647_v6 = vor.u32 %v5452_v3, %v4644_v59  ;;  %v5439_v29 = vld [vmem:[#allocation7 + $0x7b0] sm:$0xf0]  ;;  %v3743_v16 = vor.u32 %v5239_v1, %v3742_v0  ;;  %v4252_v54 = vld [vmem:[#allocation7 + $0x564] sm:$0xf0]  ;;  %v5340_v3 = vld [vmem:[#allocation7 + $0x498] sm:$0xf0] }
 0x194   :  { %v4543_v17 = vor.u32 %v5439_v29, %v4542_v2  ;;  %v5052_v56 = vld [vmem:[#allocation7 + $0xba4] sm:$0xf0]  ;;  %v4255_v59 = vor.u32 %v5353_v53, %v4252_v54  ;;  %v5528_v0 = vld [vmem:[#allocation7 + $0xa7c] sm:$0xf]  ;;  %v4952_v1 = vld [vmem:[#allocation7 + $0xadc] sm:$0xf0]  ;;  %v4151_v2 = vor.u32 %v5340_v3, %v4150_v58 }
 0x195   :  { %v2931_v61 = vpop.f32.mrf.mxu0  ;;  %v2944_v62 = vpop.f32.mrf.mxu1  ;;  %v3344_v12 = vmax.f32 %v2917_v60, 0.0  ;;  %v5055_v60 = vor.u32 %v5553_v55, %v5052_v56  ;;  %v4050_v29 = vld [vmem:[#allocation7 + $0x370] sm:$0xf]  ;;  %v5478_v11 = vld [vmem:[#allocation7 + $0x8ec] sm:$0xf]  ;;  %v630_v37 = vperm.slane %v5964_v8, 2 }
 0x196   :  { %3156 = vmatpush.bf16.msrb.mxu2 %v4143_v4  ;;  %3169 = vmatpush.bf16.msrb.mxu3 %v4943_v14  ;;  %v4544_v4 = vld [vmem:[#allocation7 + $0x7b4] sm:$0xf0]  ;;  %v3642_v14 = vld [vmem:[#allocation7 + $0x48] sm:$0xf]  ;;  %v5540_v62 = vld [vmem:[#allocation7 + $0xad8] sm:$0xf0] }
 0x197   :  { %3182 = vmatpush.bf16.msra.mxu0 %v4147_v18  ;;  %3195 = vmatpush.bf16.msra.mxu1 %v4947_v19  ;;  %v5972_v15 = vpack.c.bf16 %v3345_v9, %v3344_v12  ;;  %v5214_v18 = vld [vmem:[#allocation7 + $0xa8] sm:$0xf0]  ;;  %v4442_v19 = vld [vmem:[#allocation7 + $0x688] sm:$0xf]  ;;  %v4547_v23 = vor.u32 %v5427_v13, %v4544_v4  ;;  %v4950_v61 = vld [vmem:[#allocation7 + $0xa78] sm:$0xf]  ;;  %v4955_v9 = vor.u32 %v5528_v0, %v4952_v1 }
 0x198   :  { %v2905_v24 = vpop.f32.mrf.mxu2  ;;  %v2918_v25 = vpop.f32.mrf.mxu3  ;;  %v4850_v12 = vld [vmem:[#allocation7 + $0x9b0] sm:$0xf]  ;;  %v5515_v13 = vld [vmem:[#allocation7 + $0xa10] sm:$0xf0]  ;;  %v4652_v53 = vld [vmem:[#allocation7 + $0x884] sm:$0xf0] }
 0x199   :  { %v5303_v4 = vld [vmem:[#allocation7 + $0x374] sm:$0xf]  ;;  %v5290_v24 = vld [vmem:[#allocation7 + $0x308] sm:$0xf0]  ;;  %v4750_v25 = vld [vmem:[#allocation7 + $0x8e8] sm:$0xf] }
 0x19a   :  { %3157 = vmatpush.bf16.msrb.mxu2 %v4043_v31  ;;  %3170 = vmatpush.bf16.msrb.mxu3 %v4843_v32  ;;  %v4444_v31 = vld [vmem:[#allocation7 + $0x6ec] sm:$0xf0]  ;;  %v4350_v32 = vld [vmem:[#allocation7 + $0x5c8] sm:$0xf]  ;;  %v3750_v58 = vld [vmem:[#allocation7 + $0x118] sm:$0xf] }
 0x19b   :  { %3183 = vmatpush.bf16.msra.mxu0 %v4047_v38  ;;  %3196 = vmatpush.bf16.msra.mxu1 %v4847_v39  ;;  %v3643_v38 = vor.u32 %v5214_v18, %v3642_v14  ;;  %v4443_v39 = vor.u32 %v5414_v35, %v4442_v19  ;;  %v4447_v45 = vor.u32 %v5402_v30, %v4444_v31  ;;  %v4052_v14 = vld [vmem:[#allocation7 + $0x3d4] sm:$0xf0]  ;;  %v5490_v31 = vld [vmem:[#allocation7 + $0x948] sm:$0xf0]  ;;  %v4752_v36 = vld [vmem:[#allocation7 + $0x94c] sm:$0xf0] }
 0x19c   :  { %v4351_v46 = vor.u32 %v5390_v33, %v4350_v32  ;;  %v4051_v35 = vor.u32 %v5315_v10, %v4050_v29  ;;  %v4055_v27 = vor.u32 %v5303_v4, %v4052_v14  ;;  %v5278_v32 = vld [vmem:[#allocation7 + $0x2ac] sm:$0xf]  ;;  %v3952_v33 = vld [vmem:[#allocation7 + $0x30c] sm:$0xf0]  ;;  %v4751_v41 = vor.u32 %v5490_v31, %v4750_v25  ;;  %v5240_v3 = vld [vmem:[#allocation7 + $0x178] sm:$0xf0] }
 0x19d   :  { %v3650_v29 = vld [vmem:[#allocation7 + $0x50] sm:$0xf]  ;;  %v5215_v10 = vld [vmem:[#allocation7 + $0xb0] sm:$0xf0] }
 0x19e   :  { %3158 = vmatpush.bf16.msrb.mxu2 %v3943_v50  ;;  %3171 = vmatpush.bf16.msrb.mxu3 %v4743_v47  ;;  %v4250_v50 = vld [vmem:[#allocation7 + $0x500] sm:$0xf]  ;;  %v5365_v47 = vld [vmem:[#allocation7 + $0x560] sm:$0xf0]  ;;  %v5415_v4 = vld [vmem:[#allocation7 + $0x6f0] sm:$0xf0] }
 0x19f   :  { %3184 = vmatpush.bf16.msra.mxu0 %v3947_v51  ;;  %3197 = vmatpush.bf16.msra.mxu1 %v4747_v52  ;;  %v5050_v51 = vld [vmem:[#allocation7 + $0xb40] sm:$0xf]  ;;  %v5565_v52 = vld [vmem:[#allocation7 + $0xba0] sm:$0xf0]  ;;  %v4251_v57 = vor.u32 %v5365_v47, %v4250_v50  ;;  %v5203_v14 = vld [vmem:[#allocation7 + $0x54] sm:$0xf] }
 0x1a0   :  { %v5051_v28 = vor.u32 %v5565_v52, %v5050_v51  ;;  %v4650_v50 = vld [vmem:[#allocation7 + $0x820] sm:$0xf]  ;;  %v5465_v47 = vld [vmem:[#allocation7 + $0x880] sm:$0xf0]  ;;  %v3852_v51 = vld [vmem:[#allocation7 + $0x244] sm:$0xf0] }
 0x1a1   :  { %v5453_v52 = vld [vmem:[#allocation7 + $0x824] sm:$0xf]  ;;  %v5158_v31 = vld [vmem:[#allocation7 + $0xc10] sm:$0xf] }
 0x1a2   :  { %3159 = vmatpush.bf16.msrb.mxu2 %v3843_v34  ;;  %3172 = vmatpush.bf16.msrb.mxu3 %v4643_v63  ;;  %v5328_v34 = vld [vmem:[#allocation7 + $0x43c] sm:$0xf]  ;;  %v4152_v63 = vld [vmem:[#allocation7 + $0x49c] sm:$0xf0] }
 0x1a3   :  { %3185 = vmatpush.bf16.msra.mxu0 %v3847_v5  ;;  %3198 = vmatpush.bf16.msra.mxu1 %v4647_v6  ;;  %v4951_v5 = vor.u32 %v5540_v62, %v4950_v61  ;;  %v631_v6 = vperm.slane %v5964_v8, 3  ;;  %v4155_v7 = vor.u32 %v5328_v34, %v4152_v63  ;;  %v4655_v61 = vor.u32 %v5453_v52, %v4652_v53  ;;  %v5440_v62 = vld [vmem:[#allocation7 + $0x7b8] sm:$0xf0]  ;;  %v3752_v63 = vld [vmem:[#allocation7 + $0x17c] sm:$0xf0] }
 0x1a4   :  { %v5228_v34 = vld [vmem:[#allocation7 + $0x11c] sm:$0xf]  ;;  %v4260_v52 = vld [vmem:[#allocation7 + $0x56c] sm:$0xf0]  ;;  %v5554_v53 = vld [vmem:[#allocation7 + $0xb4c] sm:$0xf] }
 0x1a6   :  { %3160 = vmatpush.bf16.msrb.mxu2 %v3743_v16  ;;  %3173 = vmatpush.bf16.msrb.mxu3 %v4543_v17  ;;  %v5503_v16 = vld [vmem:[#allocation7 + $0x9b4] sm:$0xf]  ;;  %v4852_v17 = vld [vmem:[#allocation7 + $0xa14] sm:$0xf0] }
 0x1a7   :  { %3186 = vmatpush.bf16.msra.mxu0 %v3747_v20  ;;  %3199 = vmatpush.bf16.msra.mxu1 %v4547_v23  ;;  %v4851_v20 = vor.u32 %v5515_v13, %v4850_v12  ;;  %v3950_v23 = vld [vmem:[#allocation7 + $0x2a8] sm:$0xf]  ;;  %v4855_v30 = vor.u32 %v5503_v16, %v4852_v17  ;;  %v4450_v13 = vld [vmem:[#allocation7 + $0x690] sm:$0xf]  ;;  %v3755_v16 = vor.u32 %v5228_v34, %v3752_v63  ;;  %v5529_v34 = vld [vmem:[#allocation7 + $0xa84] sm:$0xf] }
 0x1a8   :  { %v4960_v63 = vld [vmem:[#allocation7 + $0xae4] sm:$0xf0] }
 0x1aa   :  { %3161 = vmatpush.bf16.msrb.mxu2 %v3643_v38  ;;  %3174 = vmatpush.bf16.msrb.mxu3 %v4443_v39  ;;  %v3951_v39 = vor.u32 %v5290_v24, %v3950_v23  ;;  %v4452_v23 = vld [vmem:[#allocation7 + $0x6f4] sm:$0xf0] }
 0x1ab   :  { %3187 = vmatpush.bf16.msra.mxu0 %v3647_v44  ;;  %3200 = vmatpush.bf16.msra.mxu1 %v4447_v45  ;;  %v3955_v44 = vor.u32 %v5278_v32, %v3952_v33  ;;  %v4755_v45 = vor.u32 %v5478_v11, %v4752_v36  ;;  %v5591_v32 = vld [vmem:[#allocation7 + $0xc70] sm:$0xf0]  ;;  %v3651_v36 = vor.u32 %v5215_v10, %v3650_v29  ;;  %v4858_v10 = vld [vmem:[#allocation7 + $0x9b8] sm:$0xf] }
 0x1ac   :  { %v5379_v33 = vld [vmem:[#allocation7 + $0x5d4] sm:$0xf]  ;;  %v4963_v29 = vor.u32 %v5529_v34, %v4960_v63  ;;  %v5216_v34 = vld [vmem:[#allocation7 + $0xb8] sm:$0xf0]  ;;  %v4458_v63 = vld [vmem:[#allocation7 + $0x698] sm:$0xf] }
 0x1ad   :  { %3162 = vmatmul.bf16.vlgmr.msrb.gmra.mxu2 %v5874_v21  ;;  %3175 = vmatmul.bf16.vlgmr.msrb.gmra.mxu3 %v5876_v22  ;;  %v2981_v18 = vpop.f32.mrf.mxu0  ;;  %v2994_v19 = vpop.f32.mrf.mxu1 }
 0x1ae   :  { %3206 = vmatpush.bf16.msra.mxu2 %v4351_v46  ;;  %3219 = vmatpush.bf16.msra.mxu3 %v5151_v48  ;;  %v2982_v26 = vadd.f32 %v2981_v18, %v631_v6  ;;  %v3471_v6 = vrot.slane %v5972_v15, 3 }
 0x1af   :  { %3232 = vmatpush.bf16.msrb.mxu0 %v4355_v49  ;;  %3245 = vmatpush.bf16.msrb.mxu1 %v5155_v40  ;;  %v5253_v49 = vld [vmem:[#allocation7 + $0x1e4] sm:$0xf] }
 0x1b0   :  { %3188 = vmatmul.bf16.vlgmr.msra.gmra.mxu0 %v5874_v21  ;;  %3201 = vmatmul.bf16.vlgmr.msra.gmra.mxu1 %v5876_v22  ;;  %v2995_v38 = vadd.f32 %v2994_v19, %v2982_v26  ;;  %v2955_v46 = vpop.f32.mrf.mxu2  ;;  %v2968_v48 = vpop.f32.mrf.mxu3  ;;  %v4358_v26 = vld [vmem:[#allocation7 + $0x5d0] sm:$0xf] }
 0x1b1   :  { %v2956_v40 = vadd.f32 %v2955_v46, %v630_v37  ;;  %v4451_v37 = vor.u32 %v5415_v4, %v4450_v13  ;;  %v4258_v46 = vld [vmem:[#allocation7 + $0x508] sm:$0xf]  ;;  %v5504_v13 = vld [vmem:[#allocation7 + $0x9bc] sm:$0xf]  ;;  %v4860_v4 = vld [vmem:[#allocation7 + $0xa1c] sm:$0xf0] }
 0x1b2   :  { %3207 = vmatpush.bf16.msra.mxu2 %v4251_v57  ;;  %3220 = vmatpush.bf16.msra.mxu3 %v5051_v28  ;;  %v3851_v57 = vor.u32 %v5265_v43, %v3850_v42  ;;  %v4651_v28 = vor.u32 %v5465_v47, %v4650_v50  ;;  %v3347_v0 = vmax.f32 %v2995_v38, 0.0  ;;  %v4360_v38 = vld [vmem:[#allocation7 + $0x634] sm:$0xf0] }
 0x1b3   :  { %3233 = vmatpush.bf16.msrb.mxu0 %v4255_v59  ;;  %3246 = vmatpush.bf16.msrb.mxu1 %v5055_v60  ;;  %v2969_v54 = vadd.f32 %v2968_v48, %v2956_v40  ;;  %v4550_v59 = vld [vmem:[#allocation7 + $0x758] sm:$0xf]  ;;  %v3855_v60 = vor.u32 %v5253_v49, %v3852_v51  ;;  %v5366_v48 = vld [vmem:[#allocation7 + $0x568] sm:$0xf0]  ;;  %v4363_v50 = vor.u32 %v5379_v33, %v4360_v38  ;;  %v5058_v49 = vld [vmem:[#allocation7 + $0xb48] sm:$0xf] }
 0x1b4   :  { %v4551_v12 = vor.u32 %v5440_v62, %v4550_v59  ;;  %v5566_v40 = vld [vmem:[#allocation7 + $0xba8] sm:$0xf0]  ;;  %v4958_v59 = vld [vmem:[#allocation7 + $0xa80] sm:$0xf]  ;;  %v4160_v62 = vld [vmem:[#allocation7 + $0x4a4] sm:$0xf0] }
 0x1b5   :  { %v2983_v55 = vpop.f32.mrf.mxu0  ;;  %v2996_v56 = vpop.f32.mrf.mxu1  ;;  %v3346_v1 = vmax.f32 %v2969_v54, 0.0  ;;  %v5354_v51 = vld [vmem:[#allocation7 + $0x50c] sm:$0xf]  ;;  %v5060_v54 = vld [vmem:[#allocation7 + $0xbac] sm:$0xf0] }
 0x1b6   :  { %3208 = vmatpush.bf16.msra.mxu2 %v4151_v2  ;;  %3221 = vmatpush.bf16.msra.mxu3 %v4951_v5  ;;  %v5428_v2 = vld [vmem:[#allocation7 + $0x75c] sm:$0xf]  ;;  %v4552_v5 = vld [vmem:[#allocation7 + $0x7bc] sm:$0xf0]  ;;  %v4259_v55 = vor.u32 %v5366_v48, %v4258_v46  ;;  %v5059_v56 = vor.u32 %v5566_v40, %v5058_v49  ;;  %v5454_v46 = vld [vmem:[#allocation7 + $0x82c] sm:$0xf] }
 0x1b7   :  { %3234 = vmatpush.bf16.msrb.mxu0 %v4155_v7  ;;  %3247 = vmatpush.bf16.msrb.mxu1 %v4955_v9  ;;  %v3443_v7 = vpack.c.bf16 %v3347_v0, %v3346_v1  ;;  %v3751_v9 = vor.u32 %v5240_v3, %v3750_v58  ;;  %v4555_v17 = vor.u32 %v5428_v2, %v4552_v5  ;;  %v4058_v2 = vld [vmem:[#allocation7 + $0x378] sm:$0xf]  ;;  %v5316_v5 = vld [vmem:[#allocation7 + $0x3d8] sm:$0xf0]  ;;  %v4660_v48 = vld [vmem:[#allocation7 + $0x88c] sm:$0xf0] }
 0x1b8   :  { %v2957_v18 = vpop.f32.mrf.mxu2  ;;  %v2970_v19 = vpop.f32.mrf.mxu3  ;;  %v4263_v58 = vor.u32 %v5354_v51, %v4260_v52  ;;  %v5063_v3 = vor.u32 %v5554_v53, %v5060_v54  ;;  %v3758_v51 = vld [vmem:[#allocation7 + $0x120] sm:$0xf]  ;;  %v5241_v52 = vld [vmem:[#allocation7 + $0x180] sm:$0xf0]  ;;  %v4663_v54 = vor.u32 %v5454_v46, %v4660_v48 }
 0x1b9   :  { %v3472_v24 = vrot.slane %v3443_v7, 6  ;;  %v3473_v25 = vrot.slane %v3443_v7, 1  ;;  %v5516_v7 = vld [vmem:[#allocation7 + $0xa18] sm:$0xf0]  ;;  %v3958_v19 = vld [vmem:[#allocation7 + $0x2b0] sm:$0xf] }
 0x1ba   :  { %3209 = vmatpush.bf16.msra.mxu2 %v4051_v35  ;;  %3222 = vmatpush.bf16.msra.mxu3 %v4851_v20  ;;  %v3652_v35 = vld [vmem:[#allocation7 + $0xb4] sm:$0xf0]  ;;  %v5403_v20 = vld [vmem:[#allocation7 + $0x694] sm:$0xf]  ;;  %v4859_v18 = vor.u32 %v5516_v7, %v4858_v10  ;;  %v3660_v10 = vld [vmem:[#allocation7 + $0xbc] sm:$0xf0] }
 0x1bb   :  { %3235 = vmatpush.bf16.msrb.mxu0 %v4055_v27  ;;  %3248 = vmatpush.bf16.msrb.mxu1 %v4855_v30  ;;  %v5391_v27 = vld [vmem:[#allocation7 + $0x630] sm:$0xf0]  ;;  %v3509_v30 = vsel %vm3486_vm2, %v5972_v15, %v3471_v6  ;;  %v3512_v11 = vsel %vm3490_vm3, %v3472_v24, %v3473_v25  ;;  %v3655_v43 = vor.u32 %v5203_v14, %v3652_v35  ;;  %v4758_v24 = vld [vmem:[#allocation7 + $0x8f0] sm:$0xf]  ;;  %v5404_v7 = vld [vmem:[#allocation7 + $0x69c] sm:$0xf] }
 0x1bc   :  { %v5985_v42 = vsel %vm147_vm0, %v3509_v30, %v3512_v11  ;;  %v4359_v15 = vor.u32 %v5391_v27, %v4358_v26  ;;  %v5291_v35 = vld [vmem:[#allocation7 + $0x310] sm:$0xf0]  ;;  %v3960_v27 = vld [vmem:[#allocation7 + $0x314] sm:$0xf0]  ;;  %v3858_v11 = vld [vmem:[#allocation7 + $0x1e8] sm:$0xf] }
 0x1bd   :  { %v5491_v25 = vld [vmem:[#allocation7 + $0x950] sm:$0xf0]  ;;  %v5598_v48 = vld [vmem:[#allocation10 + $0x28] sm:$0xff] }
 0x1be   :  { %3210 = vmatpush.bf16.msra.mxu2 %v3951_v39  ;;  %3223 = vmatpush.bf16.msra.mxu3 %v4751_v41  ;;  %v5579_v39 = vld [vmem:[#allocation7 + $0xc14] sm:$0xf]  ;;  %v5160_v41 = vld [vmem:[#allocation7 + $0xc74] sm:$0xf0]  ;;  %v4759_v33 = vor.u32 %v5491_v25, %v4758_v24 }
 0x1bf   :  { %3236 = vmatpush.bf16.msrb.mxu0 %v3955_v44  ;;  %3249 = vmatpush.bf16.msrb.mxu1 %v4755_v45  ;;  %v4455_v44 = vor.u32 %v5403_v20, %v4452_v23  ;;  %v5159_v45 = vor.u32 %v5591_v32, %v5158_v31  ;;  %v5163_v47 = vor.u32 %v5579_v39, %v5160_v41  ;;  %v5279_v26 = vld [vmem:[#allocation7 + $0x2b4] sm:$0xf]  ;;  %v4760_v31 = vld [vmem:[#allocation7 + $0x954] sm:$0xf0] }
 0x1c0   :  { %v4863_v23 = vor.u32 %v5504_v13, %v4860_v4  ;;  %v5479_v30 = vld [vmem:[#allocation7 + $0x8f4] sm:$0xf]  ;;  %v3959_v32 = vor.u32 %v5291_v35, %v3958_v19  ;;  %v5392_v4 = vld [vmem:[#allocation7 + $0x638] sm:$0xf0] }
 0x1c1   :  { %v4763_v38 = vor.u32 %v5479_v30, %v4760_v31  ;;  %v5367_v30 = vld [vmem:[#allocation7 + $0x570] sm:$0xf0]  ;;  %v5066_v31 = vld [vmem:[#allocation7 + $0xb50] sm:$0xf] }
 0x1c2   :  { %3211 = vmatpush.bf16.msra.mxu2 %v3851_v57  ;;  %3224 = vmatpush.bf16.msra.mxu3 %v4651_v28  ;;  %v4158_v57 = vld [vmem:[#allocation7 + $0x440] sm:$0xf]  ;;  %v5341_v28 = vld [vmem:[#allocation7 + $0x4a0] sm:$0xf0] }
 0x1c3   :  { %3237 = vmatpush.bf16.msrb.mxu0 %v3855_v60  ;;  %3250 = vmatpush.bf16.msrb.mxu1 %v4655_v61  ;;  %v5541_v60 = vld [vmem:[#allocation7 + $0xae0] sm:$0xf0]  ;;  %v4159_v0 = vor.u32 %v5341_v28, %v4158_v57  ;;  %v3760_v28 = vld [vmem:[#allocation7 + $0x184] sm:$0xf0] }
 0x1c4   :  { %v5329_v61 = vld [vmem:[#allocation7 + $0x444] sm:$0xf]  ;;  %v4959_v1 = vor.u32 %v5541_v60, %v4958_v59  ;;  %v3374_v59 = vld [vmem:[#allocation10 + $0x30] sm:$0x3]  ;;  %v3759_v60 = vor.u32 %v5241_v52, %v3758_v51  ;;  %v4866_v52 = vld [vmem:[#allocation7 + $0x9c0] sm:$0xf] }
 0x1c5   :  { %v4163_v6 = vor.u32 %v5329_v61, %v4160_v62  ;;  %v5229_v57 = vld [vmem:[#allocation7 + $0x124] sm:$0xf]  ;;  %v3658_v62 = vld [vmem:[#allocation7 + $0x58] sm:$0xf]  ;;  %v3404_v13 = vunpack.c.l.b16 %v3374_v59  ;;  %v5292_v59 = vld [vmem:[#allocation7 + $0x318] sm:$0xf0] }
 0x1c6   :  { %3212 = vmatpush.bf16.msra.mxu2 %v3751_v9  ;;  %3225 = vmatpush.bf16.msra.mxu3 %v4551_v12  ;;  %v5304_v9 = vld [vmem:[#allocation7 + $0x37c] sm:$0xf]  ;;  %v4060_v12 = vld [vmem:[#allocation7 + $0x3dc] sm:$0xf0]  ;;  %v3659_v19 = vor.u32 %v5216_v34, %v3658_v62  ;;  %v5317_v51 = vld [vmem:[#allocation7 + $0x3e0] sm:$0xf0] }
 0x1c7   :  { %3238 = vmatpush.bf16.msrb.mxu0 %v3755_v16  ;;  %3251 = vmatpush.bf16.msrb.mxu1 %v4555_v17  ;;  %v4059_v17 = vor.u32 %v5316_v5, %v4058_v2  ;;  %v4063_v20 = vor.u32 %v5304_v9, %v4060_v12  ;;  %v4460_v9 = vld [vmem:[#allocation7 + $0x6fc] sm:$0xf0]  ;;  %v4366_v12 = vld [vmem:[#allocation7 + $0x5d8] sm:$0xf]  ;;  %v634_v34 = vperm.slane %v5964_v8, 6 }
 0x1c8   :  { %v4367_v24 = vor.u32 %v5392_v4, %v4366_v12  ;;  %v5595_v4 = vld [vmem:[#allocation10 + $0x10] sm:$0xff] }
 0x1ca   :  { %3213 = vmatpush.bf16.msra.mxu2 %v3651_v36  ;;  %3226 = vmatpush.bf16.msra.mxu3 %v4451_v37  ;;  %v5266_v36 = vld [vmem:[#allocation7 + $0x248] sm:$0xf0]  ;;  %v3963_v37 = vor.u32 %v5279_v26, %v3960_v27  ;;  %v4266_v26 = vld [vmem:[#allocation7 + $0x510] sm:$0xf]  ;;  %v3411_v27 = vpack.c.b16 %v3404_v13, %v3404_v13 }
 0x1cb   :  { %3239 = vmatpush.bf16.msrb.mxu0 %v3655_v43  ;;  %3252 = vmatpush.bf16.msrb.mxu1 %v4455_v44  ;;  %v4658_v43 = vld [vmem:[#allocation7 + $0x828] sm:$0xf]  ;;  %v5466_v44 = vld [vmem:[#allocation7 + $0x888] sm:$0xf0]  ;;  %v3859_v49 = vor.u32 %v5266_v36, %v3858_v11  ;;  %v633_v11 = vperm.slane %v5964_v8, 5  ;;  %v4267_v36 = vor.u32 %v5367_v30, %v4266_v26 }
 0x1cc   :  { %v4659_v40 = vor.u32 %v5466_v44, %v4658_v43  ;;  %v4166_v43 = vld [vmem:[#allocation7 + $0x448] sm:$0xf]  ;;  %v5342_v44 = vld [vmem:[#allocation7 + $0x4a8] sm:$0xf0] }
 0x1cd   :  { %3214 = vmatmul.bf16.vlgmr.msra.gmra.mxu2 %v5874_v21  ;;  %3227 = vmatmul.bf16.vlgmr.msra.gmra.mxu3 %v5876_v22  ;;  %v5991_v14 = vpop.f32.mrf.mxu0  ;;  %v5993_v16 = vpop.f32.mrf.mxu1 }
 0x1ce   :  { %3258 = vmatpush.bf16.msrb.mxu2 %v4359_v15  ;;  %3271 = vmatpush.bf16.msrb.mxu3 %v5159_v45  ;;  %v5254_v15 = vld [vmem:[#allocation7 + $0x1ec] sm:$0xf]  ;;  %v3860_v45 = vld [vmem:[#allocation7 + $0x24c] sm:$0xf0] }
 0x1cf   :  { %3284 = vmatpush.bf16.msra.mxu0 %v4363_v50  ;;  %3297 = vmatpush.bf16.msra.mxu1 %v5163_v47  ;;  %v3863_v53 = vor.u32 %v5254_v15, %v3860_v45  ;;  %v4966_v15 = vld [vmem:[#allocation7 + $0xa88] sm:$0xf]  ;;  %v5542_v45 = vld [vmem:[#allocation7 + $0xae8] sm:$0xf0] }
 0x1d0   :  { %3240 = vmatmul.bf16.vlgmr.msrb.gmra.mxu0 %v5874_v21  ;;  %3253 = vmatmul.bf16.vlgmr.msrb.gmra.mxu1 %v5876_v22  ;;  %v5995_v39 = vpop.f32.mrf.mxu2  ;;  %v5997_v41 = vpop.f32.mrf.mxu3 }
 0x1d2   :  { %3259 = vmatpush.bf16.msrb.mxu2 %v4259_v55  ;;  %3272 = vmatpush.bf16.msrb.mxu3 %v5059_v56  ;;  %v4558_v55 = vld [vmem:[#allocation7 + $0x760] sm:$0xf]  ;;  %v5441_v56 = vld [vmem:[#allocation7 + $0x7c0] sm:$0xf0] }
 0x1d3   :  { %3285 = vmatpush.bf16.msra.mxu0 %v4263_v58  ;;  %3298 = vmatpush.bf16.msra.mxu1 %v5063_v3  ;;  %v5429_v58 = vld [vmem:[#allocation7 + $0x764] sm:$0xf]  ;;  %v4560_v3 = vld [vmem:[#allocation7 + $0x7c4] sm:$0xf0]  ;;  %v4559_v61 = vor.u32 %v5441_v56, %v4558_v55  ;;  %v5597_v56 = vld [vmem:[#allocation10 + $0x20] sm:$0xff] }
 0x1d5   :  { %v3035_v50 = vpop.f32.mrf.mxu0  ;;  %v3048_v47 = vpop.f32.mrf.mxu1 }
 0x1d6   :  { %3260 = vmatpush.bf16.msrb.mxu2 %v4159_v0  ;;  %3273 = vmatpush.bf16.msrb.mxu3 %v4959_v1  ;;  %v3763_v0 = vor.u32 %v5229_v57, %v3760_v28  ;;  %v4563_v1 = vor.u32 %v5429_v58, %v4560_v3  ;;  %v3034_v50 = vadd.f32 %v5991_v14, %v633_v11  ;;  %v3966_v3 = vld [vmem:[#allocation7 + $0x2b8] sm:$0xf] }
 0x1d7   :  { %3286 = vmatpush.bf16.msra.mxu0 %v4163_v6  ;;  %3299 = vmatpush.bf16.msra.mxu1 %v4963_v29  ;;  %v5416_v6 = vld [vmem:[#allocation7 + $0x6f8] sm:$0xf0]  ;;  %v4167_v47 = vor.u32 %v5342_v44, %v4166_v43  ;;  %v5217_v44 = vld [vmem:[#allocation7 + $0xc0] sm:$0xf0] }
 0x1d8   :  { %v3009_v2 = vpop.f32.mrf.mxu2  ;;  %v3022_v5 = vpop.f32.mrf.mxu3  ;;  %v5204_v29 = vld [vmem:[#allocation7 + $0x5c] sm:$0xf]  ;;  %v4459_v35 = vor.u32 %v5416_v6, %v4458_v63 }
 0x1d9   :  { %v3866_v2 = vld [vmem:[#allocation7 + $0x1f0] sm:$0xf] }
 0x1da   :  { %3261 = vmatpush.bf16.msrb.mxu2 %v4059_v17  ;;  %3274 = vmatpush.bf16.msrb.mxu3 %v4859_v18  ;;  %v5166_v17 = vld [vmem:[#allocation7 + $0xc18] sm:$0xf]  ;;  %v5592_v18 = vld [vmem:[#allocation7 + $0xc78] sm:$0xf0] }
 0x1db   :  { %3287 = vmatpush.bf16.msra.mxu0 %v4063_v20  ;;  %3300 = vmatpush.bf16.msra.mxu1 %v4863_v23  ;;  %v3663_v20 = vor.u32 %v5204_v29, %v3660_v10  ;;  %v4463_v23 = vor.u32 %v5404_v7, %v4460_v9  ;;  %v5167_v25 = vor.u32 %v5592_v18, %v5166_v17  ;;  %v5267_v29 = vld [vmem:[#allocation7 + $0x250] sm:$0xf0]  ;;  %v4666_v10 = vld [vmem:[#allocation7 + $0x830] sm:$0xf] }
 0x1dc   :  { %v5467_v7 = vld [vmem:[#allocation7 + $0x890] sm:$0xf0] }
 0x1de   :  { %3262 = vmatpush.bf16.msrb.mxu2 %v3959_v32  ;;  %3275 = vmatpush.bf16.msrb.mxu3 %v4759_v33  ;;  %v5567_v32 = vld [vmem:[#allocation7 + $0xbb0] sm:$0xf0]  ;;  %v632_v33 = vperm.slane %v5964_v8, 4 }
 0x1df   :  { %3288 = vmatpush.bf16.msra.mxu0 %v3963_v37  ;;  %3301 = vmatpush.bf16.msra.mxu1 %v4763_v38  ;;  %v5067_v37 = vor.u32 %v5567_v32, %v5066_v31  ;;  %v3423_v38 = vsel %vm147_vm0, %v3411_v27, 0  ;;  %v5594_v32 = vld [vmem:[#allocation10 + $0x8] sm:$0xff] }
 0x1e0   :  { %v3008_v46 = vadd.f32 %v5995_v39, %v632_v33  ;;  %v3047_v39 = vadd.f32 %v5993_v16, %v3034_v50  ;;  %v3967_v16 = vor.u32 %v5292_v59, %v3966_v3 }
 0x1e2   :  { %3263 = vmatpush.bf16.msrb.mxu2 %v3859_v49  ;;  %3276 = vmatpush.bf16.msrb.mxu3 %v4659_v40  ;;  %v4967_v49 = vor.u32 %v5542_v45, %v4966_v15  ;;  %v4066_v40 = vld [vmem:[#allocation7 + $0x380] sm:$0xf]  ;;  %v3021_v55 = vadd.f32 %v5997_v41, %v3008_v46  ;;  %v5596_v41 = vld [vmem:[#allocation10 + $0x18] sm:$0xff]  ;;  %v5417_v45 = vld [vmem:[#allocation7 + $0x700] sm:$0xf0] }
 0x1e3   :  { %3289 = vmatpush.bf16.msra.mxu0 %v3863_v53  ;;  %3302 = vmatpush.bf16.msra.mxu1 %v4663_v54  ;;  %v5517_v53 = vld [vmem:[#allocation7 + $0xa20] sm:$0xf0]  ;;  %v635_v54 = vperm.slane %v5964_v8, 7  ;;  %v4067_v28 = vor.u32 %v5317_v51, %v4066_v40  ;;  %v4466_v15 = vld [vmem:[#allocation7 + $0x6a0] sm:$0xf] }
 0x1e4   :  { %v4867_v58 = vor.u32 %v5517_v53, %v4866_v52  ;;  %v3348_v63 = vmax.f32 %v3021_v55, 0.0  ;;  %v4467_v51 = vor.u32 %v5417_v45, %v4466_v15  ;;  %v6025_v55 = vld [vmem:[#allocation9 + $0x10] sm:$0xff] }
 0x1e5   :  { %v643_v45 = vperm.slane %v6025_v55, 7 }
 0x1e6   :  { %3264 = vmatpush.bf16.msrb.mxu2 %v3759_v60  ;;  %3277 = vmatpush.bf16.msrb.mxu3 %v4559_v61  ;;  %v4766_v60 = vld [vmem:[#allocation7 + $0x8f8] sm:$0xf]  ;;  %v5492_v61 = vld [vmem:[#allocation7 + $0x958] sm:$0xf0] }
 0x1e7   :  { %3290 = vmatpush.bf16.msra.mxu0 %v3763_v0  ;;  %3303 = vmatpush.bf16.msra.mxu1 %v4563_v1  ;;  %v3349_v0 = vmax.f32 %v3047_v39, 0.0  ;;  %v4767_v1 = vor.u32 %v5492_v61, %v4766_v60 }
 0x1e9   :  { %v3444_v13 = vpack.c.bf16 %v3349_v0, %v3348_v63  ;;  %v639_v0 = vperm.slane %v6025_v55, 3 }
 0x1ea   :  { %3265 = vmatpush.bf16.msrb.mxu2 %v3659_v19  ;;  %3278 = vmatpush.bf16.msrb.mxu3 %v4459_v35  ;;  %v3867_v19 = vor.u32 %v5267_v29, %v3866_v2  ;;  %v4667_v35 = vor.u32 %v5467_v7, %v4666_v10 }
 0x1eb   :  { %3291 = vmatpush.bf16.msra.mxu0 %v3663_v20  ;;  %3304 = vmatpush.bf16.msra.mxu1 %v4463_v23  ;;  %v3766_v20 = vld [vmem:[#allocation7 + $0x128] sm:$0xf]  ;;  %v5242_v23 = vld [vmem:[#allocation7 + $0x188] sm:$0xf0]  ;;  %v3474_v30 = vrot.slane %v3444_v13, 4  ;;  %v3475_v31 = vrot.slane %v3444_v13, 7 }
 0x1ec   :  { %v3767_v11 = vor.u32 %v5242_v23, %v3766_v20 }
 0x1ed   :  { %3266 = vmatmul.bf16.vlgmr.msrb.gmra.mxu2 %v5874_v21  ;;  %3279 = vmatmul.bf16.vlgmr.msrb.gmra.mxu3 %v5876_v22  ;;  %v3085_v57 = vpop.f32.mrf.mxu0  ;;  %v3098_v14 = vpop.f32.mrf.mxu1  ;;  %v3516_v50 = vsel %vm3495_vm4, %v3474_v30, %v3475_v31 }
 0x1ee   :  { %3310 = vmatpush.bf16.msra.mxu2 %v4367_v24  ;;  %3323 = vmatpush.bf16.msra.mxu3 %v5167_v25  ;;  %v3086_v62 = vadd.f32 %v3085_v57, %v635_v54  ;;  %v4566_v24 = vld [vmem:[#allocation7 + $0x768] sm:$0xf]  ;;  %v5442_v25 = vld [vmem:[#allocation7 + $0x7c8] sm:$0xf0]  ;;  %v3361_v54 = vld [vmem:[%s6057_s5] sm:$0x1] }
 0x1ef   :  { %3292 = vmatmul.bf16.vlgmr.msra.gmra.mxu0 %v5874_v21  ;;  %3305 = vmatmul.bf16.vlgmr.msra.gmra.mxu1 %v5876_v22 }
 0x1f0   :  { %3426 = vmatpush.bf16.msrb.mxu0 %v3423_v38  ;;  %v3059_v5 = vpop.f32.mrf.mxu2  ;;  %v3072_v6 = vpop.f32.mrf.mxu3  ;;  %v3099_v9 = vadd.f32 %v3098_v14, %v3086_v62  ;;  %v636_v14 = vperm.slane %v6025_v55, 0 }
 0x1f1   :  { %v3060_v12 = vadd.f32 %v3059_v5, %v634_v34  ;;  %v638_v5 = vperm.slane %v6025_v55, 2 }
 0x1f2   :  { %3311 = vmatpush.bf16.msra.mxu2 %v4267_v36  ;;  %3324 = vmatpush.bf16.msra.mxu3 %v5067_v37  ;;  %v3351_v26 = vmax.f32 %v3099_v9, 0.0  ;;  %v4567_v36 = vor.u32 %v5442_v25, %v4566_v24  ;;  %v3666_v37 = vld [vmem:[#allocation7 + $0x60] sm:$0xf] }
 0x1f3   :  { %v3073_v8 = vadd.f32 %v3072_v6, %v3060_v12  ;;  %v3667_v40 = vor.u32 %v5217_v44, %v3666_v37 }
 0x1f4   :  { %3427 = vmatpush.bf16.msrb.mxu0 %v5598_v48 }
 0x1f5   :  { %v3087_v17 = vpop.f32.mrf.mxu0  ;;  %v3100_v18 = vpop.f32.mrf.mxu1  ;;  %v3350_v27 = vmax.f32 %v3073_v8, 0.0 }
 0x1f6   :  { %3312 = vmatpush.bf16.msra.mxu2 %v4167_v47  ;;  %3325 = vmatpush.bf16.msra.mxu3 %v4967_v49  ;;  %v5593_v47 = vld [vmem:[#allocation10] sm:$0xff] }
 0x1f7   :  { %v3445_v33 = vpack.c.bf16 %v3351_v26, %v3350_v27 }
 0x1f8   :  { %3428 = vmatpush.bf16.msrb.mxu0 %v5597_v56  ;;  %v3061_v38 = vpop.f32.mrf.mxu2  ;;  %v3074_v43 = vpop.f32.mrf.mxu3 }
 0x1f9   :  { %v3476_v46 = vrot.slane %v3445_v33, 2  ;;  %v3477_v48 = vrot.slane %v3445_v33, 5  ;;  %v640_v38 = vperm.slane %v6025_v55, 4  ;;  %v641_v43 = vperm.slane %v6025_v55, 5 }
 0x1fa   :  { %3313 = vmatpush.bf16.msra.mxu2 %v4067_v28  ;;  %3326 = vmatpush.bf16.msra.mxu3 %v4867_v58 }
 0x1fb   :  { %v3519_v49 = vsel %vm3499_vm5, %v3476_v46, %v3477_v48 }
 0x1fc   :  { %3429 = vmatpush.bf16.msrb.mxu0 %v5596_v41  ;;  %v3520_v52 = vsel %vm3503_vm6, %v3516_v50, %v3519_v49 }
 0x1fd   :  { %v3521_v53 = vsel %vm3505_vm7, %v5985_v42, %v3520_v52  ;;  %v637_v42 = vperm.slane %v6025_v55, 1 }
 0x1fe   :  { %3314 = vmatpush.bf16.msra.mxu2 %v3967_v16  ;;  %3327 = vmatpush.bf16.msra.mxu3 %v4767_v1  ;;  %3545 = vst [vmem:[%s6060_s8 + $0x8] sm:$0xff] %v3521_v53 }
 0x200   :  { %3430 = vmatpush.bf16.msrb.mxu0 %v5595_v4 }
 0x202   :  { %3315 = vmatpush.bf16.msra.mxu2 %v3867_v19  ;;  %3328 = vmatpush.bf16.msra.mxu3 %v4667_v35 }
 0x204   :  { %3431 = vmatpush.bf16.msrb.mxu0 %v5594_v32 }
 0x206   :  { %3316 = vmatpush.bf16.msra.mxu2 %v3767_v11  ;;  %3329 = vmatpush.bf16.msra.mxu3 %v4567_v36 }
 0x208   :  { %3432 = vmatpush.bf16.msrb.mxu0 %v5593_v47 }
 0x20a   :  { %3317 = vmatpush.bf16.msra.mxu2 %v3667_v40  ;;  %3330 = vmatpush.bf16.msra.mxu3 %v4467_v51  ;;  %v642_v40 = vperm.slane %v6025_v55, 6 }
 0x20b   :  { %5192 = vmatmul.msk.bf16.vlgmr.msrb.gmra.mxu0 %vm3418_vm8, %v3361_v54 }
 0x20d   :  { %3318 = vmatmul.bf16.vlgmr.msra.gmra.mxu2 %v5874_v21  ;;  %3331 = vmatmul.bf16.vlgmr.msra.gmra.mxu3 %v5876_v22  ;;  %v3137_v56 = vpop.f32.mrf.mxu0  ;;  %v3150_v39 = vpop.f32.mrf.mxu1 }
 0x20e   :  { %v3138_v57 = vadd.f32 %v3137_v56, %v637_v42 }
 0x210   :  { %v3151_v28 = vadd.f32 %v3150_v39, %v3138_v57  ;;  %v3111_v58 = vpop.f32.mrf.mxu2  ;;  %v3124_v3 = vpop.f32.mrf.mxu3 }
 0x211   :  { %v3112_v59 = vadd.f32 %v3111_v58, %v636_v14 }
 0x212   :  { %v3353_v34 = vmax.f32 %v3151_v28, 0.0 }
 0x213   :  { %v3125_v60 = vadd.f32 %v3124_v3, %v3112_v59 }
 0x215   :  { %v3139_v61 = vpop.f32.mrf.mxu0  ;;  %v3152_v62 = vpop.f32.mrf.mxu1  ;;  %v3352_v21 = vmax.f32 %v3125_v60, 0.0 }
 0x217   :  { %v3446_v63 = vpack.c.bf16 %v3353_v34, %v3352_v21 }
 0x218   :  { %v3113_v22 = vpop.f32.mrf.mxu2  ;;  %v3126_v41 = vpop.f32.mrf.mxu3 }
 0x219   :  { %v3478_v17 = vrot.slane %v3446_v63, 3 }
 0x21b   :  { %v3524_v24 = vsel %vm3486_vm2, %v3446_v63, %v3478_v17 }
 0x22d   :  { %v3189_v16 = vpop.f32.mrf.mxu0  ;;  %v3202_v1 = vpop.f32.mrf.mxu1 }
 0x22e   :  { %v3190_v2 = vadd.f32 %v3189_v16, %v639_v0  ;;  %v5610_v16 = vld [vmem:[#allocation12] ss:$0 sm:$0xff] }
 0x230   :  { %v3203_v6 = vadd.f32 %v3202_v1, %v3190_v2  ;;  %v3163_v29 = vpop.f32.mrf.mxu2  ;;  %v3176_v10 = vpop.f32.mrf.mxu3 }
 0x231   :  { %v3164_v7 = vadd.f32 %v3163_v29, %v638_v5 }
 0x232   :  { %v3355_v4 = vmax.f32 %v3203_v6, 0.0  ;;  %v5611_v6 = vld [vmem:[#allocation9 + $0x18] ss:$0 sm:$0xff] }
 0x233   :  { %v3177_v9 = vadd.f32 %v3176_v10, %v3164_v7 }
 0x235   :  { %v3191_v12 = vpop.f32.mrf.mxu0  ;;  %v3204_v13 = vpop.f32.mrf.mxu1  ;;  %v3354_v8 = vmax.f32 %v3177_v9, 0.0 }
 0x237   :  { %v3447_v18 = vpack.c.bf16 %v3355_v4, %v3354_v8 }
 0x238   :  { %v3165_v19 = vpop.f32.mrf.mxu2  ;;  %v3178_v35 = vpop.f32.mrf.mxu3 }
 0x239   :  { %v3479_v20 = vrot.slane %v3447_v18, 6  ;;  %v3480_v23 = vrot.slane %v3447_v18, 1 }
 0x23b   :  { %v3527_v25 = vsel %vm3490_vm3, %v3479_v20, %v3480_v23 }
 0x23c   :  { %v3528_v26 = vsel %vm147_vm0, %v3524_v24, %v3527_v25 }
 0x24d   :  { %v3241_v27 = vpop.f32.mrf.mxu0  ;;  %v3254_v30 = vpop.f32.mrf.mxu1 }
 0x24e   :  { %v3242_v15 = vadd.f32 %v3241_v27, %v641_v43 }
 0x250   :  { %v3215_v31 = vpop.f32.mrf.mxu2  ;;  %v3228_v32 = vpop.f32.mrf.mxu3  ;;  %v3255_v47 = vadd.f32 %v3254_v30, %v3242_v15 }
 0x251   :  { %v3216_v44 = vadd.f32 %v3215_v31, %v640_v38 }
 0x252   :  { %v3357_v54 = vmax.f32 %v3255_v47, 0.0 }
 0x253   :  { %v3229_v46 = vadd.f32 %v3228_v32, %v3216_v44 }
 0x255   :  { %v3243_v33 = vpop.f32.mrf.mxu0  ;;  %v3256_v11 = vpop.f32.mrf.mxu1  ;;  %v3356_v51 = vmax.f32 %v3229_v46, 0.0 }
 0x257   :  { %v3448_v39 = vpack.c.bf16 %v3357_v54, %v3356_v51 }
 0x258   :  { %v3217_v36 = vpop.f32.mrf.mxu2  ;;  %v3230_v37 = vpop.f32.mrf.mxu3 }
 0x259   :  { %v3481_v59 = vrot.slane %v3448_v39, 4  ;;  %v3482_v60 = vrot.slane %v3448_v39, 7 }
 0x25b   :  { %v3531_v55 = vsel %vm3495_vm4, %v3481_v59, %v3482_v60 }
 0x26c   :  { %v3293_v48 = vpop.f32.mrf.mxu0  ;;  %v3306_v50 = vpop.f32.mrf.mxu1 }
 0x26d   :  { %v3294_v49 = vadd.f32 %v3293_v48, %v643_v45 }
 0x26f   :  { %v3307_v42 = vadd.f32 %v3306_v50, %v3294_v49 }
 0x270   :  { %v3267_v52 = vpop.f32.mrf.mxu2  ;;  %v3280_v53 = vpop.f32.mrf.mxu3 }
 0x271   :  { %v3268_v56 = vadd.f32 %v3267_v52, %v642_v40  ;;  %v3359_v58 = vmax.f32 %v3307_v42, 0.0 }
 0x273   :  { %v3281_v57 = vadd.f32 %v3280_v53, %v3268_v56 }
 0x274   :  { %v3295_v14 = vpop.f32.mrf.mxu0  ;;  %v3308_v28 = vpop.f32.mrf.mxu1 }
 0x275   :  { %v3358_v3 = vmax.f32 %v3281_v57, 0.0 }
 0x277   :  { %v3449_v61 = vpack.c.bf16 %v3359_v58, %v3358_v3 }
 0x278   :  { %v3269_v62 = vpop.f32.mrf.mxu2  ;;  %v3282_v34 = vpop.f32.mrf.mxu3 }
 0x279   :  { %v3483_v21 = vrot.slane %v3449_v61, 2  ;;  %v3484_v63 = vrot.slane %v3449_v61, 5 }
 0x27b   :  { %v3534_v22 = vsel %vm3499_vm5, %v3483_v21, %v3484_v63 }
 0x27c   :  { %v3535_v41 = vsel %vm3503_vm6, %v3531_v55, %v3534_v22 }
 0x27d   :  { %v3536_v0 = vsel %vm3505_vm7, %v3528_v26, %v3535_v41 }
 0x27e   :  { %3546 = vst [vmem:[%s6060_s8 + $0x10] sm:$0xff] %v3536_v0 }
 0x288   :  { %v3434_v1 = vpop.f32.mrf.mxu0 }
 0x289   :  { %v3435_v2 = vadd.f32 %v5610_v16, %v3434_v1 }
 0x28b   :  { %v3549_v5 = vpack.c.bf16 %v3435_v2, %v3435_v2 }
 0x28d   :  { %3551 = vst.msk [vmem:[%s6061_s9] sm:$0x1] %vm3550_vm9, %v3549_v5 }
 0x290   :  { %v3319_v29 = vpop.f32.mrf.mxu2  ;;  %v3332_v10 = vpop.f32.mrf.mxu3 }
 0x291   :  { %v3320_v7 = vadd.f32 %v5611_v6, %v3319_v29  ;;  %v3436_v9 = vpop.f32.mrf.mxu0 }
 0x293   :  { %v3333_v12 = vadd.f32 %v3332_v10, %v3320_v7 }
 0x295   :  { %v3360_v13 = vmax.f32 %v3333_v12, 0.0 }
 0x297   :  { %v3450_v4 = vpack.c.bf16 %v3360_v13, %v3360_v13 }
 0x298   :  { %v3321_v8 = vpop.f32.mrf.mxu2  ;;  %v3334_v17 = vpop.f32.mrf.mxu3 }
 0x299   :  { %v3485_v18 = vrot.slane %v3450_v4, 3 }
 0x29b   :  { %v3539_v19 = vsel %vm3486_vm2, %v3450_v4, %v3485_v18 }
 0x29c   :  { %3548 = vst.msk [vmem:[%s6060_s8 + $0x18] sm:$0x1] %vm3547_vm10, %v3539_v19 }
 0x29d   :  { %3560 = vsyncpa [#allocation3], 1 }
 0x29e   :  { %3561 = vsyncpa [#allocation5], 1 }
 0x29f   :  { %3562 = vsyncpa [#allocation8], 1 }
 0x2a0   :  { %3563 = vsyncpa [#allocation11], 1 }

// kernel: _lambda_.6
= control target key start
LH: loop header
LB: loop body
LE: loop exit
PB: predicated region body
PF: predicated region fallthrough
CT: control target
= control target key end

     0   :  { %s2077_s1 = inlined_call_operand.vmem [shape: bf16[256,128], index: 1, kind: input, shape index: {}]   ;;  %s2078_s2 = inlined_call_operand.vmem [shape: f32[1,128], index: 2, kind: input, shape index: {}]   ;;  %s2079_s0 = inlined_call_operand.vmem [shape: bf16[450,256], index: 0, kind: input, shape index: {}]   ;;  %s2080_s3 = inlined_call_operand.vmem [shape: bf16[450,128], index: 3, kind: output, shape index: {}]  }
   0x1   :  { %v1322_v0 = vld [vmem:[%s2077_s1 + $0x38] sm:$0xff]  ;;  %v1321_v2 = vld [vmem:[%s2077_s1 + $0x30] sm:$0xff]  ;;  %v1320_v4 = vld [vmem:[%s2077_s1 + $0x28] sm:$0xff] }
   0x2   :  { %v1330_v1 = vld [vmem:[%s2077_s1 + $0x78] sm:$0xff]  ;;  %490 = vmatpush.bf16.msra.mxu0 %v1322_v0  ;;  %1498 = vmatpush.bf16.msra.mxu2 %v1322_v0  ;;  %v1329_v3 = vld [vmem:[%s2077_s1 + $0x70] sm:$0xff]  ;;  %v1328_v5 = vld [vmem:[%s2077_s1 + $0x68] sm:$0xff] }
   0x3   :  { %643 = vmatpush.bf16.msra.mxu1 %v1330_v1  ;;  %1506 = vmatpush.bf16.msra.mxu3 %v1330_v1  ;;  %v1319_v6 = vld [vmem:[%s2077_s1 + $0x20] sm:$0xff]  ;;  %v1318_v8 = vld [vmem:[%s2077_s1 + $0x18] sm:$0xff]  ;;  %v1317_v10 = vld [vmem:[%s2077_s1 + $0x10] sm:$0xff] }
   0x4   :  { %v1327_v7 = vld [vmem:[%s2077_s1 + $0x60] sm:$0xff]  ;;  %v1326_v9 = vld [vmem:[%s2077_s1 + $0x58] sm:$0xff]  ;;  %v1325_v11 = vld [vmem:[%s2077_s1 + $0x50] sm:$0xff] }
   0x5   :  { %v1316_v12 = vld [vmem:[%s2077_s1 + $0x8] sm:$0xff]  ;;  %v1315_v14 = vld [vmem:[%s2077_s1] sm:$0xff]  ;;  %v1289_v22 = vld [vmem:[%s2079_s0 + $0xf4] sm:$0xf] }
   0x6   :  { %491 = vmatpush.bf16.msra.mxu0 %v1321_v2  ;;  %1499 = vmatpush.bf16.msra.mxu2 %v1321_v2  ;;  %v1324_v13 = vld [vmem:[%s2077_s1 + $0x48] sm:$0xff]  ;;  %v1323_v15 = vld [vmem:[%s2077_s1 + $0x40] sm:$0xff]  ;;  %v1095_v23 = vld [vmem:[%s2079_s0 + $0xf8] sm:$0xf0] }
   0x7   :  { %644 = vmatpush.bf16.msra.mxu1 %v1329_v3  ;;  %1507 = vmatpush.bf16.msra.mxu3 %v1329_v3  ;;  %v973_v16 = vld [vmem:[%s2079_s0] sm:$0xf]  ;;  %v1260_v17 = vld [vmem:[%s2079_s0 + $0x4] sm:$0xf0]  ;;  %v1259_v20 = vld [vmem:[%s2079_s0 + $0x4] sm:$0xf]  ;;  %v1098_v27 = vor.u32 %v1289_v22, %v1095_v23 }
   0x8   :  { %v1085_v18 = vld [vmem:[%s2079_s0 + $0xe0] sm:$0xf]  ;;  %v1288_v19 = vld [vmem:[%s2079_s0 + $0xe4] sm:$0xf0]  ;;  %v975_v21 = vld [vmem:[%s2079_s0 + $0x8] sm:$0xf0]  ;;  %v974_v24 = vor.u32 %v1260_v17, %v973_v16 }
   0x9   :  { %v1086_v25 = vor.u32 %v1288_v19, %v1085_v18  ;;  %v978_v26 = vor.u32 %v1259_v20, %v975_v21  ;;  %v981_v28 = vld [vmem:[%s2079_s0 + $0x10] sm:$0xf]  ;;  %v1262_v29 = vld [vmem:[%s2079_s0 + $0x14] sm:$0xf0]  ;;  %v1261_v32 = vld [vmem:[%s2079_s0 + $0x14] sm:$0xf] }
   0xa   :  { %492 = vmatpush.bf16.msra.mxu0 %v1320_v4  ;;  %1500 = vmatpush.bf16.msra.mxu2 %v1320_v4  ;;  %v1093_v30 = vld [vmem:[%s2079_s0 + $0xf0] sm:$0xf]  ;;  %v1290_v31 = vld [vmem:[%s2079_s0 + $0xf4] sm:$0xf0]  ;;  %v983_v33 = vld [vmem:[%s2079_s0 + $0x18] sm:$0xf0]  ;;  %v982_v36 = vor.u32 %v1262_v29, %v981_v28 }
   0xb   :  { %645 = vmatpush.bf16.msra.mxu1 %v1328_v5  ;;  %1508 = vmatpush.bf16.msra.mxu3 %v1328_v5  ;;  %v1291_v34 = vld [vmem:[%s2079_s0 + $0x104] sm:$0xf]  ;;  %v1103_v35 = vld [vmem:[%s2079_s0 + $0x108] sm:$0xf0]  ;;  %v1094_v37 = vor.u32 %v1290_v31, %v1093_v30  ;;  %v986_v38 = vor.u32 %v1261_v32, %v983_v33  ;;  %v989_v40 = vld [vmem:[%s2079_s0 + $0x20] sm:$0xf] }
   0xc   :  { %v1106_v39 = vor.u32 %v1291_v34, %v1103_v35  ;;  %v1264_v41 = vld [vmem:[%s2079_s0 + $0x24] sm:$0xf0]  ;;  %v1101_v42 = vld [vmem:[%s2079_s0 + $0x100] sm:$0xf]  ;;  %v1263_v44 = vld [vmem:[%s2079_s0 + $0x24] sm:$0xf] }
   0xd   :  { %v1292_v43 = vld [vmem:[%s2079_s0 + $0x104] sm:$0xf0]  ;;  %v991_v45 = vld [vmem:[%s2079_s0 + $0x28] sm:$0xf0]  ;;  %v1293_v46 = vld [vmem:[%s2079_s0 + $0x114] sm:$0xf]  ;;  %v990_v48 = vor.u32 %v1264_v41, %v989_v40 }
   0xe   :  { %493 = vmatpush.bf16.msra.mxu0 %v1319_v6  ;;  %1501 = vmatpush.bf16.msra.mxu2 %v1319_v6  ;;  %v1111_v47 = vld [vmem:[%s2079_s0 + $0x118] sm:$0xf0]  ;;  %v1102_v49 = vor.u32 %v1292_v43, %v1101_v42  ;;  %v994_v50 = vor.u32 %v1263_v44, %v991_v45  ;;  %v997_v52 = vld [vmem:[%s2079_s0 + $0x30] sm:$0xf]  ;;  %v1266_v53 = vld [vmem:[%s2079_s0 + $0x34] sm:$0xf0] }
   0xf   :  { %646 = vmatpush.bf16.msra.mxu1 %v1327_v7  ;;  %1509 = vmatpush.bf16.msra.mxu3 %v1327_v7  ;;  %v1114_v51 = vor.u32 %v1293_v46, %v1111_v47  ;;  %v1109_v54 = vld [vmem:[%s2079_s0 + $0x110] sm:$0xf]  ;;  %v1294_v55 = vld [vmem:[%s2079_s0 + $0x114] sm:$0xf0]  ;;  %v1265_v56 = vld [vmem:[%s2079_s0 + $0x34] sm:$0xf]  ;;  %v998_v60 = vor.u32 %v1266_v53, %v997_v52 }
  0x10   :  { %v999_v57 = vld [vmem:[%s2079_s0 + $0x38] sm:$0xf0]  ;;  %v1295_v58 = vld [vmem:[%s2079_s0 + $0x124] sm:$0xf]  ;;  %v1119_v59 = vld [vmem:[%s2079_s0 + $0x128] sm:$0xf0]  ;;  %v1110_v61 = vor.u32 %v1294_v55, %v1109_v54 }
  0x11   :  { %v1002_v62 = vor.u32 %v1265_v56, %v999_v57  ;;  %v1122_v63 = vor.u32 %v1295_v58, %v1119_v59  ;;  %v1005_v0 = vld [vmem:[%s2079_s0 + $0x40] sm:$0xf]  ;;  %v1268_v1 = vld [vmem:[%s2079_s0 + $0x44] sm:$0xf0]  ;;  %v1267_v4 = vld [vmem:[%s2079_s0 + $0x44] sm:$0xf] }
  0x12   :  { %494 = vmatpush.bf16.msra.mxu0 %v1318_v8  ;;  %1502 = vmatpush.bf16.msra.mxu2 %v1318_v8  ;;  %v1117_v2 = vld [vmem:[%s2079_s0 + $0x120] sm:$0xf]  ;;  %v1296_v3 = vld [vmem:[%s2079_s0 + $0x124] sm:$0xf0]  ;;  %v1007_v5 = vld [vmem:[%s2079_s0 + $0x48] sm:$0xf0]  ;;  %v1006_v8 = vor.u32 %v1268_v1, %v1005_v0 }
  0x13   :  { %647 = vmatpush.bf16.msra.mxu1 %v1326_v9  ;;  %1510 = vmatpush.bf16.msra.mxu3 %v1326_v9  ;;  %v1297_v6 = vld [vmem:[%s2079_s0 + $0x134] sm:$0xf]  ;;  %v1127_v7 = vld [vmem:[%s2079_s0 + $0x138] sm:$0xf0]  ;;  %v1118_v9 = vor.u32 %v1296_v3, %v1117_v2  ;;  %v1299_v18 = vld [vmem:[%s2079_s0 + $0x144] sm:$0xf] }
  0x14   :  { %v1269_v16 = vld [vmem:[%s2079_s0 + $0x54] sm:$0xf]  ;;  %v1015_v17 = vld [vmem:[%s2079_s0 + $0x58] sm:$0xf0]  ;;  %v1135_v19 = vld [vmem:[%s2079_s0 + $0x148] sm:$0xf0] }
  0x15   :  { %v1018_v22 = vor.u32 %v1269_v16, %v1015_v17  ;;  %v1138_v23 = vor.u32 %v1299_v18, %v1135_v19  ;;  %v1271_v28 = vld [vmem:[%s2079_s0 + $0x64] sm:$0xf]  ;;  %v1023_v29 = vld [vmem:[%s2079_s0 + $0x68] sm:$0xf0]  ;;  %v1301_v30 = vld [vmem:[%s2079_s0 + $0x154] sm:$0xf] }
  0x16   :  { %495 = vmatpush.bf16.msra.mxu0 %v1317_v10  ;;  %1503 = vmatpush.bf16.msra.mxu2 %v1317_v10  ;;  %v1010_v10 = vor.u32 %v1267_v4, %v1007_v5  ;;  %v1143_v31 = vld [vmem:[%s2079_s0 + $0x158] sm:$0xf0]  ;;  %v1026_v34 = vor.u32 %v1271_v28, %v1023_v29  ;;  %v1273_v40 = vld [vmem:[%s2079_s0 + $0x74] sm:$0xf]  ;;  %v1303_v42 = vld [vmem:[%s2079_s0 + $0x164] sm:$0xf] }
  0x17   :  { %648 = vmatpush.bf16.msra.mxu1 %v1325_v11  ;;  %1511 = vmatpush.bf16.msra.mxu3 %v1325_v11  ;;  %v1130_v11 = vor.u32 %v1297_v6, %v1127_v7  ;;  %v1146_v35 = vor.u32 %v1301_v30, %v1143_v31  ;;  %v1031_v41 = vld [vmem:[%s2079_s0 + $0x78] sm:$0xf0]  ;;  %v1151_v43 = vld [vmem:[%s2079_s0 + $0x168] sm:$0xf0]  ;;  %v1275_v52 = vld [vmem:[%s2079_s0 + $0x84] sm:$0xf] }
  0x18   :  { %v1034_v46 = vor.u32 %v1273_v40, %v1031_v41  ;;  %v1154_v47 = vor.u32 %v1303_v42, %v1151_v43  ;;  %v1039_v53 = vld [vmem:[%s2079_s0 + $0x88] sm:$0xf0]  ;;  %v1305_v54 = vld [vmem:[%s2079_s0 + $0x174] sm:$0xf]  ;;  %v1159_v55 = vld [vmem:[%s2079_s0 + $0x178] sm:$0xf0] }
  0x19   :  { %v1042_v59 = vor.u32 %v1275_v52, %v1039_v53  ;;  %v1045_v7 = vld [vmem:[%s2079_s0 + $0x90] sm:$0xf]  ;;  %v1167_v16 = vld [vmem:[%s2079_s0 + $0x188] sm:$0xf0]  ;;  %v1309_v43 = vld [vmem:[%s2079_s0 + $0x194] sm:$0xf] }
  0x1a   :  { %496 = vmatpush.bf16.msra.mxu0 %v1316_v12  ;;  %1504 = vmatpush.bf16.msra.mxu2 %v1316_v12  ;;  %v1013_v12 = vld [vmem:[%s2079_s0 + $0x50] sm:$0xf]  ;;  %v1055_v40 = vld [vmem:[%s2079_s0 + $0xa8] sm:$0xf0] }
  0x1b   :  { %649 = vmatpush.bf16.msra.mxu1 %v1324_v13  ;;  %1512 = vmatpush.bf16.msra.mxu3 %v1324_v13  ;;  %v1270_v13 = vld [vmem:[%s2079_s0 + $0x54] sm:$0xf0] }
  0x1c   :  { %v1014_v20 = vor.u32 %v1270_v13, %v1013_v12  ;;  %v1047_v12 = vld [vmem:[%s2079_s0 + $0x98] sm:$0xf0] }
  0x1e   :  { %497 = vmatpush.bf16.msra.mxu0 %v1315_v14  ;;  %1505 = vmatpush.bf16.msra.mxu2 %v1315_v14  ;;  %v1125_v14 = vld [vmem:[%s2079_s0 + $0x130] sm:$0xf] }
  0x1f   :  { %650 = vmatpush.bf16.msra.mxu1 %v1323_v15  ;;  %1513 = vmatpush.bf16.msra.mxu3 %v1323_v15  ;;  %v1298_v15 = vld [vmem:[%s2079_s0 + $0x134] sm:$0xf0] }
  0x20   :  { %v1126_v21 = vor.u32 %v1298_v15, %v1125_v14  ;;  %v1307_v15 = vld [vmem:[%s2079_s0 + $0x184] sm:$0xf] }
  0x21   :  { %498 = vmatmul.bf16.vlgmr.msra.gmra.mxu0 %v974_v24  ;;  %568 = vmatmul.bf16.vlgmr.msra.gmra.mxu2 %v1086_v25  ;;  %v1021_v24 = vld [vmem:[%s2079_s0 + $0x60] sm:$0xf]  ;;  %v1272_v25 = vld [vmem:[%s2079_s0 + $0x64] sm:$0xf0] }
  0x22   :  { %651 = vmatmul.bf16.vlgmr.msra.gmra.mxu1 %v978_v26  ;;  %726 = vmatmul.bf16.vlgmr.msra.gmra.mxu3 %v1098_v27  ;;  %v1133_v26 = vld [vmem:[%s2079_s0 + $0x140] sm:$0xf]  ;;  %v1300_v27 = vld [vmem:[%s2079_s0 + $0x144] sm:$0xf0]  ;;  %v1022_v32 = vor.u32 %v1272_v25, %v1021_v24  ;;  %v1170_v24 = vor.u32 %v1307_v15, %v1167_v16  ;;  %v1311_v15 = vld [vmem:[%s2079_s0 + $0x1a4] sm:$0xf] }
  0x23   :  { %v1134_v33 = vor.u32 %v1300_v27, %v1133_v26  ;;  %v1183_v16 = vld [vmem:[%s2079_s0 + $0x1a8] sm:$0xf0] }
  0x31   :  { %503 = vmatmul.bf16.gmra.mxu0 %v982_v36  ;;  %573 = vmatmul.bf16.gmra.mxu2 %v1094_v37  ;;  %v1029_v36 = vld [vmem:[%s2079_s0 + $0x70] sm:$0xf]  ;;  %v1274_v37 = vld [vmem:[%s2079_s0 + $0x74] sm:$0xf0] }
  0x32   :  { %656 = vmatmul.bf16.gmra.mxu1 %v986_v38  ;;  %731 = vmatmul.bf16.gmra.mxu3 %v1106_v39  ;;  %v1141_v38 = vld [vmem:[%s2079_s0 + $0x150] sm:$0xf]  ;;  %v1302_v39 = vld [vmem:[%s2079_s0 + $0x154] sm:$0xf0]  ;;  %v1030_v44 = vor.u32 %v1274_v37, %v1029_v36  ;;  %v1280_v36 = vld [vmem:[%s2079_s0 + $0xa4] sm:$0xf0] }
  0x33   :  { %v1142_v45 = vor.u32 %v1302_v39, %v1141_v38  ;;  %v1165_v37 = vld [vmem:[%s2079_s0 + $0x180] sm:$0xf]  ;;  %v1308_v38 = vld [vmem:[%s2079_s0 + $0x184] sm:$0xf0]  ;;  %v1279_v39 = vld [vmem:[%s2079_s0 + $0xa4] sm:$0xf] }
  0x34   :  { %v1058_v53 = vor.u32 %v1279_v39, %v1055_v40 }
  0x41   :  { %508 = vmatmul.bf16.gmra.mxu0 %v990_v48  ;;  %578 = vmatmul.bf16.gmra.mxu2 %v1102_v49  ;;  %v1037_v48 = vld [vmem:[%s2079_s0 + $0x80] sm:$0xf]  ;;  %v1276_v49 = vld [vmem:[%s2079_s0 + $0x84] sm:$0xf0] }
  0x42   :  { %661 = vmatmul.bf16.gmra.mxu1 %v994_v50  ;;  %736 = vmatmul.bf16.gmra.mxu3 %v1114_v51  ;;  %v1149_v50 = vld [vmem:[%s2079_s0 + $0x160] sm:$0xf]  ;;  %v1304_v51 = vld [vmem:[%s2079_s0 + $0x164] sm:$0xf0]  ;;  %v1038_v56 = vor.u32 %v1276_v49, %v1037_v48 }
  0x43   :  { %v1150_v57 = vor.u32 %v1304_v51, %v1149_v50  ;;  %v1166_v50 = vor.u32 %v1308_v38, %v1165_v37 }
  0x51   :  { %513 = vmatmul.bf16.gmra.mxu0 %v998_v60  ;;  %583 = vmatmul.bf16.gmra.mxu2 %v1110_v61  ;;  %v1162_v60 = vor.u32 %v1305_v54, %v1159_v55  ;;  %v1802_v61 = vld [vmem:[%s2078_s2] ss:$0 sm:$0xff] }
  0x52   :  { %666 = vmatmul.bf16.gmra.mxu1 %v1002_v62  ;;  %741 = vmatmul.bf16.gmra.mxu3 %v1122_v63 }
  0x61   :  { %518 = vmatmul.bf16.gmra.mxu0 %v1006_v8  ;;  %588 = vmatmul.bf16.gmra.mxu2 %v1118_v9  ;;  %v1278_v8 = vld [vmem:[%s2079_s0 + $0x94] sm:$0xf0]  ;;  %v1157_v9 = vld [vmem:[%s2079_s0 + $0x170] sm:$0xf] }
  0x62   :  { %671 = vmatmul.bf16.gmra.mxu1 %v1010_v10  ;;  %746 = vmatmul.bf16.gmra.mxu3 %v1130_v11  ;;  %v1306_v10 = vld [vmem:[%s2079_s0 + $0x174] sm:$0xf0]  ;;  %v1277_v11 = vld [vmem:[%s2079_s0 + $0x94] sm:$0xf]  ;;  %v1046_v19 = vor.u32 %v1278_v8, %v1045_v7  ;;  %v1061_v7 = vld [vmem:[%s2079_s0 + $0xb0] sm:$0xf] }
  0x63   :  { %v1282_v8 = vld [vmem:[%s2079_s0 + $0xb4] sm:$0xf0] }
  0x71   :  { %523 = vmatmul.bf16.gmra.mxu0 %v1014_v20  ;;  %593 = vmatmul.bf16.gmra.mxu2 %v1126_v21  ;;  %v1158_v20 = vor.u32 %v1306_v10, %v1157_v9  ;;  %v1173_v9 = vld [vmem:[%s2079_s0 + $0x190] sm:$0xf]  ;;  %v1310_v10 = vld [vmem:[%s2079_s0 + $0x194] sm:$0xf0] }
  0x72   :  { %676 = vmatmul.bf16.gmra.mxu1 %v1018_v22  ;;  %751 = vmatmul.bf16.gmra.mxu3 %v1138_v23  ;;  %v1050_v23 = vor.u32 %v1277_v11, %v1047_v12  ;;  %v1281_v11 = vld [vmem:[%s2079_s0 + $0xb4] sm:$0xf]  ;;  %v1063_v12 = vld [vmem:[%s2079_s0 + $0xb8] sm:$0xf0] }
  0x81   :  { %528 = vmatmul.bf16.gmra.mxu0 %v1022_v32  ;;  %598 = vmatmul.bf16.gmra.mxu2 %v1134_v33 }
  0x82   :  { %681 = vmatmul.bf16.gmra.mxu1 %v1026_v34  ;;  %756 = vmatmul.bf16.gmra.mxu3 %v1146_v35  ;;  %v1053_v35 = vld [vmem:[%s2079_s0 + $0xa0] sm:$0xf] }
  0x91   :  { %533 = vmatmul.bf16.gmra.mxu0 %v1030_v44  ;;  %603 = vmatmul.bf16.gmra.mxu2 %v1142_v45  ;;  %v1175_v44 = vld [vmem:[%s2079_s0 + $0x198] sm:$0xf0] }
  0x92   :  { %686 = vmatmul.bf16.gmra.mxu1 %v1034_v46  ;;  %761 = vmatmul.bf16.gmra.mxu3 %v1154_v47  ;;  %v1054_v46 = vor.u32 %v1280_v36, %v1053_v35  ;;  %v1178_v54 = vor.u32 %v1309_v43, %v1175_v44  ;;  %v1284_v43 = vld [vmem:[%s2079_s0 + $0xc4] sm:$0xf0]  ;;  %v1181_v44 = vld [vmem:[%s2079_s0 + $0x1a0] sm:$0xf] }
  0x9e   :  { %v499_v58 = vpop.f32.mrf.mxu0 }
  0x9f   :  { %v652_v62 = vpop.f32.mrf.mxu1  ;;  %v500_v63 = vadd.f32 %v1802_v61, %v499_v58 }
  0xa1   :  { %538 = vmatmul.bf16.gmra.mxu0 %v1038_v56  ;;  %608 = vmatmul.bf16.gmra.mxu2 %v1150_v57  ;;  %v653_v3 = vadd.f32 %v652_v62, %v500_v63 }
  0xa2   :  { %691 = vmatmul.bf16.gmra.mxu1 %v1042_v59  ;;  %766 = vmatmul.bf16.gmra.mxu3 %v1162_v60 }
  0xa3   :  { %v796_v13 = vmax.f32 %v653_v3, 0.0 }
  0xa4   :  { %v1805_v0 = vpop.f32.mrf.mxu2 }
  0xa5   :  { %v727_v1 = vpop.f32.mrf.mxu3 }
  0xa6   :  { %v501_v2 = vpop.f32.mrf.mxu0 }
  0xa7   :  { %v502_v4 = vadd.f32 %v1802_v61, %v501_v2  ;;  %v654_v5 = vpop.f32.mrf.mxu1 }
  0xa9   :  { %v655_v6 = vadd.f32 %v654_v5, %v502_v4 }
  0xab   :  { %v797_v14 = vmax.f32 %v655_v6, 0.0 }
  0xac   :  { %v1832_v17 = vpop.f32.mrf.mxu2 }
  0xad   :  { %v1334_v18 = vpack.c.bf16 %v797_v14, %v796_v13  ;;  %v729_v21 = vpop.f32.mrf.mxu3 }
  0xae   :  { %v504_v22 = vpop.f32.mrf.mxu0 }
  0xaf   :  { %1335 = vst [vmem:[%s2080_s3] sm:$0xff] %v1334_v18   ;;  %v657_v25 = vpop.f32.mrf.mxu1  ;;  %v505_v26 = vadd.f32 %v1802_v61, %v504_v22 }
  0xb1   :  { %543 = vmatmul.bf16.gmra.mxu0 %v1046_v19  ;;  %613 = vmatmul.bf16.gmra.mxu2 %v1158_v20  ;;  %v658_v30 = vadd.f32 %v657_v25, %v505_v26  ;;  %v1062_v19 = vor.u32 %v1282_v8, %v1061_v7  ;;  %v1066_v26 = vor.u32 %v1281_v11, %v1063_v12  ;;  %v70_v12 = vld [vmem:[%s2079_s0 + $0x1c0] sm:$0x11] }
  0xb2   :  { %696 = vmatmul.bf16.gmra.mxu1 %v1050_v23  ;;  %771 = vmatmul.bf16.gmra.mxu3 %v1170_v24  ;;  %v1174_v23 = vor.u32 %v1310_v10, %v1173_v9 }
  0xb3   :  { %v798_v41 = vmax.f32 %v658_v30, 0.0 }
  0xb4   :  { %v574_v27 = vpop.f32.mrf.mxu2 }
  0xb5   :  { %v732_v28 = vpop.f32.mrf.mxu3  ;;  %v575_v33 = vadd.f32 %v1802_v61, %v574_v27  ;;  %v1186_v27 = vor.u32 %v1311_v15, %v1183_v16  ;;  %v1077_v15 = vld [vmem:[%s2079_s0 + $0xd0] sm:$0xf]  ;;  %v1286_v16 = vld [vmem:[%s2079_s0 + $0xd4] sm:$0xf0] }
  0xb6   :  { %v506_v29 = vpop.f32.mrf.mxu0 }
  0xb7   :  { %v507_v31 = vadd.f32 %v1802_v61, %v506_v29  ;;  %v659_v32 = vpop.f32.mrf.mxu1  ;;  %v728_v47 = vadd.f32 %v727_v1, %v575_v33 }
  0xb9   :  { %v660_v34 = vadd.f32 %v659_v32, %v507_v31  ;;  %v826_v57 = vmax.f32 %v728_v47, 0.0  ;;  %v1071_v47 = vld [vmem:[%s2079_s0 + $0xc8] sm:$0xf0] }
  0xbb   :  { %v799_v42 = vmax.f32 %v660_v34, 0.0 }
  0xbc   :  { %v576_v45 = vpop.f32.mrf.mxu2 }
  0xbd   :  { %v1339_v48 = vpack.c.bf16 %v799_v42, %v798_v41  ;;  %v577_v49 = vadd.f32 %v1802_v61, %v576_v45  ;;  %v734_v51 = vpop.f32.mrf.mxu3  ;;  %v1069_v42 = vld [vmem:[%s2079_s0 + $0xc0] sm:$0xf]  ;;  %v1312_v45 = vld [vmem:[%s2079_s0 + $0x1a4] sm:$0xf0] }
  0xbe   :  { %v509_v52 = vpop.f32.mrf.mxu0 }
  0xbf   :  { %1471 = vst [vmem:[%s2080_s3 + $0x8] sm:$0xff] %v1339_v48   ;;  %v730_v55 = vadd.f32 %v729_v21, %v577_v49  ;;  %v662_v56 = vpop.f32.mrf.mxu1  ;;  %v510_v60 = vadd.f32 %v1802_v61, %v509_v52 }
  0xc1   :  { %v827_v58 = vmax.f32 %v730_v55, 0.0  ;;  %548 = vmatmul.bf16.gmra.mxu0 %v1054_v46  ;;  %618 = vmatmul.bf16.gmra.mxu2 %v1166_v50  ;;  %v663_v2 = vadd.f32 %v662_v56, %v510_v60  ;;  %v1283_v46 = vld [vmem:[%s2079_s0 + $0xc4] sm:$0xf]  ;;  %v1313_v50 = vld [vmem:[%s2079_s0 + $0x1b4] sm:$0xf] }
  0xc2   :  { %701 = vmatmul.bf16.gmra.mxu1 %v1058_v53  ;;  %776 = vmatmul.bf16.gmra.mxu3 %v1178_v54  ;;  %v1070_v53 = vor.u32 %v1284_v43, %v1069_v42  ;;  %v1074_v60 = vor.u32 %v1283_v46, %v1071_v47 }
  0xc3   :  { %v1409_v59 = vpack.c.bf16 %v827_v58, %v826_v57  ;;  %v800_v13 = vmax.f32 %v663_v2, 0.0  ;;  %v1182_v57 = vor.u32 %v1312_v45, %v1181_v44 }
  0xc4   :  { %v579_v62 = vpop.f32.mrf.mxu2 }
  0xc5   :  { %1485 = vst [vmem:[%s2080_s3 + $0x78] sm:$0xff] %v1409_v59   ;;  %v737_v63 = vpop.f32.mrf.mxu3  ;;  %v580_v5 = vadd.f32 %v1802_v61, %v579_v62 }
  0xc6   :  { %v511_v1 = vpop.f32.mrf.mxu0 }
  0xc7   :  { %v512_v3 = vadd.f32 %v1802_v61, %v511_v1  ;;  %v664_v4 = vpop.f32.mrf.mxu1  ;;  %v733_v20 = vadd.f32 %v732_v28, %v580_v5 }
  0xc9   :  { %v665_v6 = vadd.f32 %v664_v4, %v512_v3  ;;  %v828_v31 = vmax.f32 %v733_v20, 0.0  ;;  %v277_v20 = vunpack.c.h.b16 %v70_v12 }
  0xcb   :  { %v801_v14 = vmax.f32 %v665_v6, 0.0 }
  0xcc   :  { %v581_v18 = vpop.f32.mrf.mxu2 }
  0xcd   :  { %v1344_v21 = vpack.c.bf16 %v801_v14, %v800_v13  ;;  %v582_v22 = vadd.f32 %v1802_v61, %v581_v18  ;;  %v739_v24 = vpop.f32.mrf.mxu3  ;;  %v1189_v18 = vld [vmem:[%s2079_s0 + $0x1b0] sm:$0xf] }
  0xce   :  { %v514_v25 = vpop.f32.mrf.mxu0 }
  0xcf   :  { %1472 = vst [vmem:[%s2080_s3 + $0x10] sm:$0xff] %v1344_v21   ;;  %v735_v29 = vadd.f32 %v734_v51, %v582_v22  ;;  %v667_v30 = vpop.f32.mrf.mxu1  ;;  %v515_v33 = vadd.f32 %v1802_v61, %v514_v25  ;;  %v1191_v51 = vld [vmem:[%s2079_s0 + $0x1b8] sm:$0xf0] }
  0xd0   :  { %v1194_v62 = vor.u32 %v1313_v50, %v1191_v51 }
  0xd1   :  { %v829_v32 = vmax.f32 %v735_v29, 0.0  ;;  %553 = vmatmul.bf16.gmra.mxu0 %v1062_v19  ;;  %623 = vmatmul.bf16.gmra.mxu2 %v1174_v23  ;;  %v668_v37 = vadd.f32 %v667_v30, %v515_v33  ;;  %v1314_v19 = vld [vmem:[%s2079_s0 + $0x1b4] sm:$0xf0]  ;;  %v1285_v23 = vld [vmem:[%s2079_s0 + $0xd4] sm:$0xf] }
  0xd2   :  { %706 = vmatmul.bf16.gmra.mxu1 %v1066_v26  ;;  %781 = vmatmul.bf16.gmra.mxu3 %v1186_v27  ;;  %v1078_v26 = vor.u32 %v1286_v16, %v1077_v15 }
  0xd3   :  { %v1414_v28 = vpack.c.bf16 %v829_v32, %v828_v31  ;;  %v802_v48 = vmax.f32 %v668_v37, 0.0  ;;  %v1190_v31 = vor.u32 %v1314_v19, %v1189_v18 }
  0xd4   :  { %v584_v34 = vpop.f32.mrf.mxu2 }
  0xd5   :  { %1486 = vst [vmem:[%s2080_s3 + $0x80] sm:$0xff] %v1414_v28   ;;  %v742_v35 = vpop.f32.mrf.mxu3  ;;  %v585_v40 = vadd.f32 %v1802_v61, %v584_v34  ;;  %v335_v34 = vpack.c.b16 %v277_v20, %v277_v20 }
  0xd6   :  { %v516_v36 = vpop.f32.mrf.mxu0 }
  0xd7   :  { %v517_v38 = vadd.f32 %v1802_v61, %v516_v36  ;;  %v669_v39 = vpop.f32.mrf.mxu1  ;;  %v738_v54 = vadd.f32 %v737_v63, %v585_v40 }
  0xd9   :  { %v670_v41 = vadd.f32 %v669_v39, %v517_v38  ;;  %v830_v3 = vmax.f32 %v738_v54, 0.0 }
  0xdb   :  { %v803_v49 = vmax.f32 %v670_v41, 0.0 }
  0xdc   :  { %v586_v52 = vpop.f32.mrf.mxu2 }
  0xdd   :  { %v1349_v55 = vpack.c.bf16 %v803_v49, %v802_v48  ;;  %v587_v56 = vadd.f32 %v1802_v61, %v586_v52  ;;  %v744_v58 = vpop.f32.mrf.mxu3  ;;  %v276_v49 = vunpack.c.l.b16 %v70_v12  ;;  %v1287_v52 = vld [vmem:[%s2079_s0 + $0xe4] sm:$0xf] }
  0xde   :  { %v519_v59 = vpop.f32.mrf.mxu0 }
  0xdf   :  { %1473 = vst [vmem:[%s2080_s3 + $0x18] sm:$0xff] %v1349_v55   ;;  %v740_v1 = vadd.f32 %v739_v24, %v587_v56  ;;  %v672_v2 = vpop.f32.mrf.mxu1  ;;  %v520_v5 = vadd.f32 %v1802_v61, %v519_v59  ;;  %v1079_v24 = vld [vmem:[%s2079_s0 + $0xd8] sm:$0xf0] }
  0xe0   :  { %v1082_v33 = vor.u32 %v1285_v23, %v1079_v24 }
  0xe1   :  { %v831_v4 = vmax.f32 %v740_v1, 0.0  ;;  %558 = vmatmul.bf16.gmra.mxu0 %v1070_v53  ;;  %628 = vmatmul.bf16.gmra.mxu2 %v1182_v57  ;;  %v673_v9 = vadd.f32 %v672_v2, %v520_v5  ;;  %v1087_v53 = vld [vmem:[%s2079_s0 + $0xe8] sm:$0xf0] }
  0xe2   :  { %711 = vmatmul.bf16.gmra.mxu1 %v1074_v60  ;;  %786 = vmatmul.bf16.gmra.mxu3 %v1194_v62  ;;  %v1090_v62 = vor.u32 %v1287_v52, %v1087_v53 }
  0xe3   :  { %v1419_v63 = vpack.c.bf16 %v831_v4, %v830_v3  ;;  %v804_v21 = vmax.f32 %v673_v9, 0.0 }
  0xe4   :  { %v589_v6 = vpop.f32.mrf.mxu2 }
  0xe5   :  { %1487 = vst [vmem:[%s2080_s3 + $0x88] sm:$0xff] %v1419_v63   ;;  %v747_v7 = vpop.f32.mrf.mxu3  ;;  %v590_v13 = vadd.f32 %v1802_v61, %v589_v6 }
  0xe6   :  { %v521_v8 = vpop.f32.mrf.mxu0 }
  0xe7   :  { %v522_v10 = vadd.f32 %v1802_v61, %v521_v8  ;;  %v674_v11 = vpop.f32.mrf.mxu1  ;;  %v743_v27 = vadd.f32 %v742_v35, %v590_v13 }
  0xe9   :  { %v675_v14 = vadd.f32 %v674_v11, %v522_v10  ;;  %v832_v38 = vmax.f32 %v743_v27, 0.0 }
  0xeb   :  { %v805_v22 = vmax.f32 %v675_v14, 0.0 }
  0xec   :  { %v591_v25 = vpop.f32.mrf.mxu2 }
  0xed   :  { %v1354_v29 = vpack.c.bf16 %v805_v22, %v804_v21  ;;  %v592_v30 = vadd.f32 %v1802_v61, %v591_v25  ;;  %v749_v32 = vpop.f32.mrf.mxu3 }
  0xee   :  { %v524_v28 = vpop.f32.mrf.mxu0 }
  0xef   :  { %1474 = vst [vmem:[%s2080_s3 + $0x20] sm:$0xff] %v1354_v29   ;;  %v745_v36 = vadd.f32 %v744_v58, %v592_v30  ;;  %v677_v37 = vpop.f32.mrf.mxu1  ;;  %v525_v40 = vadd.f32 %v1802_v61, %v524_v28  ;;  %v334_v58 = vpack.c.b16 %v276_v49, %v276_v49 }
  0xf1   :  { %v833_v39 = vmax.f32 %v745_v36, 0.0  ;;  %563 = vmatmul.bf16.gmra.mxu0 %v1078_v26  ;;  %633 = vmatmul.bf16.gmra.mxu2 %v1190_v31  ;;  %v678_v44 = vadd.f32 %v677_v37, %v525_v40 }
  0xf2   :  { %716 = vmatmul.bf16.gmra.mxu1 %v1082_v33  ;;  %791 = vmatmul.bf16.gmra.mxu3 %v335_v34 }
  0xf3   :  { %v1424_v35 = vpack.c.bf16 %v833_v39, %v832_v38  ;;  %v806_v50 = vmax.f32 %v678_v44, 0.0 }
  0xf4   :  { %v594_v41 = vpop.f32.mrf.mxu2 }
  0xf5   :  { %1488 = vst [vmem:[%s2080_s3 + $0x90] sm:$0xff] %v1424_v35   ;;  %v752_v42 = vpop.f32.mrf.mxu3  ;;  %v595_v47 = vadd.f32 %v1802_v61, %v594_v41 }
  0xf6   :  { %v526_v43 = vpop.f32.mrf.mxu0 }
  0xf7   :  { %v527_v45 = vadd.f32 %v1802_v61, %v526_v43  ;;  %v679_v46 = vpop.f32.mrf.mxu1  ;;  %v748_v55 = vadd.f32 %v747_v7, %v595_v47 }
  0xf9   :  { %v680_v48 = vadd.f32 %v679_v46, %v527_v45  ;;  %v834_v3 = vmax.f32 %v748_v55, 0.0 }
  0xfb   :  { %v807_v51 = vmax.f32 %v680_v48, 0.0 }
  0xfc   :  { %v596_v54 = vpop.f32.mrf.mxu2 }
  0xfd   :  { %v1359_v56 = vpack.c.bf16 %v807_v51, %v806_v50  ;;  %v597_v57 = vadd.f32 %v1802_v61, %v596_v54  ;;  %v754_v59 = vpop.f32.mrf.mxu3 }
  0xfe   :  { %v529_v60 = vpop.f32.mrf.mxu0 }
  0xff   :  { %1475 = vst [vmem:[%s2080_s3 + $0x28] sm:$0xff] %v1359_v56   ;;  %v750_v1 = vadd.f32 %v749_v32, %v597_v57  ;;  %v682_v2 = vpop.f32.mrf.mxu1  ;;  %v530_v5 = vadd.f32 %v1802_v61, %v529_v60 }
 0x101   :  { %v835_v4 = vmax.f32 %v750_v1, 0.0  ;;  %638 = vmatmul.bf16.gmra.mxu2 %v334_v58  ;;  %v683_v9 = vadd.f32 %v682_v2, %v530_v5 }
 0x102   :  { %721 = vmatmul.bf16.gmra.mxu1 %v1090_v62 }
 0x103   :  { %v1429_v63 = vpack.c.bf16 %v835_v4, %v834_v3  ;;  %v808_v14 = vmax.f32 %v683_v9, 0.0 }
 0x104   :  { %v599_v6 = vpop.f32.mrf.mxu2 }
 0x105   :  { %1489 = vst [vmem:[%s2080_s3 + $0x98] sm:$0xff] %v1429_v63   ;;  %v757_v7 = vpop.f32.mrf.mxu3  ;;  %v600_v12 = vadd.f32 %v1802_v61, %v599_v6 }
 0x106   :  { %v531_v8 = vpop.f32.mrf.mxu0 }
 0x107   :  { %v532_v10 = vadd.f32 %v1802_v61, %v531_v8  ;;  %v684_v11 = vpop.f32.mrf.mxu1  ;;  %v753_v18 = vadd.f32 %v752_v42, %v600_v12 }
 0x109   :  { %v685_v13 = vadd.f32 %v684_v11, %v532_v10  ;;  %v836_v25 = vmax.f32 %v753_v18, 0.0 }
 0x10b   :  { %v809_v15 = vmax.f32 %v685_v13, 0.0 }
 0x10c   :  { %v601_v16 = vpop.f32.mrf.mxu2 }
 0x10d   :  { %v1364_v19 = vpack.c.bf16 %v809_v15, %v808_v14  ;;  %v602_v20 = vadd.f32 %v1802_v61, %v601_v16  ;;  %v759_v21 = vpop.f32.mrf.mxu3 }
 0x10e   :  { %v534_v22 = vpop.f32.mrf.mxu0 }
 0x10f   :  { %1476 = vst [vmem:[%s2080_s3 + $0x30] sm:$0xff] %v1364_v19   ;;  %v755_v23 = vadd.f32 %v754_v59, %v602_v20  ;;  %v687_v24 = vpop.f32.mrf.mxu1  ;;  %v535_v29 = vadd.f32 %v1802_v61, %v534_v22 }
 0x111   :  { %v837_v26 = vmax.f32 %v755_v23, 0.0  ;;  %v688_v28 = vadd.f32 %v687_v24, %v535_v29 }
 0x113   :  { %v1434_v27 = vpack.c.bf16 %v837_v26, %v836_v25  ;;  %v810_v38 = vmax.f32 %v688_v28, 0.0 }
 0x114   :  { %v604_v30 = vpop.f32.mrf.mxu2 }
 0x115   :  { %1490 = vst [vmem:[%s2080_s3 + $0xa0] sm:$0xff] %v1434_v27   ;;  %v762_v31 = vpop.f32.mrf.mxu3  ;;  %v605_v36 = vadd.f32 %v1802_v61, %v604_v30 }
 0x116   :  { %v536_v32 = vpop.f32.mrf.mxu0 }
 0x117   :  { %v537_v33 = vadd.f32 %v1802_v61, %v536_v32  ;;  %v689_v34 = vpop.f32.mrf.mxu1  ;;  %v758_v40 = vadd.f32 %v757_v7, %v605_v36 }
 0x119   :  { %v690_v37 = vadd.f32 %v689_v34, %v537_v33  ;;  %v838_v47 = vmax.f32 %v758_v40, 0.0 }
 0x11b   :  { %v811_v39 = vmax.f32 %v690_v37, 0.0 }
 0x11c   :  { %v606_v35 = vpop.f32.mrf.mxu2 }
 0x11d   :  { %v1369_v41 = vpack.c.bf16 %v811_v39, %v810_v38  ;;  %v607_v42 = vadd.f32 %v1802_v61, %v606_v35  ;;  %v764_v43 = vpop.f32.mrf.mxu3 }
 0x11e   :  { %v539_v44 = vpop.f32.mrf.mxu0 }
 0x11f   :  { %1477 = vst [vmem:[%s2080_s3 + $0x38] sm:$0xff] %v1369_v41   ;;  %v760_v45 = vadd.f32 %v759_v21, %v607_v42  ;;  %v692_v46 = vpop.f32.mrf.mxu1  ;;  %v540_v50 = vadd.f32 %v1802_v61, %v539_v44 }
 0x121   :  { %v839_v48 = vmax.f32 %v760_v45, 0.0  ;;  %v693_v54 = vadd.f32 %v692_v46, %v540_v50 }
 0x123   :  { %v1439_v49 = vpack.c.bf16 %v839_v48, %v838_v47  ;;  %v812_v59 = vmax.f32 %v693_v54, 0.0 }
 0x124   :  { %v609_v51 = vpop.f32.mrf.mxu2 }
 0x125   :  { %1491 = vst [vmem:[%s2080_s3 + $0xa8] sm:$0xff] %v1439_v49   ;;  %v767_v52 = vpop.f32.mrf.mxu3  ;;  %v610_v57 = vadd.f32 %v1802_v61, %v609_v51 }
 0x126   :  { %v541_v53 = vpop.f32.mrf.mxu0 }
 0x127   :  { %v542_v55 = vadd.f32 %v1802_v61, %v541_v53  ;;  %v694_v56 = vpop.f32.mrf.mxu1  ;;  %v763_v1 = vadd.f32 %v762_v31, %v610_v57 }
 0x129   :  { %v695_v58 = vadd.f32 %v694_v56, %v542_v55  ;;  %v840_v7 = vmax.f32 %v763_v1, 0.0 }
 0x12b   :  { %v813_v60 = vmax.f32 %v695_v58, 0.0 }
 0x12c   :  { %v611_v62 = vpop.f32.mrf.mxu2 }
 0x12d   :  { %v1374_v2 = vpack.c.bf16 %v813_v60, %v812_v59  ;;  %v612_v3 = vadd.f32 %v1802_v61, %v611_v62  ;;  %v769_v4 = vpop.f32.mrf.mxu3 }
 0x12e   :  { %v544_v63 = vpop.f32.mrf.mxu0 }
 0x12f   :  { %1478 = vst [vmem:[%s2080_s3 + $0x40] sm:$0xff] %v1374_v2   ;;  %v765_v5 = vadd.f32 %v764_v43, %v612_v3  ;;  %v697_v6 = vpop.f32.mrf.mxu1  ;;  %v545_v10 = vadd.f32 %v1802_v61, %v544_v63 }
 0x131   :  { %v841_v8 = vmax.f32 %v765_v5, 0.0  ;;  %v698_v14 = vadd.f32 %v697_v6, %v545_v10 }
 0x133   :  { %v1444_v9 = vpack.c.bf16 %v841_v8, %v840_v7  ;;  %v814_v20 = vmax.f32 %v698_v14, 0.0 }
 0x134   :  { %v614_v11 = vpop.f32.mrf.mxu2 }
 0x135   :  { %1492 = vst [vmem:[%s2080_s3 + $0xb0] sm:$0xff] %v1444_v9   ;;  %v772_v12 = vpop.f32.mrf.mxu3  ;;  %v615_v18 = vadd.f32 %v1802_v61, %v614_v11 }
 0x136   :  { %v546_v13 = vpop.f32.mrf.mxu0 }
 0x137   :  { %v547_v15 = vadd.f32 %v1802_v61, %v546_v13  ;;  %v699_v16 = vpop.f32.mrf.mxu1  ;;  %v768_v23 = vadd.f32 %v767_v52, %v615_v18 }
 0x139   :  { %v700_v19 = vadd.f32 %v699_v16, %v547_v15  ;;  %v842_v31 = vmax.f32 %v768_v23, 0.0 }
 0x13b   :  { %v815_v21 = vmax.f32 %v700_v19, 0.0 }
 0x13c   :  { %v616_v22 = vpop.f32.mrf.mxu2 }
 0x13d   :  { %v1379_v24 = vpack.c.bf16 %v815_v21, %v814_v20  ;;  %v617_v25 = vadd.f32 %v1802_v61, %v616_v22  ;;  %v774_v26 = vpop.f32.mrf.mxu3 }
 0x13e   :  { %v549_v27 = vpop.f32.mrf.mxu0 }
 0x13f   :  { %1479 = vst [vmem:[%s2080_s3 + $0x48] sm:$0xff] %v1379_v24   ;;  %v770_v29 = vadd.f32 %v769_v4, %v617_v25  ;;  %v702_v30 = vpop.f32.mrf.mxu1  ;;  %v550_v33 = vadd.f32 %v1802_v61, %v549_v27 }
 0x141   :  { %v843_v32 = vmax.f32 %v770_v29, 0.0  ;;  %v703_v38 = vadd.f32 %v702_v30, %v550_v33 }
 0x143   :  { %v1449_v28 = vpack.c.bf16 %v843_v32, %v842_v31  ;;  %v816_v42 = vmax.f32 %v703_v38, 0.0 }
 0x144   :  { %v619_v34 = vpop.f32.mrf.mxu2 }
 0x145   :  { %1493 = vst [vmem:[%s2080_s3 + $0xb8] sm:$0xff] %v1449_v28   ;;  %v777_v36 = vpop.f32.mrf.mxu3  ;;  %v620_v40 = vadd.f32 %v1802_v61, %v619_v34 }
 0x146   :  { %v551_v37 = vpop.f32.mrf.mxu0 }
 0x147   :  { %v552_v39 = vadd.f32 %v1802_v61, %v551_v37  ;;  %v704_v35 = vpop.f32.mrf.mxu1  ;;  %v773_v45 = vadd.f32 %v772_v12, %v620_v40 }
 0x149   :  { %v705_v41 = vadd.f32 %v704_v35, %v552_v39  ;;  %v844_v52 = vmax.f32 %v773_v45, 0.0 }
 0x14b   :  { %v817_v43 = vmax.f32 %v705_v41, 0.0 }
 0x14c   :  { %v621_v44 = vpop.f32.mrf.mxu2 }
 0x14d   :  { %v1384_v46 = vpack.c.bf16 %v817_v43, %v816_v42  ;;  %v622_v47 = vadd.f32 %v1802_v61, %v621_v44  ;;  %v779_v48 = vpop.f32.mrf.mxu3 }
 0x14e   :  { %v554_v49 = vpop.f32.mrf.mxu0 }
 0x14f   :  { %1480 = vst [vmem:[%s2080_s3 + $0x50] sm:$0xff] %v1384_v46   ;;  %v775_v50 = vadd.f32 %v774_v26, %v622_v47  ;;  %v707_v51 = vpop.f32.mrf.mxu1  ;;  %v555_v55 = vadd.f32 %v1802_v61, %v554_v49 }
 0x151   :  { %v845_v53 = vmax.f32 %v775_v50, 0.0  ;;  %v708_v59 = vadd.f32 %v707_v51, %v555_v55 }
 0x153   :  { %v1454_v54 = vpack.c.bf16 %v845_v53, %v844_v52  ;;  %v818_v3 = vmax.f32 %v708_v59, 0.0  ;;  %v570_v59 = vadd.f32 %v1802_v61, %v1805_v0 }
 0x154   :  { %v624_v56 = vpop.f32.mrf.mxu2 }
 0x155   :  { %1494 = vst [vmem:[%s2080_s3 + $0xc0] sm:$0xff] %v1454_v54   ;;  %v782_v57 = vpop.f32.mrf.mxu3  ;;  %v625_v1 = vadd.f32 %v1802_v61, %v624_v56 }
 0x156   :  { %v556_v58 = vpop.f32.mrf.mxu0 }
 0x157   :  { %v557_v60 = vadd.f32 %v1802_v61, %v556_v58  ;;  %v709_v62 = vpop.f32.mrf.mxu1  ;;  %v778_v5 = vadd.f32 %v777_v36, %v625_v1  ;;  %v572_v1 = vadd.f32 %v1802_v61, %v1832_v17 }
 0x159   :  { %v710_v2 = vadd.f32 %v709_v62, %v557_v60  ;;  %v846_v12 = vmax.f32 %v778_v5, 0.0 }
 0x15b   :  { %v819_v4 = vmax.f32 %v710_v2, 0.0 }
 0x15c   :  { %v626_v63 = vpop.f32.mrf.mxu2 }
 0x15d   :  { %v1389_v6 = vpack.c.bf16 %v819_v4, %v818_v3  ;;  %v627_v7 = vadd.f32 %v1802_v61, %v626_v63  ;;  %v784_v8 = vpop.f32.mrf.mxu3 }
 0x15e   :  { %v559_v9 = vpop.f32.mrf.mxu0 }
 0x15f   :  { %1481 = vst [vmem:[%s2080_s3 + $0x58] sm:$0xff] %v1389_v6   ;;  %v780_v10 = vadd.f32 %v779_v48, %v627_v7  ;;  %v712_v11 = vpop.f32.mrf.mxu1  ;;  %v560_v15 = vadd.f32 %v1802_v61, %v559_v9 }
 0x161   :  { %v847_v13 = vmax.f32 %v780_v10, 0.0  ;;  %v713_v20 = vadd.f32 %v712_v11, %v560_v15 }
 0x163   :  { %v1459_v14 = vpack.c.bf16 %v847_v13, %v846_v12  ;;  %v820_v25 = vmax.f32 %v713_v20, 0.0 }
 0x164   :  { %v629_v16 = vpop.f32.mrf.mxu2 }
 0x165   :  { %1495 = vst [vmem:[%s2080_s3 + $0xc8] sm:$0xff] %v1459_v14   ;;  %v787_v18 = vpop.f32.mrf.mxu3  ;;  %v630_v23 = vadd.f32 %v1802_v61, %v629_v16 }
 0x166   :  { %v561_v19 = vpop.f32.mrf.mxu0 }
 0x167   :  { %v562_v21 = vadd.f32 %v1802_v61, %v561_v19  ;;  %v714_v22 = vpop.f32.mrf.mxu1  ;;  %v783_v29 = vadd.f32 %v782_v57, %v630_v23 }
 0x169   :  { %v715_v24 = vadd.f32 %v714_v22, %v562_v21  ;;  %v848_v36 = vmax.f32 %v783_v29, 0.0 }
 0x16b   :  { %v821_v26 = vmax.f32 %v715_v24, 0.0 }
 0x16c   :  { %v631_v27 = vpop.f32.mrf.mxu2 }
 0x16d   :  { %v1394_v30 = vpack.c.bf16 %v821_v26, %v820_v25  ;;  %v632_v31 = vadd.f32 %v1802_v61, %v631_v27  ;;  %v789_v32 = vpop.f32.mrf.mxu3 }
 0x16e   :  { %v564_v28 = vpop.f32.mrf.mxu0 }
 0x16f   :  { %1482 = vst [vmem:[%s2080_s3 + $0x60] sm:$0xff] %v1394_v30   ;;  %v785_v33 = vadd.f32 %v784_v8, %v632_v31  ;;  %v717_v34 = vpop.f32.mrf.mxu1  ;;  %v565_v39 = vadd.f32 %v1802_v61, %v564_v28 }
 0x171   :  { %v849_v37 = vmax.f32 %v785_v33, 0.0  ;;  %v718_v42 = vadd.f32 %v717_v34, %v565_v39 }
 0x173   :  { %v1464_v38 = vpack.c.bf16 %v849_v37, %v848_v36  ;;  %v822_v47 = vmax.f32 %v718_v42, 0.0 }
 0x174   :  { %v634_v35 = vpop.f32.mrf.mxu2 }
 0x175   :  { %1496 = vst [vmem:[%s2080_s3 + $0xd0] sm:$0xff] %v1464_v38   ;;  %v792_v40 = vpop.f32.mrf.mxu3  ;;  %v635_v45 = vadd.f32 %v1802_v61, %v634_v35 }
 0x176   :  { %v566_v41 = vpop.f32.mrf.mxu0 }
 0x177   :  { %v567_v43 = vadd.f32 %v1802_v61, %v566_v41  ;;  %v719_v44 = vpop.f32.mrf.mxu1  ;;  %v788_v50 = vadd.f32 %v787_v18, %v635_v45 }
 0x179   :  { %v720_v46 = vadd.f32 %v719_v44, %v567_v43  ;;  %v850_v56 = vmax.f32 %v788_v50, 0.0 }
 0x17b   :  { %v823_v48 = vmax.f32 %v720_v46, 0.0 }
 0x17c   :  { %v636_v49 = vpop.f32.mrf.mxu2 }
 0x17d   :  { %v1399_v51 = vpack.c.bf16 %v823_v48, %v822_v47  ;;  %v637_v52 = vadd.f32 %v1802_v61, %v636_v49  ;;  %v794_v53 = vpop.f32.mrf.mxu3 }
 0x17f   :  { %1483 = vst [vmem:[%s2080_s3 + $0x68] sm:$0xff] %v1399_v51   ;;  %v790_v54 = vadd.f32 %v789_v32, %v637_v52  ;;  %v722_v55 = vpop.f32.mrf.mxu1 }
 0x180   :  { %v723_v2 = vadd.f32 %v722_v55, %v570_v59 }
 0x181   :  { %v851_v57 = vmax.f32 %v790_v54, 0.0 }
 0x182   :  { %v824_v6 = vmax.f32 %v723_v2, 0.0 }
 0x183   :  { %v1469_v58 = vpack.c.bf16 %v851_v57, %v850_v56 }
 0x184   :  { %v639_v60 = vpop.f32.mrf.mxu2 }
 0x185   :  { %1497 = vst [vmem:[%s2080_s3 + $0xd8] sm:$0xff] %v1469_v58   ;;  %v640_v62 = vadd.f32 %v1802_v61, %v639_v60 }
 0x187   :  { %v793_v3 = vadd.f32 %v792_v40, %v640_v62  ;;  %v724_v4 = vpop.f32.mrf.mxu1 }
 0x188   :  { %v725_v63 = vadd.f32 %v724_v4, %v572_v1 }
 0x189   :  { %v852_v5 = vmax.f32 %v793_v3, 0.0 }
 0x18a   :  { %v825_v7 = vmax.f32 %v725_v63, 0.0 }
 0x18b   :  { %v909_v8 = vpack.c.bf16 %v852_v5, %v852_v5 }
 0x18c   :  { %v1404_v9 = vpack.c.bf16 %v825_v7, %v824_v6  ;;  %v641_v0 = vpop.f32.mrf.mxu2 }
 0x18d   :  { %966 = vst [vmem:[%s2080_s3 + $0xe0] sm:$0x1] %v909_v8 }
 0x18e   :  { %1484 = vst [vmem:[%s2080_s3 + $0x70] sm:$0xff] %v1404_v9  }

// kernel: _lambda_.7
= control target key start
LH: loop header
LB: loop body
LE: loop exit
PB: predicated region body
PF: predicated region fallthrough
CT: control target
= control target key end

     0   :  { %s4349_s12 = smov 0   ;;  %s4351_s13 = smov 0   ;;  %s5852_s0 = inlined_call_operand.vmem [shape: bf16[1568,288], index: 0, kind: input, shape index: {}]   ;;  %s5853_s1 = inlined_call_operand.vmem [shape: bf16[288,128], index: 1, kind: input, shape index: {}]   ;;  %s5854_s2 = inlined_call_operand.vmem [shape: f32[1,128], index: 2, kind: input, shape index: {}]   ;;  %s5855_s3 = inlined_call_operand.vmem [shape: f32[1568,128], index: 3, kind: output, shape index: {}]  }
   0x1   :  { %s4353_s14 = smov 0  }
   0x2 LB: > { %s4362_s15 = sadd.s32 4294967295, %s4295_s14   ;;  %s4364_s16 = sadd.s32 1, %s4295_s14   ;;  %s4295_s14 = sphi %s4353_s14, %s5910_s14   ;;  %s4291_s13 = sphi %s4351_s13, %s5909_s13   ;;  %s4287_s12 = sphi %s4349_s12, %s5908_s12  }
   0x3   : > { %s85_s17 = ssub.s32 %s4295_s14, %s4364_s16  ;;  %s88_s18 = sadd.s32 1, %s4291_s13 }
   0x4   : > { %p86_p0 = scmp.eq.s32.totalorder %s85_s17, 0  ;;  %p98_p1 = scmp.ne.s32.totalorder %s4291_s13, %s4287_s12 }
   0x5   : > { %p99_p2 = scmp.eq.s32.totalorder %s4362_s15, 3  ;;  %p3184_p3 = scmp.ge.s32.totalorder %s4295_s14, 1 }
   0x6   : > { %s4372_s19 = scalar_select %p86_p0, %s4291_s13, %s88_s18  }
   0x7   : > { %p4374_p4 = por %p99_p2, %p98_p1  ;;  %p149_p5 = scmp.lt.s32.totalorder %s4295_s14, 5 }
   0x9   : > { %p150_p6 = pnand %p3184_p3, %p149_p5 }
   0xa   : > { %s4392_s27 = sshll.u32 (!%p150_p6), %s4362_s15, 6  ;;  %s175_s25 = sand.u32 (!%p150_p6), 1, %s4287_s12  }
   0xb   : > { %153 = sbr.rel (%p150_p6) target bundleno = 669 (0x29d), region = 32  ;;  %p184_p7 = scmp.lt.s32.totalorder (!%p150_p6), %s4392_s27, 195 }
   0xc   : > { %s4574_s26 = sshll.u32 (!%p150_p6), %s175_s25, 9 }
   0xd   : > { %s4590_s12 = scalar_lea.vmem (!%p150_p6), [#allocation2], %s4574_s26  }
  0x10   : > { %v3860_v0 = vld [vmem:[%s5853_s1 + $0x38] sm:$0xff]  ;;  %v4384_v1 = vld [vmem:[%s5853_s1 + $0x88] sm:$0xff]  ;;  %v3859_v3 = vld [vmem:[%s5853_s1 + $0x30] sm:$0xff]  ;;  %s185_s7 = scalar_select %p184_p7, %s4392_s27, 195  ;;  %vm957_vm0 = vcmask 261120  }
  0x11   : > { %v4389_v2 = vld [vmem:[%s5853_s1 + $0x78] sm:$0xff]  ;;  %1054 = vmatpush.bf16.msra.mxu0 %v3860_v0  ;;  %3874 = vmatpush.bf16.msra.mxu3 %v3860_v0  ;;  %v4403_v4 = vld [vmem:[%s5853_s1 + $0x80] sm:$0xff]  ;;  %v3867_v5 = vld [vmem:[%s5853_s1 + $0x70] sm:$0xff]  ;;  %s2849_s6 = ssub.s32 (%p4374_p4), 196, %s4392_s27 }
  0x12   : > { %1398 = vmatpush.bf16.msra.mxu2 %v4384_v1  ;;  %1223 = vmatpush.bf16.msra.mxu1 %v4389_v2  ;;  %s3892_s8 = smul.u32 12, %s185_s7  ;;  %v3858_v6 = vld [vmem:[%s5853_s1 + $0x28] sm:$0xff]  ;;  %v3857_v11 = vld [vmem:[%s5853_s1 + $0x20] sm:$0xff]  ;;  %v3856_v13 = vld [vmem:[%s5853_s1 + $0x18] sm:$0xff]  ;;  %s3871_s7 = sshll.u32 (%p4374_p4), %s4362_s15, 9 }
  0x13   : > { %v3866_v7 = vld [vmem:[%s5853_s1 + $0x68] sm:$0xff]  ;;  %v3865_v12 = vld [vmem:[%s5853_s1 + $0x60] sm:$0xff]  ;;  %v3864_v14 = vld [vmem:[%s5853_s1 + $0x58] sm:$0xff]  ;;  %p2850_p8 = scmp.lt.s32.totalorder (%p4374_p4), %s2849_s6, 64  ;;  %s5717_s10 = scalar_lea.vmem (%p4374_p4), %s5855_s3, %s3871_s7  }
  0x14   : > { %s4416_s17 = scalar_lea.vmem %s5852_s0, %s3892_s8  ;;  %v3855_v15 = vld [vmem:[%s5853_s1 + $0x10] sm:$0xff]  ;;  %v3854_v19 = vld [vmem:[%s5853_s1 + $0x8] sm:$0xff]  ;;  %v3853_v22 = vld [vmem:[%s5853_s1] sm:$0xff] }
  0x15   : > { %1055 = vmatpush.bf16.msra.mxu0 %v3859_v3  ;;  %3875 = vmatpush.bf16.msra.mxu3 %v3859_v3  ;;  %v3198_v8 = vld [vmem:[%s4416_s17 + $0x8] sm:$0xf]  ;;  %v3759_v9 = vld [vmem:[%s4416_s17 + $0x10] sm:$0xf0]  ;;  %v3210_v17 = vld [vmem:[%s4416_s17 + $0x20] sm:$0xf] }
  0x16   : > { %1399 = vmatpush.bf16.msra.mxu2 %v4403_v4  ;;  %1224 = vmatpush.bf16.msra.mxu1 %v3867_v5  ;;  %v3199_v10 = vor.u32 %v3759_v9, %v3198_v8  ;;  %v3863_v16 = vld [vmem:[%s5853_s1 + $0x50] sm:$0xff]  ;;  %v3762_v18 = vld [vmem:[%s4416_s17 + $0x28] sm:$0xf0]  ;;  %v3190_v23 = vld [vmem:[%s4416_s17] sm:$0xf] }
  0x17   : > { %v3211_v20 = vor.u32 %v3762_v18, %v3210_v17  ;;  %v3862_v21 = vld [vmem:[%s5853_s1 + $0x48] sm:$0xff]  ;;  %v3478_v25 = vld [vmem:[%s4416_s17 + $0x240] sm:$0xf]  ;;  %v3757_v28 = vld [vmem:[%s4416_s17 + $0x4] sm:$0xf] }
  0x18   : > { %v3758_v24 = vld [vmem:[%s4416_s17 + $0x8] sm:$0xf0]  ;;  %v3861_v27 = vld [vmem:[%s5853_s1 + $0x40] sm:$0xff]  ;;  %v3192_v29 = vld [vmem:[%s4416_s17 + $0xc] sm:$0xf0] }
  0x19   : > { %1056 = vmatpush.bf16.msra.mxu0 %v3858_v6  ;;  %3876 = vmatpush.bf16.msra.mxu3 %v3858_v6  ;;  %v3830_v26 = vld [vmem:[%s4416_s17 + $0x248] sm:$0xf0]  ;;  %v3191_v30 = vor.u32 %v3758_v24, %v3190_v23  ;;  %v3195_v32 = vor.u32 %v3757_v28, %v3192_v29  ;;  %v3222_v33 = vld [vmem:[%s4416_s17 + $0x38] sm:$0xf]  ;;  %v3765_v34 = vld [vmem:[%s4416_s17 + $0x40] sm:$0xf0] }
  0x1a   : > { %3644 = vmatmul.msk.bf16.vlgmr.msra.gmra.mxu2 %vm957_vm0, %v3199_v10  ;;  %1225 = vmatpush.bf16.msra.mxu1 %v3866_v7  ;;  %v3479_v31 = vor.u32 %v3830_v26, %v3478_v25  ;;  %v3223_v35 = vor.u32 %v3765_v34, %v3222_v33  ;;  %v3202_v36 = vld [vmem:[%s4416_s17 + $0x18] sm:$0xf]  ;;  %v3761_v37 = vld [vmem:[%s4416_s17 + $0x20] sm:$0xf0]  ;;  %v3760_v40 = vld [vmem:[%s4416_s17 + $0x1c] sm:$0xf] }
  0x1b   : > { %v3490_v38 = vld [vmem:[%s4416_s17 + $0x258] sm:$0xf]  ;;  %v3833_v39 = vld [vmem:[%s4416_s17 + $0x260] sm:$0xf0]  ;;  %v3204_v41 = vld [vmem:[%s4416_s17 + $0x24] sm:$0xf0]  ;;  %v3203_v42 = vor.u32 %v3761_v37, %v3202_v36 }
  0x1c   : > { %v3491_v43 = vor.u32 %v3833_v39, %v3490_v38  ;;  %v3207_v44 = vor.u32 %v3760_v40, %v3204_v41  ;;  %v3234_v45 = vld [vmem:[%s4416_s17 + $0x50] sm:$0xf]  ;;  %v3768_v46 = vld [vmem:[%s4416_s17 + $0x58] sm:$0xf0]  ;;  %v3763_v52 = vld [vmem:[%s4416_s17 + $0x34] sm:$0xf] }
  0x1d   : > { %1057 = vmatpush.bf16.msra.mxu0 %v3857_v11  ;;  %3877 = vmatpush.bf16.msra.mxu3 %v3857_v11  ;;  %v3235_v47 = vor.u32 %v3768_v46, %v3234_v45  ;;  %v3214_v48 = vld [vmem:[%s4416_s17 + $0x30] sm:$0xf]  ;;  %v3764_v49 = vld [vmem:[%s4416_s17 + $0x38] sm:$0xf0]  ;;  %v3216_v53 = vld [vmem:[%s4416_s17 + $0x3c] sm:$0xf0] }
  0x1e   : > { %1226 = vmatpush.bf16.msra.mxu1 %v3865_v12  ;;  %v3502_v50 = vld [vmem:[%s4416_s17 + $0x270] sm:$0xf]  ;;  %v3836_v51 = vld [vmem:[%s4416_s17 + $0x278] sm:$0xf0]  ;;  %v3215_v54 = vor.u32 %v3764_v49, %v3214_v48  ;;  %v3219_v56 = vor.u32 %v3763_v52, %v3216_v53  ;;  %v3246_v57 = vld [vmem:[%s4416_s17 + $0x68] sm:$0xf] }
  0x1f   : > { %v3503_v55 = vor.u32 %v3836_v51, %v3502_v50  ;;  %v3771_v58 = vld [vmem:[%s4416_s17 + $0x70] sm:$0xf0]  ;;  %v3226_v60 = vld [vmem:[%s4416_s17 + $0x48] sm:$0xf]  ;;  %v3766_v0 = vld [vmem:[%s4416_s17 + $0x4c] sm:$0xf] }
  0x20   : > { %v3247_v59 = vor.u32 %v3771_v58, %v3246_v57  ;;  %v3767_v61 = vld [vmem:[%s4416_s17 + $0x50] sm:$0xf0]  ;;  %v3514_v62 = vld [vmem:[%s4416_s17 + $0x288] sm:$0xf]  ;;  %v3774_v6 = vld [vmem:[%s4416_s17 + $0x88] sm:$0xf0] }
  0x21   : > { %1058 = vmatpush.bf16.msra.mxu0 %v3856_v13  ;;  %3878 = vmatpush.bf16.msra.mxu3 %v3856_v13  ;;  %v3839_v63 = vld [vmem:[%s4416_s17 + $0x290] sm:$0xf0]  ;;  %v3238_v8 = vld [vmem:[%s4416_s17 + $0x60] sm:$0xf]  ;;  %v3770_v9 = vld [vmem:[%s4416_s17 + $0x68] sm:$0xf0] }
  0x22   : > { %1227 = vmatpush.bf16.msra.mxu1 %v3864_v14  ;;  %v3515_v3 = vor.u32 %v3839_v63, %v3514_v62  ;;  %v3526_v10 = vld [vmem:[%s4416_s17 + $0x2a0] sm:$0xf]  ;;  %v3842_v11 = vld [vmem:[%s4416_s17 + $0x2a8] sm:$0xf0]  ;;  %v3240_v13 = vld [vmem:[%s4416_s17 + $0x6c] sm:$0xf0] }
  0x23   : > { %v3270_v17 = vld [vmem:[%s4416_s17 + $0x98] sm:$0xf]  ;;  %v3777_v18 = vld [vmem:[%s4416_s17 + $0xa0] sm:$0xf0]  ;;  %v3772_v24 = vld [vmem:[%s4416_s17 + $0x7c] sm:$0xf] }
  0x24   : > { %v3845_v23 = vld [vmem:[%s4416_s17 + $0x2c0] sm:$0xf0]  ;;  %v3252_v25 = vld [vmem:[%s4416_s17 + $0x84] sm:$0xf0]  ;;  %v3282_v29 = vld [vmem:[%s4416_s17 + $0xb0] sm:$0xf] }
  0x25   : > { %1059 = vmatpush.bf16.msra.mxu0 %v3855_v15  ;;  %3879 = vmatpush.bf16.msra.mxu3 %v3855_v15  ;;  %v3527_v15 = vor.u32 %v3842_v11, %v3526_v10  ;;  %v3255_v28 = vor.u32 %v3772_v24, %v3252_v25  ;;  %v3776_v33 = vld [vmem:[%s4416_s17 + $0x98] sm:$0xf0]  ;;  %v3550_v34 = vld [vmem:[%s4416_s17 + $0x2d0] sm:$0xf]  ;;  %v3775_v36 = vld [vmem:[%s4416_s17 + $0x94] sm:$0xf] }
  0x26   : > { %1228 = vmatpush.bf16.msra.mxu1 %v3863_v16  ;;  %v3264_v37 = vld [vmem:[%s4416_s17 + $0x9c] sm:$0xf0]  ;;  %v3294_v41 = vld [vmem:[%s4416_s17 + $0xc8] sm:$0xf]  ;;  %v3779_v45 = vld [vmem:[%s4416_s17 + $0xb0] sm:$0xf0] }
  0x27   : > { %v3267_v40 = vor.u32 %v3775_v36, %v3264_v37  ;;  %v3562_v46 = vld [vmem:[%s4416_s17 + $0x2e8] sm:$0xf]  ;;  %v3778_v48 = vld [vmem:[%s4416_s17 + $0xac] sm:$0xf]  ;;  %v3276_v49 = vld [vmem:[%s4416_s17 + $0xb4] sm:$0xf0] }
  0x28   : > { %v3279_v53 = vor.u32 %v3778_v48, %v3276_v49  ;;  %v3286_v58 = vld [vmem:[%s4416_s17 + $0xc0] sm:$0xf]  ;;  %v3781_v63 = vld [vmem:[%s4416_s17 + $0xc4] sm:$0xf]  ;;  %v3318_v11 = vld [vmem:[%s4416_s17 + $0xf8] sm:$0xf] }
  0x29   : > { %1060 = vmatpush.bf16.msra.mxu0 %v3854_v19  ;;  %3880 = vmatpush.bf16.msra.mxu3 %v3854_v19  ;;  %v3271_v19 = vor.u32 %v3777_v18, %v3270_v17  ;;  %v4539_v62 = vld [vmem:[%s5854_s2] ss:$0 sm:$0xff]  ;;  %v3784_v25 = vld [vmem:[%s4416_s17 + $0xdc] sm:$0xf] }
  0x2a   : > { %3645 = vmatmul.msk.bf16.gmra.mxu2 %vm957_vm0, %v3211_v20  ;;  %1229 = vmatpush.bf16.msra.mxu1 %v3862_v21  ;;  %v3250_v20 = vld [vmem:[%s4416_s17 + $0x78] sm:$0xf] }
  0x2d   : > { %1061 = vmatpush.bf16.msra.mxu0 %v3853_v22  ;;  %3881 = vmatpush.bf16.msra.mxu3 %v3853_v22  ;;  %v3538_v22 = vld [vmem:[%s4416_s17 + $0x2b8] sm:$0xf] }
  0x2e   : > { %1230 = vmatpush.bf16.msra.mxu1 %v3861_v27 }
  0x30   : > { %1062 = vmatmul.bf16.vlgmr.msra.gmra.mxu0 %v3191_v30  ;;  %1182 = vmatmul.bf16.vlgmr.msra.gmra.mxu3 %v3479_v31  ;;  %v3780_v30 = vld [vmem:[%s4416_s17 + $0xb8] sm:$0xf0] }
  0x31   : > { %3882 = vmatpush.bf16.msrb.mxu3 %v4389_v2  ;;  %1231 = vmatmul.bf16.vlgmr.msra.gmra.mxu1 %v3195_v32  ;;  %v3227_v2 = vor.u32 %v3767_v61, %v3226_v60  ;;  %v3283_v31 = vor.u32 %v3780_v30, %v3282_v29  ;;  %v3262_v32 = vld [vmem:[%s4416_s17 + $0x90] sm:$0xf]  ;;  %v3829_v60 = vld [vmem:[%s4416_s17 + $0x244] sm:$0xf] }
  0x32   : > { %v3263_v38 = vor.u32 %v3776_v33, %v3262_v32  ;;  %v3480_v61 = vld [vmem:[%s4416_s17 + $0x24c] sm:$0xf0] }
  0x35   : > { %3883 = vmatpush.bf16.msrb.mxu3 %v3867_v5  ;;  %v3258_v5 = vld [vmem:[%s4416_s17 + $0x80] sm:$0xf] }
  0x39   : > { %3884 = vmatpush.bf16.msrb.mxu3 %v3866_v7  ;;  %v3259_v7 = vor.u32 %v3774_v6, %v3258_v5 }
  0x3a   : > { %3646 = vmatmul.msk.bf16.gmra.mxu2 %vm957_vm0, %v3223_v35  ;;  %v3848_v35 = vld [vmem:[%s4416_s17 + $0x2d8] sm:$0xf0] }
  0x3b   : > { %v3551_v39 = vor.u32 %v3848_v35, %v3550_v34 }
  0x3d   : > { %3885 = vmatpush.bf16.msrb.mxu3 %v3865_v12  ;;  %v3769_v12 = vld [vmem:[%s4416_s17 + $0x64] sm:$0xf] }
  0x40   : > { %1067 = vmatmul.bf16.gmra.mxu0 %v3203_v42  ;;  %1187 = vmatmul.bf16.gmra.mxu3 %v3491_v43  ;;  %v3783_v42 = vld [vmem:[%s4416_s17 + $0xd0] sm:$0xf0] }
  0x41   : > { %3886 = vmatpush.bf16.msrb.mxu3 %v3864_v14  ;;  %1236 = vmatmul.bf16.gmra.mxu1 %v3207_v44  ;;  %v3239_v14 = vor.u32 %v3770_v9, %v3238_v8  ;;  %v3295_v43 = vor.u32 %v3783_v42, %v3294_v41  ;;  %v3274_v44 = vld [vmem:[%s4416_s17 + $0xa8] sm:$0xf]  ;;  %v3330_v41 = vld [vmem:[%s4416_s17 + $0x110] sm:$0xf]  ;;  %v3792_v42 = vld [vmem:[%s4416_s17 + $0x118] sm:$0xf0] }
  0x42   : > { %v3275_v50 = vor.u32 %v3779_v45, %v3274_v44 }
  0x45   : > { %3887 = vmatpush.bf16.msrb.mxu3 %v3863_v16  ;;  %v3243_v16 = vor.u32 %v3769_v12, %v3240_v13  ;;  %v3789_v12 = vld [vmem:[%s4416_s17 + $0x100] sm:$0xf0] }
  0x46   : > { %v3319_v18 = vor.u32 %v3789_v12, %v3318_v11 }
  0x49   : > { %3888 = vmatpush.bf16.msrb.mxu3 %v3862_v21  ;;  %v3773_v21 = vld [vmem:[%s4416_s17 + $0x80] sm:$0xf0] }
  0x4a   : > { %3647 = vmatmul.msk.bf16.gmra.mxu2 %vm957_vm0, %v3235_v47  ;;  %v3251_v26 = vor.u32 %v3773_v21, %v3250_v20  ;;  %v3851_v47 = vld [vmem:[%s4416_s17 + $0x2f0] sm:$0xf0]  ;;  %v3298_v20 = vld [vmem:[%s4416_s17 + $0xd8] sm:$0xf]  ;;  %v3785_v21 = vld [vmem:[%s4416_s17 + $0xe0] sm:$0xf0] }
  0x4b   : > { %v3563_v51 = vor.u32 %v3851_v47, %v3562_v46  ;;  %v3299_v30 = vor.u32 %v3785_v21, %v3298_v20 }
  0x4d   : > { %3889 = vmatpush.bf16.msrb.mxu3 %v3861_v27  ;;  %v3539_v27 = vor.u32 %v3845_v23, %v3538_v22  ;;  %v3832_v22 = vld [vmem:[%s4416_s17 + $0x25c] sm:$0xf]  ;;  %v3492_v23 = vld [vmem:[%s4416_s17 + $0x264] sm:$0xf0] }
  0x50   : > { %1072 = vmatmul.bf16.gmra.mxu0 %v3215_v54  ;;  %1192 = vmatmul.bf16.gmra.mxu3 %v3503_v55  ;;  %v3306_v54 = vld [vmem:[%s4416_s17 + $0xe0] sm:$0xf]  ;;  %v3786_v55 = vld [vmem:[%s4416_s17 + $0xe8] sm:$0xf0] }
  0x51   : > { %3890 = vmatpush.bf16.msra.mxu3 %v4384_v1  ;;  %1241 = vmatmul.bf16.gmra.mxu1 %v3219_v56  ;;  %v3228_v1 = vld [vmem:[%s4416_s17 + $0x54] sm:$0xf0]  ;;  %v3307_v57 = vor.u32 %v3786_v55, %v3306_v54  ;;  %v3310_v55 = vld [vmem:[%s4416_s17 + $0xf0] sm:$0xf] }
  0x55   : > { %3891 = vmatpush.bf16.msra.mxu3 %v4403_v4  ;;  %v3231_v4 = vor.u32 %v3766_v0, %v3228_v1  ;;  %v3288_v0 = vld [vmem:[%s4416_s17 + $0xcc] sm:$0xf0] }
  0x56   : > { %v3291_v5 = vor.u32 %v3781_v63, %v3288_v0  ;;  %v3787_v0 = vld [vmem:[%s4416_s17 + $0xf4] sm:$0xf] }
  0x5a   : > { %3648 = vmatmul.msk.bf16.gmra.mxu2 %vm957_vm0, %v3247_v59  ;;  %v3782_v59 = vld [vmem:[%s4416_s17 + $0xc8] sm:$0xf0] }
  0x5b   : > { %v3287_v1 = vor.u32 %v3782_v59, %v3286_v58  ;;  %v3835_v58 = vld [vmem:[%s4416_s17 + $0x274] sm:$0xf]  ;;  %v3504_v59 = vld [vmem:[%s4416_s17 + $0x27c] sm:$0xf0] }
  0x60   : > { %1077 = vmatmul.bf16.gmra.mxu0 %v3227_v2  ;;  %1197 = vmatmul.bf16.gmra.mxu3 %v3515_v3  ;;  %v3483_v2 = vor.u32 %v3829_v60, %v3480_v61 }
  0x61   : > { %1246 = vmatmul.bf16.gmra.mxu1 %v3231_v4 }
  0x6a   : > { %3649 = vmatmul.msk.bf16.gmra.mxu2 %vm957_vm0, %v3259_v7 }
  0x70   : > { %1082 = vmatmul.bf16.gmra.mxu0 %v3239_v14  ;;  %1202 = vmatmul.bf16.gmra.mxu3 %v3527_v15 }
  0x71   : > { %1251 = vmatmul.bf16.gmra.mxu1 %v3243_v16 }
  0x7a   : > { %3650 = vmatmul.msk.bf16.gmra.mxu2 %vm957_vm0, %v3271_v19 }
  0x80   : > { %1087 = vmatmul.bf16.gmra.mxu0 %v3251_v26  ;;  %1207 = vmatmul.bf16.gmra.mxu3 %v3539_v27  ;;  %v3300_v26 = vld [vmem:[%s4416_s17 + $0xe4] sm:$0xf0] }
  0x81   : > { %1256 = vmatmul.bf16.gmra.mxu1 %v3255_v28  ;;  %v3303_v35 = vor.u32 %v3784_v25, %v3300_v26  ;;  %v3342_v25 = vld [vmem:[%s4416_s17 + $0x128] sm:$0xf]  ;;  %v3795_v26 = vld [vmem:[%s4416_s17 + $0x130] sm:$0xf0] }
  0x8a   : > { %3651 = vmatmul.msk.bf16.gmra.mxu2 %vm957_vm0, %v3283_v31  ;;  %v3495_v31 = vor.u32 %v3832_v22, %v3492_v23 }
  0x90   : > { %1092 = vmatmul.bf16.gmra.mxu0 %v3263_v38  ;;  %1212 = vmatmul.bf16.gmra.mxu3 %v3551_v39 }
  0x91   : > { %1261 = vmatmul.bf16.gmra.mxu1 %v3267_v40 }
  0x9a   : > { %3652 = vmatmul.msk.bf16.gmra.mxu2 %vm957_vm0, %v3295_v43 }
  0x9d   : > { %v1401_v52 = vpop.f32.mrf.mxu2 }
  0xa0   : > { %1097 = vmatmul.bf16.gmra.mxu0 %v3275_v50  ;;  %1217 = vmatmul.bf16.gmra.mxu3 %v3563_v51 }
  0xa1   : > { %1266 = vmatmul.bf16.gmra.mxu1 %v3279_v53 }
  0xa5   : > { %v1403_v56 = vpop.f32.mrf.mxu2 }
  0xaa   : > { %3653 = vmatmul.msk.bf16.gmra.mxu2 %vm957_vm0, %v3307_v57 }
  0xad   : > { %v1406_v3 = vpop.f32.mrf.mxu2  ;;  %v1063_v4 = vpop.f32.mrf.mxu0 }
  0xae   : > { %v1064_v6 = vadd.f32 %v4539_v62, %v1063_v4  ;;  %v1232_v7 = vpop.f32.mrf.mxu1 }
  0xb0   : > { %v1233_v8 = vadd.f32 %v1232_v7, %v1064_v6  ;;  %1102 = vmatmul.bf16.gmra.mxu0 %v3287_v1  ;;  %1351 = vmatmul.bf16.vlgmr.msrb.gmra.mxu3 %v3483_v2  ;;  %v3312_v1 = vld [vmem:[%s4416_s17 + $0xfc] sm:$0xf0]  ;;  %v3507_v7 = vor.u32 %v3835_v58, %v3504_v59 }
  0xb1   : > { %1271 = vmatmul.bf16.gmra.mxu1 %v3291_v5 }
  0xb2   : > { %v1402_v9 = vadd.f32 %v1401_v52, %v1233_v8  ;;  %v3331_v52 = vor.u32 %v3792_v42, %v3330_v41 }
  0xb3   : > { %v4544_v10 = vpop.f32.mrf.mxu3 }
  0xb4   : > { %v3676_v13 = vmul.f32 -1.442695, %v1402_v9 }
  0xb5   : > { %v1408_v14 = vpop.f32.mrf.mxu2  ;;  %v1065_v15 = vpop.f32.mrf.mxu0 }
  0xb6   : > { %3982 = vpow2.f32 %v3676_v13  ;;  %v1066_v16 = vadd.f32 %v4539_v62, %v1065_v15  ;;  %v1234_v17 = vpop.f32.mrf.mxu1 }
  0xb8   : > { %v1235_v19 = vadd.f32 %v1234_v17, %v1066_v16 }
  0xba   : > { %v1404_v24 = vadd.f32 %v1403_v56, %v1235_v19  ;;  %3654 = vmatmul.msk.bf16.gmra.mxu2 %vm957_vm0, %v3319_v18  ;;  %v3788_v56 = vld [vmem:[%s4416_s17 + $0xf8] sm:$0xf0] }
  0xbb   : > { %v4556_v27 = vpop.f32.mrf.mxu3 }
  0xbc   : > { %v3983_v28 = vpop.eup %3982  ;;  %v3677_v29 = vmul.f32 -1.442695, %v1404_v24 }
  0xbd   : > { %v1753_v32 = vadd.f32 1.0, %v3983_v28  ;;  %v4558_v33 = vpop.f32.mrf.mxu2  ;;  %v1068_v34 = vpop.f32.mrf.mxu0 }
  0xbe   : > { %3984 = vpow2.f32 %v3677_v29  ;;  %v1069_v36 = vadd.f32 %v4539_v62, %v1068_v34  ;;  %v1237_v37 = vpop.f32.mrf.mxu1 }
  0xbf   : > { %3986 = vrcp.f32 %v1753_v32  ;;  %v1828_v57 = vand.u32 2147483648, %v1753_v32  ;;  %v1826_v61 = vand.u32 2147483647, %v1753_v32  ;;  %vm1822_vm2 = vweird.f32 %v1753_v32 }
  0xc0   : > { %v1238_v38 = vadd.f32 %v1237_v37, %v1069_v36  ;;  %1107 = vmatmul.bf16.gmra.mxu0 %v3299_v30  ;;  %1356 = vmatmul.bf16.gmra.mxu3 %v3495_v31 }
  0xc1   : > { %1276 = vmatmul.bf16.gmra.mxu1 %v3303_v35  ;;  %v1829_v9 = vor.u32 1.1754944e-38, %v1828_v57  ;;  %vm1827_vm4 = vcmp.eq.f32.partialorder %v1826_v61, 8.507059e+37 }
  0xc2   : > { %v1407_v39 = vadd.f32 %v1406_v3, %v1238_v38  ;;  %v3311_v3 = vor.u32 %v3788_v56, %v3310_v55  ;;  %v3343_v38 = vor.u32 %v3795_v26, %v3342_v25  ;;  %v3790_v55 = vld [vmem:[%s4416_s17 + $0x10c] sm:$0xf]  ;;  %v3324_v56 = vld [vmem:[%s4416_s17 + $0x114] sm:$0xf0] }
  0xc3   : > { %v4561_v40 = vpop.f32.mrf.mxu3 }
  0xc4   : > { %v3985_v43 = vpop.eup %3984  ;;  %v3678_v44 = vmul.f32 -1.442695, %v1407_v39 }
  0xc5   : > { %v3987_v45 = vpop.eup %3986  ;;  %v4565_v46 = vadd.f32 1.0, %v3985_v43  ;;  %v4567_v47 = vpop.f32.mrf.mxu2 }
  0xc6   : > { %v1070_v48 = vpop.f32.mrf.mxu0  ;;  %v1818_v49 = vmul.f32 %v3987_v45, %v1753_v32  ;;  %3988 = vpow2.f32 %v3678_v44  ;;  %v1239_v51 = vpop.f32.mrf.mxu1  ;;  %vm1823_vm1 = vweird.f32 %v3987_v45 }
  0xc7   : > { %v1071_v50 = vadd.f32 %v4539_v62, %v1070_v48  ;;  %3990 = vrcp.f32 %v4565_v46  ;;  %vm1824_vm3 = vmor %vm1822_vm2, %vm1823_vm1  ;;  %v1843_v21 = vand.u32 2147483648, %v4565_v46  ;;  %v1841_v23 = vand.u32 2147483647, %v4565_v46  ;;  %v3791_v48 = vld [vmem:[%s4416_s17 + $0x110] sm:$0xf0] }
  0xc8   : > { %v1819_v53 = vsub.f32 1.0, %v1818_v49  ;;  %vm1837_vm6 = vweird.f32 %v4565_v46 }
  0xc9   : > { %v1240_v54 = vadd.f32 %v1239_v51, %v1071_v50  ;;  %v1844_v34 = vor.u32 1.1754944e-38, %v1843_v21  ;;  %vm1842_vm8 = vcmp.eq.f32.partialorder %v1841_v23, 8.507059e+37  ;;  %v3838_v50 = vld [vmem:[%s4416_s17 + $0x28c] sm:$0xf]  ;;  %v3516_v51 = vld [vmem:[%s4416_s17 + $0x294] sm:$0xf0] }
  0xca   : > { %v1820_v60 = vmul.f32 %v3987_v45, %v1819_v53  ;;  %3655 = vmatmul.msk.bf16.gmra.mxu2 %vm957_vm0, %v3331_v52  ;;  %v3519_v61 = vor.u32 %v3838_v50, %v3516_v51 }
  0xcb   : > { %v1409_v63 = vadd.f32 %v1408_v14, %v1240_v54  ;;  %v4581_v2 = vpop.f32.mrf.mxu3  ;;  %v3315_v14 = vor.u32 %v3787_v0, %v3312_v1 }
  0xcc   : > { %v3989_v4 = vpop.eup %3988  ;;  %v1821_v5 = vadd.f32 %v3987_v45, %v1820_v60 }
  0xcd   : > { %v3679_v6 = vmul.f32 -1.442695, %v1409_v63  ;;  %v3991_v8 = vpop.eup %3990  ;;  %v4583_v11 = vadd.f32 1.0, %v3989_v4  ;;  %v4585_v12 = vpop.f32.mrf.mxu2  ;;  %v3327_v4 = vor.u32 %v3790_v55, %v3324_v56 }
  0xce   : > { %v1073_v13 = vpop.f32.mrf.mxu0  ;;  %v1825_v15 = vsel %vm1824_vm3, %v3987_v45, %v1821_v5  ;;  %v1833_v16 = vmul.f32 %v3991_v8, %v4565_v46  ;;  %v1242_v17 = vpop.f32.mrf.mxu1  ;;  %vm1838_vm5 = vweird.f32 %v3991_v8  ;;  %v3322_v46 = vld [vmem:[%s4416_s17 + $0x108] sm:$0xf] }
  0xcf   : > { %3992 = vpow2.f32 %v3679_v6  ;;  %v1830_v18 = vsel %vm1827_vm4, %v1829_v9, %v1825_v15  ;;  %v1074_v20 = vadd.f32 %v4539_v62, %v1073_v13  ;;  %vm1839_vm7 = vmor %vm1837_vm6, %vm1838_vm5  ;;  %v1858_v49 = vand.u32 2147483648, %v4583_v11 }
  0xd0   : > { %3994 = vrcp.f32 %v4583_v11  ;;  %2777 = vst [vmem:[%s4590_s12] sm:$0xff] %v1830_v18  ;;  %v1834_v19 = vsub.f32 1.0, %v1833_v16  ;;  %1112 = vmatmul.bf16.gmra.mxu0 %v3311_v3  ;;  %1361 = vmatmul.bf16.gmra.mxu3 %v3507_v7  ;;  %v1856_v53 = vand.u32 2147483647, %v4583_v11  ;;  %v3323_v58 = vor.u32 %v3791_v48, %v3322_v46  ;;  %v3793_v48 = vld [vmem:[%s4416_s17 + $0x124] sm:$0xf] }
  0xd1   : > { %1281 = vmatmul.bf16.gmra.mxu1 %v3315_v14  ;;  %v1243_v24 = vadd.f32 %v1242_v17, %v1074_v20  ;;  %vm1852_vm10 = vweird.f32 %v4583_v11  ;;  %v1859_v0 = vor.u32 1.1754944e-38, %v1858_v49  ;;  %v3798_v20 = vld [vmem:[%s4416_s17 + $0x148] sm:$0xf0]  ;;  %v3336_v49 = vld [vmem:[%s4416_s17 + $0x12c] sm:$0xf0] }
  0xd2   : > { %v1835_v22 = vmul.f32 %v3991_v8, %v1834_v19  ;;  %vm1857_vm12 = vcmp.eq.f32.partialorder %v1856_v53, 8.507059e+37  ;;  %v3354_v19 = vld [vmem:[%s4416_s17 + $0x140] sm:$0xf] }
  0xd3   : > { %v4598_v28 = vpop.f32.mrf.mxu3  ;;  %v1412_v31 = vadd.f32 %v4558_v33, %v1243_v24 }
  0xd4   : > { %v1836_v30 = vadd.f32 %v3991_v8, %v1835_v22 }
  0xd5   : > { %v3993_v29 = vpop.eup %3992  ;;  %v4604_v36 = vpop.f32.mrf.mxu2  ;;  %v3680_v42 = vmul.f32 -1.442695, %v1412_v31 }
  0xd6   : > { %v3995_v32 = vpop.eup %3994  ;;  %v4602_v35 = vadd.f32 1.0, %v3993_v29  ;;  %v1075_v37 = vpop.f32.mrf.mxu0  ;;  %v1840_v39 = vsel %vm1839_vm7, %v3991_v8, %v1836_v30  ;;  %v3355_v29 = vor.u32 %v3798_v20, %v3354_v19 }
  0xd7   : > { %v1848_v41 = vmul.f32 %v3995_v32, %v4583_v11  ;;  %v1244_v43 = vpop.f32.mrf.mxu1  ;;  %v1845_v33 = vsel %vm1842_vm8, %v1844_v34, %v1840_v39  ;;  %v1076_v45 = vadd.f32 %v4539_v62, %v1075_v37  ;;  %vm1853_vm9 = vweird.f32 %v3995_v32  ;;  %v3334_v39 = vld [vmem:[%s4416_s17 + $0x120] sm:$0xf] }
  0xd8   : > { %3996 = vrcp.f32 %v4602_v35  ;;  %2778 = vst [vmem:[%s4590_s12 + $0x8] sm:$0xff] %v1845_v33  ;;  %vm1854_vm11 = vmor %vm1852_vm10, %vm1853_vm9  ;;  %v1873_v15 = vand.u32 2147483648, %v4602_v35  ;;  %v1871_v17 = vand.u32 2147483647, %v4602_v35  ;;  %vm1867_vm14 = vweird.f32 %v4602_v35  ;;  %v3841_v33 = vld [vmem:[%s4416_s17 + $0x2a4] sm:$0xf] }
  0xd9   : > { %v1849_v44 = vsub.f32 1.0, %v1848_v41  ;;  %3998 = vpow2.f32 %v3680_v42  ;;  %v1245_v54 = vadd.f32 %v1244_v43, %v1076_v45  ;;  %v3794_v41 = vld [vmem:[%s4416_s17 + $0x128] sm:$0xf0] }
  0xda   : > { %3656 = vmatmul.msk.bf16.gmra.mxu2 %vm957_vm0, %v3343_v38  ;;  %v1874_v24 = vor.u32 1.1754944e-38, %v1873_v15  ;;  %vm1872_vm1 = vcmp.eq.f32.partialorder %v1871_v17, 8.507059e+37 }
  0xdb   : > { %v1850_v52 = vmul.f32 %v3995_v32, %v1849_v44  ;;  %v4619_v57 = vpop.f32.mrf.mxu3  ;;  %v1414_v60 = vadd.f32 %v4567_v47, %v1245_v54  ;;  %v3528_v44 = vld [vmem:[%s4416_s17 + $0x2ac] sm:$0xf0] }
  0xdc   : > { %v3531_v53 = vor.u32 %v3841_v33, %v3528_v44  ;;  %v3796_v44 = vld [vmem:[%s4416_s17 + $0x13c] sm:$0xf] }
  0xdd   : > { %v1851_v59 = vadd.f32 %v3995_v32, %v1850_v52  ;;  %v4623_v1 = vpop.f32.mrf.mxu2  ;;  %v3681_v8 = vmul.f32 -1.442695, %v1414_v60  ;;  %v3335_v52 = vor.u32 %v3794_v41, %v3334_v39  ;;  %v3339_v60 = vor.u32 %v3793_v48, %v3336_v49  ;;  %v3540_v41 = vld [vmem:[%s4416_s17 + $0x2c4] sm:$0xf0] }
  0xde   : > { %v3997_v63 = vpop.eup %3996  ;;  %v1078_v3 = vpop.f32.mrf.mxu0 }
  0xdf   : > { %v3999_v5 = vpop.eup %3998  ;;  %v1855_v6 = vsel %vm1854_vm11, %v3995_v32, %v1851_v59  ;;  %v1863_v7 = vmul.f32 %v3997_v63, %v4602_v35  ;;  %v1247_v9 = vpop.f32.mrf.mxu1  ;;  %v1079_v13 = vadd.f32 %v4539_v62, %v1078_v3  ;;  %4000 = vpow2.f32 %v3681_v8 }
  0xe0   : > { %v1860_v11 = vsel %vm1857_vm12, %v1859_v0, %v1855_v6  ;;  %v4626_v47 = vadd.f32 1.0, %v3999_v5  ;;  %1117 = vmatmul.bf16.gmra.mxu0 %v3323_v58  ;;  %1366 = vmatmul.bf16.gmra.mxu3 %v3519_v61  ;;  %vm1868_vm13 = vweird.f32 %v3997_v63 }
  0xe1   : > { %2779 = vst [vmem:[%s4590_s12 + $0x10] sm:$0xff] %v1860_v11  ;;  %v1864_v14 = vsub.f32 1.0, %v1863_v7  ;;  %1286 = vmatmul.bf16.gmra.mxu1 %v3327_v4  ;;  %v1248_v18 = vadd.f32 %v1247_v9, %v1079_v13  ;;  %vm1869_vm15 = vmor %vm1867_vm14, %vm1868_vm13  ;;  %v3366_v13 = vld [vmem:[%s4416_s17 + $0x158] sm:$0xf] }
  0xe2   : > { %4002 = vrcp.f32 %v4626_v47  ;;  %v1888_v50 = vand.u32 2147483648, %v4626_v47  ;;  %v1886_v55 = vand.u32 2147483647, %v4626_v47  ;;  %vm1882_vm3 = vweird.f32 %v4626_v47 }
  0xe3   : > { %v1865_v16 = vmul.f32 %v3997_v63, %v1864_v14  ;;  %v4635_v21 = vpop.f32.mrf.mxu3  ;;  %v1417_v23 = vadd.f32 %v4585_v12, %v1248_v18  ;;  %v3801_v14 = vld [vmem:[%s4416_s17 + $0x160] sm:$0xf0] }
  0xe4   : > { %v1889_v4 = vor.u32 1.1754944e-38, %v1888_v50  ;;  %vm1887_vm5 = vcmp.eq.f32.partialorder %v1886_v55, 8.507059e+37 }
  0xe5   : > { %v1866_v22 = vadd.f32 %v3997_v63, %v1865_v16  ;;  %v4639_v25 = vpop.f32.mrf.mxu2  ;;  %v4001_v30 = vpop.eup %4000  ;;  %v3682_v32 = vmul.f32 -1.442695, %v1417_v23 }
  0xe6   : > { %v1080_v26 = vpop.f32.mrf.mxu0  ;;  %v4642_v38 = vadd.f32 1.0, %v4001_v30 }
  0xe7   : > { %v1870_v31 = vsel %vm1869_vm15, %v3997_v63, %v1866_v22  ;;  %v1081_v34 = vadd.f32 %v4539_v62, %v1080_v26  ;;  %v1249_v35 = vpop.f32.mrf.mxu1  ;;  %4004 = vpow2.f32 %v3682_v32 }
  0xe8   : > { %v4003_v37 = vpop.eup %4002  ;;  %v1875_v12 = vsel %vm1872_vm1, %v1874_v24, %v1870_v31  ;;  %4006 = vrcp.f32 %v4642_v38  ;;  %v1903_v15 = vand.u32 2147483648, %v4642_v38  ;;  %v1901_v19 = vand.u32 2147483647, %v4642_v38 }
  0xe9   : > { %2780 = vst [vmem:[%s4590_s12 + $0x18] sm:$0xff] %v1875_v12  ;;  %v1878_v42 = vmul.f32 %v4003_v37, %v4626_v47  ;;  %v1250_v43 = vadd.f32 %v1249_v35, %v1081_v34  ;;  %vm1883_vm2 = vweird.f32 %v4003_v37  ;;  %vm1897_vm7 = vweird.f32 %v4642_v38  ;;  %v3346_v34 = vld [vmem:[%s4416_s17 + $0x138] sm:$0xf]  ;;  %v3797_v35 = vld [vmem:[%s4416_s17 + $0x140] sm:$0xf0] }
  0xea   : > { %3657 = vmatmul.msk.bf16.gmra.mxu2 %vm957_vm0, %v3355_v29  ;;  %vm1884_vm4 = vmor %vm1882_vm3, %vm1883_vm2  ;;  %v1904_v32 = vor.u32 1.1754944e-38, %v1903_v15  ;;  %vm1902_vm9 = vcmp.eq.f32.partialorder %v1901_v19, 8.507059e+37  ;;  %v3347_v49 = vor.u32 %v3797_v35, %v3346_v34 }
  0xeb   : > { %v1879_v45 = vsub.f32 1.0, %v1878_v42  ;;  %v1419_v46 = vadd.f32 %v4604_v36, %v1250_v43  ;;  %v4656_v51 = vpop.f32.mrf.mxu3 }
  0xed   : > { %v1880_v54 = vmul.f32 %v4003_v37, %v1879_v45  ;;  %v3683_v56 = vmul.f32 -1.442695, %v1419_v46  ;;  %v4659_v58 = vpop.f32.mrf.mxu2  ;;  %v4005_v36 = vpop.eup %4004  ;;  %v3348_v45 = vld [vmem:[%s4416_s17 + $0x144] sm:$0xf0] }
  0xee   : > { %v1083_v59 = vpop.f32.mrf.mxu0  ;;  %v4007_v3 = vpop.eup %4006  ;;  %v4663_v5 = vadd.f32 1.0, %v4005_v36  ;;  %v3351_v36 = vor.u32 %v3796_v44, %v3348_v45  ;;  %v3799_v45 = vld [vmem:[%s4416_s17 + $0x154] sm:$0xf] }
  0xef   : > { %v1881_v61 = vadd.f32 %v4003_v37, %v1880_v54  ;;  %4008 = vpow2.f32 %v3683_v56  ;;  %v1084_v63 = vadd.f32 %v4539_v62, %v1083_v59  ;;  %v1252_v0 = vpop.f32.mrf.mxu1  ;;  %v1893_v7 = vmul.f32 %v4007_v3, %v4642_v38  ;;  %v3844_v38 = vld [vmem:[%s4416_s17 + $0x2bc] sm:$0xf] }
  0xf0   : > { %1122 = vmatmul.bf16.gmra.mxu0 %v3335_v52  ;;  %1371 = vmatmul.bf16.gmra.mxu3 %v3531_v53  ;;  %4010 = vrcp.f32 %v4663_v5  ;;  %vm1898_vm6 = vweird.f32 %v4007_v3  ;;  %v1918_v46 = vand.u32 2147483648, %v4663_v5  ;;  %v3543_v50 = vor.u32 %v3844_v38, %v3540_v41  ;;  %v3847_v41 = vld [vmem:[%s4416_s17 + $0x2d4] sm:$0xf] }
  0xf1   : > { %v1885_v6 = vsel %vm1884_vm4, %v4003_v37, %v1881_v61  ;;  %v1253_v8 = vadd.f32 %v1252_v0, %v1084_v63  ;;  %1291 = vmatmul.bf16.gmra.mxu1 %v3339_v60  ;;  %v1894_v11 = vsub.f32 1.0, %v1893_v7  ;;  %vm1899_vm8 = vmor %vm1897_vm7, %vm1898_vm6  ;;  %v1916_v54 = vand.u32 2147483647, %v4663_v5 }
  0xf2   : > { %v1890_v9 = vsel %vm1887_vm5, %v1889_v4, %v1885_v6  ;;  %vm1912_vm11 = vweird.f32 %v4663_v5 }
  0xf3   : > { %2781 = vst [vmem:[%s4590_s12 + $0x20] sm:$0xff] %v1890_v9  ;;  %v1422_v47 = vadd.f32 %v4623_v1, %v1253_v8  ;;  %v4672_v16 = vpop.f32.mrf.mxu3  ;;  %v1895_v18 = vmul.f32 %v4007_v3, %v1894_v11  ;;  %v3367_v1 = vor.u32 %v3801_v14, %v3366_v13  ;;  %vm1917_vm13 = vcmp.eq.f32.partialorder %v1916_v54, 8.507059e+37  ;;  %v3378_v9 = vld [vmem:[%s4416_s17 + $0x170] sm:$0xf]  ;;  %v3804_v14 = vld [vmem:[%s4416_s17 + $0x178] sm:$0xf0] }
  0xf5   : > { %v4009_v17 = vpop.eup %4008  ;;  %v3684_v20 = vmul.f32 -1.442695, %v1422_v47  ;;  %v4677_v23 = vpop.f32.mrf.mxu2  ;;  %v1896_v26 = vadd.f32 %v4007_v3, %v1895_v18 }
  0xf6   : > { %v4675_v22 = vadd.f32 1.0, %v4009_v17  ;;  %v1085_v24 = vpop.f32.mrf.mxu0  ;;  %v4011_v31 = vpop.eup %4010 }
  0xf7   : > { %4012 = vpow2.f32 %v3684_v20  ;;  %v1086_v29 = vadd.f32 %v4539_v62, %v1085_v24  ;;  %v1254_v30 = vpop.f32.mrf.mxu1  ;;  %v1900_v37 = vsel %vm1899_vm8, %v4007_v3, %v1896_v26  ;;  %v1908_v12 = vmul.f32 %v4011_v31, %v4663_v5 }
  0xf8   : > { %4014 = vrcp.f32 %v4675_v22  ;;  %v1905_v42 = vsel %vm1902_vm9, %v1904_v32, %v1900_v37  ;;  %vm1913_vm10 = vweird.f32 %v4011_v31  ;;  %v1919_v3 = vor.u32 1.1754944e-38, %v1918_v46  ;;  %v3360_v46 = vld [vmem:[%s4416_s17 + $0x15c] sm:$0xf0] }
  0xf9   : > { %v1255_v39 = vadd.f32 %v1254_v30, %v1086_v29  ;;  %2782 = vst [vmem:[%s4590_s12 + $0x28] sm:$0xff] %v1905_v42  ;;  %v1909_v43 = vsub.f32 1.0, %v1908_v12  ;;  %vm1914_vm12 = vmor %vm1912_vm11, %vm1913_vm10  ;;  %v1933_v5 = vand.u32 2147483648, %v4675_v22  ;;  %v1931_v47 = vand.u32 2147483647, %v4675_v22 }
  0xfa   : > { %3658 = vmatmul.msk.bf16.gmra.mxu2 %vm957_vm0, %v3367_v1  ;;  %vm1927_vm15 = vweird.f32 %v4675_v22  ;;  %v3379_v30 = vor.u32 %v3804_v14, %v3378_v9  ;;  %v3358_v12 = vld [vmem:[%s4416_s17 + $0x150] sm:$0xf]  ;;  %v3552_v42 = vld [vmem:[%s4416_s17 + $0x2dc] sm:$0xf0]  ;;  %v3807_v14 = vld [vmem:[%s4416_s17 + $0x190] sm:$0xf0] }
  0xfb   : > { %v1424_v33 = vadd.f32 %v4639_v25, %v1255_v39  ;;  %v4693_v48 = vpop.f32.mrf.mxu3  ;;  %v1910_v53 = vmul.f32 %v4011_v31, %v1909_v43  ;;  %v1934_v24 = vor.u32 1.1754944e-38, %v1933_v5  ;;  %vm1932_vm2 = vcmp.eq.f32.partialorder %v1931_v47, 8.507059e+37  ;;  %v3800_v39 = vld [vmem:[%s4416_s17 + $0x158] sm:$0xf0] }
  0xfc   : > { %v3555_v54 = vor.u32 %v3847_v41, %v3552_v42  ;;  %v3850_v41 = vld [vmem:[%s4416_s17 + $0x2ec] sm:$0xf]  ;;  %v3564_v42 = vld [vmem:[%s4416_s17 + $0x2f4] sm:$0xf0] }
  0xfd   : > { %v4013_v52 = vpop.eup %4012  ;;  %v3685_v55 = vmul.f32 -1.442695, %v1424_v33  ;;  %v4698_v25 = vpop.f32.mrf.mxu2  ;;  %v1911_v61 = vadd.f32 %v4011_v31, %v1910_v53 }
  0xfe   : > { %v4015_v56 = vpop.eup %4014  ;;  %v4696_v59 = vadd.f32 1.0, %v4013_v52  ;;  %v1088_v60 = vpop.f32.mrf.mxu0 }
  0xff   : > { %v1923_v63 = vmul.f32 %v4015_v56, %v4675_v22  ;;  %4016 = vpow2.f32 %v3685_v55  ;;  %v1257_v0 = vpop.f32.mrf.mxu1  ;;  %v1915_v4 = vsel %vm1914_vm12, %v4011_v31, %v1911_v61  ;;  %v1089_v7 = vadd.f32 %v4539_v62, %v1088_v60 }
 0x100   : > { %4018 = vrcp.f32 %v4696_v59  ;;  %1127 = vmatmul.bf16.gmra.mxu0 %v3347_v49  ;;  %1376 = vmatmul.bf16.gmra.mxu3 %v3543_v50  ;;  %v1920_v8 = vsel %vm1917_vm13, %v1919_v3, %v1915_v4  ;;  %vm1928_vm14 = vweird.f32 %v4015_v56  ;;  %v1948_v38 = vand.u32 2147483648, %v4696_v59 }
 0x101   : > { %v1924_v6 = vsub.f32 1.0, %v1923_v63  ;;  %1296 = vmatmul.bf16.gmra.mxu1 %v3351_v36  ;;  %2783 = vst [vmem:[%s4590_s12 + $0x30] sm:$0xff] %v1920_v8  ;;  %v1258_v13 = vadd.f32 %v1257_v0, %v1089_v7  ;;  %vm1929_vm1 = vmor %vm1927_vm15, %vm1928_vm14  ;;  %v1946_v33 = vand.u32 2147483647, %v4696_v59  ;;  %v3359_v50 = vor.u32 %v3800_v39, %v3358_v12  ;;  %v3803_v12 = vld [vmem:[%s4416_s17 + $0x170] sm:$0xf0] }
 0x102   : > { %vm1942_vm4 = vweird.f32 %v4696_v59  ;;  %v3363_v61 = vor.u32 %v3799_v45, %v3360_v46  ;;  %v3372_v45 = vld [vmem:[%s4416_s17 + $0x174] sm:$0xf0] }
 0x103   : > { %v1925_v11 = vmul.f32 %v4015_v56, %v1924_v6  ;;  %v4709_v15 = vpop.f32.mrf.mxu3  ;;  %v1427_v19 = vadd.f32 %v4659_v58, %v1258_v13  ;;  %vm1947_vm6 = vcmp.eq.f32.partialorder %v1946_v33, 8.507059e+37  ;;  %v3390_v13 = vld [vmem:[%s4416_s17 + $0x188] sm:$0xf] }
 0x105   : > { %v4017_v17 = vpop.eup %4016  ;;  %v1926_v18 = vadd.f32 %v4015_v56, %v1925_v11  ;;  %v4715_v26 = vpop.f32.mrf.mxu2  ;;  %v3686_v32 = vmul.f32 -1.442695, %v1427_v19 }
 0x106   : > { %v4019_v20 = vpop.eup %4018  ;;  %v4713_v1 = vadd.f32 1.0, %v4017_v17  ;;  %v1090_v29 = vpop.f32.mrf.mxu0 }
 0x107   : > { %v1930_v31 = vsel %vm1929_vm1, %v4015_v56, %v1926_v18  ;;  %v1938_v22 = vmul.f32 %v4019_v20, %v4696_v59  ;;  %v1259_v34 = vpop.f32.mrf.mxu1  ;;  %v1091_v37 = vadd.f32 %v4539_v62, %v1090_v29  ;;  %vm1943_vm3 = vweird.f32 %v4019_v20 }
 0x108   : > { %v1935_v58 = vsel %vm1932_vm2, %v1934_v24, %v1930_v31  ;;  %4020 = vrcp.f32 %v4713_v1  ;;  %vm1944_vm5 = vmor %vm1942_vm4, %vm1943_vm3  ;;  %v1949_v56 = vor.u32 1.1754944e-38, %v1948_v38  ;;  %v1963_v5 = vand.u32 2147483648, %v4713_v1 }
 0x109   : > { %2784 = vst [vmem:[%s4590_s12 + $0x38] sm:$0xff] %v1935_v58  ;;  %v1939_v35 = vsub.f32 1.0, %v1938_v22  ;;  %4022 = vpow2.f32 %v3686_v32  ;;  %v1260_v44 = vadd.f32 %v1259_v34, %v1091_v37  ;;  %v1961_v11 = vand.u32 2147483647, %v4713_v1  ;;  %v3370_v37 = vld [vmem:[%s4416_s17 + $0x168] sm:$0xf] }
 0x10a   : > { %3659 = vmatmul.msk.bf16.gmra.mxu2 %vm957_vm0, %v3379_v30  ;;  %vm1957_vm8 = vweird.f32 %v4713_v1  ;;  %v3391_v30 = vor.u32 %v3807_v14, %v3390_v13  ;;  %v3402_v13 = vld [vmem:[%s4416_s17 + $0x1a0] sm:$0xf]  ;;  %v3810_v14 = vld [vmem:[%s4416_s17 + $0x1a8] sm:$0xf0] }
 0x10b   : > { %v1940_v43 = vmul.f32 %v4019_v20, %v1939_v35  ;;  %v4730_v49 = vpop.f32.mrf.mxu3  ;;  %v1429_v53 = vadd.f32 %v4677_v23, %v1260_v44  ;;  %vm1962_vm10 = vcmp.eq.f32.partialorder %v1961_v11, 8.507059e+37  ;;  %v3802_v44 = vld [vmem:[%s4416_s17 + $0x16c] sm:$0xf] }
 0x10d   : > { %v1941_v52 = vadd.f32 %v4019_v20, %v1940_v43  ;;  %v4734_v60 = vpop.f32.mrf.mxu2  ;;  %v3687_v4 = vmul.f32 -1.442695, %v1429_v53  ;;  %v3567_v53 = vor.u32 %v3850_v41, %v3564_v42 }
 0x10e   : > { %v4021_v55 = vpop.eup %4020  ;;  %v1093_v36 = vpop.f32.mrf.mxu0 }
 0x10f   : > { %v4023_v63 = vpop.eup %4022  ;;  %v1945_v0 = vsel %vm1944_vm5, %v4019_v20, %v1941_v52  ;;  %v1953_v3 = vmul.f32 %v4021_v55, %v4713_v1  ;;  %v1262_v6 = vpop.f32.mrf.mxu1  ;;  %v1094_v7 = vadd.f32 %v4539_v62, %v1093_v36  ;;  %4024 = vpow2.f32 %v3687_v4 }
 0x110   : > { %v1950_v59 = vsel %vm1947_vm6, %v1949_v56, %v1945_v0  ;;  %v4737_v23 = vadd.f32 1.0, %v4023_v63  ;;  %1132 = vmatmul.bf16.gmra.mxu0 %v3359_v50  ;;  %1381 = vmatmul.bf16.gmra.mxu3 %v3555_v54  ;;  %vm1958_vm7 = vweird.f32 %v4021_v55  ;;  %v1964_v20 = vor.u32 1.1754944e-38, %v1963_v5 }
 0x111   : > { %2785 = vst [vmem:[%s4590_s12 + $0x40] sm:$0xff] %v1950_v59  ;;  %v1954_v8 = vsub.f32 1.0, %v1953_v3  ;;  %1301 = vmatmul.bf16.gmra.mxu1 %v3363_v61  ;;  %v1263_v47 = vadd.f32 %v1262_v6, %v1094_v7  ;;  %vm1959_vm9 = vmor %vm1957_vm8, %vm1958_vm7  ;;  %v3371_v52 = vor.u32 %v3803_v12, %v3370_v37  ;;  %v3375_v63 = vor.u32 %v3802_v44, %v3372_v45 }
 0x112   : > { %4026 = vrcp.f32 %v4737_v23  ;;  %v1978_v46 = vand.u32 2147483648, %v4737_v23  ;;  %vm1972_vm12 = vweird.f32 %v4737_v23 }
 0x113   : > { %v1955_v9 = vmul.f32 %v4021_v55, %v1954_v8  ;;  %v4746_v17 = vpop.f32.mrf.mxu3  ;;  %v1432_v19 = vadd.f32 %v4698_v25, %v1263_v47 }
 0x114   : > { %v1979_v59 = vor.u32 1.1754944e-38, %v1978_v46  ;;  %v3805_v46 = vld [vmem:[%s4416_s17 + $0x184] sm:$0xf] }
 0x115   : > { %v1956_v18 = vadd.f32 %v4021_v55, %v1955_v9  ;;  %v4750_v24 = vpop.f32.mrf.mxu2  ;;  %v4025_v31 = vpop.eup %4024  ;;  %v3688_v32 = vmul.f32 -1.442695, %v1432_v19 }
 0x116   : > { %v1095_v29 = vpop.f32.mrf.mxu0  ;;  %v4753_v35 = vadd.f32 1.0, %v4025_v31 }
 0x117   : > { %v1960_v22 = vsel %vm1959_vm9, %v4021_v55, %v1956_v18  ;;  %v1096_v34 = vadd.f32 %v4539_v62, %v1095_v29  ;;  %v1264_v1 = vpop.f32.mrf.mxu1  ;;  %4028 = vpow2.f32 %v3688_v32  ;;  %v1976_v55 = vand.u32 2147483647, %v4737_v23 }
 0x118   : > { %v4027_v58 = vpop.eup %4026  ;;  %v1965_v25 = vsel %vm1962_vm10, %v1964_v20, %v1960_v22  ;;  %4030 = vrcp.f32 %v4753_v35  ;;  %v1993_v18 = vand.u32 2147483648, %v4753_v35  ;;  %vm1987_vm1 = vweird.f32 %v4753_v35 }
 0x119   : > { %2786 = vst [vmem:[%s4590_s12 + $0x48] sm:$0xff] %v1965_v25  ;;  %v1968_v39 = vmul.f32 %v4027_v58, %v4737_v23  ;;  %v1265_v38 = vadd.f32 %v1264_v1, %v1096_v34  ;;  %vm1973_vm11 = vweird.f32 %v4027_v58  ;;  %vm1977_vm14 = vcmp.eq.f32.partialorder %v1976_v55, 8.507059e+37 }
 0x11a   : > { %3660 = vmatmul.msk.bf16.gmra.mxu2 %vm957_vm0, %v3391_v30  ;;  %vm1974_vm13 = vmor %vm1972_vm12, %vm1973_vm11  ;;  %v1991_v30 = vand.u32 2147483647, %v4753_v35  ;;  %v1994_v12 = vor.u32 1.1754944e-38, %v1993_v18 }
 0x11b   : > { %v1969_v43 = vsub.f32 1.0, %v1968_v39  ;;  %v1434_v33 = vadd.f32 %v4715_v26, %v1265_v38  ;;  %v4767_v50 = vpop.f32.mrf.mxu3  ;;  %v3382_v39 = vld [vmem:[%s4416_s17 + $0x180] sm:$0xf]  ;;  %v3806_v38 = vld [vmem:[%s4416_s17 + $0x188] sm:$0xf0] }
 0x11c   : > { %vm1992_vm3 = vcmp.eq.f32.partialorder %v1991_v30, 8.507059e+37  ;;  %v3383_v55 = vor.u32 %v3806_v38, %v3382_v39 }
 0x11d   : > { %v1970_v54 = vmul.f32 %v4027_v58, %v1969_v43  ;;  %v3689_v56 = vmul.f32 -1.442695, %v1434_v33  ;;  %v4770_v36 = vpop.f32.mrf.mxu2  ;;  %v4029_v26 = vpop.eup %4028  ;;  %v3837_v33 = vld [vmem:[%s4416_s17 + $0x280] sm:$0xf0] }
 0x11e   : > { %v1098_v61 = vpop.f32.mrf.mxu0  ;;  %v4031_v6 = vpop.eup %4030  ;;  %v4774_v7 = vadd.f32 1.0, %v4029_v26 }
 0x11f   : > { %v1971_v0 = vadd.f32 %v4027_v58, %v1970_v54  ;;  %4032 = vpow2.f32 %v3689_v56  ;;  %v1099_v3 = vadd.f32 %v4539_v62, %v1098_v61  ;;  %v1267_v4 = vpop.f32.mrf.mxu1  ;;  %v1983_v5 = vmul.f32 %v4031_v6, %v4753_v35  ;;  %v3510_v35 = vld [vmem:[%s4416_s17 + $0x278] sm:$0xf] }
 0x120   : > { %1137 = vmatmul.bf16.gmra.mxu0 %v3371_v52  ;;  %1386 = vmatmul.bf16.gmra.mxu3 %v3567_v53  ;;  %4034 = vrcp.f32 %v4774_v7  ;;  %vm1988_vm15 = vweird.f32 %v4031_v6  ;;  %v3384_v52 = vld [vmem:[%s4416_s17 + $0x18c] sm:$0xf0]  ;;  %v2008_v53 = vand.u32 2147483648, %v4774_v7  ;;  %v3511_v56 = vor.u32 %v3837_v33, %v3510_v35 }
 0x121   : > { %v1975_v8 = vsel %vm1974_vm13, %v4027_v58, %v1971_v0  ;;  %v1268_v9 = vadd.f32 %v1267_v4, %v1099_v3  ;;  %1306 = vmatmul.bf16.gmra.mxu1 %v3375_v63  ;;  %v1984_v11 = vsub.f32 1.0, %v1983_v5  ;;  %vm1989_vm2 = vmor %vm1987_vm1, %vm1988_vm15  ;;  %v2006_v26 = vand.u32 2147483647, %v4774_v7 }
 0x122   : > { %v1980_v23 = vsel %vm1977_vm14, %v1979_v59, %v1975_v8  ;;  %v3387_v59 = vor.u32 %v3805_v46, %v3384_v52  ;;  %vm2002_vm5 = vweird.f32 %v4774_v7 }
 0x123   : > { %2787 = vst [vmem:[%s4590_s12 + $0x50] sm:$0xff] %v1980_v23  ;;  %v1437_v47 = vadd.f32 %v4734_v60, %v1268_v9  ;;  %v4783_v19 = vpop.f32.mrf.mxu3  ;;  %v1985_v29 = vmul.f32 %v4031_v6, %v1984_v11  ;;  %v3403_v60 = vor.u32 %v3810_v14, %v3402_v13  ;;  %v2009_v23 = vor.u32 1.1754944e-38, %v2008_v53  ;;  %v4817_v13 = vld [vmem:[%s5854_s2] ss:$0 sm:$0xff]  ;;  %v3522_v53 = vld [vmem:[%s4416_s17 + $0x290] sm:$0xf] }
 0x124   : > { %vm2007_vm7 = vcmp.eq.f32.partialorder %v2006_v26, 8.507059e+37  ;;  %v1184_v14 = vadd.f32 %v4817_v13, %v4544_v10 }
 0x125   : > { %v4033_v20 = vpop.eup %4032  ;;  %v3690_v31 = vmul.f32 -1.442695, %v1437_v47  ;;  %v4788_v32 = vpop.f32.mrf.mxu2  ;;  %v1986_v1 = vadd.f32 %v4031_v6, %v1985_v29  ;;  %v3414_v29 = vld [vmem:[%s4416_s17 + $0x1b8] sm:$0xf] }
 0x126   : > { %v4786_v22 = vadd.f32 1.0, %v4033_v20  ;;  %v1100_v34 = vpop.f32.mrf.mxu0  ;;  %v4035_v37 = vpop.eup %4034 }
 0x127   : > { %4036 = vpow2.f32 %v3690_v31  ;;  %v1101_v58 = vadd.f32 %v4539_v62, %v1100_v34  ;;  %v1269_v25 = vpop.f32.mrf.mxu1  ;;  %v1990_v41 = vsel %vm1989_vm2, %v4031_v6, %v1986_v1  ;;  %v1998_v42 = vmul.f32 %v4035_v37, %v4774_v7 }
 0x128   : > { %4038 = vrcp.f32 %v4786_v22  ;;  %v1995_v44 = vsel %vm1992_vm3, %v1994_v12, %v1990_v41  ;;  %vm2003_vm4 = vweird.f32 %v4035_v37  ;;  %v2023_v20 = vand.u32 2147483648, %v4786_v22 }
 0x129   : > { %v1270_v43 = vadd.f32 %v1269_v25, %v1101_v58  ;;  %2788 = vst [vmem:[%s4590_s12 + $0x58] sm:$0xff] %v1995_v44  ;;  %v1999_v62 = vsub.f32 1.0, %v1998_v42  ;;  %vm2004_vm6 = vmor %vm2002_vm5, %vm2003_vm4  ;;  %v2021_v31 = vand.u32 2147483647, %v4786_v22  ;;  %vm2017_vm9 = vweird.f32 %v4786_v22 }
 0x12a   : > { %3661 = vmatmul.msk.bf16.gmra.mxu2 %vm957_vm0, %v3403_v60  ;;  %v3813_v60 = vld [vmem:[%s4416_s17 + $0x1c0] sm:$0xf0]  ;;  %v2024_v39 = vor.u32 1.1754944e-38, %v2023_v20 }
 0x12b   : > { %v1439_v45 = vadd.f32 %v4750_v24, %v1270_v43  ;;  %v4804_v54 = vpop.f32.mrf.mxu3  ;;  %v2000_v63 = vmul.f32 %v4035_v37, %v1999_v62  ;;  %v3415_v43 = vor.u32 %v3813_v60, %v3414_v29  ;;  %vm2022_vm11 = vcmp.eq.f32.partialorder %v2021_v31, 8.507059e+37  ;;  %v3394_v62 = vld [vmem:[%s4416_s17 + $0x198] sm:$0xf] }
 0x12d   : > { %v4037_v61 = vpop.eup %4036  ;;  %v3691_v0 = vmul.f32 -1.442695, %v1439_v45  ;;  %v4809_v24 = vpop.f32.mrf.mxu2  ;;  %v2001_v8 = vadd.f32 %v4035_v37, %v2000_v63  ;;  %v3809_v45 = vld [vmem:[%s4416_s17 + $0x1a0] sm:$0xf0] }
 0x12e   : > { %v4039_v3 = vpop.eup %4038  ;;  %v4807_v4 = vadd.f32 1.0, %v4037_v61  ;;  %v1103_v6 = vpop.f32.mrf.mxu0 }
 0x12f   : > { %v2013_v5 = vmul.f32 %v4039_v3, %v4786_v22  ;;  %4040 = vpow2.f32 %v3691_v0  ;;  %v1272_v9 = vpop.f32.mrf.mxu1  ;;  %v2005_v11 = vsel %vm2004_vm6, %v4035_v37, %v2001_v8  ;;  %v1104_v7 = vadd.f32 %v4817_v13, %v1103_v6  ;;  %v3396_v6 = vld [vmem:[%s4416_s17 + $0x1a4] sm:$0xf0] }
 0x130   : > { %4042 = vrcp.f32 %v4807_v4  ;;  %1142 = vmatmul.bf16.gmra.mxu0 %v3383_v55  ;;  %3670 = vmatmul.msk.bf16.vlgmr.msra.gmra.mxu3 %vm957_vm0, %v3511_v56  ;;  %v2010_v18 = vsel %vm2007_vm7, %v2009_v23, %v2005_v11  ;;  %vm2018_vm8 = vweird.f32 %v4039_v3  ;;  %v3840_v55 = vld [vmem:[%s4416_s17 + $0x298] sm:$0xf0]  ;;  %v1186_v56 = vadd.f32 %v4817_v13, %v4556_v27 }
 0x131   : > { %v2014_v47 = vsub.f32 1.0, %v2013_v5  ;;  %1311 = vmatmul.bf16.gmra.mxu1 %v3387_v59  ;;  %2789 = vst [vmem:[%s4590_s12 + $0x60] sm:$0xff] %v2010_v18  ;;  %v1273_v34 = vadd.f32 %v1272_v9, %v1104_v7  ;;  %vm2019_vm10 = vmor %vm2017_vm9, %vm2018_vm8  ;;  %v2038_v61 = vand.u32 2147483648, %v4807_v4  ;;  %v2036_v26 = vand.u32 2147483647, %v4807_v4 }
 0x132   : > { %v3395_v8 = vor.u32 %v3809_v45, %v3394_v62  ;;  %v3523_v5 = vor.u32 %v3840_v55, %v3522_v53  ;;  %vm2032_vm13 = vweird.f32 %v4807_v4 }
 0x133   : > { %v2015_v30 = vmul.f32 %v4039_v3, %v2014_v47  ;;  %v1352_v1 = vpop.f32.mrf.mxu3  ;;  %v1442_v37 = vadd.f32 %v4770_v36, %v1273_v34  ;;  %v2039_v47 = vor.u32 1.1754944e-38, %v2038_v61  ;;  %vm2037_vm15 = vcmp.eq.f32.partialorder %v2036_v26, 8.507059e+37  ;;  %v3812_v26 = vld [vmem:[%s4416_s17 + $0x1b8] sm:$0xf0] }
 0x134   : > { %v4830_v10 = vadd.f32 %v1352_v1, %v1184_v14 }
 0x135   : > { %v4041_v58 = vpop.eup %4040  ;;  %v2016_v25 = vadd.f32 %v4039_v3, %v2015_v30  ;;  %v4834_v41 = vpop.f32.mrf.mxu2  ;;  %v3692_v22 = vmul.f32 -1.442695, %v1442_v37 }
 0x136   : > { %v4043_v12 = vpop.eup %4042  ;;  %v4832_v38 = vadd.f32 1.0, %v4041_v58  ;;  %v1105_v42 = vpop.f32.mrf.mxu0  ;;  %v1189_v58 = vadd.f32 %v4817_v13, %v4561_v40 }
 0x137   : > { %v2020_v35 = vsel %vm2019_vm10, %v4039_v3, %v2016_v25  ;;  %v2028_v36 = vmul.f32 %v4043_v12, %v4807_v4  ;;  %v1274_v33 = vpop.f32.mrf.mxu1  ;;  %v1106_v52 = vadd.f32 %v4817_v13, %v1105_v42  ;;  %vm2033_vm12 = vweird.f32 %v4043_v12  ;;  %v3808_v3 = vld [vmem:[%s4416_s17 + $0x19c] sm:$0xf]  ;;  %v3426_v42 = vld [vmem:[%s4416_s17 + $0x1d0] sm:$0xf] }
 0x138   : > { %v2025_v44 = vsel %vm2022_vm11, %v2024_v39, %v2020_v35  ;;  %4044 = vrcp.f32 %v4832_v38  ;;  %vm2034_vm14 = vmor %vm2032_vm13, %vm2033_vm12  ;;  %v3399_v18 = vor.u32 %v3808_v3, %v3396_v6  ;;  %v2053_v25 = vand.u32 2147483648, %v4832_v38  ;;  %v3534_v6 = vld [vmem:[%s4416_s17 + $0x2a8] sm:$0xf] }
 0x139   : > { %2790 = vst [vmem:[%s4590_s12 + $0x68] sm:$0xff] %v2025_v44  ;;  %v2029_v46 = vsub.f32 1.0, %v2028_v36  ;;  %4046 = vpow2.f32 %v3692_v22  ;;  %v1275_v0 = vadd.f32 %v1274_v33, %v1106_v52  ;;  %vm2047_vm2 = vweird.f32 %v4832_v38 }
 0x13a   : > { %3662 = vmatmul.msk.bf16.gmra.mxu2 %vm957_vm0, %v3415_v43  ;;  %v3816_v43 = vld [vmem:[%s4416_s17 + $0x1d8] sm:$0xf0]  ;;  %v2054_v33 = vor.u32 1.1754944e-38, %v2053_v25 }
 0x13b   : > { %v2030_v63 = vmul.f32 %v4043_v12, %v2029_v46  ;;  %v1354_v59 = vpop.f32.mrf.mxu3  ;;  %v1444_v23 = vadd.f32 %v4788_v32, %v1275_v0  ;;  %v3427_v45 = vor.u32 %v3816_v43, %v3426_v42 }
 0x13c   : > { %v4853_v27 = vadd.f32 %v1354_v59, %v1186_v56  ;;  %v3843_v59 = vld [vmem:[%s4416_s17 + $0x2b0] sm:$0xf0] }
 0x13d   : > { %v2031_v9 = vadd.f32 %v4043_v12, %v2030_v63  ;;  %v4855_v7 = vpop.f32.mrf.mxu2  ;;  %v3693_v31 = vmul.f32 -1.442695, %v1444_v23  ;;  %v3406_v63 = vld [vmem:[%s4416_s17 + $0x1b0] sm:$0xf]  ;;  %v3811_v23 = vld [vmem:[%s4416_s17 + $0x1b4] sm:$0xf] }
 0x13e   : > { %v4045_v11 = vpop.eup %4044  ;;  %v1108_v14 = vpop.f32.mrf.mxu0 }
 0x13f   : > { %v4047_v20 = vpop.eup %4046  ;;  %v2035_v29 = vsel %vm2034_vm14, %v4043_v12, %v2031_v9  ;;  %v2043_v30 = vmul.f32 %v4045_v11, %v4832_v38  ;;  %v1277_v34 = vpop.f32.mrf.mxu1  ;;  %v1109_v60 = vadd.f32 %v4817_v13, %v1108_v14  ;;  %4048 = vpow2.f32 %v3693_v31 }
 0x140   : > { %v2040_v4 = vsel %vm2037_vm15, %v2039_v47, %v2035_v29  ;;  %v4858_v32 = vadd.f32 1.0, %v4047_v20  ;;  %1147 = vmatmul.bf16.gmra.mxu0 %v3395_v8  ;;  %3671 = vmatmul.msk.bf16.gmra.mxu3 %vm957_vm0, %v3523_v5  ;;  %vm2048_vm1 = vweird.f32 %v4045_v11  ;;  %v2051_v12 = vand.u32 2147483647, %v4832_v38 }
 0x141   : > { %2791 = vst [vmem:[%s4590_s12 + $0x70] sm:$0xff] %v2040_v4  ;;  %v2044_v1 = vsub.f32 1.0, %v2043_v30  ;;  %1316 = vmatmul.bf16.gmra.mxu1 %v3399_v18  ;;  %v1278_v39 = vadd.f32 %v1277_v34, %v1109_v60  ;;  %vm2049_vm3 = vmor %vm2047_vm2, %vm2048_vm1  ;;  %v1191_v8 = vadd.f32 %v4817_v13, %v4581_v2  ;;  %v3407_v20 = vor.u32 %v3812_v26, %v3406_v63 }
 0x142   : > { %4050 = vrcp.f32 %v4858_v32  ;;  %vm2052_vm4 = vcmp.eq.f32.partialorder %v2051_v12, 8.507059e+37  ;;  %v2066_v47 = vand.u32 2147483647, %v4858_v32  ;;  %v2068_v14 = vand.u32 2147483648, %v4858_v32 }
 0x143   : > { %v2045_v37 = vmul.f32 %v4045_v11, %v2044_v1  ;;  %v1357_v35 = vpop.f32.mrf.mxu3  ;;  %v1447_v22 = vadd.f32 %v4809_v24, %v1278_v39  ;;  %v3535_v29 = vor.u32 %v3843_v59, %v3534_v6  ;;  %vm2062_vm6 = vweird.f32 %v4858_v32 }
 0x144   : > { %v4872_v40 = vadd.f32 %v1357_v35, %v1189_v58  ;;  %v2069_v12 = vor.u32 1.1754944e-38, %v2068_v14  ;;  %vm2067_vm8 = vcmp.eq.f32.partialorder %v2066_v47, 8.507059e+37  ;;  %v3846_v14 = vld [vmem:[%s4416_s17 + $0x2c8] sm:$0xf0] }
 0x145   : > { %v2046_v36 = vadd.f32 %v4045_v11, %v2045_v37  ;;  %v4874_v44 = vpop.f32.mrf.mxu2  ;;  %v4049_v46 = vpop.eup %4048  ;;  %v3694_v53 = vmul.f32 -1.442695, %v1447_v22 }
 0x146   : > { %v1110_v62 = vpop.f32.mrf.mxu0  ;;  %v4877_v61 = vadd.f32 1.0, %v4049_v46 }
 0x147   : > { %v2050_v52 = vsel %vm2049_vm3, %v4045_v11, %v2046_v36  ;;  %v1111_v38 = vadd.f32 %v4817_v13, %v1110_v62  ;;  %v1279_v24 = vpop.f32.mrf.mxu1  ;;  %4052 = vpow2.f32 %v3694_v53  ;;  %v3408_v11 = vld [vmem:[%s4416_s17 + $0x1bc] sm:$0xf0]  ;;  %v1194_v36 = vadd.f32 %v4817_v13, %v4598_v28  ;;  %v3438_v62 = vld [vmem:[%s4416_s17 + $0x1e8] sm:$0xf] }
 0x148   : > { %v4051_v55 = vpop.eup %4050  ;;  %v2055_v56 = vsel %vm2052_vm4, %v2054_v33, %v2050_v52  ;;  %4054 = vrcp.f32 %v4877_v61  ;;  %v2081_v46 = vand.u32 2147483647, %v4877_v61  ;;  %v2083_v52 = vand.u32 2147483648, %v4877_v61 }
 0x149   : > { %2792 = vst [vmem:[%s4590_s12 + $0x78] sm:$0xff] %v2055_v56  ;;  %v2058_v0 = vmul.f32 %v4051_v55, %v4858_v32  ;;  %v1280_v3 = vadd.f32 %v1279_v24, %v1111_v38  ;;  %vm2063_vm5 = vweird.f32 %v4051_v55  ;;  %vm2077_vm10 = vweird.f32 %v4877_v61 }
 0x14a   : > { %3663 = vmatmul.msk.bf16.gmra.mxu2 %vm957_vm0, %v3427_v45  ;;  %vm2064_vm7 = vmor %vm2062_vm6, %vm2063_vm5  ;;  %v3819_v45 = vld [vmem:[%s4416_s17 + $0x1f0] sm:$0xf0]  ;;  %vm2082_vm12 = vcmp.eq.f32.partialorder %v2081_v46, 8.507059e+37 }
 0x14b   : > { %v2059_v5 = vsub.f32 1.0, %v2058_v0  ;;  %v1449_v9 = vadd.f32 %v4834_v41, %v1280_v3  ;;  %v1359_v18 = vpop.f32.mrf.mxu3  ;;  %v3411_v41 = vor.u32 %v3811_v23, %v3408_v11  ;;  %v3439_v26 = vor.u32 %v3819_v45, %v3438_v62 }
 0x14c   : > { %v4894_v34 = vadd.f32 %v1359_v18, %v1191_v8  ;;  %v2084_v8 = vor.u32 1.1754944e-38, %v2083_v52 }
 0x14d   : > { %v2060_v30 = vmul.f32 %v4051_v55, %v2059_v5  ;;  %v3695_v31 = vmul.f32 -1.442695, %v1449_v9  ;;  %v4896_v2 = vpop.f32.mrf.mxu2  ;;  %v4053_v60 = vpop.eup %4052  ;;  %v3418_v5 = vld [vmem:[%s4416_s17 + $0x1c8] sm:$0xf]  ;;  %v3815_v9 = vld [vmem:[%s4416_s17 + $0x1d0] sm:$0xf0] }
 0x14e   : > { %v1113_v4 = vpop.f32.mrf.mxu0  ;;  %v4055_v37 = vpop.eup %4054  ;;  %v4900_v39 = vadd.f32 1.0, %v4053_v60 }
 0x14f   : > { %v2061_v1 = vadd.f32 %v4051_v55, %v2060_v30  ;;  %4056 = vpow2.f32 %v3695_v31  ;;  %v1114_v58 = vadd.f32 %v4817_v13, %v1113_v4  ;;  %v1282_v25 = vpop.f32.mrf.mxu1  ;;  %v2073_v43 = vmul.f32 %v4055_v37, %v4877_v61  ;;  %v3546_v61 = vld [vmem:[%s4416_s17 + $0x2c0] sm:$0xf]  ;;  %v3814_v31 = vld [vmem:[%s4416_s17 + $0x1cc] sm:$0xf]  ;;  %v3420_v4 = vld [vmem:[%s4416_s17 + $0x1d4] sm:$0xf0] }
 0x150   : > { %1152 = vmatmul.bf16.gmra.mxu0 %v3407_v20  ;;  %3672 = vmatmul.msk.bf16.gmra.mxu3 %vm957_vm0, %v3535_v29  ;;  %4058 = vrcp.f32 %v4900_v39  ;;  %vm2078_vm9 = vweird.f32 %v4055_v37  ;;  %v1196_v20 = vadd.f32 %v4817_v13, %v4619_v57  ;;  %v2098_v60 = vand.u32 2147483648, %v4900_v39 }
 0x151   : > { %v2065_v42 = vsel %vm2064_vm7, %v4051_v55, %v2061_v1  ;;  %v1283_v35 = vadd.f32 %v1282_v25, %v1114_v58  ;;  %1321 = vmatmul.bf16.gmra.mxu1 %v3411_v41  ;;  %v2074_v22 = vsub.f32 1.0, %v2073_v43  ;;  %vm2079_vm11 = vmor %vm2077_vm10, %vm2078_vm9  ;;  %v2096_v41 = vand.u32 2147483647, %v4900_v39 }
 0x152   : > { %v2070_v32 = vsel %vm2067_vm8, %v2069_v12, %v2065_v42  ;;  %v3419_v58 = vor.u32 %v3815_v9, %v3418_v5  ;;  %v3547_v25 = vor.u32 %v3846_v14, %v3546_v61  ;;  %vm2092_vm14 = vweird.f32 %v4900_v39 }
 0x153   : > { %2793 = vst [vmem:[%s4590_s12 + $0x80] sm:$0xff] %v2070_v32  ;;  %v1452_v33 = vadd.f32 %v4855_v7, %v1283_v35  ;;  %v1362_v53 = vpop.f32.mrf.mxu3  ;;  %v2075_v24 = vmul.f32 %v4055_v37, %v2074_v22  ;;  %v2099_v45 = vor.u32 1.1754944e-38, %v2098_v60  ;;  %vm2097_vm1 = vcmp.eq.f32.partialorder %v2096_v41, 8.507059e+37  ;;  %v3558_v60 = vld [vmem:[%s4416_s17 + $0x2d8] sm:$0xf] }
 0x154   : > { %v4913_v56 = vadd.f32 %v1362_v53, %v1194_v36  ;;  %v3423_v36 = vor.u32 %v3814_v31, %v3420_v4  ;;  %v3818_v31 = vld [vmem:[%s4416_s17 + $0x1e8] sm:$0xf0] }
 0x155   : > { %v4057_v38 = vpop.eup %4056  ;;  %v3696_v55 = vmul.f32 -1.442695, %v1452_v33  ;;  %v4917_v63 = vpop.f32.mrf.mxu2  ;;  %v2076_v0 = vadd.f32 %v4055_v37, %v2075_v24 }
 0x156   : > { %v4915_v28 = vadd.f32 1.0, %v4057_v38  ;;  %v1115_v7 = vpop.f32.mrf.mxu0  ;;  %v4059_v59 = vpop.eup %4058 }
 0x157   : > { %4060 = vpow2.f32 %v3696_v55  ;;  %v1116_v3 = vadd.f32 %v4817_v13, %v1115_v7  ;;  %v1284_v6 = vpop.f32.mrf.mxu1  ;;  %v2080_v23 = vsel %vm2079_vm11, %v4055_v37, %v2076_v0  ;;  %v2088_v11 = vmul.f32 %v4059_v59, %v4900_v39  ;;  %v3450_v55 = vld [vmem:[%s4416_s17 + $0x200] sm:$0xf] }
 0x158   : > { %4062 = vrcp.f32 %v4915_v28  ;;  %v2085_v18 = vsel %vm2082_vm12, %v2084_v8, %v2080_v23  ;;  %vm2093_vm13 = vweird.f32 %v4059_v59  ;;  %v1199_v39 = vadd.f32 %v4817_v13, %v4635_v21 }
 0x159   : > { %v1285_v47 = vadd.f32 %v1284_v6, %v1116_v3  ;;  %2794 = vst [vmem:[%s4590_s12 + $0x88] sm:$0xff] %v2085_v18  ;;  %v2089_v29 = vsub.f32 1.0, %v2088_v11  ;;  %vm2094_vm15 = vmor %vm2092_vm14, %vm2093_vm13  ;;  %v2113_v24 = vand.u32 2147483648, %v4915_v28  ;;  %v3822_v3 = vld [vmem:[%s4416_s17 + $0x208] sm:$0xf0]  ;;  %vm2107_vm3 = vweird.f32 %v4915_v28 }
 0x15a   : > { %3664 = vmatmul.msk.bf16.gmra.mxu2 %vm957_vm0, %v3439_v26  ;;  %v2111_v26 = vand.u32 2147483647, %v4915_v28  ;;  %v3451_v14 = vor.u32 %v3822_v3, %v3450_v55 }
 0x15b   : > { %v1454_v30 = vadd.f32 %v4874_v44, %v1285_v47  ;;  %v1364_v1 = vpop.f32.mrf.mxu3  ;;  %v2090_v12 = vmul.f32 %v4059_v59, %v2089_v29  ;;  %v2114_v23 = vor.u32 1.1754944e-38, %v2113_v24 }
 0x15c   : > { %v4936_v57 = vadd.f32 %v1364_v1, %v1196_v20  ;;  %vm2112_vm5 = vcmp.eq.f32.partialorder %v2111_v26, 8.507059e+37  ;;  %v3849_v1 = vld [vmem:[%s4416_s17 + $0x2e0] sm:$0xf0] }
 0x15d   : > { %v4061_v37 = vpop.eup %4060  ;;  %v3697_v42 = vmul.f32 -1.442695, %v1454_v30  ;;  %v4940_v44 = vpop.f32.mrf.mxu2  ;;  %v2091_v22 = vadd.f32 %v4059_v59, %v2090_v12  ;;  %v3430_v30 = vld [vmem:[%s4416_s17 + $0x1e0] sm:$0xf] }
 0x15e   : > { %v4063_v43 = vpop.eup %4062  ;;  %v4938_v35 = vadd.f32 1.0, %v4061_v37  ;;  %v1118_v32 = vpop.f32.mrf.mxu0 }
 0x15f   : > { %v2103_v33 = vmul.f32 %v4063_v43, %v4915_v28  ;;  %4064 = vpow2.f32 %v3697_v42  ;;  %v1287_v62 = vpop.f32.mrf.mxu1  ;;  %v2095_v46 = vsel %vm2094_vm15, %v4059_v59, %v2091_v22  ;;  %v1119_v53 = vadd.f32 %v4817_v13, %v1118_v32  ;;  %v3432_v32 = vld [vmem:[%s4416_s17 + $0x1ec] sm:$0xf0] }
 0x160   : > { %4066 = vrcp.f32 %v4938_v35  ;;  %1157 = vmatmul.bf16.gmra.mxu0 %v3419_v58  ;;  %3673 = vmatmul.msk.bf16.gmra.mxu3 %vm957_vm0, %v3547_v25  ;;  %v2100_v38 = vsel %vm2097_vm1, %v2099_v45, %v2095_v46  ;;  %vm2108_vm2 = vweird.f32 %v4063_v43  ;;  %v1201_v58 = vadd.f32 %v4817_v13, %v4656_v51 }
 0x161   : > { %v2104_v52 = vsub.f32 1.0, %v2103_v33  ;;  %1326 = vmatmul.bf16.gmra.mxu1 %v3423_v36  ;;  %2795 = vst [vmem:[%s4590_s12 + $0x90] sm:$0xff] %v2100_v38  ;;  %v1288_v0 = vadd.f32 %v1287_v62, %v1119_v53  ;;  %vm2109_vm4 = vmor %vm2107_vm3, %vm2108_vm2  ;;  %v2128_v25 = vand.u32 2147483648, %v4938_v35  ;;  %v2126_v12 = vand.u32 2147483647, %v4938_v35 }
 0x162   : > { %v3431_v22 = vor.u32 %v3818_v31, %v3430_v30  ;;  %v3559_v33 = vor.u32 %v3849_v1, %v3558_v60  ;;  %vm2122_vm7 = vweird.f32 %v4938_v35 }
 0x163   : > { %v2105_v7 = vmul.f32 %v4063_v43, %v2104_v52  ;;  %v1367_v6 = vpop.f32.mrf.mxu3  ;;  %v1457_v5 = vadd.f32 %v4896_v2, %v1288_v0  ;;  %v2129_v52 = vor.u32 1.1754944e-38, %v2128_v25  ;;  %vm2127_vm9 = vcmp.eq.f32.partialorder %v2126_v12, 8.507059e+37  ;;  %v3821_v12 = vld [vmem:[%s4416_s17 + $0x200] sm:$0xf0] }
 0x164   : > { %v4956_v21 = vadd.f32 %v1367_v6, %v1199_v39 }
 0x165   : > { %v4065_v59 = vpop.eup %4064  ;;  %v2106_v8 = vadd.f32 %v4063_v43, %v2105_v7  ;;  %v4960_v47 = vpop.f32.mrf.mxu2  ;;  %v3698_v28 = vmul.f32 -1.442695, %v1457_v5 }
 0x166   : > { %v4067_v9 = vpop.eup %4066  ;;  %v4958_v11 = vadd.f32 1.0, %v4065_v59  ;;  %v1120_v61 = vpop.f32.mrf.mxu0  ;;  %v1204_v59 = vadd.f32 %v4817_v13, %v4672_v16 }
 0x167   : > { %v2110_v18 = vsel %vm2109_vm4, %v4063_v43, %v2106_v8  ;;  %v2118_v2 = vmul.f32 %v4067_v9, %v4938_v35  ;;  %v1289_v20 = vpop.f32.mrf.mxu1  ;;  %v1121_v41 = vadd.f32 %v4817_v13, %v1120_v61  ;;  %vm2123_vm6 = vweird.f32 %v4067_v9  ;;  %v3817_v43 = vld [vmem:[%s4416_s17 + $0x1e4] sm:$0xf]  ;;  %v3462_v61 = vld [vmem:[%s4416_s17 + $0x218] sm:$0xf] }
 0x168   : > { %v2115_v29 = vsel %vm2112_vm5, %v2114_v23, %v2110_v18  ;;  %4068 = vrcp.f32 %v4958_v11  ;;  %vm2124_vm8 = vmor %vm2122_vm7, %vm2123_vm6  ;;  %v3435_v38 = vor.u32 %v3817_v43, %v3432_v32  ;;  %v2143_v8 = vand.u32 2147483648, %v4958_v11  ;;  %v3570_v32 = vld [vmem:[%s4416_s17 + $0x2f0] sm:$0xf] }
 0x169   : > { %2796 = vst [vmem:[%s4590_s12 + $0x98] sm:$0xff] %v2115_v29  ;;  %v2119_v4 = vsub.f32 1.0, %v2118_v2  ;;  %4070 = vpow2.f32 %v3698_v28  ;;  %v1290_v42 = vadd.f32 %v1289_v20, %v1121_v41  ;;  %vm2137_vm11 = vweird.f32 %v4958_v11 }
 0x16a   : > { %3665 = vmatmul.msk.bf16.gmra.mxu2 %vm957_vm0, %v3451_v14  ;;  %v3825_v14 = vld [vmem:[%s4416_s17 + $0x220] sm:$0xf0]  ;;  %v2144_v20 = vor.u32 1.1754944e-38, %v2143_v8 }
 0x16b   : > { %v2120_v37 = vmul.f32 %v4067_v9, %v2119_v4  ;;  %v1369_v36 = vpop.f32.mrf.mxu3  ;;  %v1459_v45 = vadd.f32 %v4917_v63, %v1290_v42  ;;  %v3463_v31 = vor.u32 %v3825_v14, %v3462_v61 }
 0x16c   : > { %v4979_v51 = vadd.f32 %v1369_v36, %v1201_v58  ;;  %v3852_v36 = vld [vmem:[%s4416_s17 + $0x2f8] sm:$0xf0] }
 0x16d   : > { %v2121_v62 = vadd.f32 %v4067_v9, %v2120_v37  ;;  %v4981_v53 = vpop.f32.mrf.mxu2  ;;  %v3699_v26 = vmul.f32 -1.442695, %v1459_v45  ;;  %v3442_v37 = vld [vmem:[%s4416_s17 + $0x1f8] sm:$0xf]  ;;  %v3820_v45 = vld [vmem:[%s4416_s17 + $0x1fc] sm:$0xf] }
 0x16e   : > { %v4069_v46 = vpop.eup %4068  ;;  %v1123_v39 = vpop.f32.mrf.mxu0 }
 0x16f   : > { %v4071_v24 = vpop.eup %4070  ;;  %v2125_v55 = vsel %vm2124_vm8, %v4067_v9, %v2121_v62  ;;  %v2133_v7 = vmul.f32 %v4069_v46, %v4958_v11  ;;  %v1292_v0 = vpop.f32.mrf.mxu1  ;;  %v1124_v3 = vadd.f32 %v4817_v13, %v1123_v39  ;;  %4072 = vpow2.f32 %v3699_v26 }
 0x170   : > { %v2130_v35 = vsel %vm2127_vm9, %v2129_v52, %v2125_v55  ;;  %v4984_v63 = vadd.f32 1.0, %v4071_v24  ;;  %1162 = vmatmul.bf16.gmra.mxu0 %v3431_v22  ;;  %3674 = vmatmul.msk.bf16.gmra.mxu3 %vm957_vm0, %v3559_v33  ;;  %vm2138_vm10 = vweird.f32 %v4069_v46  ;;  %v2141_v9 = vand.u32 2147483647, %v4958_v11 }
 0x171   : > { %2797 = vst [vmem:[%s4590_s12 + $0xa0] sm:$0xff] %v2130_v35  ;;  %v2134_v6 = vsub.f32 1.0, %v2133_v7  ;;  %1331 = vmatmul.bf16.gmra.mxu1 %v3435_v38  ;;  %v1293_v23 = vadd.f32 %v1292_v0, %v1124_v3  ;;  %vm2139_vm12 = vmor %vm2137_vm11, %vm2138_vm10  ;;  %v1206_v22 = vadd.f32 %v4817_v13, %v4693_v48  ;;  %v3443_v24 = vor.u32 %v3821_v12, %v3442_v37 }
 0x172   : > { %4074 = vrcp.f32 %v4984_v63  ;;  %vm2142_vm13 = vcmp.eq.f32.partialorder %v2141_v9, 8.507059e+37  ;;  %v2156_v52 = vand.u32 2147483647, %v4984_v63  ;;  %v2158_v39 = vand.u32 2147483648, %v4984_v63 }
 0x173   : > { %v2135_v5 = vmul.f32 %v4069_v46, %v2134_v6  ;;  %v1372_v18 = vpop.f32.mrf.mxu3  ;;  %v1462_v28 = vadd.f32 %v4940_v44, %v1293_v23  ;;  %v3571_v55 = vor.u32 %v3852_v36, %v3570_v32  ;;  %vm2152_vm15 = vweird.f32 %v4984_v63 }
 0x174   : > { %v4998_v16 = vadd.f32 %v1372_v18, %v1204_v59  ;;  %v2159_v9 = vor.u32 1.1754944e-38, %v2158_v39  ;;  %vm2157_vm2 = vcmp.eq.f32.partialorder %v2156_v52, 8.507059e+37  ;;  %v3824_v52 = vld [vmem:[%s4416_s17 + $0x218] sm:$0xf0]  ;;  %v1211_v39 = vadd.f32 %v4817_v13, %v4730_v49 }
 0x175   : > { %v2136_v2 = vadd.f32 %v4069_v46, %v2135_v5  ;;  %v5000_v29 = vpop.f32.mrf.mxu2  ;;  %v4073_v4 = vpop.eup %4072  ;;  %v3700_v60 = vmul.f32 -1.442695, %v1462_v28 }
 0x176   : > { %v1125_v30 = vpop.f32.mrf.mxu0  ;;  %v5003_v25 = vadd.f32 1.0, %v4073_v4 }
 0x177   : > { %v2140_v41 = vsel %vm2139_vm12, %v4069_v46, %v2136_v2  ;;  %v1126_v11 = vadd.f32 %v4817_v13, %v1125_v30  ;;  %v1294_v44 = vpop.f32.mrf.mxu1  ;;  %4076 = vpow2.f32 %v3700_v60  ;;  %v3444_v46 = vld [vmem:[%s4416_s17 + $0x204] sm:$0xf0]  ;;  %v1209_v2 = vadd.f32 %v4817_v13, %v4709_v15  ;;  %v3474_v30 = vld [vmem:[%s4416_s17 + $0x230] sm:$0xf] }
 0x178   : > { %v4075_v1 = vpop.eup %4074  ;;  %v2145_v58 = vsel %vm2142_vm13, %v2144_v20, %v2140_v41  ;;  %4078 = vrcp.f32 %v5003_v25  ;;  %v2171_v4 = vand.u32 2147483647, %v5003_v25  ;;  %v2173_v41 = vand.u32 2147483648, %v5003_v25 }
 0x179   : > { %2798 = vst [vmem:[%s4590_s12 + $0xa8] sm:$0xff] %v2145_v58  ;;  %v2148_v42 = vmul.f32 %v4075_v1, %v4984_v63  ;;  %v1295_v43 = vadd.f32 %v1294_v44, %v1126_v11  ;;  %vm2153_vm14 = vweird.f32 %v4075_v1  ;;  %vm2167_vm4 = vweird.f32 %v5003_v25 }
 0x17a   : > { %3666 = vmatmul.msk.bf16.gmra.mxu2 %vm957_vm0, %v3463_v31  ;;  %vm2154_vm1 = vmor %vm2152_vm15, %vm2153_vm14  ;;  %v3828_v31 = vld [vmem:[%s4416_s17 + $0x238] sm:$0xf0]  ;;  %vm2172_vm6 = vcmp.eq.f32.partialorder %v2171_v4, 8.507059e+37 }
 0x17b   : > { %v2149_v33 = vsub.f32 1.0, %v2148_v42  ;;  %v1464_v62 = vadd.f32 %v4960_v47, %v1295_v43  ;;  %v1374_v38 = vpop.f32.mrf.mxu3  ;;  %v3447_v47 = vor.u32 %v3820_v45, %v3444_v46  ;;  %v3454_v46 = vld [vmem:[%s4416_s17 + $0x210] sm:$0xf] }
 0x17c   : > { %v5020_v0 = vadd.f32 %v1374_v38, %v1206_v22  ;;  %v2174_v22 = vor.u32 1.1754944e-38, %v2173_v41 }
 0x17d   : > { %v2150_v7 = vmul.f32 %v4075_v1, %v2149_v33  ;;  %v3701_v26 = vmul.f32 -1.442695, %v1464_v62  ;;  %v5022_v48 = vpop.f32.mrf.mxu2  ;;  %v4077_v3 = vpop.eup %4076 }
 0x17e   : > { %v1128_v35 = vpop.f32.mrf.mxu0  ;;  %v4079_v5 = vpop.eup %4078  ;;  %v5026_v23 = vadd.f32 1.0, %v4077_v3  ;;  %v3455_v3 = vor.u32 %v3824_v52, %v3454_v46 }
 0x17f   : > { %v2151_v6 = vadd.f32 %v4075_v1, %v2150_v7  ;;  %4080 = vpow2.f32 %v3701_v26  ;;  %v1129_v59 = vadd.f32 %v4817_v13, %v1128_v35  ;;  %v1297_v8 = vpop.f32.mrf.mxu1  ;;  %v2163_v14 = vmul.f32 %v4079_v5, %v5003_v25  ;;  %v3456_v7 = vld [vmem:[%s4416_s17 + $0x21c] sm:$0xf0] }
 0x180   : > { %1167 = vmatmul.bf16.gmra.mxu0 %v3443_v24  ;;  %3675 = vmatmul.msk.bf16.gmra.mxu3 %vm957_vm0, %v3571_v55  ;;  %4082 = vrcp.f32 %v5026_v23  ;;  %vm2168_vm3 = vweird.f32 %v4079_v5  ;;  %v3823_v55 = vld [vmem:[%s4416_s17 + $0x214] sm:$0xf]  ;;  %v2186_v26 = vand.u32 2147483647, %v5026_v23  ;;  %v2188_v35 = vand.u32 2147483648, %v5026_v23 }
 0x181   : > { %v2155_v61 = vsel %vm2154_vm1, %v4075_v1, %v2151_v6  ;;  %v1298_v18 = vadd.f32 %v1297_v8, %v1129_v59  ;;  %1336 = vmatmul.bf16.gmra.mxu1 %v3447_v47  ;;  %v2164_v28 = vsub.f32 1.0, %v2163_v14  ;;  %vm2169_vm5 = vmor %vm2167_vm4, %vm2168_vm3  ;;  %v3459_v14 = vor.u32 %v3823_v55, %v3456_v7  ;;  %v3466_v55 = vld [vmem:[%s4416_s17 + $0x228] sm:$0xf]  ;;  %v3827_v7 = vld [vmem:[%s4416_s17 + $0x230] sm:$0xf0] }
 0x182   : > { %v2160_v63 = vsel %vm2157_vm2, %v2159_v9, %v2155_v61  ;;  %vm2182_vm8 = vweird.f32 %v5026_v23  ;;  %vm2187_vm10 = vcmp.eq.f32.partialorder %v2186_v26, 8.507059e+37  ;;  %v1216_v26 = vadd.f32 %v4817_v13, %v4767_v50 }
 0x183   : > { %2799 = vst [vmem:[%s4590_s12 + $0xb0] sm:$0xff] %v2160_v63  ;;  %v1467_v20 = vadd.f32 %v4981_v53, %v1298_v18  ;;  %v1377_v60 = vpop.f32.mrf.mxu3  ;;  %v2165_v44 = vmul.f32 %v4079_v5, %v2164_v28  ;;  %v3475_v53 = vor.u32 %v3828_v31, %v3474_v30  ;;  %v2189_v28 = vor.u32 1.1754944e-38, %v2188_v35 }
 0x184   : > { %v5039_v58 = vadd.f32 %v1377_v60, %v1209_v2  ;;  %v3486_v60 = vld [vmem:[%s4416_s17 + $0x248] sm:$0xf] }
 0x185   : > { %v4081_v11 = vpop.eup %4080  ;;  %v3702_v1 = vmul.f32 -1.442695, %v1467_v20  ;;  %v5043_v15 = vpop.f32.mrf.mxu2  ;;  %v2166_v42 = vadd.f32 %v4079_v5, %v2165_v44 }
 0x186   : > { %v5041_v37 = vadd.f32 1.0, %v4081_v11  ;;  %v1130_v12 = vpop.f32.mrf.mxu0  ;;  %v4083_v36 = vpop.eup %4082 }
 0x187   : > { %4084 = vpow2.f32 %v3702_v1  ;;  %v1131_v43 = vadd.f32 %v4817_v13, %v1130_v12  ;;  %v1299_v32 = vpop.f32.mrf.mxu1  ;;  %v2170_v33 = vsel %vm2169_vm5, %v4079_v5, %v2166_v42  ;;  %v2178_v62 = vmul.f32 %v4083_v36, %v5026_v23  ;;  %v3831_v12 = vld [vmem:[%s4416_s17 + $0x250] sm:$0xf0] }
 0x188   : > { %4086 = vrcp.f32 %v5041_v37  ;;  %v2175_v25 = vsel %vm2172_vm6, %v2174_v22, %v2170_v33  ;;  %vm2183_vm7 = vweird.f32 %v4083_v36  ;;  %v1214_v23 = vadd.f32 %v4817_v13, %v4746_v17 }
 0x189   : > { %v1300_v45 = vadd.f32 %v1299_v32, %v1131_v43  ;;  %2800 = vst [vmem:[%s4590_s12 + $0xb8] sm:$0xff] %v2175_v25  ;;  %v2179_v38 = vsub.f32 1.0, %v2178_v62  ;;  %vm2184_vm9 = vmor %vm2182_vm8, %vm2183_vm7  ;;  %v2203_v41 = vand.u32 2147483648, %v5041_v37  ;;  %v2201_v44 = vand.u32 2147483647, %v5041_v37 }
 0x18a   : > { %3667 = vmatmul.msk.bf16.gmra.mxu2 %vm957_vm0, %v3475_v53  ;;  %vm2197_vm12 = vweird.f32 %v5041_v37  ;;  %v3487_v46 = vor.u32 %v3831_v12, %v3486_v60 }
 0x18b   : > { %v1469_v24 = vadd.f32 %v5000_v29, %v1300_v45  ;;  %v1379_v47 = vpop.f32.mrf.mxu3  ;;  %v2180_v59 = vmul.f32 %v4083_v36, %v2179_v38  ;;  %v2204_v22 = vor.u32 1.1754944e-38, %v2203_v41  ;;  %vm2202_vm14 = vcmp.eq.f32.partialorder %v2201_v44, 8.507059e+37 }
 0x18c   : > { %v5060_v5 = vadd.f32 %v1379_v47, %v1211_v39 }
 0x18d   : > { %v4085_v6 = vpop.eup %4084  ;;  %v3703_v8 = vmul.f32 -1.442695, %v1469_v24  ;;  %v5064_v29 = vpop.f32.mrf.mxu2  ;;  %v2181_v18 = vadd.f32 %v4083_v36, %v2180_v59  ;;  %v3826_v59 = vld [vmem:[%s4416_s17 + $0x22c] sm:$0xf] }
 0x18e   : > { %v4087_v49 = vpop.eup %4086  ;;  %v5062_v9 = vadd.f32 1.0, %v4085_v6  ;;  %v1133_v61 = vpop.f32.mrf.mxu0 }
 0x18f   : > { %v2193_v63 = vmul.f32 %v4087_v49, %v5041_v37  ;;  %4088 = vpow2.f32 %v3703_v8  ;;  %v1302_v2 = vpop.f32.mrf.mxu1  ;;  %v2185_v20 = vsel %vm2184_vm9, %v4083_v36, %v2181_v18  ;;  %v1134_v31 = vadd.f32 %v4817_v13, %v1133_v61  ;;  %v3468_v8 = vld [vmem:[%s4416_s17 + $0x234] sm:$0xf0] }
 0x190   : > { %4090 = vrcp.f32 %v5062_v9  ;;  %1172 = vmatmul.bf16.gmra.mxu0 %v3455_v3  ;;  %v2190_v4 = vsel %vm2187_vm10, %v2189_v28, %v2185_v20  ;;  %vm2198_vm11 = vweird.f32 %v4087_v49  ;;  %v2218_v35 = vand.u32 2147483648, %v5062_v9 }
 0x191   : > { %v2194_v30 = vsub.f32 1.0, %v2193_v63  ;;  %1341 = vmatmul.bf16.gmra.mxu1 %v3459_v14  ;;  %2801 = vst [vmem:[%s4590_s12 + $0xc0] sm:$0xff] %v2190_v4  ;;  %v1303_v1 = vadd.f32 %v1302_v2, %v1134_v31  ;;  %vm2199_vm13 = vmor %vm2197_vm12, %vm2198_vm11  ;;  %v2216_v3 = vand.u32 2147483647, %v5062_v9  ;;  %v3467_v61 = vor.u32 %v3827_v7, %v3466_v55 }
 0x192   : > { %vm2212_vm1 = vweird.f32 %v5062_v9  ;;  %v2219_v2 = vor.u32 1.1754944e-38, %v2218_v35 }
 0x193   : > { %v2195_v11 = vmul.f32 %v4087_v49, %v2194_v30  ;;  %v1382_v53 = vpop.f32.mrf.mxu3  ;;  %v1472_v32 = vadd.f32 %v5022_v48, %v1303_v1  ;;  %v3471_v30 = vor.u32 %v3826_v59, %v3468_v8  ;;  %vm2217_vm3 = vcmp.eq.f32.partialorder %v2216_v3, 8.507059e+37  ;;  %v5112_v1 = vld [vmem:[%s5854_s2] ss:$0 sm:$0xff] }
 0x194   : > { %v5079_v17 = vadd.f32 %v1382_v53, %v1214_v23  ;;  %v1219_v12 = vadd.f32 %v5112_v1, %v4783_v19  ;;  %v1221_v3 = vadd.f32 %v5112_v1, %v4804_v54 }
 0x195   : > { %v4089_v42 = vpop.eup %4088  ;;  %v2196_v43 = vadd.f32 %v4087_v49, %v2195_v11  ;;  %v5083_v62 = vpop.f32.mrf.mxu2  ;;  %v3704_v25 = vmul.f32 -1.442695, %v1472_v32  ;;  %v3498_v32 = vld [vmem:[%s4416_s17 + $0x260] sm:$0xf] }
 0x196   : > { %v4091_v36 = vpop.eup %4090  ;;  %v5081_v33 = vadd.f32 1.0, %v4089_v42  ;;  %v1135_v45 = vpop.f32.mrf.mxu0 }
 0x197   : > { %v2200_v52 = vsel %vm2199_vm13, %v4087_v49, %v2196_v43  ;;  %v2208_v37 = vmul.f32 %v4091_v36, %v5062_v9  ;;  %v1304_v48 = vpop.f32.mrf.mxu1  ;;  %v1136_v24 = vadd.f32 %v4817_v13, %v1135_v45  ;;  %vm2213_vm15 = vweird.f32 %v4091_v36 }
 0x198   : > { %v2205_v39 = vsel %vm2202_vm14, %v2204_v22, %v2200_v52  ;;  %4092 = vrcp.f32 %v5081_v33  ;;  %vm2214_vm2 = vmor %vm2212_vm1, %vm2213_vm15  ;;  %v2233_v53 = vand.u32 2147483648, %v5081_v33  ;;  %vm2227_vm5 = vweird.f32 %v5081_v33 }
 0x199   : > { %2802 = vst [vmem:[%s4590_s12 + $0xc8] sm:$0xff] %v2205_v39  ;;  %v2209_v38 = vsub.f32 1.0, %v2208_v37  ;;  %4094 = vpow2.f32 %v3704_v25  ;;  %v1305_v6 = vadd.f32 %v1304_v48, %v1136_v24 }
 0x19a   : > { %3668 = vmatmul.msk.bf16.gmra.mxu2 %vm957_vm0, %v3487_v46  ;;  %v2234_v52 = vor.u32 1.1754944e-38, %v2233_v53 }
 0x19b   : > { %v2210_v47 = vmul.f32 %v4091_v36, %v2209_v38  ;;  %v1384_v49 = vpop.f32.mrf.mxu3  ;;  %v1474_v18 = vadd.f32 %v5043_v15, %v1305_v6 }
 0x19c   : > { %v5100_v63 = vadd.f32 %v1384_v49, %v1216_v26 }
 0x19d   : > { %v2211_v14 = vadd.f32 %v4091_v36, %v2210_v47  ;;  %v5102_v28 = vpop.f32.mrf.mxu2  ;;  %v3705_v41 = vmul.f32 -1.442695, %v1474_v18 }
 0x19e   : > { %v4093_v50 = vpop.eup %4092  ;;  %v1138_v20 = vpop.f32.mrf.mxu0 }
 0x19f   : > { %v4095_v31 = vpop.eup %4094  ;;  %v2215_v23 = vsel %vm2214_vm2, %v4091_v36, %v2211_v14  ;;  %v2223_v4 = vmul.f32 %v4093_v50, %v5081_v33  ;;  %v1307_v60 = vpop.f32.mrf.mxu1  ;;  %v1139_v11 = vadd.f32 %v4817_v13, %v1138_v20  ;;  %4096 = vpow2.f32 %v3705_v41  ;;  %v3834_v36 = vld [vmem:[%s4416_s17 + $0x268] sm:$0xf0] }
 0x1a0   : > { %v2220_v9 = vsel %vm2217_vm3, %v2219_v2, %v2215_v23  ;;  %v5105_v15 = vadd.f32 1.0, %v4095_v31  ;;  %1177 = vmatmul.bf16.gmra.mxu0 %v3467_v61  ;;  %vm2228_vm4 = vweird.f32 %v4093_v50  ;;  %v2231_v13 = vand.u32 2147483647, %v5081_v33 }
 0x1a1   : > { %2803 = vst [vmem:[%s4590_s12 + $0xd0] sm:$0xff] %v2220_v9  ;;  %v2224_v44 = vsub.f32 1.0, %v2223_v4  ;;  %1346 = vmatmul.bf16.gmra.mxu1 %v3471_v30  ;;  %v1308_v43 = vadd.f32 %v1307_v60, %v1139_v11  ;;  %vm2229_vm6 = vmor %vm2227_vm5, %vm2228_vm4  ;;  %v3499_v48 = vor.u32 %v3834_v36, %v3498_v32 }
 0x1a2   : > { %4098 = vrcp.f32 %v5105_v15  ;;  %vm2232_vm7 = vcmp.eq.f32.partialorder %v2231_v13, 8.507059e+37  ;;  %v2246_v8 = vand.u32 2147483647, %v5105_v15  ;;  %v2248_v49 = vand.u32 2147483648, %v5105_v15 }
 0x1a3   : > { %v2225_v42 = vmul.f32 %v4093_v50, %v2224_v44  ;;  %v1387_v22 = vpop.f32.mrf.mxu3  ;;  %v1477_v46 = vadd.f32 %v5064_v29, %v1308_v43  ;;  %vm2242_vm9 = vweird.f32 %v5105_v15 }
 0x1a4   : > { %v5123_v19 = vadd.f32 %v1387_v22, %v1219_v12  ;;  %v2249_v4 = vor.u32 1.1754944e-38, %v2248_v49  ;;  %vm2247_vm10 = vcmp.eq.f32.partialorder %v2246_v8, 8.507059e+37 }
 0x1a5   : > { %v2226_v45 = vadd.f32 %v4093_v50, %v2225_v42  ;;  %v5125_v37 = vpop.f32.mrf.mxu2  ;;  %v4097_v39 = vpop.eup %4096  ;;  %v3706_v24 = vmul.f32 -1.442695, %v1477_v46 }
 0x1a6   : > { %v1140_v25 = vpop.f32.mrf.mxu0  ;;  %v1782_v35 = vadd.f32 1.0, %v4097_v39 }
 0x1a7   : > { %v2230_v38 = vsel %vm2229_vm6, %v4093_v50, %v2226_v45  ;;  %v1141_v55 = vadd.f32 %v5112_v1, %v1140_v25  ;;  %v1309_v7 = vpop.f32.mrf.mxu1  ;;  %4100 = vpow2.f32 %v3706_v24 }
 0x1a8   : > { %v4099_v26 = vpop.eup %4098  ;;  %v2235_v33 = vsel %vm2232_vm7, %v2234_v52, %v2230_v38  ;;  %4102 = vrcp.f32 %v1782_v35  ;;  %v2261_v42 = vand.u32 2147483647, %v1782_v35  ;;  %vm2257_vm12 = vweird.f32 %v1782_v35 }
 0x1a9   : > { %2804 = vst [vmem:[%s4590_s12 + $0xd8] sm:$0xff] %v2235_v33  ;;  %v2238_v29 = vmul.f32 %v4099_v26, %v5105_v15  ;;  %v1310_v47 = vadd.f32 %v1309_v7, %v1141_v55  ;;  %vm2243_vm8 = vweird.f32 %v4099_v26  ;;  %v2263_v15 = vand.u32 2147483648, %v1782_v35 }
 0x1aa   : > { %3669 = vmatmul.msk.bf16.gmra.mxu2 %vm957_vm0, %v3499_v48  ;;  %vm2244_vm0 = vmor %vm2242_vm9, %vm2243_vm8  ;;  %vm2262_vm14 = vcmp.eq.f32.partialorder %v2261_v42, 8.507059e+37 }
 0x1ab   : > { %v2239_v6 = vsub.f32 1.0, %v2238_v29  ;;  %v1479_v59 = vadd.f32 %v5083_v62, %v1310_v47  ;;  %v1389_v61 = vpop.f32.mrf.mxu3  ;;  %v2264_v24 = vor.u32 1.1754944e-38, %v2263_v15 }
 0x1ac   : > { %v5136_v50 = vadd.f32 %v1389_v61, %v1221_v3 }
 0x1ad   : > { %v2240_v14 = vmul.f32 %v4099_v26, %v2239_v6  ;;  %v3707_v18 = vmul.f32 -1.442695, %v1479_v59  ;;  %v5138_v2 = vpop.f32.mrf.mxu2  ;;  %v4101_v30 = vpop.eup %4100 }
 0x1ae   : > { %v1143_v20 = vpop.f32.mrf.mxu0  ;;  %v4103_v23 = vpop.eup %4102  ;;  %v1783_v41 = vadd.f32 1.0, %v4101_v30 }
 0x1af   : > { %v2241_v54 = vadd.f32 %v4099_v26, %v2240_v14  ;;  %4104 = vpow2.f32 %v3707_v18  ;;  %v1144_v62 = vadd.f32 %v5112_v1, %v1143_v20  ;;  %v1312_v31 = vpop.f32.mrf.mxu1  ;;  %v2253_v9 = vmul.f32 %v4103_v23, %v1782_v35 }
 0x1b0   : > { %4106 = vrcp.f32 %v1783_v41  ;;  %vm2258_vm11 = vweird.f32 %v4103_v23  ;;  %v2276_v35 = vand.u32 2147483647, %v1783_v41  ;;  %v2278_v29 = vand.u32 2147483648, %v1783_v41 }
 0x1b1   : > { %v2245_v60 = vsel %vm2244_vm0, %v4099_v26, %v2241_v54  ;;  %v1313_v11 = vadd.f32 %v1312_v31, %v1144_v62  ;;  %v2254_v12 = vsub.f32 1.0, %v2253_v9  ;;  %vm2259_vm13 = vmor %vm2257_vm12, %vm2258_vm11  ;;  %vm2272_vm1 = vweird.f32 %v1783_v41 }
 0x1b2   : > { %v2250_v44 = vsel %vm2247_vm10, %v2249_v4, %v2245_v60  ;;  %vm2277_vm3 = vcmp.eq.f32.partialorder %v2276_v35, 8.507059e+37 }
 0x1b3   : > { %2805 = vst [vmem:[%s4590_s12 + $0xe0] sm:$0xff] %v2250_v44  ;;  %v1482_v53 = vadd.f32 %v5102_v28, %v1313_v11  ;;  %v1531_v13 = vpop.f32.mrf.mxu3  ;;  %v2255_v32 = vmul.f32 %v4103_v23, %v2254_v12 }
 0x1b4   : > { %v1532_v22 = vadd.f32 %v1531_v13, %v4913_v56 }
 0x1b5   : > { %v4105_v43 = vpop.eup %4104  ;;  %v3708_v36 = vmul.f32 -1.442695, %v1482_v53  ;;  %v5147_v46 = vpop.f32.mrf.mxu2  ;;  %v2256_v25 = vadd.f32 %v4103_v23, %v2255_v32 }
 0x1b6   : > { %v5145_v45 = vadd.f32 1.0, %v4105_v43  ;;  %v1145_v52 = vpop.f32.mrf.mxu0  ;;  %v3728_v48 = vmul.f32 -1.442695, %v1532_v22  ;;  %v4107_v38 = vpop.eup %4106 }
 0x1b7   : > { %4108 = vpow2.f32 %v3708_v36  ;;  %v1146_v28 = vadd.f32 %v5112_v1, %v1145_v52  ;;  %v1314_v39 = vpop.f32.mrf.mxu1  ;;  %v2260_v55 = vsel %vm2259_vm13, %v4103_v23, %v2256_v25  ;;  %v2268_v56 = vmul.f32 %v4107_v38, %v1783_v41 }
 0x1b8   : > { %4110 = vrcp.f32 %v5145_v45  ;;  %v2265_v7 = vsel %vm2262_vm14, %v2264_v24, %v2260_v55  ;;  %vm2273_vm15 = vweird.f32 %v4107_v38  ;;  %v2279_v23 = vor.u32 1.1754944e-38, %v2278_v29 }
 0x1b9   : > { %4112 = vpow2.f32 %v3728_v48  ;;  %v1315_v26 = vadd.f32 %v1314_v39, %v1146_v28  ;;  %2806 = vst [vmem:[%s4590_s12 + $0xe8] sm:$0xff] %v2265_v7  ;;  %v2269_v33 = vsub.f32 1.0, %v2268_v56  ;;  %vm2274_vm2 = vmor %vm2272_vm1, %vm2273_vm15  ;;  %v2291_v11 = vand.u32 2147483647, %v5145_v45 }
 0x1ba   : > { %v2293_v41 = vand.u32 2147483648, %v5145_v45  ;;  %vm2287_vm5 = vweird.f32 %v5145_v45 }
 0x1bb   : > { %v1484_v47 = vadd.f32 %v5125_v37, %v1315_v26  ;;  %v1533_v3 = vpop.f32.mrf.mxu3  ;;  %v2270_v59 = vmul.f32 %v4107_v38, %v2269_v33  ;;  %vm2292_vm7 = vcmp.eq.f32.partialorder %v2291_v11, 8.507059e+37 }
 0x1bc   : > { %v1534_v8 = vadd.f32 %v1533_v3, %v4936_v57  ;;  %v2294_v43 = vor.u32 1.1754944e-38, %v2293_v41 }
 0x1bd   : > { %v4109_v6 = vpop.eup %4108  ;;  %v3709_v14 = vmul.f32 -1.442695, %v1484_v47  ;;  %v5156_v18 = vpop.f32.mrf.mxu2  ;;  %v2271_v54 = vadd.f32 %v4107_v38, %v2270_v59 }
 0x1be   : > { %v4111_v49 = vpop.eup %4110  ;;  %v5154_v61 = vadd.f32 1.0, %v4109_v6  ;;  %v1148_v20 = vpop.f32.mrf.mxu0  ;;  %v3729_v37 = vmul.f32 -1.442695, %v1534_v8 }
 0x1bf   : > { %v4113_v30 = vpop.eup %4112  ;;  %v2283_v62 = vmul.f32 %v4111_v49, %v5145_v45  ;;  %v1317_v31 = vpop.f32.mrf.mxu1  ;;  %v2275_v57 = vsel %vm2274_vm2, %v4107_v38, %v2271_v54  ;;  %vm2288_vm4 = vweird.f32 %v4111_v49  ;;  %v1149_v12 = vadd.f32 %v5112_v1, %v1148_v20 }
 0x1c0   : > { %4114 = vrcp.f32 %v5154_v61  ;;  %v5160_v60 = vadd.f32 1.0, %v4113_v30  ;;  %v2280_v9 = vsel %vm2277_vm3, %v2279_v23, %v2275_v57  ;;  %vm2289_vm6 = vmor %vm2287_vm5, %vm2288_vm4  ;;  %v2306_v28 = vand.u32 2147483647, %v5154_v61 }
 0x1c1   : > { %v2284_v4 = vsub.f32 1.0, %v2283_v62  ;;  %4116 = vpow2.f32 %v3709_v14  ;;  %2807 = vst [vmem:[%s4590_s12 + $0xf0] sm:$0xff] %v2280_v9  ;;  %v1318_v32 = vadd.f32 %v1317_v31, %v1149_v12  ;;  %vm2302_vm9 = vweird.f32 %v5154_v61 }
 0x1c2   : > { %4118 = vpow2.f32 %v3729_v37  ;;  %v2606_v55 = vand.u32 2147483647, %v5160_v60  ;;  %v2608_v47 = vand.u32 2147483648, %v5160_v60  ;;  %vm5187_vm0 = vcmp.eq.f32.partialorder %v2306_v28, 8.507059e+37 }
 0x1c3   : > { %v2285_v44 = vmul.f32 %v4111_v49, %v2284_v4  ;;  %4120 = vrcp.f32 %v5160_v60  ;;  %v1536_v53 = vpop.f32.mrf.mxu3  ;;  %v1487_v35 = vadd.f32 %v5138_v2, %v1318_v32  ;;  %vm2602_vm10 = vweird.f32 %v5160_v60 }
 0x1c4   : > { %v1537_v15 = vadd.f32 %v1536_v53, %v4956_v21  ;;  %v2308_v21 = vand.u32 2147483648, %v5154_v61  ;;  %vm5192_vm11 = vcmp.eq.f32.partialorder %v2606_v55, 8.507059e+37  ;;  %v2609_v62 = vor.u32 1.1754944e-38, %v2608_v47 }
 0x1c5   : > { %v2286_v42 = vadd.f32 %v4111_v49, %v2285_v44  ;;  %v5169_v36 = vpop.f32.mrf.mxu2  ;;  %v3710_v30 = vmul.f32 -1.442695, %v1487_v35 }
 0x1c6   : > { %v4115_v13 = vpop.eup %4114  ;;  %v1150_v22 = vpop.f32.mrf.mxu0  ;;  %v3730_v39 = vmul.f32 -1.442695, %v1537_v15  ;;  %v2309_v2 = vor.u32 1.1754944e-38, %v2308_v21 }
 0x1c7   : > { %v4117_v52 = vpop.eup %4116  ;;  %v2290_v25 = vsel %vm2289_vm6, %v4111_v49, %v2286_v42  ;;  %v2298_v48 = vmul.f32 %v4115_v13, %v5154_v61  ;;  %v1319_v38 = vpop.f32.mrf.mxu1  ;;  %v1151_v3 = vadd.f32 %v5112_v1, %v1150_v22  ;;  %vm2303_vm8 = vweird.f32 %v4115_v13 }
 0x1c8   : > { %v4119_v45 = vpop.eup %4118  ;;  %v2295_v24 = vsel %vm2292_vm7, %v2294_v43, %v2290_v25  ;;  %v5175_v56 = vadd.f32 1.0, %v4117_v52  ;;  %4122 = vpow2.f32 %v3730_v39  ;;  %vm5196_vm12 = vmor %vm2302_vm9, %vm2303_vm8 }
 0x1c9   : > { %v4121_v7 = vpop.eup %4120  ;;  %2808 = vst [vmem:[%s4590_s12 + $0xf8] sm:$0xff] %v2295_v24  ;;  %v2299_v26 = vsub.f32 1.0, %v2298_v48  ;;  %v5178_v33 = vadd.f32 1.0, %v4119_v45  ;;  %v1320_v37 = vadd.f32 %v1319_v38, %v1151_v3 }
 0x1ca   : > { %v2598_v29 = vmul.f32 %v4121_v7, %v5160_v60  ;;  %4124 = vrcp.f32 %v5175_v56  ;;  %vm2603_vm13 = vweird.f32 %v4121_v7  ;;  %vm2317_vm14 = vweird.f32 %v5175_v56 }
 0x1cb   : > { %v2300_v6 = vmul.f32 %v4115_v13, %v2299_v26  ;;  %4126 = vrcp.f32 %v5178_v33  ;;  %v1538_v49 = vpop.f32.mrf.mxu3  ;;  %v1489_v15 = vadd.f32 %v5147_v46, %v1320_v37  ;;  %vm2604_vm15 = vmor %vm2602_vm10, %vm2603_vm13  ;;  %v2323_v25 = vand.u32 2147483648, %v5175_v56 }
 0x1cc   : > { %v2599_v8 = vsub.f32 1.0, %v2598_v29  ;;  %4128 = vpow2.f32 %v3710_v30  ;;  %v1539_v9 = vadd.f32 %v1538_v49, %v4979_v51  ;;  %vm2617_vm1 = vweird.f32 %v5178_v33 }
 0x1cd   : > { %v2301_v14 = vadd.f32 %v4115_v13, %v2300_v6  ;;  %v5200_v31 = vpop.f32.mrf.mxu2  ;;  %v2621_v60 = vand.u32 2147483647, %v5178_v33  ;;  %v2623_v38 = vand.u32 2147483648, %v5178_v33  ;;  %v3711_v45 = vmul.f32 -1.442695, %v1489_v15 }
 0x1ce   : > { %v2600_v61 = vmul.f32 %v4121_v7, %v2599_v8  ;;  %v1153_v23 = vpop.f32.mrf.mxu0  ;;  %v4123_v57 = vpop.eup %4122  ;;  %v3731_v32 = vmul.f32 -1.442695, %v1539_v9 }
 0x1cf   : > { %v2305_v4 = vsel %vm5196_vm12, %v4115_v13, %v2301_v14  ;;  %v1154_v11 = vadd.f32 %v5112_v1, %v1153_v23  ;;  %v1322_v41 = vpop.f32.mrf.mxu1  ;;  %v5209_v42 = vadd.f32 1.0, %v4123_v57  ;;  %v2321_v13 = vand.u32 2147483647, %v5175_v56 }
 0x1d0   : > { %v4125_v44 = vpop.eup %4124  ;;  %v2310_v12 = vsel %vm5187_vm0, %v2309_v2, %v2305_v4  ;;  %v2601_v53 = vadd.f32 %v4121_v7, %v2600_v61  ;;  %v2324_v2 = vor.u32 1.1754944e-38, %v2323_v25  ;;  %vm2622_vm7 = vcmp.eq.f32.partialorder %v2621_v60, 8.507059e+37 }
 0x1d1   : > { %v4127_v43 = vpop.eup %4126  ;;  %2809 = vst [vmem:[%s4590_s12 + $0x100] sm:$0xff] %v2310_v12  ;;  %v2313_v51 = vmul.f32 %v4125_v44, %v5175_v56  ;;  %v1323_v22 = vadd.f32 %v1322_v41, %v1154_v11  ;;  %4130 = vrcp.f32 %v5209_v42  ;;  %vm2318_vm2 = vweird.f32 %v4125_v44 }
 0x1d2   : > { %v2605_v52 = vsel %vm2604_vm15, %v4121_v7, %v2601_v53  ;;  %v2613_v48 = vmul.f32 %v4127_v43, %v5178_v33  ;;  %4132 = vpow2.f32 %v3731_v32  ;;  %v4129_v21 = vpop.eup %4128  ;;  %vm2618_vm3 = vweird.f32 %v4127_v43  ;;  %vm2319_vm5 = vmor %vm2317_vm14, %vm2318_vm2 }
 0x1d3   : > { %v2610_v46 = vsel %vm5192_vm11, %v2609_v62, %v2605_v52  ;;  %v2314_v28 = vsub.f32 1.0, %v2313_v51  ;;  %v1541_v24 = vpop.f32.mrf.mxu3  ;;  %v1492_v7 = vadd.f32 %v5156_v18, %v1323_v22  ;;  %v5229_v29 = vadd.f32 1.0, %v4129_v21  ;;  %vm2619_vm6 = vmor %vm2617_vm1, %vm2618_vm3 }
 0x1d4   : > { %2829 = vst [vmem:[%s4590_s12 + $0x1a0] sm:$0xff] %v2610_v46  ;;  %v2614_v39 = vsub.f32 1.0, %v2613_v48  ;;  %v1542_v26 = vadd.f32 %v1541_v24, %v4998_v16  ;;  %4134 = vpow2.f32 %v3711_v45  ;;  %vm5233_vm4 = vcmp.eq.f32.partialorder %v2321_v13, 8.507059e+37 }
 0x1d5   : > { %v2315_v55 = vmul.f32 %v4125_v44, %v2314_v28  ;;  %v5231_v47 = vpop.f32.mrf.mxu2  ;;  %v3712_v8 = vmul.f32 -1.442695, %v1492_v7  ;;  %4136 = vrcp.f32 %v5229_v29  ;;  %v2624_v54 = vor.u32 1.1754944e-38, %v2623_v38 }
 0x1d6   : > { %v2615_v35 = vmul.f32 %v4127_v43, %v2614_v39  ;;  %v1155_v3 = vpop.f32.mrf.mxu0  ;;  %v3732_v18 = vmul.f32 -1.442695, %v1542_v26  ;;  %v2636_v23 = vand.u32 2147483647, %v5209_v42  ;;  %v2638_v9 = vand.u32 2147483648, %v5209_v42 }
 0x1d7   : > { %v2316_v6 = vadd.f32 %v4125_v44, %v2315_v55  ;;  %v1324_v49 = vpop.f32.mrf.mxu1  ;;  %v4131_v14 = vpop.eup %4130  ;;  %v1156_v20 = vadd.f32 %v5112_v1, %v1155_v3  ;;  %4138 = vpow2.f32 %v3712_v8  ;;  %v2336_v41 = vand.u32 2147483647, %v5229_v29 }
 0x1d8   : > { %v2616_v16 = vadd.f32 %v4127_v43, %v2615_v35  ;;  %v2628_v61 = vmul.f32 %v4131_v14, %v5209_v42  ;;  %v4133_v62 = vpop.eup %4132  ;;  %4140 = vpow2.f32 %v3732_v18  ;;  %vm2633_vm8 = vweird.f32 %v4131_v14 }
 0x1d9   : > { %v2320_v30 = vsel %vm2319_vm5, %v4125_v44, %v2316_v6  ;;  %v5251_v33 = vadd.f32 1.0, %v4133_v62  ;;  %v1325_v44 = vadd.f32 %v1324_v49, %v1156_v20  ;;  %vm2632_vm9 = vweird.f32 %v5209_v42 }
 0x1da   : > { %v2325_v56 = vsel %vm5233_vm4, %v2324_v2, %v2320_v30  ;;  %v2620_v37 = vsel %vm2619_vm6, %v4127_v43, %v2616_v16  ;;  %v2629_v4 = vsub.f32 1.0, %v2628_v61  ;;  %v4135_v11 = vpop.eup %4134  ;;  %vm5259_vm0 = vcmp.eq.f32.partialorder %v2636_v23, 8.507059e+37  ;;  %vm2634_vm12 = vmor %vm2632_vm9, %vm2633_vm8 }
 0x1db   : > { %2810 = vst [vmem:[%s4590_s12 + $0x108] sm:$0xff] %v2325_v56  ;;  %v2625_v57 = vsel %vm2622_vm7, %v2624_v54, %v2620_v37  ;;  %v1543_v12 = vpop.f32.mrf.mxu3  ;;  %v5255_v15 = vadd.f32 1.0, %v4135_v11  ;;  %4142 = vrcp.f32 %v5251_v33  ;;  %v4137_v43 = vpop.eup %4136  ;;  %v1494_v13 = vadd.f32 %v5169_v36, %v1325_v44 }
 0x1dc   : > { %2830 = vst [vmem:[%s4590_s12 + $0x1a8] sm:$0xff] %v2625_v57  ;;  %v2630_v53 = vmul.f32 %v4131_v14, %v2629_v4  ;;  %v2328_v52 = vmul.f32 %v4137_v43, %v5229_v29  ;;  %v2639_v48 = vor.u32 1.1754944e-38, %v2638_v9  ;;  %vm2332_vm10 = vweird.f32 %v5229_v29 }
 0x1dd   : > { %v5264_v32 = vpop.f32.mrf.mxu2  ;;  %4144 = vrcp.f32 %v5255_v15  ;;  %v4139_v28 = vpop.eup %4138  ;;  %vm5269_vm11 = vcmp.eq.f32.partialorder %v2336_v41, 8.507059e+37  ;;  %v2338_v36 = vand.u32 2147483648, %v5229_v29  ;;  %v2651_v60 = vand.u32 2147483647, %v5251_v33 }
 0x1de   : > { %v1158_v22 = vpop.f32.mrf.mxu0  ;;  %v2631_v25 = vadd.f32 %v4131_v14, %v2630_v53  ;;  %v2329_v39 = vsub.f32 1.0, %v2328_v52  ;;  %v5276_v45 = vadd.f32 1.0, %v4139_v28  ;;  %v1544_v24 = vadd.f32 %v1543_v12, %v5020_v0  ;;  %v4141_v21 = vpop.eup %4140 }
 0x1df   : > { %v1327_v46 = vpop.f32.mrf.mxu1  ;;  %vm2333_vm13 = vweird.f32 %v4137_v43  ;;  %v2653_v7 = vand.u32 2147483648, %v5251_v33  ;;  %v3713_v26 = vmul.f32 -1.442695, %v1494_v13  ;;  %v2351_v6 = vand.u32 2147483647, %v5255_v15 }
 0x1e0   : > { %v2635_v38 = vsel %vm2634_vm12, %v4131_v14, %v2631_v25  ;;  %v2330_v3 = vmul.f32 %v4137_v43, %v2329_v39  ;;  %v2353_v59 = vand.u32 2147483648, %v5255_v15  ;;  %4146 = vrcp.f32 %v5276_v45  ;;  %vm2334_vm1 = vmor %vm2332_vm10, %vm2333_vm13 }
 0x1e1   : > { %v2640_v55 = vsel %vm5259_vm0, %v2639_v48, %v2635_v38  ;;  %v4143_v35 = vpop.eup %4142  ;;  %v2339_v2 = vor.u32 1.1754944e-38, %v2338_v36  ;;  %vm2647_vm14 = vweird.f32 %v5251_v33  ;;  %v5288_v8 = vadd.f32 1.0, %v4141_v21 }
 0x1e2   : > { %2831 = vst [vmem:[%s4590_s12 + $0x1b0] sm:$0xff] %v2640_v55  ;;  %v2643_v0 = vmul.f32 %v4143_v35, %v5251_v33  ;;  %v2331_v16 = vadd.f32 %v4137_v43, %v2330_v3  ;;  %vm2347_vm15 = vweird.f32 %v5255_v15  ;;  %4148 = vpow2.f32 %v3713_v26 }
 0x1e3   : > { %v1546_v49 = vpop.f32.mrf.mxu3  ;;  %v4145_v14 = vpop.eup %4144  ;;  %v3733_v18 = vmul.f32 -1.442695, %v1544_v24  ;;  %vm5295_vm2 = vcmp.eq.f32.partialorder %v2651_v60, 8.507059e+37  ;;  %v2654_v61 = vor.u32 1.1754944e-38, %v2653_v7  ;;  %vm5301_vm3 = vcmp.eq.f32.partialorder %v2351_v6, 8.507059e+37 }
 0x1e4   : > { %v2343_v20 = vmul.f32 %v4145_v14, %v5255_v15  ;;  %v2644_v30 = vsub.f32 1.0, %v2643_v0  ;;  %v2335_v37 = vsel %vm2334_vm1, %v4137_v43, %v2331_v16  ;;  %v2354_v57 = vor.u32 1.1754944e-38, %v2353_v59 }
 0x1e5   : > { %v5299_v62 = vpop.f32.mrf.mxu2  ;;  %4150 = vrcp.f32 %v5288_v8  ;;  %v2340_v4 = vsel %vm5269_vm11, %v2339_v2, %v2335_v37  ;;  %vm2648_vm4 = vweird.f32 %v4143_v35  ;;  %vm2362_vm5 = vweird.f32 %v5276_v45 }
 0x1e6   : > { %v1160_v56 = vpop.f32.mrf.mxu0  ;;  %v2344_v9 = vsub.f32 1.0, %v2343_v20  ;;  %v2645_v11 = vmul.f32 %v4143_v35, %v2644_v30  ;;  %v4147_v41 = vpop.eup %4146  ;;  %2811 = vst [vmem:[%s4590_s12 + $0x110] sm:$0xff] %v2340_v4  ;;  %v2366_v44 = vand.u32 2147483647, %v5276_v45  ;;  %4152 = vpow2.f32 %v3733_v18  ;;  %vm2649_vm7 = vmor %vm2647_vm14, %vm2648_vm4 }
 0x1e7   : > { %v1329_v29 = vpop.f32.mrf.mxu1  ;;  %v1159_v12 = vadd.f32 %v5112_v1, %v1158_v22  ;;  %v1547_v53 = vadd.f32 %v1546_v49, %v5039_v58  ;;  %vm2348_vm6 = vweird.f32 %v4145_v14  ;;  %v2358_v13 = vmul.f32 %v4147_v41, %v5276_v45 }
 0x1e8   : > { %v2345_v43 = vmul.f32 %v4145_v14, %v2344_v9  ;;  %v2646_v51 = vadd.f32 %v4143_v35, %v2645_v11  ;;  %v4149_v52 = vpop.eup %4148  ;;  %v2368_v25 = vand.u32 2147483648, %v5276_v45  ;;  %v1161_v42 = vadd.f32 %v5112_v1, %v1160_v56  ;;  %vm2349_vm8 = vmor %vm2347_vm15, %vm2348_vm6 }
 0x1e9   : > { %v1328_v48 = vadd.f32 %v1327_v46, %v1159_v12  ;;  %v3734_v28 = vmul.f32 -1.442695, %v1547_v53  ;;  %v2359_v60 = vsub.f32 1.0, %v2358_v13  ;;  %v5318_v58 = vadd.f32 1.0, %v4149_v52 }
 0x1ea   : > { %v2346_v36 = vadd.f32 %v4145_v14, %v2345_v43  ;;  %v2650_v22 = vsel %vm2649_vm7, %v4143_v35, %v2646_v51  ;;  %v1330_v46 = vadd.f32 %v1329_v29, %v1161_v42  ;;  %vm2363_vm9 = vweird.f32 %v4147_v41 }
 0x1eb   : > { %v1548_v39 = vpop.f32.mrf.mxu3  ;;  %v4151_v38 = vpop.eup %4150  ;;  %v2655_v33 = vsel %vm5295_vm2, %v2654_v61, %v2650_v22  ;;  %v1497_v24 = vadd.f32 %v5200_v31, %v1328_v48  ;;  %4154 = vpow2.f32 %v3734_v28  ;;  %v2360_v55 = vmul.f32 %v4147_v41, %v2359_v60  ;;  %vm2364_vm10 = vmor %vm2362_vm5, %vm2363_vm9 }
 0x1ec   : > { %v2350_v21 = vsel %vm2349_vm8, %v4145_v14, %v2346_v36  ;;  %2832 = vst [vmem:[%s4590_s12 + $0x1b8] sm:$0xff] %v2655_v33  ;;  %v2658_v7 = vmul.f32 %v4151_v38, %v5288_v8  ;;  %v4153_v3 = vpop.eup %4152  ;;  %vm5332_vm0 = vcmp.eq.f32.partialorder %v2366_v44, 8.507059e+37  ;;  %v2369_v31 = vor.u32 1.1754944e-38, %v2368_v25 }
 0x1ed   : > { %v5328_v26 = vpop.f32.mrf.mxu2  ;;  %v2355_v15 = vsel %vm5301_vm3, %v2354_v57, %v2350_v21  ;;  %4156 = vrcp.f32 %v5318_v58  ;;  %v2361_v2 = vadd.f32 %v4147_v41, %v2360_v55  ;;  %v2666_v49 = vand.u32 2147483647, %v5288_v8 }
 0x1ee   : > { %v1163_v35 = vpop.f32.mrf.mxu0  ;;  %2812 = vst [vmem:[%s4590_s12 + $0x118] sm:$0xff] %v2355_v15  ;;  %v2659_v0 = vsub.f32 1.0, %v2658_v7  ;;  %v5339_v14 = vadd.f32 1.0, %v4153_v3  ;;  %vm2663_vm11 = vweird.f32 %v4151_v38  ;;  %v2668_v16 = vand.u32 2147483648, %v5288_v8 }
 0x1ef   : > { %v1332_v59 = vpop.f32.mrf.mxu1  ;;  %v3714_v18 = vmul.f32 -1.442695, %v1497_v24  ;;  %v1499_v20 = vadd.f32 %v5231_v47, %v1330_v46  ;;  %v2365_v30 = vsel %vm2364_vm10, %v4147_v41, %v2361_v2  ;;  %v1549_v61 = vadd.f32 %v1548_v39, %v5060_v5 }
 0x1f0   : > { %v2660_v54 = vmul.f32 %v4151_v38, %v2659_v0  ;;  %4158 = vrcp.f32 %v5339_v14  ;;  %v2370_v37 = vsel %vm5332_vm0, %v2369_v31, %v2365_v30  ;;  %vm2662_vm12 = vweird.f32 %v5288_v8 }
 0x1f1   : > { %v4155_v56 = vpop.eup %4154  ;;  %2813 = vst [vmem:[%s4590_s12 + $0x120] sm:$0xff] %v2370_v37  ;;  %4160 = vpow2.f32 %v3714_v18  ;;  %v3715_v57 = vmul.f32 -1.442695, %v1499_v20  ;;  %vm2664_vm13 = vmor %vm2662_vm12, %vm2663_vm11  ;;  %vm2667_vm14 = vcmp.eq.f32.partialorder %v2666_v49, 8.507059e+37  ;;  %v2669_v4 = vor.u32 1.1754944e-38, %v2668_v16 }
 0x1f2   : > { %v2661_v45 = vadd.f32 %v4151_v38, %v2660_v54  ;;  %v5352_v23 = vadd.f32 1.0, %v4155_v56  ;;  %v2381_v5 = vand.u32 2147483647, %v5318_v58  ;;  %v1164_v9 = vadd.f32 %v5112_v1, %v1163_v35 }
 0x1f3   : > { %v1551_v29 = vpop.f32.mrf.mxu3  ;;  %v4157_v47 = vpop.eup %4156  ;;  %v3735_v41 = vmul.f32 -1.442695, %v1549_v61  ;;  %vm2377_vm15 = vweird.f32 %v5318_v58  ;;  %v2383_v43 = vand.u32 2147483648, %v5318_v58  ;;  %v2681_v36 = vand.u32 2147483647, %v5339_v14 }
 0x1f4   : > { %v2665_v11 = vsel %vm2664_vm13, %v4151_v38, %v2661_v45  ;;  %v2373_v8 = vmul.f32 %v4157_v47, %v5318_v58  ;;  %4162 = vrcp.f32 %v5352_v23  ;;  %v1333_v25 = vadd.f32 %v1332_v59, %v1164_v9 }
 0x1f5   : > { %v5359_v44 = vpop.f32.mrf.mxu2  ;;  %v2670_v53 = vsel %vm2667_vm14, %v2669_v4, %v2665_v11  ;;  %4164 = vpow2.f32 %v3715_v57  ;;  %v1552_v48 = vadd.f32 %v1551_v29, %v5079_v17  ;;  %vm2378_vm1 = vweird.f32 %v4157_v47 }
 0x1f6   : > { %v1165_v12 = vpop.f32.mrf.mxu0  ;;  %v4159_v13 = vpop.eup %4158  ;;  %2833 = vst [vmem:[%s4590_s12 + $0x1c0] sm:$0xff] %v2670_v53  ;;  %v2374_v52 = vsub.f32 1.0, %v2373_v8  ;;  %vm5367_vm2 = vcmp.eq.f32.partialorder %v2381_v5, 8.507059e+37  ;;  %4166 = vpow2.f32 %v3735_v41  ;;  %v1502_v39 = vadd.f32 %v5264_v32, %v1333_v25  ;;  %vm2379_vm4 = vmor %vm2377_vm15, %vm2378_vm1 }
 0x1f7   : > { %v5363_v51 = vpop.f32.mrf.mxu1  ;;  %v2673_v42 = vmul.f32 %v4159_v13, %v5339_v14  ;;  %v4161_v22 = vpop.eup %4160  ;;  %v3736_v38 = vmul.f32 -1.442695, %v1552_v48  ;;  %v2384_v33 = vor.u32 1.1754944e-38, %v2383_v43  ;;  %vm2677_vm3 = vweird.f32 %v5339_v14 }
 0x1f8   : > { %v2375_v60 = vmul.f32 %v4157_v47, %v2374_v52  ;;  %v5375_v17 = vadd.f32 1.0, %v4161_v22  ;;  %v2683_v55 = vand.u32 2147483648, %v5339_v14  ;;  %v3716_v7 = vmul.f32 -1.442695, %v1502_v39 }
 0x1f9   : > { %v2674_v24 = vsub.f32 1.0, %v2673_v42  ;;  %4168 = vpow2.f32 %v3736_v38  ;;  %vm2678_vm5 = vweird.f32 %v4159_v13  ;;  %vm5383_vm6 = vcmp.eq.f32.partialorder %v2681_v36, 8.507059e+37 }
 0x1fa   : > { %v5377_v46 = vpop.eup %4162  ;;  %v2376_v21 = vadd.f32 %v4157_v47, %v2375_v60  ;;  %4170 = vrcp.f32 %v5375_v17  ;;  %v2696_v59 = vand.u32 2147483647, %v5352_v23  ;;  %v2698_v58 = vand.u32 2147483648, %v5352_v23  ;;  %vm2679_vm7 = vmor %vm2677_vm3, %vm2678_vm5 }
 0x1fb   : > { %v2675_v35 = vmul.f32 %v4159_v13, %v2674_v24  ;;  %v1553_v3 = vpop.f32.mrf.mxu3  ;;  %v4165_v15 = vpop.eup %4164  ;;  %v2688_v31 = vmul.f32 %v5377_v46, %v5352_v23  ;;  %v1166_v20 = vadd.f32 %v5112_v1, %v1165_v12  ;;  %v2684_v61 = vor.u32 1.1754944e-38, %v2683_v55 }
 0x1fc   : > { %v2380_v6 = vsel %vm2379_vm4, %v4157_v47, %v2376_v21  ;;  %v5398_v18 = vadd.f32 1.0, %v4165_v15  ;;  %v4167_v54 = vpop.eup %4166  ;;  %v2396_v56 = vand.u32 2147483647, %v5375_v17  ;;  %4172 = vpow2.f32 %v3716_v7 }
 0x1fd   : > { %v5392_v2 = vpop.f32.mrf.mxu2  ;;  %v2385_v49 = vsel %vm5367_vm2, %v2384_v33, %v2380_v6  ;;  %v2676_v16 = vadd.f32 %v4159_v13, %v2675_v35  ;;  %v2689_v37 = vsub.f32 1.0, %v2688_v31  ;;  %v2398_v57 = vand.u32 2147483648, %v5375_v17 }
 0x1fe   : > { %v5394_v0 = vpop.f32.mrf.mxu0  ;;  %2814 = vst [vmem:[%s4590_s12 + $0x128] sm:$0xff] %v2385_v49  ;;  %vm2692_vm8 = vweird.f32 %v5352_v23  ;;  %4174 = vrcp.f32 %v5398_v18  ;;  %vm2693_vm9 = vweird.f32 %v5377_v46  ;;  %v5415_v47 = vadd.f32 1.0, %v4167_v54 }
 0x1ff   : > { %v5401_v30 = vpop.f32.mrf.mxu1  ;;  %v2680_v45 = vsel %vm2679_vm7, %v4159_v13, %v2676_v16  ;;  %v4169_v1 = vpop.eup %4168  ;;  %v2690_v14 = vmul.f32 %v5377_v46, %v2689_v37  ;;  %vm5418_vm0 = vcmp.eq.f32.partialorder %v2696_v59, 8.507059e+37  ;;  %v2699_v9 = vor.u32 1.1754944e-38, %v2698_v58  ;;  %vm2694_vm12 = vmor %vm2692_vm8, %vm2693_vm9 }
 0x200   : > { %v2685_v29 = vsel %vm5383_vm6, %v2684_v61, %v2680_v45  ;;  %v4171_v4 = vpop.eup %4170  ;;  %v5422_v11 = vadd.f32 1.0, %v4169_v1  ;;  %v1335_v8 = vadd.f32 %v5363_v51, %v1166_v20  ;;  %vm2392_vm10 = vweird.f32 %v5375_v17 }
 0x201   : > { %2834 = vst [vmem:[%s4590_s12 + $0x1c8] sm:$0xff] %v2685_v29  ;;  %v2388_v41 = vmul.f32 %v4171_v4, %v5375_v17  ;;  %vm5427_vm11 = vcmp.eq.f32.partialorder %v2396_v56, 8.507059e+37  ;;  %v2691_v53 = vadd.f32 %v5377_v46, %v2690_v14  ;;  %v2399_v43 = vor.u32 1.1754944e-38, %v2398_v57  ;;  %v5482_v29 = vld [vmem:[%s5854_s2] ss:$0 sm:$0xff] }
 0x202   : > { %v2411_v13 = vand.u32 2147483647, %v5398_v18  ;;  %v2413_v52 = vand.u32 2147483648, %v5398_v18  ;;  %4176 = vrcp.f32 %v5415_v47  ;;  %v4173_v51 = vpop.eup %4172  ;;  %vm2407_vm13 = vweird.f32 %v5398_v18 }
 0x203   : > { %v2389_v25 = vsub.f32 1.0, %v2388_v41  ;;  %v2695_v48 = vsel %vm2694_vm12, %v5377_v46, %v2691_v53  ;;  %v2713_v28 = vand.u32 2147483648, %v5415_v47  ;;  %4178 = vrcp.f32 %v5422_v11  ;;  %v1556_v33 = vpop.f32.mrf.mxu3 }
 0x204   : > { %v4175_v36 = vpop.eup %4174  ;;  %v2700_v22 = vsel %vm5418_vm0, %v2699_v9, %v2695_v48  ;;  %v5445_v60 = vadd.f32 1.0, %v4173_v51  ;;  %v1504_v39 = vadd.f32 %v5299_v62, %v1335_v8  ;;  %v1554_v38 = vadd.f32 %v1553_v3, %v5100_v63 }
 0x205   : > { %v5441_v42 = vpop.f32.mrf.mxu2  ;;  %v2390_v46 = vmul.f32 %v4171_v4, %v2389_v25  ;;  %vm2393_vm14 = vweird.f32 %v4171_v4  ;;  %2835 = vst [vmem:[%s4590_s12 + $0x1d0] sm:$0xff] %v2700_v22  ;;  %v2403_v21 = vmul.f32 %v4175_v36, %v5398_v18  ;;  %v2711_v55 = vand.u32 2147483647, %v5415_v47 }
 0x206   : > { %v1170_v23 = vpop.f32.mrf.mxu0  ;;  %vm5452_vm15 = vcmp.eq.f32.partialorder %v2411_v13, 8.507059e+37  ;;  %v2414_v35 = vor.u32 1.1754944e-38, %v2413_v52  ;;  %4180 = vrcp.f32 %v5445_v60  ;;  %v2726_v62 = vand.u32 2147483647, %v5422_v11  ;;  %vm2394_vm2 = vmor %vm2392_vm10, %vm2393_vm14 }
 0x207   : > { %v1339_v24 = vpop.f32.mrf.mxu1  ;;  %v2391_v32 = vadd.f32 %v4171_v4, %v2390_v46  ;;  %v2404_v63 = vsub.f32 1.0, %v2403_v21  ;;  %vm2707_vm1 = vweird.f32 %v5415_v47  ;;  %v2714_v3 = vor.u32 1.1754944e-38, %v2713_v28 }
 0x208   : > { %v4177_v15 = vpop.eup %4176  ;;  %vm2408_vm3 = vweird.f32 %v4175_v36  ;;  %v2426_v6 = vand.u32 2147483647, %v5445_v60  ;;  %vm2722_vm4 = vweird.f32 %v5422_v11  ;;  %v3717_v31 = vmul.f32 -1.442695, %v1504_v39 }
 0x209   : > { %v3737_v59 = vmul.f32 -1.442695, %v1554_v38  ;;  %v4179_v58 = vpop.eup %4178  ;;  %v2395_v49 = vsel %vm2394_vm2, %v4171_v4, %v2391_v32  ;;  %v2405_v16 = vmul.f32 %v4175_v36, %v2404_v63  ;;  %v2703_v20 = vmul.f32 %v4177_v15, %v5415_v47  ;;  %vm2409_vm9 = vmor %vm2407_vm13, %vm2408_vm3 }
 0x20a   : > { %vm5464_vm5 = vcmp.eq.f32.partialorder %v2711_v55, 8.507059e+37  ;;  %v2428_v17 = vand.u32 2147483648, %v5445_v60  ;;  %v2400_v61 = vsel %vm5427_vm11, %v2399_v43, %v2395_v49  ;;  %vm2708_vm6 = vweird.f32 %v4177_v15 }
 0x20b   : > { %v2718_v56 = vmul.f32 %v4179_v58, %v5422_v11  ;;  %vm5472_vm7 = vcmp.eq.f32.partialorder %v2726_v62, 8.507059e+37  ;;  %v2728_v45 = vand.u32 2147483648, %v5422_v11  ;;  %2815 = vst [vmem:[%s4590_s12 + $0x130] sm:$0xff] %v2400_v61  ;;  %v2406_v57 = vadd.f32 %v4175_v36, %v2405_v16  ;;  %v1558_v48 = vpop.f32.mrf.mxu3  ;;  %vm2709_vm10 = vmor %vm2707_vm1, %vm2708_vm6 }
 0x20c   : > { %v2704_v1 = vsub.f32 1.0, %v2703_v20  ;;  %vm2422_vm8 = vweird.f32 %v5445_v60  ;;  %4182 = vpow2.f32 %v3717_v31  ;;  %v1169_v14 = vadd.f32 %v5482_v29, %v5394_v0  ;;  %v4181_v9 = vpop.eup %4180 }
 0x20d   : > { %v5486_v4 = vpop.f32.mrf.mxu2  ;;  %v2719_v8 = vsub.f32 1.0, %v2718_v56  ;;  %4184 = vpow2.f32 %v3737_v59  ;;  %v1557_v41 = vadd.f32 %v1556_v33, %v5123_v19  ;;  %v1171_v12 = vadd.f32 %v5482_v29, %v1170_v23 }
 0x20e   : > { %v1173_v5 = vpop.f32.mrf.mxu0  ;;  %v2410_v53 = vsel %vm2409_vm9, %v4175_v36, %v2406_v57  ;;  %v2705_v43 = vmul.f32 %v4177_v15, %v2704_v1  ;;  %v2418_v13 = vmul.f32 %v4181_v9, %v5445_v60  ;;  %vm2723_vm0 = vweird.f32 %v4179_v58 }
 0x20f   : > { %v1342_v0 = vpop.f32.mrf.mxu1  ;;  %v2415_v52 = vsel %vm5452_vm15, %v2414_v35, %v2410_v53  ;;  %v2720_v51 = vmul.f32 %v4179_v58, %v2719_v8  ;;  %v1338_v18 = vadd.f32 %v5401_v30, %v1169_v14  ;;  %v3738_v25 = vmul.f32 -1.442695, %v1557_v41  ;;  %vm2724_vm12 = vmor %vm2722_vm4, %vm2723_vm0 }
 0x210   : > { %2816 = vst [vmem:[%s4590_s12 + $0x138] sm:$0xff] %v2415_v52  ;;  %v2706_v28 = vadd.f32 %v4177_v15, %v2705_v43  ;;  %v2419_v22 = vsub.f32 1.0, %v2418_v13  ;;  %v2729_v19 = vor.u32 1.1754944e-38, %v2728_v45  ;;  %v1340_v39 = vadd.f32 %v1339_v24, %v1171_v12 }
 0x211   : > { %vm2423_vm11 = vweird.f32 %v4181_v9  ;;  %v2721_v23 = vadd.f32 %v4179_v58, %v2720_v51  ;;  %v1507_v36 = vadd.f32 %v5328_v26, %v1338_v18  ;;  %4186 = vpow2.f32 %v3738_v25 }
 0x212   : > { %v4183_v38 = vpop.eup %4182  ;;  %v2710_v33 = vsel %vm2709_vm10, %v4177_v15, %v2706_v28  ;;  %v2420_v30 = vmul.f32 %v4181_v9, %v2419_v22  ;;  %v1509_v24 = vadd.f32 %v5359_v44, %v1340_v39  ;;  %v1559_v46 = vadd.f32 %v1558_v48, %v5136_v50  ;;  %vm2424_vm13 = vmor %vm2422_vm8, %vm2423_vm11 }
 0x213   : > { %v4185_v47 = vpop.eup %4184  ;;  %v2715_v21 = vsel %vm5464_vm5, %v2714_v3, %v2710_v33  ;;  %v2725_v55 = vsel %vm2724_vm12, %v4179_v58, %v2721_v23  ;;  %v5509_v7 = vadd.f32 1.0, %v4183_v38  ;;  %v1174_v26 = vadd.f32 %v5482_v29, %v1173_v5 }
 0x214   : > { %2836 = vst [vmem:[%s4590_s12 + $0x1d8] sm:$0xff] %v2715_v21  ;;  %v2421_v35 = vadd.f32 %v4181_v9, %v2420_v30  ;;  %v2730_v11 = vsel %vm5472_vm7, %v2729_v19, %v2725_v55  ;;  %v5515_v62 = vadd.f32 1.0, %v4185_v47  ;;  %v3718_v44 = vmul.f32 -1.442695, %v1507_v36 }
 0x215   : > { %v5517_v32 = vpop.f32.mrf.mxu2  ;;  %v2429_v50 = vor.u32 1.1754944e-38, %v2428_v17  ;;  %2837 = vst [vmem:[%s4590_s12 + $0x1e0] sm:$0xff] %v2730_v11  ;;  %4188 = vrcp.f32 %v5509_v7  ;;  %v3719_v63 = vmul.f32 -1.442695, %v1509_v24  ;;  %vm2427_vm14 = vcmp.eq.f32.partialorder %v2426_v6, 8.507059e+37 }
 0x216   : > { %v2425_v3 = vsel %vm2424_vm13, %v4181_v9, %v2421_v35  ;;  %4190 = vrcp.f32 %v5515_v62  ;;  %v1175_v15 = vpop.f32.mrf.mxu0  ;;  %v3739_v49 = vmul.f32 -1.442695, %v1559_v46  ;;  %v1343_v16 = vadd.f32 %v1342_v0, %v1174_v26 }
 0x217   : > { %v4187_v31 = vpop.eup %4186  ;;  %v2430_v59 = vsel %vm2427_vm14, %v2429_v50, %v2425_v3  ;;  %4192 = vpow2.f32 %v3718_v44  ;;  %v1344_v20 = vpop.f32.mrf.mxu1  ;;  %v2441_v54 = vand.u32 2147483647, %v5509_v7  ;;  %v2443_v17 = vand.u32 2147483648, %v5509_v7 }
 0x218   : > { %2817 = vst [vmem:[%s4590_s12 + $0x140] sm:$0xff] %v2430_v59  ;;  %v5528_v58 = vadd.f32 1.0, %v4187_v31  ;;  %4194 = vpow2.f32 %v3719_v63  ;;  %v2741_v60 = vand.u32 2147483647, %v5515_v62  ;;  %v1176_v6 = vadd.f32 %v5482_v29, %v1175_v15 }
 0x219   : > { %v2743_v56 = vand.u32 2147483648, %v5515_v62  ;;  %v1512_v37 = vadd.f32 %v5392_v2, %v1343_v16  ;;  %vm2437_vm15 = vweird.f32 %v5509_v7  ;;  %vm2737_vm1 = vweird.f32 %v5515_v62 }
 0x21a   : > { %4196 = vrcp.f32 %v5528_v58  ;;  %vm5540_vm2 = vcmp.eq.f32.partialorder %v2441_v54, 8.507059e+37  ;;  %v2444_v5 = vor.u32 1.1754944e-38, %v2443_v17  ;;  %vm5545_vm3 = vcmp.eq.f32.partialorder %v2741_v60, 8.507059e+37 }
 0x21b   : > { %v4189_v61 = vpop.eup %4188  ;;  %4198 = vpow2.f32 %v3739_v49  ;;  %v3720_v8 = vmul.f32 -1.442695, %v1512_v37  ;;  %v2756_v53 = vand.u32 2147483647, %v5528_v58  ;;  %v1345_v43 = vadd.f32 %v1344_v20, %v1176_v6 }
 0x21c   : > { %v4191_v45 = vpop.eup %4190  ;;  %v2433_v57 = vmul.f32 %v4189_v61, %v5509_v7  ;;  %v2744_v52 = vor.u32 1.1754944e-38, %v2743_v56  ;;  %vm2438_vm4 = vweird.f32 %v4189_v61  ;;  %vm2752_vm5 = vweird.f32 %v5528_v58 }
 0x21d   : > { %v1521_v1 = vpop.f32.mrf.mxu2  ;;  %v2733_v9 = vmul.f32 %v4191_v45, %v5515_v62  ;;  %v4193_v41 = vpop.eup %4192  ;;  %4200 = vpow2.f32 %v3720_v8  ;;  %vm2738_vm6 = vweird.f32 %v4191_v45  ;;  %v2758_v19 = vand.u32 2147483648, %v5528_v58  ;;  %vm2439_vm8 = vmor %vm2437_vm15, %vm2438_vm4 }
 0x21e   : > { %v2434_v12 = vsub.f32 1.0, %v2433_v57  ;;  %v4195_v13 = vpop.eup %4194  ;;  %v5550_v51 = vadd.f32 1.0, %v4193_v41  ;;  %v1178_v28 = vpop.f32.mrf.mxu0  ;;  %vm5561_vm7 = vcmp.eq.f32.partialorder %v2756_v53, 8.507059e+37  ;;  %v1514_v33 = vadd.f32 %v5441_v42, %v1345_v43  ;;  %vm2739_vm9 = vmor %vm2737_vm1, %vm2738_vm6 }
 0x21f   : > { %v2734_v0 = vsub.f32 1.0, %v2733_v9  ;;  %v5555_v48 = vadd.f32 1.0, %v4195_v13  ;;  %v1522_v30 = vadd.f32 %v1521_v1, %v4830_v10  ;;  %v1347_v24 = vpop.f32.mrf.mxu1  ;;  %v1179_v21 = vadd.f32 %v5482_v29, %v1178_v28 }
 0x220   : > { %v5552_v18 = vpop.eup %4196  ;;  %v2435_v25 = vmul.f32 %v4189_v61, %v2434_v12  ;;  %4202 = vrcp.f32 %v5550_v51  ;;  %v2456_v47 = vand.u32 2147483647, %v5550_v51  ;;  %v2458_v10 = vand.u32 2147483648, %v5550_v51 }
 0x221   : > { %v2735_v22 = vmul.f32 %v4191_v45, %v2734_v0  ;;  %v4199_v39 = vpop.eup %4198  ;;  %v2748_v36 = vmul.f32 %v5552_v18, %v5528_v58  ;;  %4204 = vrcp.f32 %v5555_v48  ;;  %vm2753_vm0 = vweird.f32 %v5552_v18 }
 0x222   : > { %v2436_v23 = vadd.f32 %v4189_v61, %v2435_v25  ;;  %v2471_v44 = vand.u32 2147483647, %v5555_v48  ;;  %v5581_v50 = vadd.f32 1.0, %v4199_v39  ;;  %v2473_v3 = vand.u32 2147483648, %v5555_v48  ;;  %vm2754_vm12 = vmor %vm2752_vm5, %vm2753_vm0 }
 0x223   : > { %v2736_v46 = vadd.f32 %v4191_v45, %v2735_v22  ;;  %v2749_v42 = vsub.f32 1.0, %v2748_v36  ;;  %v4201_v26 = vpop.eup %4200  ;;  %v2759_v59 = vor.u32 1.1754944e-38, %v2758_v19  ;;  %v3721_v49 = vmul.f32 -1.442695, %v1514_v33 }
 0x224   : > { %v2440_v55 = vsel %vm2439_vm8, %v4189_v61, %v2436_v23  ;;  %v5588_v15 = vadd.f32 1.0, %v4201_v26  ;;  %4206 = vrcp.f32 %v5581_v50  ;;  %v3724_v16 = vmul.f32 -1.442695, %v1522_v30 }
 0x225   : > { %v1523_v7 = vpop.f32.mrf.mxu2  ;;  %v2445_v35 = vsel %vm5540_vm2, %v2444_v5, %v2440_v55  ;;  %v2740_v11 = vsel %vm2739_vm9, %v4191_v45, %v2736_v46  ;;  %v2750_v63 = vmul.f32 %v5552_v18, %v2749_v42  ;;  %vm2452_vm10 = vweird.f32 %v5550_v51 }
 0x226   : > { %2818 = vst [vmem:[%s4590_s12 + $0x148] sm:$0xff] %v2445_v35  ;;  %v2745_v62 = vsel %vm5545_vm3, %v2744_v52, %v2740_v11  ;;  %v4203_v31 = vpop.eup %4202  ;;  %v1348_v17 = vadd.f32 %v1347_v24, %v1179_v21  ;;  %vm5595_vm11 = vcmp.eq.f32.partialorder %v2456_v47, 8.507059e+37  ;;  %v2459_v61 = vor.u32 1.1754944e-38, %v2458_v10  ;;  %v1180_v14 = vpop.f32.mrf.mxu0 }
 0x227   : > { %2838 = vst [vmem:[%s4590_s12 + $0x1e8] sm:$0xff] %v2745_v62  ;;  %v2448_v20 = vmul.f32 %v4203_v31, %v5550_v51  ;;  %v2751_v54 = vadd.f32 %v5552_v18, %v2750_v63  ;;  %v4205_v60 = vpop.eup %4204  ;;  %vm2467_vm13 = vweird.f32 %v5555_v48  ;;  %4208 = vrcp.f32 %v5588_v15  ;;  %v1349_v2 = vpop.f32.mrf.mxu1 }
 0x228   : > { %v2463_v45 = vmul.f32 %v4205_v60, %v5555_v48  ;;  %vm5607_vm14 = vcmp.eq.f32.partialorder %v2471_v44, 8.507059e+37  ;;  %v2474_v1 = vor.u32 1.1754944e-38, %v2473_v3  ;;  %vm2453_vm15 = vweird.f32 %v4203_v31 }
 0x229   : > { %v2449_v56 = vsub.f32 1.0, %v2448_v20  ;;  %v2755_v37 = vsel %vm2754_vm12, %v5552_v18, %v2751_v54  ;;  %v2771_v5 = vand.u32 2147483647, %v5581_v50  ;;  %v2773_v9 = vand.u32 2147483648, %v5581_v50  ;;  %vm2454_vm3 = vmor %vm2452_vm10, %vm2453_vm15 }
 0x22a   : > { %v2760_v58 = vsel %vm5561_vm7, %v2759_v59, %v2755_v37  ;;  %v2464_v41 = vsub.f32 1.0, %v2463_v45  ;;  %vm2767_vm1 = vweird.f32 %v5581_v50  ;;  %4210 = vpow2.f32 %v3721_v49  ;;  %v4207_v53 = vpop.eup %4206 }
 0x22b   : > { %v2450_v8 = vmul.f32 %v4203_v31, %v2449_v56  ;;  %2839 = vst [vmem:[%s4590_s12 + $0x1f0] sm:$0xff] %v2760_v58  ;;  %v1517_v12 = vadd.f32 %v5486_v4, %v1348_v17  ;;  %v2486_v43 = vand.u32 2147483647, %v5588_v15  ;;  %4212 = vpow2.f32 %v3724_v16 }
 0x22c   : > { %v1524_v13 = vadd.f32 %v1523_v7, %v4853_v27  ;;  %v1181_v0 = vadd.f32 %v5482_v29, %v1180_v14  ;;  %v2465_v18 = vmul.f32 %v4205_v60, %v2464_v41  ;;  %vm2468_vm2 = vweird.f32 %v4205_v60 }
 0x22d   : > { %v2451_v52 = vadd.f32 %v4203_v31, %v2450_v8  ;;  %v2763_v25 = vmul.f32 %v4207_v53, %v5581_v50  ;;  %v1526_v28 = vpop.f32.mrf.mxu2  ;;  %v4209_v22 = vpop.eup %4208  ;;  %vm2768_vm4 = vweird.f32 %v4207_v53  ;;  %v3722_v4 = vmul.f32 -1.442695, %v1517_v12  ;;  %vm2469_vm5 = vmor %vm2467_vm13, %vm2468_vm2 }
 0x22e   : > { %v3725_v19 = vmul.f32 -1.442695, %v1524_v13  ;;  %v1350_v39 = vadd.f32 %v1349_v2, %v1181_v0  ;;  %v2466_v27 = vadd.f32 %v4205_v60, %v2465_v18  ;;  %v2478_v29 = vmul.f32 %v4209_v22, %v5588_v15  ;;  %vm2769_vm7 = vmor %vm2767_vm1, %vm2768_vm4 }
 0x22f   : > { %v2455_v23 = vsel %vm2454_vm3, %v4203_v31, %v2451_v52  ;;  %v2764_v36 = vsub.f32 1.0, %v2763_v25  ;;  %4214 = vpow2.f32 %v3722_v4  ;;  %v1527_v33 = vadd.f32 %v1526_v28, %v4872_v40 }
 0x230   : > { %v2460_v38 = vsel %vm5595_vm11, %v2459_v61, %v2455_v23  ;;  %v1519_v51 = vadd.f32 %v5517_v32, %v1350_v39  ;;  %v4211_v30 = vpop.eup %4210  ;;  %v2470_v24 = vsel %vm2469_vm5, %v4205_v60, %v2466_v27  ;;  %v2479_v47 = vsub.f32 1.0, %v2478_v29 }
 0x231   : > { %2819 = vst [vmem:[%s4590_s12 + $0x150] sm:$0xff] %v2460_v38  ;;  %v2765_v46 = vmul.f32 %v4207_v53, %v2764_v36  ;;  %4216 = vpow2.f32 %v3725_v19  ;;  %v4213_v21 = vpop.eup %4212  ;;  %v2475_v55 = vsel %vm5607_vm14, %v2474_v1, %v2470_v24  ;;  %vm2483_vm6 = vweird.f32 %v4209_v22 }
 0x232   : > { %v2488_v48 = vand.u32 2147483648, %v5588_v15  ;;  %v5636_v10 = vadd.f32 1.0, %v4211_v30  ;;  %2820 = vst [vmem:[%s4590_s12 + $0x158] sm:$0xff] %v2475_v55  ;;  %v2480_v32 = vmul.f32 %v4209_v22, %v2479_v47  ;;  %v5639_v7 = vadd.f32 1.0, %v4213_v21 }
 0x233   : > { %v2766_v42 = vadd.f32 %v4207_v53, %v2765_v46  ;;  %v3723_v40 = vmul.f32 -1.442695, %v1519_v51  ;;  %vm2772_vm8 = vcmp.eq.f32.partialorder %v2771_v5, 8.507059e+37  ;;  %v2774_v26 = vor.u32 1.1754944e-38, %v2773_v9 }
 0x234   : > { %4218 = vrcp.f32 %v5636_v10  ;;  %v3726_v35 = vmul.f32 -1.442695, %v1527_v33  ;;  %v2481_v44 = vadd.f32 %v4209_v22, %v2480_v32  ;;  %vm2482_vm9 = vweird.f32 %v5588_v15 }
 0x235   : > { %v2770_v11 = vsel %vm2769_vm7, %v4207_v53, %v2766_v42  ;;  %4220 = vrcp.f32 %v5639_v7  ;;  %v4215_v62 = vpop.eup %4214  ;;  %vm2484_vm0 = vmor %vm2482_vm9, %vm2483_vm6  ;;  %v2489_v3 = vor.u32 1.1754944e-38, %v2488_v48  ;;  %vm2487_vm10 = vcmp.eq.f32.partialorder %v2486_v43, 8.507059e+37  ;;  %v1528_v61 = vpop.f32.mrf.mxu2 }
 0x236   : > { %v2775_v63 = vsel %vm2772_vm8, %v2774_v26, %v2770_v11  ;;  %v2485_v50 = vsel %vm2484_vm0, %v4209_v22, %v2481_v44  ;;  %v5649_v59 = vadd.f32 1.0, %v4215_v62  ;;  %4222 = vpow2.f32 %v3723_v40 }
 0x237   : > { %v4217_v31 = vpop.eup %4216  ;;  %2840 = vst [vmem:[%s4590_s12 + $0x1f8] sm:$0xff] %v2775_v63  ;;  %v2490_v49 = vsel %vm2487_vm10, %v2489_v3, %v2485_v50  ;;  %4224 = vpow2.f32 %v3726_v35  ;;  %v2501_v15 = vand.u32 2147483647, %v5636_v10  ;;  %v2503_v54 = vand.u32 2147483648, %v5636_v10 }
 0x238   : > { %v5651_v16 = vadd.f32 1.0, %v4217_v31  ;;  %2821 = vst [vmem:[%s4590_s12 + $0x160] sm:$0xff] %v2490_v49  ;;  %4226 = vrcp.f32 %v5649_v59  ;;  %v2546_v6 = vand.u32 2147483647, %v5639_v7  ;;  %vm2497_vm11 = vweird.f32 %v5636_v10 }
 0x239   : > { %vm5662_vm12 = vcmp.eq.f32.partialorder %v2501_v15, 8.507059e+37  ;;  %vm2542_vm13 = vweird.f32 %v5639_v7  ;;  %v2548_v1 = vand.u32 2147483648, %v5639_v7  ;;  %v2504_v58 = vor.u32 1.1754944e-38, %v2503_v54 }
 0x23a   : > { %v4219_v20 = vpop.eup %4218  ;;  %4228 = vrcp.f32 %v5651_v16  ;;  %v1529_v8 = vadd.f32 %v1528_v61, %v4894_v34  ;;  %vm5671_vm15 = vcmp.eq.f32.partialorder %v2546_v6, 8.507059e+37  ;;  %v2516_v34 = vand.u32 2147483647, %v5649_v59 }
 0x23b   : > { %v4221_v17 = vpop.eup %4220  ;;  %v2493_v60 = vmul.f32 %v4219_v20, %v5636_v10  ;;  %vm2498_vm14 = vweird.f32 %v4219_v20  ;;  %v2549_v18 = vor.u32 1.1754944e-38, %v2548_v1  ;;  %v2518_v4 = vand.u32 2147483648, %v5649_v59 }
 0x23c   : > { %v2538_v56 = vmul.f32 %v4221_v17, %v5639_v7  ;;  %v4223_v37 = vpop.eup %4222  ;;  %vm2543_vm1 = vweird.f32 %v4221_v17  ;;  %vm2499_vm2 = vmor %vm2497_vm11, %vm2498_vm14  ;;  %v3727_v19 = vmul.f32 -1.442695, %v1529_v8  ;;  %v2563_v27 = vand.u32 2147483648, %v5651_v16 }
 0x23d   : > { %v2494_v45 = vsub.f32 1.0, %v2493_v60  ;;  %v4225_v14 = vpop.eup %4224  ;;  %v5668_v9 = vadd.f32 1.0, %v4223_v37  ;;  %vm2544_vm3 = vmor %vm2542_vm13, %vm2543_vm1  ;;  %v2561_v30 = vand.u32 2147483647, %v5651_v16  ;;  %vm2512_vm6 = vweird.f32 %v5649_v59 }
 0x23e   : > { %v2539_v5 = vsub.f32 1.0, %v2538_v56  ;;  %v4227_v41 = vpop.eup %4226  ;;  %v5675_v53 = vadd.f32 1.0, %v4225_v14  ;;  %v2519_v47 = vor.u32 1.1754944e-38, %v2518_v4  ;;  %vm2557_vm8 = vweird.f32 %v5651_v16 }
 0x23f   : > { %v2495_v12 = vmul.f32 %v4219_v20, %v2494_v45  ;;  %v2508_v0 = vmul.f32 %v4227_v41, %v5649_v59  ;;  %4230 = vrcp.f32 %v5668_v9  ;;  %vm2513_vm4 = vweird.f32 %v4227_v41 }
 0x240   : > { %v4229_v43 = vpop.eup %4228  ;;  %v2540_v13 = vmul.f32 %v4221_v17, %v2539_v5  ;;  %4232 = vrcp.f32 %v5675_v53  ;;  %vm2514_vm7 = vmor %vm2512_vm6, %vm2513_vm4  ;;  %vm2517_vm9 = vcmp.eq.f32.partialorder %v2516_v34, 8.507059e+37  ;;  %v2564_v10 = vor.u32 1.1754944e-38, %v2563_v27 }
 0x241   : > { %v2496_v52 = vadd.f32 %v4219_v20, %v2495_v12  ;;  %v2553_v25 = vmul.f32 %v4229_v43, %v5651_v16  ;;  %v2509_v22 = vsub.f32 1.0, %v2508_v0  ;;  %vm2558_vm5 = vweird.f32 %v4229_v43 }
 0x242   : > { %v2541_v28 = vadd.f32 %v4221_v17, %v2540_v13  ;;  %4234 = vpow2.f32 %v3727_v19  ;;  %vm2559_vm0 = vmor %vm2557_vm8, %vm2558_vm5  ;;  %vm2562_vm10 = vcmp.eq.f32.partialorder %v2561_v30, 8.507059e+37  ;;  %v2533_v35 = vand.u32 2147483648, %v5668_v9 }
 0x243   : > { %v2500_v39 = vsel %vm2499_vm2, %v4219_v20, %v2496_v52  ;;  %v2554_v23 = vsub.f32 1.0, %v2553_v25  ;;  %v2510_v38 = vmul.f32 %v4227_v41, %v2509_v22  ;;  %v2531_v62 = vand.u32 2147483647, %v5668_v9 }
 0x244   : > { %v2505_v36 = vsel %vm5662_vm12, %v2504_v58, %v2500_v39  ;;  %v2545_v29 = vsel %vm2544_vm3, %v4221_v17, %v2541_v28  ;;  %vm2527_vm12 = vweird.f32 %v5668_v9  ;;  %v2578_v50 = vand.u32 2147483648, %v5675_v53 }
 0x245   : > { %2822 = vst [vmem:[%s4590_s12 + $0x168] sm:$0xff] %v2505_v36  ;;  %v2550_v51 = vsel %vm5671_vm15, %v2549_v18, %v2545_v29  ;;  %v2555_v33 = vmul.f32 %v4229_v43, %v2554_v23  ;;  %v4231_v24 = vpop.eup %4230  ;;  %v2511_v46 = vadd.f32 %v4227_v41, %v2510_v38  ;;  %v2534_v49 = vor.u32 1.1754944e-38, %v2533_v35 }
 0x246   : > { %2825 = vst [vmem:[%s4590_s12 + $0x180] sm:$0xff] %v2550_v51  ;;  %v2523_v55 = vmul.f32 %v4231_v24, %v5668_v9  ;;  %v4233_v42 = vpop.eup %4232  ;;  %vm2528_vm11 = vweird.f32 %v4231_v24  ;;  %v2576_v15 = vand.u32 2147483647, %v5675_v53  ;;  %vm2532_vm15 = vcmp.eq.f32.partialorder %v2531_v62, 8.507059e+37 }
 0x247   : > { %v2556_v21 = vadd.f32 %v4229_v43, %v2555_v33  ;;  %v2515_v48 = vsel %vm2514_vm7, %v4227_v41, %v2511_v46  ;;  %v2568_v11 = vmul.f32 %v4233_v42, %v5675_v53  ;;  %vm2529_vm13 = vmor %vm2527_vm12, %vm2528_vm11  ;;  %vm2573_vm14 = vweird.f32 %v4233_v42 }
 0x248   : > { %v2520_v32 = vsel %vm2517_vm9, %v2519_v47, %v2515_v48  ;;  %v2524_v40 = vsub.f32 1.0, %v2523_v55  ;;  %v4235_v63 = vpop.eup %4234  ;;  %vm2572_vm1 = vweird.f32 %v5675_v53  ;;  %v2579_v60 = vor.u32 1.1754944e-38, %v2578_v50 }
 0x249   : > { %v2560_v7 = vsel %vm2559_vm0, %v4229_v43, %v2556_v21  ;;  %2823 = vst [vmem:[%s4590_s12 + $0x170] sm:$0xff] %v2520_v32  ;;  %v2569_v3 = vsub.f32 1.0, %v2568_v11  ;;  %v1804_v59 = vadd.f32 1.0, %v4235_v63  ;;  %vm2574_vm2 = vmor %vm2572_vm1, %vm2573_vm14  ;;  %vm2577_vm3 = vcmp.eq.f32.partialorder %v2576_v15, 8.507059e+37 }
 0x24a   : > { %v2565_v26 = vsel %vm2562_vm10, %v2564_v10, %v2560_v7  ;;  %v2525_v44 = vmul.f32 %v4231_v24, %v2524_v40 }
 0x24b   : > { %2826 = vst [vmem:[%s4590_s12 + $0x188] sm:$0xff] %v2565_v26  ;;  %v2570_v16 = vmul.f32 %v4233_v42, %v2569_v3  ;;  %4236 = vrcp.f32 %v1804_v59  ;;  %v2593_v57 = vand.u32 2147483648, %v1804_v59  ;;  %v2591_v14 = vand.u32 2147483647, %v1804_v59 }
 0x24c   : > { %v2526_v31 = vadd.f32 %v4231_v24, %v2525_v44  ;;  %vm2587_vm5 = vweird.f32 %v1804_v59 }
 0x24d   : > { %v2571_v17 = vadd.f32 %v4233_v42, %v2570_v16  ;;  %v2594_v5 = vor.u32 1.1754944e-38, %v2593_v57  ;;  %vm2592_vm7 = vcmp.eq.f32.partialorder %v2591_v14, 8.507059e+37 }
 0x24e   : > { %v2530_v20 = vsel %vm2529_vm13, %v4231_v24, %v2526_v31 }
 0x24f   : > { %v2535_v54 = vsel %vm2532_vm15, %v2534_v49, %v2530_v20  ;;  %v2575_v6 = vsel %vm2574_vm2, %v4233_v42, %v2571_v17 }
 0x250   : > { %2824 = vst [vmem:[%s4590_s12 + $0x178] sm:$0xff] %v2535_v54  ;;  %v2580_v61 = vsel %vm2577_vm3, %v2579_v60, %v2575_v6 }
 0x251   : > { %2827 = vst [vmem:[%s4590_s12 + $0x190] sm:$0xff] %v2580_v61  ;;  %v4237_v56 = vpop.eup %4236 }
 0x252   : > { %v2583_v37 = vmul.f32 %v4237_v56, %v1804_v59  ;;  %vm2588_vm4 = vweird.f32 %v4237_v56 }
 0x253   : > { %vm2589_vm6 = vmor %vm2587_vm5, %vm2588_vm4 }
 0x254   : > { %v2584_v45 = vsub.f32 1.0, %v2583_v37 }
 0x256   : > { %v2585_v1 = vmul.f32 %v4237_v56, %v2584_v45 }
 0x258   : > { %v2586_v58 = vadd.f32 %v4237_v56, %v2585_v1  ;;  %2847 = sbr.rel (!%p4374_p4) target bundleno = 669 (0x29d), region = 36 }
 0x25a   : > { %v2590_v9 = vsel %vm2589_vm6, %v4237_v56, %v2586_v58 }
 0x25b   : > { %v2595_v8 = vsel %vm2592_vm7, %v2594_v5, %v2590_v9 }
 0x25c   : > { %2828 = vst [vmem:[%s4590_s12 + $0x198] sm:$0xff] %v2595_v8 }
 0x25d   : > { %s5912_s6 = smov (!%p2850_p8, %s2849_s6), 64 }
 0x25e   : > { %s3742_s11 = sshll.u32 %s5912_s6, 3 }
 0x25f   : > { %p3745_p9 = scmp.eq.s32.totalorder %s3742_s11, 0 }
 0x260   : > { %s5723_s14 = sshrl.u32 (!%p3745_p9), %s5912_s6, 5 }
 0x261   : > { %2858 = sbr.rel (%p3745_p9) target bundleno = 669 (0x29d), region = 40  ;;  %p3746_p10 = scmp.le.s32.totalorder (!%p3745_p9), %s5723_s14, 0 }
 0x266   : > { %3137 = sbr.rel (%p3746_p10) target bundleno = 652 (0x28c), region = 116  ;;  %s5903_s15 = smov (!%p3746_p10), %s5717_s10 }
 0x267   : > { %s5904_s20 = smov (!%p3746_p10), %s4590_s12  ;;  %s5732_s27 = smov (!%p3746_p10), 0  }
 0x268   : > { %s5734_s18 = smov (!%p3746_p10), 0  }
 0x26b LB: >> { %v2983_v41 = vld [vmem:[%s4303_s20] sm:$0xff]  ;;  %v2985_v12 = vld [vmem:[%s4303_s20 + $0x8] sm:$0xff]  ;;  %v2987_v2 = vld [vmem:[%s4303_s20 + $0x10] sm:$0xff]  ;;  %s3047_s21 = sadd.s32 1, %s4307_s27  ;;  %s2977_s18 = sadd.s32 1, %s4311_s18   ;;  %s4311_s18 = sphi %s5734_s18, %s2977_s18   ;;  %s4307_s27 = sphi %s5732_s27, %s5907_s27   ;;  %s4303_s20 = sphi %s5904_s20, %s5906_s20   ;;  %s4299_s15 = sphi %s5903_s15, %s5905_s15  }
 0x26c   : >> { %2984 = vst [vmem:[%s4299_s15] sm:$0xff] %v2983_v41  ;;  %v2989_v53 = vld [vmem:[%s4303_s20 + $0x18] sm:$0xff]  ;;  %p3048_p11 = scmp.ge.s32.totalorder %s3047_s21, %s5723_s14  ;;  %v2991_v43 = vld [vmem:[%s4303_s20 + $0x20] sm:$0xff]  ;;  %v2993_v13 = vld [vmem:[%s4303_s20 + $0x28] sm:$0xff]  ;;  %p2976_p12 = scmp.ge.s32.totalorder %s2977_s18, %s5723_s14 }
 0x26d   : >> { %2986 = vst [vmem:[%s4299_s15 + $0x8] sm:$0xff] %v2985_v12  ;;  %v2995_v0 = vld [vmem:[%s4303_s20 + $0x30] sm:$0xff]  ;;  %v2997_v52 = vld [vmem:[%s4303_s20 + $0x38] sm:$0xff]  ;;  %v2999_v18 = vld [vmem:[%s4303_s20 + $0x40] sm:$0xff] }
 0x26e   : >> { %2988 = vst [vmem:[%s4299_s15 + $0x10] sm:$0xff] %v2987_v2  ;;  %s5914_s21 = smov (%p3048_p11, %s3047_s21), 0  ;;  %v3001_v34 = vld [vmem:[%s4303_s20 + $0x48] sm:$0xff]  ;;  %v3003_v25 = vld [vmem:[%s4303_s20 + $0x50] sm:$0xff]  ;;  %v3005_v28 = vld [vmem:[%s4303_s20 + $0x58] sm:$0xff] }
 0x26f   : >> { %2990 = vst [vmem:[%s4299_s15 + $0x18] sm:$0xff] %v2989_v53  ;;  %s3747_s22 = sshll.u32 %s5914_s21, 8  ;;  %v3007_v22 = vld [vmem:[%s4303_s20 + $0x60] sm:$0xff]  ;;  %v3009_v4 = vld [vmem:[%s4303_s20 + $0x68] sm:$0xff]  ;;  %v3011_v19 = vld [vmem:[%s4303_s20 + $0x70] sm:$0xff]  ;;  %s5907_s27 = smov %s5914_s21 }
 0x270   : >> { %2992 = vst [vmem:[%s4299_s15 + $0x20] sm:$0xff] %v2991_v43  ;;  %s5766_s23 = scalar_lea.vmem %s4590_s12, %s3747_s22 [#allocation2]   ;;  %s5769_s24 = scalar_lea.vmem %s5717_s10, %s3747_s22   ;;  %v3013_v39 = vld [vmem:[%s4303_s20 + $0x78] sm:$0xff]  ;;  %v3015_v23 = vld [vmem:[%s4303_s20 + $0x80] sm:$0xff]  ;;  %v3017_v27 = vld [vmem:[%s4303_s20 + $0x88] sm:$0xff] }
 0x271   : >> { %2994 = vst [vmem:[%s4299_s15 + $0x28] sm:$0xff] %v2993_v13  ;;  %v3019_v36 = vld [vmem:[%s4303_s20 + $0x90] sm:$0xff]  ;;  %v3021_v29 = vld [vmem:[%s4303_s20 + $0x98] sm:$0xff]  ;;  %v3023_v38 = vld [vmem:[%s4303_s20 + $0xa0] sm:$0xff] }
 0x272   : >> { %2996 = vst [vmem:[%s4299_s15 + $0x30] sm:$0xff] %v2995_v0  ;;  %v3025_v51 = vld [vmem:[%s4303_s20 + $0xa8] sm:$0xff]  ;;  %v3027_v33 = vld [vmem:[%s4303_s20 + $0xb0] sm:$0xff]  ;;  %v3029_v30 = vld [vmem:[%s4303_s20 + $0xb8] sm:$0xff] }
 0x273   : >> { %2998 = vst [vmem:[%s4299_s15 + $0x38] sm:$0xff] %v2997_v52  ;;  %v3031_v24 = vld [vmem:[%s4303_s20 + $0xc0] sm:$0xff]  ;;  %v3033_v46 = vld [vmem:[%s4303_s20 + $0xc8] sm:$0xff]  ;;  %v3035_v47 = vld [vmem:[%s4303_s20 + $0xd0] sm:$0xff] }
 0x274   : >> { %3000 = vst [vmem:[%s4299_s15 + $0x40] sm:$0xff] %v2999_v18  ;;  %v3037_v21 = vld [vmem:[%s4303_s20 + $0xd8] sm:$0xff]  ;;  %v3039_v55 = vld [vmem:[%s4303_s20 + $0xe0] sm:$0xff]  ;;  %v3041_v48 = vld [vmem:[%s4303_s20 + $0xe8] sm:$0xff] }
 0x275   : >> { %3002 = vst [vmem:[%s4299_s15 + $0x48] sm:$0xff] %v3001_v34  ;;  %v3043_v10 = vld [vmem:[%s4303_s20 + $0xf0] sm:$0xff]  ;;  %v3045_v42 = vld [vmem:[%s4303_s20 + $0xf8] sm:$0xff]  ;;  %s5906_s20 = smov %s5766_s23 }
 0x276   : >> { %3004 = vst [vmem:[%s4299_s15 + $0x50] sm:$0xff] %v3003_v25 }
 0x277   : >> { %3006 = vst [vmem:[%s4299_s15 + $0x58] sm:$0xff] %v3005_v28 }
 0x278   : >> { %3008 = vst [vmem:[%s4299_s15 + $0x60] sm:$0xff] %v3007_v22 }
 0x279   : >> { %3010 = vst [vmem:[%s4299_s15 + $0x68] sm:$0xff] %v3009_v4 }
 0x27a   : >> { %3012 = vst [vmem:[%s4299_s15 + $0x70] sm:$0xff] %v3011_v19 }
 0x27b   : >> { %3014 = vst [vmem:[%s4299_s15 + $0x78] sm:$0xff] %v3013_v39 }
 0x27c   : >> { %3016 = vst [vmem:[%s4299_s15 + $0x80] sm:$0xff] %v3015_v23 }
 0x27d   : >> { %3018 = vst [vmem:[%s4299_s15 + $0x88] sm:$0xff] %v3017_v27 }
 0x27e   : >> { %3020 = vst [vmem:[%s4299_s15 + $0x90] sm:$0xff] %v3019_v36 }
 0x27f   : >> { %3022 = vst [vmem:[%s4299_s15 + $0x98] sm:$0xff] %v3021_v29 }
 0x280   : >> { %3024 = vst [vmem:[%s4299_s15 + $0xa0] sm:$0xff] %v3023_v38 }
 0x281   : >> { %3026 = vst [vmem:[%s4299_s15 + $0xa8] sm:$0xff] %v3025_v51 }
 0x282   : >> { %3028 = vst [vmem:[%s4299_s15 + $0xb0] sm:$0xff] %v3027_v33 }
 0x283   : >> { %3030 = vst [vmem:[%s4299_s15 + $0xb8] sm:$0xff] %v3029_v30 }
 0x284   : >> { %3032 = vst [vmem:[%s4299_s15 + $0xc0] sm:$0xff] %v3031_v24 }
 0x285   : >> { %3034 = vst [vmem:[%s4299_s15 + $0xc8] sm:$0xff] %v3033_v46 }
 0x286   : >> { %3036 = vst [vmem:[%s4299_s15 + $0xd0] sm:$0xff] %v3035_v47 }
 0x287   : >> { %3038 = vst [vmem:[%s4299_s15 + $0xd8] sm:$0xff] %v3037_v21  ;;  %2979 = sbr.rel (!%p2976_p12) target bundleno = 619 (0x26b), region = 122 }
 0x288   : >> { %3040 = vst [vmem:[%s4299_s15 + $0xe0] sm:$0xff] %v3039_v55 }
 0x289   : >> { %3042 = vst [vmem:[%s4299_s15 + $0xe8] sm:$0xff] %v3041_v48 }
 0x28a   : >> { %3044 = vst [vmem:[%s4299_s15 + $0xf0] sm:$0xff] %v3043_v10 }
 0x28b   : >> { %3046 = vst [vmem:[%s4299_s15 + $0xf8] sm:$0xff] %v3045_v42  ;;  %s5905_s15 = smov %s5769_s24 }
 0x28c PF: > { %s5834_s25 = sand.u32 31, %s5912_s6   ;;  %s3872_s26 = sshll.u32 %s5723_s14, 8 }
 0x28d   : > { %s3058_s28 = scalar_lea.vmem %s4590_s12, %s3872_s26 [#allocation2]   ;;  %s3060_s29 = scalar_lea.vmem %s5717_s10, %s3872_s26  }
 0x28e   : > { %p3752_p13 = scmp.le.s32.totalorder %s5834_s25, 0 }
 0x28f   : > { %s4313_s30 = smov (!%p3752_p13), %s3060_s29   ;;  %s4317_s4 = smov (!%p3752_p13), %s3058_s28  }
 0x290   : > { %3151 = sbr.rel (%p3752_p13) target bundleno = 669 (0x29d), region = 127  ;;  %s4321_s17 = smov (!%p3752_p13), 0  }
 0x291   : > { %s4325_s5 = smov (!%p3752_p13), 0  }
 0x295 LB: >> { %v3070_v32 = vld [vmem:[%s4319_s4] sm:$0xff]  ;;  %s3072_s6 = sadd.s32 1, %s4323_s17  ;;  %s3064_s5 = sadd.s32 1, %s4327_s5   ;;  %s4327_s5 = sphi %s4325_s5, %s3064_s5   ;;  %s4323_s17 = sphi %s4321_s17, %s4322_s17   ;;  %s4319_s4 = sphi %s4317_s4, %s3077_s4   ;;  %s4315_s30 = sphi %s4313_s30, %s3078_s30  }
 0x296   : >> { %3071 = vst [vmem:[%s4315_s30] sm:$0xff] %v3070_v32  ;;  %p3073_p0 = scmp.ge.s32.totalorder %s3072_s6, %s5834_s25  ;;  %p3063_p1 = scmp.ge.s32.totalorder %s3064_s5, %s5834_s25 }
 0x298   : >> { %s5916_s6 = smov (%p3073_p0, %s3072_s6), 0  ;;  %3066 = sbr.rel (!%p3063_p1) target bundleno = 661 (0x295), region = 133 }
 0x299   : >> { %s3753_s12 = sshll.u32 %s5916_s6, 3  ;;  %s4322_s17 = smov %s5916_s6  }
 0x29a   : >> { %s3077_s4 = scalar_lea.vmem %s3058_s28, %s3753_s12 [#allocation2]   ;;  %s3078_s30 = scalar_lea.vmem %s3060_s29, %s3753_s12  }
 0x29d PF: > { %p10_p2 = scmp.ge.s32.totalorder %s4364_s16, 6   ;;  %s5908_s12 = smov %s4291_s13 }
 0x29e   : > { %s5909_s13 = smov %s4372_s19  ;;  %s5910_s14 = smov %s4364_s16 }
 0x29f   :  { %12 = sbr.rel (!%p10_p2) target bundleno = 2 (0x2), region = 144 }

</bundles_post_ra>
